<compile_context>
chip_gen: v7x
topology: tpu7x:2x2x1
jax: 0.10.0
libtpu: 0.0.40
codegen_flags: <defaults>
</compile_context>

<pallas_src>
import functools

import jax
import jax.numpy as jnp
from jax import lax
from jax.experimental import pallas as pl
from jax.experimental.pallas import tpu as pltpu

_HIGHEST = jax.lax.Precision.HIGHEST


def _activation(x, name):
    if name is None:
        return x
    if name == "ReLU":
        return jnp.maximum(x, 0.0)
    if name == "Softplus":
        return jnp.log1p(jnp.exp(-jnp.abs(x))) + jnp.maximum(x, 0.0)
    if name == "Tanh":
        return jnp.tanh(x)
    raise ValueError(f"unsupported activation: {name!r}")


def _round_up(x, m):
    return ((x + m - 1) // m) * m


def _make_cde_kernel(n_mid, n_channels, num_steps, activation, final_activation,
                     unroll):
    """Fused CDE forward kernel.

    Ref order:
      x0, dxs, w_init, b_init, w1_t, w1_h, b1,
      (w_mid_i, b_mid_i) * n_mid,
      wL_split, bL_t, w_ro, b_ro, out
    """
    f32 = jnp.float32

    def kernel(*refs):
        (x0_ref, dxs_ref, w_init_ref, b_init_ref,
         w1t_ref, w1h_ref, b1_ref) = refs[:7]
        idx = 7
        mid_refs = [(refs[idx + 2 * i], refs[idx + 2 * i + 1])
                    for i in range(n_mid)]
        idx += 2 * n_mid
        wL_ref, bLt_ref, w_ro_ref, b_ro_ref, out_ref = refs[idx:idx + 5]

        def dot(a, b):
            return jnp.dot(a, b, precision=_HIGHEST,
                           preferred_element_type=f32)

        def vector_field(t, z, dx):
            # First Linear with the t/h concat fused into the bias.
            a = dot(z, w1h_ref[...].astype(f32))
            a = _activation(
                a + (t * w1t_ref[...].astype(f32) + b1_ref[...].astype(f32)),
                activation)
            for w_ref, b_ref in mid_refs:
                a = _activation(dot(a, w_ref[...].astype(f32))
                                + b_ref[...].astype(f32), activation)
            # Final Linear viewed as (B, hidden, C) and contracted with dx (B, C):
            #   f[b, h] = sum_c dx[b, c] * act_f(a @ WL[:, h, c] + bL[h, c])
            # decomposed into C small (m_last, hidden) matmuls (no in-kernel reshape).
            bLt = bLt_ref[...].astype(f32)                     # (C, hidden)
            f = jnp.zeros_like(z)
            for c in range(n_channels):
                oc = dot(a, wL_ref[c].astype(f32)) + bLt[c:c + 1, :]
                oc = _activation(oc, final_activation)
                f = f + dx[:, c:c + 1] * oc
            return f

        # h0 = initial(X(0))
        h0 = dot(x0_ref[...].astype(f32), w_init_ref[...].astype(f32))
        h0 = h0 + b_init_ref[...].astype(f32)

        # Reversible Heun (torchsde backend), dt = 1, zero diffusion.
        f0 = vector_field(jnp.float32(0.0), h0, dxs_ref[0].astype(f32))

        def step(n, carry):
            y, z, f = carry
            z_new = 2.0 * y - z + f
            f_new = vector_field((n + 1).astype(f32), z_new,
                                 dxs_ref[n + 1].astype(f32))
            y_new = y + 0.5 * (f + f_new)
            return (y_new, z_new, f_new)

        y_final, _, _ = lax.fori_loop(0, num_steps, step, (h0, h0, f0),
                                      unroll=unroll)

        # Readout + sigmoid.
        logits = dot(y_final, w_ro_ref[...].astype(f32)) + b_ro_ref[...].astype(f32)
        out_ref[...] = (1.0 / (1.0 + jnp.exp(-logits))).astype(out_ref.dtype)

    return kernel


@functools.partial(jax.jit, static_argnames=("activation", "final_activation"))
def cde_classification_forward(ys_coeffs, params, *, activation="ReLU",
                               final_activation=None):
    """Pallas forward of CDEClassificationNet (label=None path).

    ys_coeffs: (B, T, 1 + dim) control-path values at integer knots
               (torchcde linear-interpolation coefficients == the data itself).
    params:    dict with
        'initial': (W, b)   W: (1+dim, hidden)          b: (1, hidden)
        'mlp':     [(W, b), ...]  in->out layout; first in = 1+hidden,
                                  last out = hidden*(1+dim)
        'readout': (W, b)   W: (hidden, 1)              b: (1, 1)
    Returns sigmoid probabilities of shape (B, 1).
    """
    # TODO(synk): the label != None path (repeat_interleave + channel concat before
    # interpolation) and intermediate=True outputs are plain-JAX glue, not implemented.
    f32 = jnp.float32
    B, T, C = ys_coeffs.shape
    if T < 2:
        raise ValueError("need at least two interpolation knots")

    w_init, b_init = params["initial"]
    mlp = params["mlp"]
    w_ro, b_ro = params["readout"]
    if len(mlp) < 2:
        raise ValueError("MLP must have at least one hidden layer")

    hidden = w_init.shape[1]
    if mlp[0][0].shape[0] != 1 + hidden or mlp[-1][0].shape[1] != hidden * C:
        raise ValueError("parameter shapes inconsistent with ys_coeffs")

    ys = ys_coeffs.astype(f32)

    # ---- tiny plain-JAX glue: path finite differences + weight re-layouts --------
    dX = ys[:, 1:, :] - ys[:, :-1, :]                       # (B, T-1, C)
    # X.derivative(n) for n = 0..T-1 (left segment of the interpolation, clamped at 0).
    dXs = jnp.concatenate([dX[:, :1, :], dX], axis=1)       # (B, T, C)
    x0 = ys[:, 0, :]                                        # (B, C)

    TB = min(_round_up(B, 8), 128)          # batch tile (sublane multiple)
    B_pad = _round_up(B, TB)
    C_pad = _round_up(C, 8)                 # aligned matmul K dim

    x0_p = jnp.zeros((B_pad, C_pad), f32).at[:B, :C].set(x0)
    dxs_p = jnp.zeros((T, B_pad, C_pad), f32).at[:, :B, :C].set(
        jnp.transpose(dXs, (1, 0, 2)))

    w_init_p = jnp.zeros((C_pad, hidden), f32).at[:C, :].set(w_init.astype(f32))
    b_init_p = b_init.astype(f32).reshape(1, hidden)

    # First MLP layer: split off the t-row so torch.cat([t, h]) never materializes.
    w1 = mlp[0][0].astype(f32)
    w1_t, w1_h = w1[0:1, :], w1[1:, :]
    b1 = mlp[0][1].astype(f32).reshape(1, -1)

    mids = [(w.astype(f32), b.astype(f32).reshape(1, -1)) for (w, b) in mlp[1:-1]]

    # Last MLP layer: (m_last, hidden*C) -> C matrices (m_last, hidden); bias -> (C, hidden).
    wL, bL = mlp[-1]
    m_last = wL.shape[0]
    wL_split = jnp.transpose(wL.astype(f32).reshape(m_last, hidden, C), (2, 0, 1))
    bL_t = jnp.transpose(bL.astype(f32).reshape(hidden, C), (1, 0))

    w_ro = w_ro.astype(f32)
    b_ro = b_ro.astype(f32).reshape(1, -1)

    # ---- one fused pallas_call ----------------------------------------------------
    n_bt = B_pad // TB
    num_steps = T - 1
    n_mid = len(mids)

    def _resident(shape):
        # Full-array block with a constant block index: DMA'd once, VMEM-resident
        # across the batch-tile grid (no re-fetch between consecutive grid steps).
        nd = len(shape)
        return pl.BlockSpec(shape, lambda i, _nd=nd: (0,) * _nd)

    flat_inputs = [x0_p, dxs_p, w_init_p, b_init_p, w1_t, w1_h, b1]
    in_specs = [
        pl.BlockSpec((TB, C_pad), lambda i: (i, 0)),
        pl.BlockSpec((T, TB, C_pad), lambda i: (0, i, 0)),
        _resident(w_init_p.shape), _resident(b_init_p.shape),
        _resident(w1_t.shape), _resident(w1_h.shape), _resident(b1.shape),
    ]
    for w, b in mids:
        flat_inputs += [w, b]
        in_specs += [_resident(w.shape), _resident(b.shape)]
    flat_inputs += [wL_split, bL_t, w_ro, b_ro]
    in_specs += [_resident(wL_split.shape), _resident(bL_t.shape),
                 _resident(w_ro.shape), _resident(b_ro.shape)]

    kernel = _make_cde_kernel(
        n_mid=n_mid, n_channels=C, num_steps=num_steps,
        activation=activation, final_activation=final_activation,
        unroll=num_steps <= 16)

    out = pl.pallas_call(
        kernel,
        out_shape=jax.ShapeDtypeStruct((B_pad, 1), f32),
        grid=(n_bt,),
        in_specs=in_specs,
        out_specs=pl.BlockSpec((TB, 1), lambda i: (i, 0)),
        compiler_params=pltpu.CompilerParams(
            dimension_semantics=("parallel",),
        ),
    )(*flat_inputs)

    return out[:B]


def init_cde_params(key, dim, hidden_dims, hidden_state_dim, out_dim=1,
                    dtype=jnp.float32):
    """Synthetic parameters with the same layer shapes as the PyTorch module.

    nn.Linear weights are stored transposed: W is (in_features, out_features),
    b is (1, out_features).
    """
    C = 1 + dim

    def linear(k, fan_in, fan_out):
        kw, kb = jax.random.split(k)
        bound = float(fan_in) ** -0.5
        w = jax.random.uniform(kw, (fan_in, fan_out), dtype, -bound, bound)
        b = jax.random.uniform(kb, (1, fan_out), dtype, -bound, bound)
        return w, b

    n_mlp = len(hidden_dims) + 1
    keys = jax.random.split(key, n_mlp + 2)
    initial = linear(keys[0], C, hidden_state_dim)
    dims = [1 + hidden_state_dim] + list(hidden_dims) + [hidden_state_dim * C]
    mlp = [linear(keys[1 + i], dims[i], dims[i + 1]) for i in range(n_mlp)]
    readout = linear(keys[-1], hidden_state_dim, out_dim)
    return {"initial": initial, "mlp": mlp, "readout": readout}


def _reference_forward(ys_coeffs, params, activation="ReLU", final_activation=None):
    """Pure-JAX reference (natural formulation with concat + reshape)."""
    f32 = jnp.float32
    ys = ys_coeffs.astype(f32)
    B, T, C = ys.shape
    w_init, b_init = params["initial"]
    mlp = params["mlp"]
    w_ro, b_ro = params["readout"]
    hidden = w_init.shape[1]

    def mlp_apply(t, h):
        x = jnp.concatenate([jnp.full((B, 1), t, f32), h], axis=1)
        n = len(mlp)
        for i, (w, b) in enumerate(mlp):
            x = jnp.dot(x, w.astype(f32), precision=_HIGHEST) + b.astype(f32)
            x = _activation(x, activation if i < n - 1 else final_activation)
        return x.reshape(B, hidden, C)

    dX = ys[:, 1:, :] - ys[:, :-1, :]
    dXs = jnp.concatenate([dX[:, :1, :], dX], axis=1)

    def vf(n, h):
        return jnp.einsum("bhc,bc->bh", mlp_apply(jnp.float32(n), h),
                          dXs[:, n, :], precision=_HIGHEST)

    h0 = jnp.dot(ys[:, 0, :], w_init.astype(f32), precision=_HIGHEST) \
        + b_init.astype(f32).reshape(1, -1)
    y, z, f = h0, h0, vf(0, h0)
    for n in range(T - 1):          # reversible Heun, dt = 1, zero diffusion
        z = 2.0 * y - z + f
        f_new = vf(n + 1, z)
        y = y + 0.5 * (f + f_new)
        f = f_new
    logits = jnp.dot(y, w_ro.astype(f32), precision=_HIGHEST) \
        + b_ro.astype(f32).reshape(1, -1)
    return jax.nn.sigmoid(logits)


if __name__ == "__main__":
    dim = 4                 # data channels; the control path has 1 + dim channels
    hidden_dims = [64, 64]  # MLP hidden widths
    hidden_state_dim = 32
    batch = 2
    seq = 8                 # interpolation knots -> T-1 = 7 reversible-Heun steps

    key = jax.random.PRNGKey(0)
    k_path, k_par = jax.random.split(key)

    # Control path values at integer grid points (channel 0 = time, as is usual for
    # neural-CDE inputs) == the linear-interpolation coefficients.
    t_chan = jnp.broadcast_to(
        jnp.arange(seq, dtype=jnp.float32)[None, :, None], (batch, seq, 1))
    data = 0.3 * jax.random.normal(k_path, (batch, seq, dim), dtype=jnp.float32)
    ys_coeffs = jnp.concatenate([t_chan, data], axis=-1)     # (2, 8, 5)

    params = init_cde_params(k_par, dim, hidden_dims, hidden_state_dim)

    out = cde_classification_forward(ys_coeffs, params)
    out = jax.block_until_ready(out)

    ref = _reference_forward(ys_coeffs, params)
    assert out.shape == (batch, 1), out.shape
    assert bool(jnp.all(jnp.isfinite(out)))
    max_err = float(jnp.max(jnp.abs(out - ref)))
    assert max_err < 1e-4, f"mismatch vs reference: max abs err = {max_err}"

    print("KERNEL_OK")
</pallas_src>

<mosaic_0001>
module attributes {stable_mosaic.version = 11 : i64} {
  func.func @kernel(%arg0: i32, %arg1: memref<8x8xf32, #tpu.memory_space<vmem>>, %arg2: memref<8x8x8xf32, #tpu.memory_space<vmem>>, %arg3: memref<8x32xf32, #tpu.memory_space<vmem>>, %arg4: memref<1x32xf32, #tpu.memory_space<vmem>>, %arg5: memref<1x64xf32, #tpu.memory_space<vmem>>, %arg6: memref<32x64xf32, #tpu.memory_space<vmem>>, %arg7: memref<1x64xf32, #tpu.memory_space<vmem>>, %arg8: memref<64x64xf32, #tpu.memory_space<vmem>>, %arg9: memref<1x64xf32, #tpu.memory_space<vmem>>, %arg10: memref<5x64x32xf32, #tpu.memory_space<vmem>>, %arg11: memref<5x32xf32, #tpu.memory_space<vmem>>, %arg12: memref<32x1xf32, #tpu.memory_space<vmem>>, %arg13: memref<1x1xf32, #tpu.memory_space<vmem>>, %arg14: memref<8x1xf32, #tpu.memory_space<vmem>>) attributes {dimension_semantics = [#tpu.dimension_semantics<parallel>], iteration_bounds = array<i64: 1>, scalar_prefetch = 0 : i64, scratch_operands = 0 : i64, tpu.core_type = #tpu.core_type<tc>, window_params = [{transform_indices = @transform_0, window_bounds = array<i64: 8, 8>}, {transform_indices = @transform_1, window_bounds = array<i64: 8, 8, 8>}, {pipeline_mode = #tpu.pipeline_mode<synchronous>, transform_indices = @transform_2, window_bounds = array<i64: 8, 32>}, {pipeline_mode = #tpu.pipeline_mode<synchronous>, transform_indices = @transform_3, window_bounds = array<i64: 1, 32>}, {pipeline_mode = #tpu.pipeline_mode<synchronous>, transform_indices = @transform_4, window_bounds = array<i64: 1, 64>}, {pipeline_mode = #tpu.pipeline_mode<synchronous>, transform_indices = @transform_5, window_bounds = array<i64: 32, 64>}, {pipeline_mode = #tpu.pipeline_mode<synchronous>, transform_indices = @transform_6, window_bounds = array<i64: 1, 64>}, {pipeline_mode = #tpu.pipeline_mode<synchronous>, transform_indices = @transform_7, window_bounds = array<i64: 64, 64>}, {pipeline_mode = #tpu.pipeline_mode<synchronous>, transform_indices = @transform_8, window_bounds = array<i64: 1, 64>}, {pipeline_mode = #tpu.pipeline_mode<synchronous>, transform_indices = @transform_9, window_bounds = array<i64: 5, 64, 32>}, {pipeline_mode = #tpu.pipeline_mode<synchronous>, transform_indices = @transform_10, window_bounds = array<i64: 5, 32>}, {pipeline_mode = #tpu.pipeline_mode<synchronous>, transform_indices = @transform_11, window_bounds = array<i64: 32, 1>}, {pipeline_mode = #tpu.pipeline_mode<synchronous>, transform_indices = @transform_12, window_bounds = array<i64: 1, 1>}, {transform_indices = @transform_13, window_bounds = array<i64: 8, 1>}]} {
    %c0 = arith.constant 0 : index
    %c0_0 = arith.constant 0 : index
    %0 = vector.load %arg1[%c0, %c0_0] : memref<8x8xf32, #tpu.memory_space<vmem>>, vector<8x8xf32>
    %c0_1 = arith.constant 0 : index
    %c0_2 = arith.constant 0 : index
    %1 = vector.load %arg3[%c0_1, %c0_2] : memref<8x32xf32, #tpu.memory_space<vmem>>, vector<8x32xf32>
    %cst = arith.constant dense<0.000000e+00> : vector<8x32xf32>
    %2 = tpu.matmul %0, %1, %cst {dimension_numbers = #tpu.dot_dimension_numbers<[1], [0], [0], [1], [0, 0, 1, 1], [], []>, precision = #tpu.contract_precision<fp32>} : vector<8x8xf32>, vector<8x32xf32>, vector<8x32xf32> -> vector<8x32xf32>
    %c0_3 = arith.constant 0 : index
    %c0_4 = arith.constant 0 : index
    %3 = vector.load %arg4[%c0_3, %c0_4] : memref<1x32xf32, #tpu.memory_space<vmem>>, vector<1x32xf32>
    %4 = vector.broadcast %3 : vector<1x32xf32> to vector<8x32xf32>
    %5 = arith.addf %2, %4 : vector<8x32xf32>
    %c0_5 = arith.constant 0 : index
    %c0_6 = arith.constant 0 : index
    %c0_7 = arith.constant 0 : index
    %6 = vector.load %arg2[%c0_5, %c0_6, %c0_7] : memref<8x8x8xf32, #tpu.memory_space<vmem>>, vector<1x8x8xf32>
    %7 = vector.shape_cast %6 : vector<1x8x8xf32> to vector<8x8xf32>
    %c0_8 = arith.constant 0 : index
    %c0_9 = arith.constant 0 : index
    %8 = vector.load %arg6[%c0_8, %c0_9] : memref<32x64xf32, #tpu.memory_space<vmem>>, vector<32x64xf32>
    %cst_10 = arith.constant dense<0.000000e+00> : vector<8x64xf32>
    %9 = tpu.matmul %5, %8, %cst_10 {dimension_numbers = #tpu.dot_dimension_numbers<[1], [0], [0], [1], [0, 0, 1, 1], [], []>, precision = #tpu.contract_precision<fp32>} : vector<8x32xf32>, vector<32x64xf32>, vector<8x64xf32> -> vector<8x64xf32>
    %c0_11 = arith.constant 0 : index
    %c0_12 = arith.constant 0 : index
    %10 = vector.load %arg5[%c0_11, %c0_12] : memref<1x64xf32, #tpu.memory_space<vmem>>, vector<1x64xf32>
    %cst_13 = arith.constant 0.000000e+00 : f32
    %11 = vector.broadcast %cst_13 : f32 to vector<1x64xf32>
    %12 = arith.mulf %11, %10 : vector<1x64xf32>
    %c0_14 = arith.constant 0 : index
    %c0_15 = arith.constant 0 : index
    %13 = vector.load %arg7[%c0_14, %c0_15] : memref<1x64xf32, #tpu.memory_space<vmem>>, vector<1x64xf32>
    %14 = arith.addf %12, %13 : vector<1x64xf32>
    %15 = vector.broadcast %14 : vector<1x64xf32> to vector<8x64xf32>
    %16 = arith.addf %9, %15 : vector<8x64xf32>
    %cst_16 = arith.constant 0.000000e+00 : f32
    %17 = vector.broadcast %cst_16 : f32 to vector<8x64xf32>
    %18 = arith.maximumf %16, %17 : vector<8x64xf32>
    %c0_17 = arith.constant 0 : index
    %c0_18 = arith.constant 0 : index
    %19 = vector.load %arg8[%c0_17, %c0_18] : memref<64x64xf32, #tpu.memory_space<vmem>>, vector<64x64xf32>
    %cst_19 = arith.constant dense<0.000000e+00> : vector<8x64xf32>
    %20 = tpu.matmul %18, %19, %cst_19 {dimension_numbers = #tpu.dot_dimension_numbers<[1], [0], [0], [1], [0, 0, 1, 1], [], []>, precision = #tpu.contract_precision<fp32>} : vector<8x64xf32>, vector<64x64xf32>, vector<8x64xf32> -> vector<8x64xf32>
    %c0_20 = arith.constant 0 : index
    %c0_21 = arith.constant 0 : index
    %21 = vector.load %arg9[%c0_20, %c0_21] : memref<1x64xf32, #tpu.memory_space<vmem>>, vector<1x64xf32>
    %22 = vector.broadcast %21 : vector<1x64xf32> to vector<8x64xf32>
    %23 = arith.addf %20, %22 : vector<8x64xf32>
    %cst_22 = arith.constant 0.000000e+00 : f32
    %24 = vector.broadcast %cst_22 : f32 to vector<8x64xf32>
    %25 = arith.maximumf %23, %24 : vector<8x64xf32>
    %c0_23 = arith.constant 0 : index
    %c0_24 = arith.constant 0 : index
    %26 = vector.load %arg11[%c0_23, %c0_24] : memref<5x32xf32, #tpu.memory_space<vmem>>, vector<5x32xf32>
    %cst_25 = arith.constant 0.000000e+00 : f32
    %27 = vector.broadcast %cst_25 : f32 to vector<8x32xf32>
    %c0_26 = arith.constant 0 : index
    %c0_27 = arith.constant 0 : index
    %c0_28 = arith.constant 0 : index
    %28 = vector.load %arg10[%c0_26, %c0_27, %c0_28] : memref<5x64x32xf32, #tpu.memory_space<vmem>>, vector<1x64x32xf32>
    %29 = vector.shape_cast %28 : vector<1x64x32xf32> to vector<64x32xf32>
    %cst_29 = arith.constant dense<0.000000e+00> : vector<8x32xf32>
    %30 = tpu.matmul %25, %29, %cst_29 {dimension_numbers = #tpu.dot_dimension_numbers<[1], [0], [0], [1], [0, 0, 1, 1], [], []>, precision = #tpu.contract_precision<fp32>} : vector<8x64xf32>, vector<64x32xf32>, vector<8x32xf32> -> vector<8x32xf32>
    %31 = vector.extract_strided_slice %26 {offsets = [0, 0], sizes = [1, 32], strides = [1, 1]} : vector<5x32xf32> to vector<1x32xf32>
    %32 = vector.broadcast %31 : vector<1x32xf32> to vector<8x32xf32>
    %33 = arith.addf %30, %32 : vector<8x32xf32>
    %34 = vector.extract_strided_slice %7 {offsets = [0, 0], sizes = [8, 1], strides = [1, 1]} : vector<8x8xf32> to vector<8x1xf32>
    %35 = vector.broadcast %34 : vector<8x1xf32> to vector<8x32xf32>
    %36 = arith.mulf %35, %33 : vector<8x32xf32>
    %37 = arith.addf %27, %36 : vector<8x32xf32>
    %c1 = arith.constant 1 : index
    %c0_30 = arith.constant 0 : index
    %c0_31 = arith.constant 0 : index
    %38 = vector.load %arg10[%c1, %c0_30, %c0_31] : memref<5x64x32xf32, #tpu.memory_space<vmem>>, vector<1x64x32xf32>
    %39 = vector.shape_cast %38 : vector<1x64x32xf32> to vector<64x32xf32>
    %cst_32 = arith.constant dense<0.000000e+00> : vector<8x32xf32>
    %40 = tpu.matmul %25, %39, %cst_32 {dimension_numbers = #tpu.dot_dimension_numbers<[1], [0], [0], [1], [0, 0, 1, 1], [], []>, precision = #tpu.contract_precision<fp32>} : vector<8x64xf32>, vector<64x32xf32>, vector<8x32xf32> -> vector<8x32xf32>
    %41 = vector.extract_strided_slice %26 {offsets = [1, 0], sizes = [1, 32], strides = [1, 1]} : vector<5x32xf32> to vector<1x32xf32>
    %42 = vector.broadcast %41 : vector<1x32xf32> to vector<8x32xf32>
    %43 = arith.addf %40, %42 : vector<8x32xf32>
    %44 = vector.extract_strided_slice %7 {offsets = [0, 1], sizes = [8, 1], strides = [1, 1]} : vector<8x8xf32> to vector<8x1xf32>
    %45 = vector.broadcast %44 : vector<8x1xf32> to vector<8x32xf32>
    %46 = arith.mulf %45, %43 : vector<8x32xf32>
    %47 = arith.addf %37, %46 : vector<8x32xf32>
    %c2 = arith.constant 2 : index
    %c0_33 = arith.constant 0 : index
    %c0_34 = arith.constant 0 : index
    %48 = vector.load %arg10[%c2, %c0_33, %c0_34] : memref<5x64x32xf32, #tpu.memory_space<vmem>>, vector<1x64x32xf32>
    %49 = vector.shape_cast %48 : vector<1x64x32xf32> to vector<64x32xf32>
    %cst_35 = arith.constant dense<0.000000e+00> : vector<8x32xf32>
    %50 = tpu.matmul %25, %49, %cst_35 {dimension_numbers = #tpu.dot_dimension_numbers<[1], [0], [0], [1], [0, 0, 1, 1], [], []>, precision = #tpu.contract_precision<fp32>} : vector<8x64xf32>, vector<64x32xf32>, vector<8x32xf32> -> vector<8x32xf32>
    %51 = vector.extract_strided_slice %26 {offsets = [2, 0], sizes = [1, 32], strides = [1, 1]} : vector<5x32xf32> to vector<1x32xf32>
    %52 = vector.broadcast %51 : vector<1x32xf32> to vector<8x32xf32>
    %53 = arith.addf %50, %52 : vector<8x32xf32>
    %54 = vector.extract_strided_slice %7 {offsets = [0, 2], sizes = [8, 1], strides = [1, 1]} : vector<8x8xf32> to vector<8x1xf32>
    %55 = vector.broadcast %54 : vector<8x1xf32> to vector<8x32xf32>
    %56 = arith.mulf %55, %53 : vector<8x32xf32>
    %57 = arith.addf %47, %56 : vector<8x32xf32>
    %c3 = arith.constant 3 : index
    %c0_36 = arith.constant 0 : index
    %c0_37 = arith.constant 0 : index
    %58 = vector.load %arg10[%c3, %c0_36, %c0_37] : memref<5x64x32xf32, #tpu.memory_space<vmem>>, vector<1x64x32xf32>
    %59 = vector.shape_cast %58 : vector<1x64x32xf32> to vector<64x32xf32>
    %cst_38 = arith.constant dense<0.000000e+00> : vector<8x32xf32>
    %60 = tpu.matmul %25, %59, %cst_38 {dimension_numbers = #tpu.dot_dimension_numbers<[1], [0], [0], [1], [0, 0, 1, 1], [], []>, precision = #tpu.contract_precision<fp32>} : vector<8x64xf32>, vector<64x32xf32>, vector<8x32xf32> -> vector<8x32xf32>
    %61 = vector.extract_strided_slice %26 {offsets = [3, 0], sizes = [1, 32], strides = [1, 1]} : vector<5x32xf32> to vector<1x32xf32>
    %62 = vector.broadcast %61 : vector<1x32xf32> to vector<8x32xf32>
    %63 = arith.addf %60, %62 : vector<8x32xf32>
    %64 = vector.extract_strided_slice %7 {offsets = [0, 3], sizes = [8, 1], strides = [1, 1]} : vector<8x8xf32> to vector<8x1xf32>
    %65 = vector.broadcast %64 : vector<8x1xf32> to vector<8x32xf32>
    %66 = arith.mulf %65, %63 : vector<8x32xf32>
    %67 = arith.addf %57, %66 : vector<8x32xf32>
    %c4 = arith.constant 4 : index
    %c0_39 = arith.constant 0 : index
    %c0_40 = arith.constant 0 : index
    %68 = vector.load %arg10[%c4, %c0_39, %c0_40] : memref<5x64x32xf32, #tpu.memory_space<vmem>>, vector<1x64x32xf32>
    %69 = vector.shape_cast %68 : vector<1x64x32xf32> to vector<64x32xf32>
    %cst_41 = arith.constant dense<0.000000e+00> : vector<8x32xf32>
    %70 = tpu.matmul %25, %69, %cst_41 {dimension_numbers = #tpu.dot_dimension_numbers<[1], [0], [0], [1], [0, 0, 1, 1], [], []>, precision = #tpu.contract_precision<fp32>} : vector<8x64xf32>, vector<64x32xf32>, vector<8x32xf32> -> vector<8x32xf32>
    %71 = vector.extract_strided_slice %26 {offsets = [4, 0], sizes = [1, 32], strides = [1, 1]} : vector<5x32xf32> to vector<1x32xf32>
    %72 = vector.broadcast %71 : vector<1x32xf32> to vector<8x32xf32>
    %73 = arith.addf %70, %72 : vector<8x32xf32>
    %74 = vector.extract_strided_slice %7 {offsets = [0, 4], sizes = [8, 1], strides = [1, 1]} : vector<8x8xf32> to vector<8x1xf32>
    %75 = vector.broadcast %74 : vector<8x1xf32> to vector<8x32xf32>
    %76 = arith.mulf %75, %73 : vector<8x32xf32>
    %77 = arith.addf %67, %76 : vector<8x32xf32>
    %c0_i32 = arith.constant 0 : i32
    %cst_42 = arith.constant 2.000000e+00 : f32
    %78 = vector.broadcast %cst_42 : f32 to vector<8x32xf32>
    %79 = arith.mulf %78, %5 : vector<8x32xf32>
    %80 = arith.subf %79, %5 : vector<8x32xf32>
    %81 = arith.addf %80, %77 : vector<8x32xf32>
    %c1_i32 = arith.constant 1 : i32
    %82 = arith.addi %c0_i32, %c1_i32 : i32
    %83 = arith.sitofp %82 : i32 to f32
    %c1_i32_43 = arith.constant 1 : i32
    %84 = arith.addi %c0_i32, %c1_i32_43 : i32
    %85 = arith.index_cast %84 : i32 to index
    %c0_44 = arith.constant 0 : index
    %c0_45 = arith.constant 0 : index
    %86 = vector.load %arg2[%85, %c0_44, %c0_45] : memref<8x8x8xf32, #tpu.memory_space<vmem>>, vector<1x8x8xf32>
    %87 = vector.shape_cast %86 : vector<1x8x8xf32> to vector<8x8xf32>
    %c0_46 = arith.constant 0 : index
    %c0_47 = arith.constant 0 : index
    %88 = vector.load %arg6[%c0_46, %c0_47] : memref<32x64xf32, #tpu.memory_space<vmem>>, vector<32x64xf32>
    %cst_48 = arith.constant dense<0.000000e+00> : vector<8x64xf32>
    %89 = tpu.matmul %81, %88, %cst_48 {dimension_numbers = #tpu.dot_dimension_numbers<[1], [0], [0], [1], [0, 0, 1, 1], [], []>, precision = #tpu.contract_precision<fp32>} : vector<8x32xf32>, vector<32x64xf32>, vector<8x64xf32> -> vector<8x64xf32>
    %c0_49 = arith.constant 0 : index
    %c0_50 = arith.constant 0 : index
    %90 = vector.load %arg5[%c0_49, %c0_50] : memref<1x64xf32, #tpu.memory_space<vmem>>, vector<1x64xf32>
    %91 = vector.broadcast %83 : f32 to vector<1x64xf32>
    %92 = arith.mulf %91, %90 : vector<1x64xf32>
    %c0_51 = arith.constant 0 : index
    %c0_52 = arith.constant 0 : index
    %93 = vector.load %arg7[%c0_51, %c0_52] : memref<1x64xf32, #tpu.memory_space<vmem>>, vector<1x64xf32>
    %94 = arith.addf %92, %93 : vector<1x64xf32>
    %95 = vector.broadcast %94 : vector<1x64xf32> to vector<8x64xf32>
    %96 = arith.addf %89, %95 : vector<8x64xf32>
    %cst_53 = arith.constant 0.000000e+00 : f32
    %97 = vector.broadcast %cst_53 : f32 to vector<8x64xf32>
    %98 = arith.maximumf %96, %97 : vector<8x64xf32>
    %c0_54 = arith.constant 0 : index
    %c0_55 = arith.constant 0 : index
    %99 = vector.load %arg8[%c0_54, %c0_55] : memref<64x64xf32, #tpu.memory_space<vmem>>, vector<64x64xf32>
    %cst_56 = arith.constant dense<0.000000e+00> : vector<8x64xf32>
    %100 = tpu.matmul %98, %99, %cst_56 {dimension_numbers = #tpu.dot_dimension_numbers<[1], [0], [0], [1], [0, 0, 1, 1], [], []>, precision = #tpu.contract_precision<fp32>} : vector<8x64xf32>, vector<64x64xf32>, vector<8x64xf32> -> vector<8x64xf32>
    %c0_57 = arith.constant 0 : index
    %c0_58 = arith.constant 0 : index
    %101 = vector.load %arg9[%c0_57, %c0_58] : memref<1x64xf32, #tpu.memory_space<vmem>>, vector<1x64xf32>
    %102 = vector.broadcast %101 : vector<1x64xf32> to vector<8x64xf32>
    %103 = arith.addf %100, %102 : vector<8x64xf32>
    %cst_59 = arith.constant 0.000000e+00 : f32
    %104 = vector.broadcast %cst_59 : f32 to vector<8x64xf32>
    %105 = arith.maximumf %103, %104 : vector<8x64xf32>
    %c0_60 = arith.constant 0 : index
    %c0_61 = arith.constant 0 : index
    %106 = vector.load %arg11[%c0_60, %c0_61] : memref<5x32xf32, #tpu.memory_space<vmem>>, vector<5x32xf32>
    %cst_62 = arith.constant 0.000000e+00 : f32
    %107 = vector.broadcast %cst_62 : f32 to vector<8x32xf32>
    %c0_63 = arith.constant 0 : index
    %c0_64 = arith.constant 0 : index
    %c0_65 = arith.constant 0 : index
    %108 = vector.load %arg10[%c0_63, %c0_64, %c0_65] : memref<5x64x32xf32, #tpu.memory_space<vmem>>, vector<1x64x32xf32>
    %109 = vector.shape_cast %108 : vector<1x64x32xf32> to vector<64x32xf32>
    %cst_66 = arith.constant dense<0.000000e+00> : vector<8x32xf32>
    %110 = tpu.matmul %105, %109, %cst_66 {dimension_numbers = #tpu.dot_dimension_numbers<[1], [0], [0], [1], [0, 0, 1, 1], [], []>, precision = #tpu.contract_precision<fp32>} : vector<8x64xf32>, vector<64x32xf32>, vector<8x32xf32> -> vector<8x32xf32>
    %111 = vector.extract_strided_slice %106 {offsets = [0, 0], sizes = [1, 32], strides = [1, 1]} : vector<5x32xf32> to vector<1x32xf32>
    %112 = vector.broadcast %111 : vector<1x32xf32> to vector<8x32xf32>
    %113 = arith.addf %110, %112 : vector<8x32xf32>
    %114 = vector.extract_strided_slice %87 {offsets = [0, 0], sizes = [8, 1], strides = [1, 1]} : vector<8x8xf32> to vector<8x1xf32>
    %115 = vector.broadcast %114 : vector<8x1xf32> to vector<8x32xf32>
    %116 = arith.mulf %115, %113 : vector<8x32xf32>
    %117 = arith.addf %107, %116 : vector<8x32xf32>
    %c1_67 = arith.constant 1 : index
    %c0_68 = arith.constant 0 : index
    %c0_69 = arith.constant 0 : index
    %118 = vector.load %arg10[%c1_67, %c0_68, %c0_69] : memref<5x64x32xf32, #tpu.memory_space<vmem>>, vector<1x64x32xf32>
    %119 = vector.shape_cast %118 : vector<1x64x32xf32> to vector<64x32xf32>
    %cst_70 = arith.constant dense<0.000000e+00> : vector<8x32xf32>
    %120 = tpu.matmul %105, %119, %cst_70 {dimension_numbers = #tpu.dot_dimension_numbers<[1], [0], [0], [1], [0, 0, 1, 1], [], []>, precision = #tpu.contract_precision<fp32>} : vector<8x64xf32>, vector<64x32xf32>, vector<8x32xf32> -> vector<8x32xf32>
    %121 = vector.extract_strided_slice %106 {offsets = [1, 0], sizes = [1, 32], strides = [1, 1]} : vector<5x32xf32> to vector<1x32xf32>
    %122 = vector.broadcast %121 : vector<1x32xf32> to vector<8x32xf32>
    %123 = arith.addf %120, %122 : vector<8x32xf32>
    %124 = vector.extract_strided_slice %87 {offsets = [0, 1], sizes = [8, 1], strides = [1, 1]} : vector<8x8xf32> to vector<8x1xf32>
    %125 = vector.broadcast %124 : vector<8x1xf32> to vector<8x32xf32>
    %126 = arith.mulf %125, %123 : vector<8x32xf32>
    %127 = arith.addf %117, %126 : vector<8x32xf32>
    %c2_71 = arith.constant 2 : index
    %c0_72 = arith.constant 0 : index
    %c0_73 = arith.constant 0 : index
    %128 = vector.load %arg10[%c2_71, %c0_72, %c0_73] : memref<5x64x32xf32, #tpu.memory_space<vmem>>, vector<1x64x32xf32>
    %129 = vector.shape_cast %128 : vector<1x64x32xf32> to vector<64x32xf32>
    %cst_74 = arith.constant dense<0.000000e+00> : vector<8x32xf32>
    %130 = tpu.matmul %105, %129, %cst_74 {dimension_numbers = #tpu.dot_dimension_numbers<[1], [0], [0], [1], [0, 0, 1, 1], [], []>, precision = #tpu.contract_precision<fp32>} : vector<8x64xf32>, vector<64x32xf32>, vector<8x32xf32> -> vector<8x32xf32>
    %131 = vector.extract_strided_slice %106 {offsets = [2, 0], sizes = [1, 32], strides = [1, 1]} : vector<5x32xf32> to vector<1x32xf32>
    %132 = vector.broadcast %131 : vector<1x32xf32> to vector<8x32xf32>
    %133 = arith.addf %130, %132 : vector<8x32xf32>
    %134 = vector.extract_strided_slice %87 {offsets = [0, 2], sizes = [8, 1], strides = [1, 1]} : vector<8x8xf32> to vector<8x1xf32>
    %135 = vector.broadcast %134 : vector<8x1xf32> to vector<8x32xf32>
    %136 = arith.mulf %135, %133 : vector<8x32xf32>
    %137 = arith.addf %127, %136 : vector<8x32xf32>
    %c3_75 = arith.constant 3 : index
    %c0_76 = arith.constant 0 : index
    %c0_77 = arith.constant 0 : index
    %138 = vector.load %arg10[%c3_75, %c0_76, %c0_77] : memref<5x64x32xf32, #tpu.memory_space<vmem>>, vector<1x64x32xf32>
    %139 = vector.shape_cast %138 : vector<1x64x32xf32> to vector<64x32xf32>
    %cst_78 = arith.constant dense<0.000000e+00> : vector<8x32xf32>
    %140 = tpu.matmul %105, %139, %cst_78 {dimension_numbers = #tpu.dot_dimension_numbers<[1], [0], [0], [1], [0, 0, 1, 1], [], []>, precision = #tpu.contract_precision<fp32>} : vector<8x64xf32>, vector<64x32xf32>, vector<8x32xf32> -> vector<8x32xf32>
    %141 = vector.extract_strided_slice %106 {offsets = [3, 0], sizes = [1, 32], strides = [1, 1]} : vector<5x32xf32> to vector<1x32xf32>
    %142 = vector.broadcast %141 : vector<1x32xf32> to vector<8x32xf32>
    %143 = arith.addf %140, %142 : vector<8x32xf32>
    %144 = vector.extract_strided_slice %87 {offsets = [0, 3], sizes = [8, 1], strides = [1, 1]} : vector<8x8xf32> to vector<8x1xf32>
    %145 = vector.broadcast %144 : vector<8x1xf32> to vector<8x32xf32>
    %146 = arith.mulf %145, %143 : vector<8x32xf32>
    %147 = arith.addf %137, %146 : vector<8x32xf32>
    %c4_79 = arith.constant 4 : index
    %c0_80 = arith.constant 0 : index
    %c0_81 = arith.constant 0 : index
    %148 = vector.load %arg10[%c4_79, %c0_80, %c0_81] : memref<5x64x32xf32, #tpu.memory_space<vmem>>, vector<1x64x32xf32>
    %149 = vector.shape_cast %148 : vector<1x64x32xf32> to vector<64x32xf32>
    %cst_82 = arith.constant dense<0.000000e+00> : vector<8x32xf32>
    %150 = tpu.matmul %105, %149, %cst_82 {dimension_numbers = #tpu.dot_dimension_numbers<[1], [0], [0], [1], [0, 0, 1, 1], [], []>, precision = #tpu.contract_precision<fp32>} : vector<8x64xf32>, vector<64x32xf32>, vector<8x32xf32> -> vector<8x32xf32>
    %151 = vector.extract_strided_slice %106 {offsets = [4, 0], sizes = [1, 32], strides = [1, 1]} : vector<5x32xf32> to vector<1x32xf32>
    %152 = vector.broadcast %151 : vector<1x32xf32> to vector<8x32xf32>
    %153 = arith.addf %150, %152 : vector<8x32xf32>
    %154 = vector.extract_strided_slice %87 {offsets = [0, 4], sizes = [8, 1], strides = [1, 1]} : vector<8x8xf32> to vector<8x1xf32>
    %155 = vector.broadcast %154 : vector<8x1xf32> to vector<8x32xf32>
    %156 = arith.mulf %155, %153 : vector<8x32xf32>
    %157 = arith.addf %147, %156 : vector<8x32xf32>
    %158 = arith.addf %77, %157 : vector<8x32xf32>
    %cst_83 = arith.constant 5.000000e-01 : f32
    %159 = vector.broadcast %cst_83 : f32 to vector<8x32xf32>
    %160 = arith.mulf %159, %158 : vector<8x32xf32>
    %161 = arith.addf %5, %160 : vector<8x32xf32>
    %c1_i32_84 = arith.constant 1 : i32
    %cst_85 = arith.constant 2.000000e+00 : f32
    %162 = vector.broadcast %cst_85 : f32 to vector<8x32xf32>
    %163 = arith.mulf %162, %161 : vector<8x32xf32>
    %164 = arith.subf %163, %81 : vector<8x32xf32>
    %165 = arith.addf %164, %157 : vector<8x32xf32>
    %c1_i32_86 = arith.constant 1 : i32
    %166 = arith.addi %c1_i32_84, %c1_i32_86 : i32
    %167 = arith.sitofp %166 : i32 to f32
    %c1_i32_87 = arith.constant 1 : i32
    %168 = arith.addi %c1_i32_84, %c1_i32_87 : i32
    %169 = arith.index_cast %168 : i32 to index
    %c0_88 = arith.constant 0 : index
    %c0_89 = arith.constant 0 : index
    %170 = vector.load %arg2[%169, %c0_88, %c0_89] : memref<8x8x8xf32, #tpu.memory_space<vmem>>, vector<1x8x8xf32>
    %171 = vector.shape_cast %170 : vector<1x8x8xf32> to vector<8x8xf32>
    %c0_90 = arith.constant 0 : index
    %c0_91 = arith.constant 0 : index
    %172 = vector.load %arg6[%c0_90, %c0_91] : memref<32x64xf32, #tpu.memory_space<vmem>>, vector<32x64xf32>
    %cst_92 = arith.constant dense<0.000000e+00> : vector<8x64xf32>
    %173 = tpu.matmul %165, %172, %cst_92 {dimension_numbers = #tpu.dot_dimension_numbers<[1], [0], [0], [1], [0, 0, 1, 1], [], []>, precision = #tpu.contract_precision<fp32>} : vector<8x32xf32>, vector<32x64xf32>, vector<8x64xf32> -> vector<8x64xf32>
    %c0_93 = arith.constant 0 : index
    %c0_94 = arith.constant 0 : index
    %174 = vector.load %arg5[%c0_93, %c0_94] : memref<1x64xf32, #tpu.memory_space<vmem>>, vector<1x64xf32>
    %175 = vector.broadcast %167 : f32 to vector<1x64xf32>
    %176 = arith.mulf %175, %174 : vector<1x64xf32>
    %c0_95 = arith.constant 0 : index
    %c0_96 = arith.constant 0 : index
    %177 = vector.load %arg7[%c0_95, %c0_96] : memref<1x64xf32, #tpu.memory_space<vmem>>, vector<1x64xf32>
    %178 = arith.addf %176, %177 : vector<1x64xf32>
    %179 = vector.broadcast %178 : vector<1x64xf32> to vector<8x64xf32>
    %180 = arith.addf %173, %179 : vector<8x64xf32>
    %cst_97 = arith.constant 0.000000e+00 : f32
    %181 = vector.broadcast %cst_97 : f32 to vector<8x64xf32>
    %182 = arith.maximumf %180, %181 : vector<8x64xf32>
    %c0_98 = arith.constant 0 : index
    %c0_99 = arith.constant 0 : index
    %183 = vector.load %arg8[%c0_98, %c0_99] : memref<64x64xf32, #tpu.memory_space<vmem>>, vector<64x64xf32>
    %cst_100 = arith.constant dense<0.000000e+00> : vector<8x64xf32>
    %184 = tpu.matmul %182, %183, %cst_100 {dimension_numbers = #tpu.dot_dimension_numbers<[1], [0], [0], [1], [0, 0, 1, 1], [], []>, precision = #tpu.contract_precision<fp32>} : vector<8x64xf32>, vector<64x64xf32>, vector<8x64xf32> -> vector<8x64xf32>
    %c0_101 = arith.constant 0 : index
    %c0_102 = arith.constant 0 : index
    %185 = vector.load %arg9[%c0_101, %c0_102] : memref<1x64xf32, #tpu.memory_space<vmem>>, vector<1x64xf32>
    %186 = vector.broadcast %185 : vector<1x64xf32> to vector<8x64xf32>
    %187 = arith.addf %184, %186 : vector<8x64xf32>
    %cst_103 = arith.constant 0.000000e+00 : f32
    %188 = vector.broadcast %cst_103 : f32 to vector<8x64xf32>
    %189 = arith.maximumf %187, %188 : vector<8x64xf32>
    %c0_104 = arith.constant 0 : index
    %c0_105 = arith.constant 0 : index
    %190 = vector.load %arg11[%c0_104, %c0_105] : memref<5x32xf32, #tpu.memory_space<vmem>>, vector<5x32xf32>
    %cst_106 = arith.constant 0.000000e+00 : f32
    %191 = vector.broadcast %cst_106 : f32 to vector<8x32xf32>
    %c0_107 = arith.constant 0 : index
    %c0_108 = arith.constant 0 : index
    %c0_109 = arith.constant 0 : index
    %192 = vector.load %arg10[%c0_107, %c0_108, %c0_109] : memref<5x64x32xf32, #tpu.memory_space<vmem>>, vector<1x64x32xf32>
    %193 = vector.shape_cast %192 : vector<1x64x32xf32> to vector<64x32xf32>
    %cst_110 = arith.constant dense<0.000000e+00> : vector<8x32xf32>
    %194 = tpu.matmul %189, %193, %cst_110 {dimension_numbers = #tpu.dot_dimension_numbers<[1], [0], [0], [1], [0, 0, 1, 1], [], []>, precision = #tpu.contract_precision<fp32>} : vector<8x64xf32>, vector<64x32xf32>, vector<8x32xf32> -> vector<8x32xf32>
    %195 = vector.extract_strided_slice %190 {offsets = [0, 0], sizes = [1, 32], strides = [1, 1]} : vector<5x32xf32> to vector<1x32xf32>
    %196 = vector.broadcast %195 : vector<1x32xf32> to vector<8x32xf32>
    %197 = arith.addf %194, %196 : vector<8x32xf32>
    %198 = vector.extract_strided_slice %171 {offsets = [0, 0], sizes = [8, 1], strides = [1, 1]} : vector<8x8xf32> to vector<8x1xf32>
    %199 = vector.broadcast %198 : vector<8x1xf32> to vector<8x32xf32>
    %200 = arith.mulf %199, %197 : vector<8x32xf32>
    %201 = arith.addf %191, %200 : vector<8x32xf32>
    %c1_111 = arith.constant 1 : index
    %c0_112 = arith.constant 0 : index
    %c0_113 = arith.constant 0 : index
    %202 = vector.load %arg10[%c1_111, %c0_112, %c0_113] : memref<5x64x32xf32, #tpu.memory_space<vmem>>, vector<1x64x32xf32>
    %203 = vector.shape_cast %202 : vector<1x64x32xf32> to vector<64x32xf32>
    %cst_114 = arith.constant dense<0.000000e+00> : vector<8x32xf32>
    %204 = tpu.matmul %189, %203, %cst_114 {dimension_numbers = #tpu.dot_dimension_numbers<[1], [0], [0], [1], [0, 0, 1, 1], [], []>, precision = #tpu.contract_precision<fp32>} : vector<8x64xf32>, vector<64x32xf32>, vector<8x32xf32> -> vector<8x32xf32>
    %205 = vector.extract_strided_slice %190 {offsets = [1, 0], sizes = [1, 32], strides = [1, 1]} : vector<5x32xf32> to vector<1x32xf32>
    %206 = vector.broadcast %205 : vector<1x32xf32> to vector<8x32xf32>
    %207 = arith.addf %204, %206 : vector<8x32xf32>
    %208 = vector.extract_strided_slice %171 {offsets = [0, 1], sizes = [8, 1], strides = [1, 1]} : vector<8x8xf32> to vector<8x1xf32>
    %209 = vector.broadcast %208 : vector<8x1xf32> to vector<8x32xf32>
    %210 = arith.mulf %209, %207 : vector<8x32xf32>
    %211 = arith.addf %201, %210 : vector<8x32xf32>
    %c2_115 = arith.constant 2 : index
    %c0_116 = arith.constant 0 : index
    %c0_117 = arith.constant 0 : index
    %212 = vector.load %arg10[%c2_115, %c0_116, %c0_117] : memref<5x64x32xf32, #tpu.memory_space<vmem>>, vector<1x64x32xf32>
    %213 = vector.shape_cast %212 : vector<1x64x32xf32> to vector<64x32xf32>
    %cst_118 = arith.constant dense<0.000000e+00> : vector<8x32xf32>
    %214 = tpu.matmul %189, %213, %cst_118 {dimension_numbers = #tpu.dot_dimension_numbers<[1], [0], [0], [1], [0, 0, 1, 1], [], []>, precision = #tpu.contract_precision<fp32>} : vector<8x64xf32>, vector<64x32xf32>, vector<8x32xf32> -> vector<8x32xf32>
    %215 = vector.extract_strided_slice %190 {offsets = [2, 0], sizes = [1, 32], strides = [1, 1]} : vector<5x32xf32> to vector<1x32xf32>
    %216 = vector.broadcast %215 : vector<1x32xf32> to vector<8x32xf32>
    %217 = arith.addf %214, %216 : vector<8x32xf32>
    %218 = vector.extract_strided_slice %171 {offsets = [0, 2], sizes = [8, 1], strides = [1, 1]} : vector<8x8xf32> to vector<8x1xf32>
    %219 = vector.broadcast %218 : vector<8x1xf32> to vector<8x32xf32>
    %220 = arith.mulf %219, %217 : vector<8x32xf32>
    %221 = arith.addf %211, %220 : vector<8x32xf32>
    %c3_119 = arith.constant 3 : index
    %c0_120 = arith.constant 0 : index
    %c0_121 = arith.constant 0 : index
    %222 = vector.load %arg10[%c3_119, %c0_120, %c0_121] : memref<5x64x32xf32, #tpu.memory_space<vmem>>, vector<1x64x32xf32>
    %223 = vector.shape_cast %222 : vector<1x64x32xf32> to vector<64x32xf32>
    %cst_122 = arith.constant dense<0.000000e+00> : vector<8x32xf32>
    %224 = tpu.matmul %189, %223, %cst_122 {dimension_numbers = #tpu.dot_dimension_numbers<[1], [0], [0], [1], [0, 0, 1, 1], [], []>, precision = #tpu.contract_precision<fp32>} : vector<8x64xf32>, vector<64x32xf32>, vector<8x32xf32> -> vector<8x32xf32>
    %225 = vector.extract_strided_slice %190 {offsets = [3, 0], sizes = [1, 32], strides = [1, 1]} : vector<5x32xf32> to vector<1x32xf32>
    %226 = vector.broadcast %225 : vector<1x32xf32> to vector<8x32xf32>
    %227 = arith.addf %224, %226 : vector<8x32xf32>
    %228 = vector.extract_strided_slice %171 {offsets = [0, 3], sizes = [8, 1], strides = [1, 1]} : vector<8x8xf32> to vector<8x1xf32>
    %229 = vector.broadcast %228 : vector<8x1xf32> to vector<8x32xf32>
    %230 = arith.mulf %229, %227 : vector<8x32xf32>
    %231 = arith.addf %221, %230 : vector<8x32xf32>
    %c4_123 = arith.constant 4 : index
    %c0_124 = arith.constant 0 : index
    %c0_125 = arith.constant 0 : index
    %232 = vector.load %arg10[%c4_123, %c0_124, %c0_125] : memref<5x64x32xf32, #tpu.memory_space<vmem>>, vector<1x64x32xf32>
    %233 = vector.shape_cast %232 : vector<1x64x32xf32> to vector<64x32xf32>
    %cst_126 = arith.constant dense<0.000000e+00> : vector<8x32xf32>
    %234 = tpu.matmul %189, %233, %cst_126 {dimension_numbers = #tpu.dot_dimension_numbers<[1], [0], [0], [1], [0, 0, 1, 1], [], []>, precision = #tpu.contract_precision<fp32>} : vector<8x64xf32>, vector<64x32xf32>, vector<8x32xf32> -> vector<8x32xf32>
    %235 = vector.extract_strided_slice %190 {offsets = [4, 0], sizes = [1, 32], strides = [1, 1]} : vector<5x32xf32> to vector<1x32xf32>
    %236 = vector.broadcast %235 : vector<1x32xf32> to vector<8x32xf32>
    %237 = arith.addf %234, %236 : vector<8x32xf32>
    %238 = vector.extract_strided_slice %171 {offsets = [0, 4], sizes = [8, 1], strides = [1, 1]} : vector<8x8xf32> to vector<8x1xf32>
    %239 = vector.broadcast %238 : vector<8x1xf32> to vector<8x32xf32>
    %240 = arith.mulf %239, %237 : vector<8x32xf32>
    %241 = arith.addf %231, %240 : vector<8x32xf32>
    %242 = arith.addf %157, %241 : vector<8x32xf32>
    %cst_127 = arith.constant 5.000000e-01 : f32
    %243 = vector.broadcast %cst_127 : f32 to vector<8x32xf32>
    %244 = arith.mulf %243, %242 : vector<8x32xf32>
    %245 = arith.addf %161, %244 : vector<8x32xf32>
    %c2_i32 = arith.constant 2 : i32
    %cst_128 = arith.constant 2.000000e+00 : f32
    %246 = vector.broadcast %cst_128 : f32 to vector<8x32xf32>
    %247 = arith.mulf %246, %245 : vector<8x32xf32>
    %248 = arith.subf %247, %165 : vector<8x32xf32>
    %249 = arith.addf %248, %241 : vector<8x32xf32>
    %c1_i32_129 = arith.constant 1 : i32
    %250 = arith.addi %c2_i32, %c1_i32_129 : i32
    %251 = arith.sitofp %250 : i32 to f32
    %c1_i32_130 = arith.constant 1 : i32
    %252 = arith.addi %c2_i32, %c1_i32_130 : i32
    %253 = arith.index_cast %252 : i32 to index
    %c0_131 = arith.constant 0 : index
    %c0_132 = arith.constant 0 : index
    %254 = vector.load %arg2[%253, %c0_131, %c0_132] : memref<8x8x8xf32, #tpu.memory_space<vmem>>, vector<1x8x8xf32>
    %255 = vector.shape_cast %254 : vector<1x8x8xf32> to vector<8x8xf32>
    %c0_133 = arith.constant 0 : index
    %c0_134 = arith.constant 0 : index
    %256 = vector.load %arg6[%c0_133, %c0_134] : memref<32x64xf32, #tpu.memory_space<vmem>>, vector<32x64xf32>
    %cst_135 = arith.constant dense<0.000000e+00> : vector<8x64xf32>
    %257 = tpu.matmul %249, %256, %cst_135 {dimension_numbers = #tpu.dot_dimension_numbers<[1], [0], [0], [1], [0, 0, 1, 1], [], []>, precision = #tpu.contract_precision<fp32>} : vector<8x32xf32>, vector<32x64xf32>, vector<8x64xf32> -> vector<8x64xf32>
    %c0_136 = arith.constant 0 : index
    %c0_137 = arith.constant 0 : index
    %258 = vector.load %arg5[%c0_136, %c0_137] : memref<1x64xf32, #tpu.memory_space<vmem>>, vector<1x64xf32>
    %259 = vector.broadcast %251 : f32 to vector<1x64xf32>
    %260 = arith.mulf %259, %258 : vector<1x64xf32>
    %c0_138 = arith.constant 0 : index
    %c0_139 = arith.constant 0 : index
    %261 = vector.load %arg7[%c0_138, %c0_139] : memref<1x64xf32, #tpu.memory_space<vmem>>, vector<1x64xf32>
    %262 = arith.addf %260, %261 : vector<1x64xf32>
    %263 = vector.broadcast %262 : vector<1x64xf32> to vector<8x64xf32>
    %264 = arith.addf %257, %263 : vector<8x64xf32>
    %cst_140 = arith.constant 0.000000e+00 : f32
    %265 = vector.broadcast %cst_140 : f32 to vector<8x64xf32>
    %266 = arith.maximumf %264, %265 : vector<8x64xf32>
    %c0_141 = arith.constant 0 : index
    %c0_142 = arith.constant 0 : index
    %267 = vector.load %arg8[%c0_141, %c0_142] : memref<64x64xf32, #tpu.memory_space<vmem>>, vector<64x64xf32>
    %cst_143 = arith.constant dense<0.000000e+00> : vector<8x64xf32>
    %268 = tpu.matmul %266, %267, %cst_143 {dimension_numbers = #tpu.dot_dimension_numbers<[1], [0], [0], [1], [0, 0, 1, 1], [], []>, precision = #tpu.contract_precision<fp32>} : vector<8x64xf32>, vector<64x64xf32>, vector<8x64xf32> -> vector<8x64xf32>
    %c0_144 = arith.constant 0 : index
    %c0_145 = arith.constant 0 : index
    %269 = vector.load %arg9[%c0_144, %c0_145] : memref<1x64xf32, #tpu.memory_space<vmem>>, vector<1x64xf32>
    %270 = vector.broadcast %269 : vector<1x64xf32> to vector<8x64xf32>
    %271 = arith.addf %268, %270 : vector<8x64xf32>
    %cst_146 = arith.constant 0.000000e+00 : f32
    %272 = vector.broadcast %cst_146 : f32 to vector<8x64xf32>
    %273 = arith.maximumf %271, %272 : vector<8x64xf32>
    %c0_147 = arith.constant 0 : index
    %c0_148 = arith.constant 0 : index
    %274 = vector.load %arg11[%c0_147, %c0_148] : memref<5x32xf32, #tpu.memory_space<vmem>>, vector<5x32xf32>
    %cst_149 = arith.constant 0.000000e+00 : f32
    %275 = vector.broadcast %cst_149 : f32 to vector<8x32xf32>
    %c0_150 = arith.constant 0 : index
    %c0_151 = arith.constant 0 : index
    %c0_152 = arith.constant 0 : index
    %276 = vector.load %arg10[%c0_150, %c0_151, %c0_152] : memref<5x64x32xf32, #tpu.memory_space<vmem>>, vector<1x64x32xf32>
    %277 = vector.shape_cast %276 : vector<1x64x32xf32> to vector<64x32xf32>
    %cst_153 = arith.constant dense<0.000000e+00> : vector<8x32xf32>
    %278 = tpu.matmul %273, %277, %cst_153 {dimension_numbers = #tpu.dot_dimension_numbers<[1], [0], [0], [1], [0, 0, 1, 1], [], []>, precision = #tpu.contract_precision<fp32>} : vector<8x64xf32>, vector<64x32xf32>, vector<8x32xf32> -> vector<8x32xf32>
    %279 = vector.extract_strided_slice %274 {offsets = [0, 0], sizes = [1, 32], strides = [1, 1]} : vector<5x32xf32> to vector<1x32xf32>
    %280 = vector.broadcast %279 : vector<1x32xf32> to vector<8x32xf32>
    %281 = arith.addf %278, %280 : vector<8x32xf32>
    %282 = vector.extract_strided_slice %255 {offsets = [0, 0], sizes = [8, 1], strides = [1, 1]} : vector<8x8xf32> to vector<8x1xf32>
    %283 = vector.broadcast %282 : vector<8x1xf32> to vector<8x32xf32>
    %284 = arith.mulf %283, %281 : vector<8x32xf32>
    %285 = arith.addf %275, %284 : vector<8x32xf32>
    %c1_154 = arith.constant 1 : index
    %c0_155 = arith.constant 0 : index
    %c0_156 = arith.constant 0 : index
    %286 = vector.load %arg10[%c1_154, %c0_155, %c0_156] : memref<5x64x32xf32, #tpu.memory_space<vmem>>, vector<1x64x32xf32>
    %287 = vector.shape_cast %286 : vector<1x64x32xf32> to vector<64x32xf32>
    %cst_157 = arith.constant dense<0.000000e+00> : vector<8x32xf32>
    %288 = tpu.matmul %273, %287, %cst_157 {dimension_numbers = #tpu.dot_dimension_numbers<[1], [0], [0], [1], [0, 0, 1, 1], [], []>, precision = #tpu.contract_precision<fp32>} : vector<8x64xf32>, vector<64x32xf32>, vector<8x32xf32> -> vector<8x32xf32>
    %289 = vector.extract_strided_slice %274 {offsets = [1, 0], sizes = [1, 32], strides = [1, 1]} : vector<5x32xf32> to vector<1x32xf32>
    %290 = vector.broadcast %289 : vector<1x32xf32> to vector<8x32xf32>
    %291 = arith.addf %288, %290 : vector<8x32xf32>
    %292 = vector.extract_strided_slice %255 {offsets = [0, 1], sizes = [8, 1], strides = [1, 1]} : vector<8x8xf32> to vector<8x1xf32>
    %293 = vector.broadcast %292 : vector<8x1xf32> to vector<8x32xf32>
    %294 = arith.mulf %293, %291 : vector<8x32xf32>
    %295 = arith.addf %285, %294 : vector<8x32xf32>
    %c2_158 = arith.constant 2 : index
    %c0_159 = arith.constant 0 : index
    %c0_160 = arith.constant 0 : index
    %296 = vector.load %arg10[%c2_158, %c0_159, %c0_160] : memref<5x64x32xf32, #tpu.memory_space<vmem>>, vector<1x64x32xf32>
    %297 = vector.shape_cast %296 : vector<1x64x32xf32> to vector<64x32xf32>
    %cst_161 = arith.constant dense<0.000000e+00> : vector<8x32xf32>
    %298 = tpu.matmul %273, %297, %cst_161 {dimension_numbers = #tpu.dot_dimension_numbers<[1], [0], [0], [1], [0, 0, 1, 1], [], []>, precision = #tpu.contract_precision<fp32>} : vector<8x64xf32>, vector<64x32xf32>, vector<8x32xf32> -> vector<8x32xf32>
    %299 = vector.extract_strided_slice %274 {offsets = [2, 0], sizes = [1, 32], strides = [1, 1]} : vector<5x32xf32> to vector<1x32xf32>
    %300 = vector.broadcast %299 : vector<1x32xf32> to vector<8x32xf32>
    %301 = arith.addf %298, %300 : vector<8x32xf32>
    %302 = vector.extract_strided_slice %255 {offsets = [0, 2], sizes = [8, 1], strides = [1, 1]} : vector<8x8xf32> to vector<8x1xf32>
    %303 = vector.broadcast %302 : vector<8x1xf32> to vector<8x32xf32>
    %304 = arith.mulf %303, %301 : vector<8x32xf32>
    %305 = arith.addf %295, %304 : vector<8x32xf32>
    %c3_162 = arith.constant 3 : index
    %c0_163 = arith.constant 0 : index
    %c0_164 = arith.constant 0 : index
    %306 = vector.load %arg10[%c3_162, %c0_163, %c0_164] : memref<5x64x32xf32, #tpu.memory_space<vmem>>, vector<1x64x32xf32>
    %307 = vector.shape_cast %306 : vector<1x64x32xf32> to vector<64x32xf32>
    %cst_165 = arith.constant dense<0.000000e+00> : vector<8x32xf32>
    %308 = tpu.matmul %273, %307, %cst_165 {dimension_numbers = #tpu.dot_dimension_numbers<[1], [0], [0], [1], [0, 0, 1, 1], [], []>, precision = #tpu.contract_precision<fp32>} : vector<8x64xf32>, vector<64x32xf32>, vector<8x32xf32> -> vector<8x32xf32>
    %309 = vector.extract_strided_slice %274 {offsets = [3, 0], sizes = [1, 32], strides = [1, 1]} : vector<5x32xf32> to vector<1x32xf32>
    %310 = vector.broadcast %309 : vector<1x32xf32> to vector<8x32xf32>
    %311 = arith.addf %308, %310 : vector<8x32xf32>
    %312 = vector.extract_strided_slice %255 {offsets = [0, 3], sizes = [8, 1], strides = [1, 1]} : vector<8x8xf32> to vector<8x1xf32>
    %313 = vector.broadcast %312 : vector<8x1xf32> to vector<8x32xf32>
    %314 = arith.mulf %313, %311 : vector<8x32xf32>
    %315 = arith.addf %305, %314 : vector<8x32xf32>
    %c4_166 = arith.constant 4 : index
    %c0_167 = arith.constant 0 : index
    %c0_168 = arith.constant 0 : index
    %316 = vector.load %arg10[%c4_166, %c0_167, %c0_168] : memref<5x64x32xf32, #tpu.memory_space<vmem>>, vector<1x64x32xf32>
    %317 = vector.shape_cast %316 : vector<1x64x32xf32> to vector<64x32xf32>
    %cst_169 = arith.constant dense<0.000000e+00> : vector<8x32xf32>
    %318 = tpu.matmul %273, %317, %cst_169 {dimension_numbers = #tpu.dot_dimension_numbers<[1], [0], [0], [1], [0, 0, 1, 1], [], []>, precision = #tpu.contract_precision<fp32>} : vector<8x64xf32>, vector<64x32xf32>, vector<8x32xf32> -> vector<8x32xf32>
    %319 = vector.extract_strided_slice %274 {offsets = [4, 0], sizes = [1, 32], strides = [1, 1]} : vector<5x32xf32> to vector<1x32xf32>
    %320 = vector.broadcast %319 : vector<1x32xf32> to vector<8x32xf32>
    %321 = arith.addf %318, %320 : vector<8x32xf32>
    %322 = vector.extract_strided_slice %255 {offsets = [0, 4], sizes = [8, 1], strides = [1, 1]} : vector<8x8xf32> to vector<8x1xf32>
    %323 = vector.broadcast %322 : vector<8x1xf32> to vector<8x32xf32>
    %324 = arith.mulf %323, %321 : vector<8x32xf32>
    %325 = arith.addf %315, %324 : vector<8x32xf32>
    %326 = arith.addf %241, %325 : vector<8x32xf32>
    %cst_170 = arith.constant 5.000000e-01 : f32
    %327 = vector.broadcast %cst_170 : f32 to vector<8x32xf32>
    %328 = arith.mulf %327, %326 : vector<8x32xf32>
    %329 = arith.addf %245, %328 : vector<8x32xf32>
    %c3_i32 = arith.constant 3 : i32
    %cst_171 = arith.constant 2.000000e+00 : f32
    %330 = vector.broadcast %cst_171 : f32 to vector<8x32xf32>
    %331 = arith.mulf %330, %329 : vector<8x32xf32>
    %332 = arith.subf %331, %249 : vector<8x32xf32>
    %333 = arith.addf %332, %325 : vector<8x32xf32>
    %c1_i32_172 = arith.constant 1 : i32
    %334 = arith.addi %c3_i32, %c1_i32_172 : i32
    %335 = arith.sitofp %334 : i32 to f32
    %c1_i32_173 = arith.constant 1 : i32
    %336 = arith.addi %c3_i32, %c1_i32_173 : i32
    %337 = arith.index_cast %336 : i32 to index
    %c0_174 = arith.constant 0 : index
    %c0_175 = arith.constant 0 : index
    %338 = vector.load %arg2[%337, %c0_174, %c0_175] : memref<8x8x8xf32, #tpu.memory_space<vmem>>, vector<1x8x8xf32>
    %339 = vector.shape_cast %338 : vector<1x8x8xf32> to vector<8x8xf32>
    %c0_176 = arith.constant 0 : index
    %c0_177 = arith.constant 0 : index
    %340 = vector.load %arg6[%c0_176, %c0_177] : memref<32x64xf32, #tpu.memory_space<vmem>>, vector<32x64xf32>
    %cst_178 = arith.constant dense<0.000000e+00> : vector<8x64xf32>
    %341 = tpu.matmul %333, %340, %cst_178 {dimension_numbers = #tpu.dot_dimension_numbers<[1], [0], [0], [1], [0, 0, 1, 1], [], []>, precision = #tpu.contract_precision<fp32>} : vector<8x32xf32>, vector<32x64xf32>, vector<8x64xf32> -> vector<8x64xf32>
    %c0_179 = arith.constant 0 : index
    %c0_180 = arith.constant 0 : index
    %342 = vector.load %arg5[%c0_179, %c0_180] : memref<1x64xf32, #tpu.memory_space<vmem>>, vector<1x64xf32>
    %343 = vector.broadcast %335 : f32 to vector<1x64xf32>
    %344 = arith.mulf %343, %342 : vector<1x64xf32>
    %c0_181 = arith.constant 0 : index
    %c0_182 = arith.constant 0 : index
    %345 = vector.load %arg7[%c0_181, %c0_182] : memref<1x64xf32, #tpu.memory_space<vmem>>, vector<1x64xf32>
    %346 = arith.addf %344, %345 : vector<1x64xf32>
    %347 = vector.broadcast %346 : vector<1x64xf32> to vector<8x64xf32>
    %348 = arith.addf %341, %347 : vector<8x64xf32>
    %cst_183 = arith.constant 0.000000e+00 : f32
    %349 = vector.broadcast %cst_183 : f32 to vector<8x64xf32>
    %350 = arith.maximumf %348, %349 : vector<8x64xf32>
    %c0_184 = arith.constant 0 : index
    %c0_185 = arith.constant 0 : index
    %351 = vector.load %arg8[%c0_184, %c0_185] : memref<64x64xf32, #tpu.memory_space<vmem>>, vector<64x64xf32>
    %cst_186 = arith.constant dense<0.000000e+00> : vector<8x64xf32>
    %352 = tpu.matmul %350, %351, %cst_186 {dimension_numbers = #tpu.dot_dimension_numbers<[1], [0], [0], [1], [0, 0, 1, 1], [], []>, precision = #tpu.contract_precision<fp32>} : vector<8x64xf32>, vector<64x64xf32>, vector<8x64xf32> -> vector<8x64xf32>
    %c0_187 = arith.constant 0 : index
    %c0_188 = arith.constant 0 : index
    %353 = vector.load %arg9[%c0_187, %c0_188] : memref<1x64xf32, #tpu.memory_space<vmem>>, vector<1x64xf32>
    %354 = vector.broadcast %353 : vector<1x64xf32> to vector<8x64xf32>
    %355 = arith.addf %352, %354 : vector<8x64xf32>
    %cst_189 = arith.constant 0.000000e+00 : f32
    %356 = vector.broadcast %cst_189 : f32 to vector<8x64xf32>
    %357 = arith.maximumf %355, %356 : vector<8x64xf32>
    %c0_190 = arith.constant 0 : index
    %c0_191 = arith.constant 0 : index
    %358 = vector.load %arg11[%c0_190, %c0_191] : memref<5x32xf32, #tpu.memory_space<vmem>>, vector<5x32xf32>
    %cst_192 = arith.constant 0.000000e+00 : f32
    %359 = vector.broadcast %cst_192 : f32 to vector<8x32xf32>
    %c0_193 = arith.constant 0 : index
    %c0_194 = arith.constant 0 : index
    %c0_195 = arith.constant 0 : index
    %360 = vector.load %arg10[%c0_193, %c0_194, %c0_195] : memref<5x64x32xf32, #tpu.memory_space<vmem>>, vector<1x64x32xf32>
    %361 = vector.shape_cast %360 : vector<1x64x32xf32> to vector<64x32xf32>
    %cst_196 = arith.constant dense<0.000000e+00> : vector<8x32xf32>
    %362 = tpu.matmul %357, %361, %cst_196 {dimension_numbers = #tpu.dot_dimension_numbers<[1], [0], [0], [1], [0, 0, 1, 1], [], []>, precision = #tpu.contract_precision<fp32>} : vector<8x64xf32>, vector<64x32xf32>, vector<8x32xf32> -> vector<8x32xf32>
    %363 = vector.extract_strided_slice %358 {offsets = [0, 0], sizes = [1, 32], strides = [1, 1]} : vector<5x32xf32> to vector<1x32xf32>
    %364 = vector.broadcast %363 : vector<1x32xf32> to vector<8x32xf32>
    %365 = arith.addf %362, %364 : vector<8x32xf32>
    %366 = vector.extract_strided_slice %339 {offsets = [0, 0], sizes = [8, 1], strides = [1, 1]} : vector<8x8xf32> to vector<8x1xf32>
    %367 = vector.broadcast %366 : vector<8x1xf32> to vector<8x32xf32>
    %368 = arith.mulf %367, %365 : vector<8x32xf32>
    %369 = arith.addf %359, %368 : vector<8x32xf32>
    %c1_197 = arith.constant 1 : index
    %c0_198 = arith.constant 0 : index
    %c0_199 = arith.constant 0 : index
    %370 = vector.load %arg10[%c1_197, %c0_198, %c0_199] : memref<5x64x32xf32, #tpu.memory_space<vmem>>, vector<1x64x32xf32>
    %371 = vector.shape_cast %370 : vector<1x64x32xf32> to vector<64x32xf32>
    %cst_200 = arith.constant dense<0.000000e+00> : vector<8x32xf32>
    %372 = tpu.matmul %357, %371, %cst_200 {dimension_numbers = #tpu.dot_dimension_numbers<[1], [0], [0], [1], [0, 0, 1, 1], [], []>, precision = #tpu.contract_precision<fp32>} : vector<8x64xf32>, vector<64x32xf32>, vector<8x32xf32> -> vector<8x32xf32>
    %373 = vector.extract_strided_slice %358 {offsets = [1, 0], sizes = [1, 32], strides = [1, 1]} : vector<5x32xf32> to vector<1x32xf32>
    %374 = vector.broadcast %373 : vector<1x32xf32> to vector<8x32xf32>
    %375 = arith.addf %372, %374 : vector<8x32xf32>
    %376 = vector.extract_strided_slice %339 {offsets = [0, 1], sizes = [8, 1], strides = [1, 1]} : vector<8x8xf32> to vector<8x1xf32>
    %377 = vector.broadcast %376 : vector<8x1xf32> to vector<8x32xf32>
    %378 = arith.mulf %377, %375 : vector<8x32xf32>
    %379 = arith.addf %369, %378 : vector<8x32xf32>
    %c2_201 = arith.constant 2 : index
    %c0_202 = arith.constant 0 : index
    %c0_203 = arith.constant 0 : index
    %380 = vector.load %arg10[%c2_201, %c0_202, %c0_203] : memref<5x64x32xf32, #tpu.memory_space<vmem>>, vector<1x64x32xf32>
    %381 = vector.shape_cast %380 : vector<1x64x32xf32> to vector<64x32xf32>
    %cst_204 = arith.constant dense<0.000000e+00> : vector<8x32xf32>
    %382 = tpu.matmul %357, %381, %cst_204 {dimension_numbers = #tpu.dot_dimension_numbers<[1], [0], [0], [1], [0, 0, 1, 1], [], []>, precision = #tpu.contract_precision<fp32>} : vector<8x64xf32>, vector<64x32xf32>, vector<8x32xf32> -> vector<8x32xf32>
    %383 = vector.extract_strided_slice %358 {offsets = [2, 0], sizes = [1, 32], strides = [1, 1]} : vector<5x32xf32> to vector<1x32xf32>
    %384 = vector.broadcast %383 : vector<1x32xf32> to vector<8x32xf32>
    %385 = arith.addf %382, %384 : vector<8x32xf32>
    %386 = vector.extract_strided_slice %339 {offsets = [0, 2], sizes = [8, 1], strides = [1, 1]} : vector<8x8xf32> to vector<8x1xf32>
    %387 = vector.broadcast %386 : vector<8x1xf32> to vector<8x32xf32>
    %388 = arith.mulf %387, %385 : vector<8x32xf32>
    %389 = arith.addf %379, %388 : vector<8x32xf32>
    %c3_205 = arith.constant 3 : index
    %c0_206 = arith.constant 0 : index
    %c0_207 = arith.constant 0 : index
    %390 = vector.load %arg10[%c3_205, %c0_206, %c0_207] : memref<5x64x32xf32, #tpu.memory_space<vmem>>, vector<1x64x32xf32>
    %391 = vector.shape_cast %390 : vector<1x64x32xf32> to vector<64x32xf32>
    %cst_208 = arith.constant dense<0.000000e+00> : vector<8x32xf32>
    %392 = tpu.matmul %357, %391, %cst_208 {dimension_numbers = #tpu.dot_dimension_numbers<[1], [0], [0], [1], [0, 0, 1, 1], [], []>, precision = #tpu.contract_precision<fp32>} : vector<8x64xf32>, vector<64x32xf32>, vector<8x32xf32> -> vector<8x32xf32>
    %393 = vector.extract_strided_slice %358 {offsets = [3, 0], sizes = [1, 32], strides = [1, 1]} : vector<5x32xf32> to vector<1x32xf32>
    %394 = vector.broadcast %393 : vector<1x32xf32> to vector<8x32xf32>
    %395 = arith.addf %392, %394 : vector<8x32xf32>
    %396 = vector.extract_strided_slice %339 {offsets = [0, 3], sizes = [8, 1], strides = [1, 1]} : vector<8x8xf32> to vector<8x1xf32>
    %397 = vector.broadcast %396 : vector<8x1xf32> to vector<8x32xf32>
    %398 = arith.mulf %397, %395 : vector<8x32xf32>
    %399 = arith.addf %389, %398 : vector<8x32xf32>
    %c4_209 = arith.constant 4 : index
    %c0_210 = arith.constant 0 : index
    %c0_211 = arith.constant 0 : index
    %400 = vector.load %arg10[%c4_209, %c0_210, %c0_211] : memref<5x64x32xf32, #tpu.memory_space<vmem>>, vector<1x64x32xf32>
    %401 = vector.shape_cast %400 : vector<1x64x32xf32> to vector<64x32xf32>
    %cst_212 = arith.constant dense<0.000000e+00> : vector<8x32xf32>
    %402 = tpu.matmul %357, %401, %cst_212 {dimension_numbers = #tpu.dot_dimension_numbers<[1], [0], [0], [1], [0, 0, 1, 1], [], []>, precision = #tpu.contract_precision<fp32>} : vector<8x64xf32>, vector<64x32xf32>, vector<8x32xf32> -> vector<8x32xf32>
    %403 = vector.extract_strided_slice %358 {offsets = [4, 0], sizes = [1, 32], strides = [1, 1]} : vector<5x32xf32> to vector<1x32xf32>
    %404 = vector.broadcast %403 : vector<1x32xf32> to vector<8x32xf32>
    %405 = arith.addf %402, %404 : vector<8x32xf32>
    %406 = vector.extract_strided_slice %339 {offsets = [0, 4], sizes = [8, 1], strides = [1, 1]} : vector<8x8xf32> to vector<8x1xf32>
    %407 = vector.broadcast %406 : vector<8x1xf32> to vector<8x32xf32>
    %408 = arith.mulf %407, %405 : vector<8x32xf32>
    %409 = arith.addf %399, %408 : vector<8x32xf32>
    %410 = arith.addf %325, %409 : vector<8x32xf32>
    %cst_213 = arith.constant 5.000000e-01 : f32
    %411 = vector.broadcast %cst_213 : f32 to vector<8x32xf32>
    %412 = arith.mulf %411, %410 : vector<8x32xf32>
    %413 = arith.addf %329, %412 : vector<8x32xf32>
    %c4_i32 = arith.constant 4 : i32
    %cst_214 = arith.constant 2.000000e+00 : f32
    %414 = vector.broadcast %cst_214 : f32 to vector<8x32xf32>
    %415 = arith.mulf %414, %413 : vector<8x32xf32>
    %416 = arith.subf %415, %333 : vector<8x32xf32>
    %417 = arith.addf %416, %409 : vector<8x32xf32>
    %c1_i32_215 = arith.constant 1 : i32
    %418 = arith.addi %c4_i32, %c1_i32_215 : i32
    %419 = arith.sitofp %418 : i32 to f32
    %c1_i32_216 = arith.constant 1 : i32
    %420 = arith.addi %c4_i32, %c1_i32_216 : i32
    %421 = arith.index_cast %420 : i32 to index
    %c0_217 = arith.constant 0 : index
    %c0_218 = arith.constant 0 : index
    %422 = vector.load %arg2[%421, %c0_217, %c0_218] : memref<8x8x8xf32, #tpu.memory_space<vmem>>, vector<1x8x8xf32>
    %423 = vector.shape_cast %422 : vector<1x8x8xf32> to vector<8x8xf32>
    %c0_219 = arith.constant 0 : index
    %c0_220 = arith.constant 0 : index
    %424 = vector.load %arg6[%c0_219, %c0_220] : memref<32x64xf32, #tpu.memory_space<vmem>>, vector<32x64xf32>
    %cst_221 = arith.constant dense<0.000000e+00> : vector<8x64xf32>
    %425 = tpu.matmul %417, %424, %cst_221 {dimension_numbers = #tpu.dot_dimension_numbers<[1], [0], [0], [1], [0, 0, 1, 1], [], []>, precision = #tpu.contract_precision<fp32>} : vector<8x32xf32>, vector<32x64xf32>, vector<8x64xf32> -> vector<8x64xf32>
    %c0_222 = arith.constant 0 : index
    %c0_223 = arith.constant 0 : index
    %426 = vector.load %arg5[%c0_222, %c0_223] : memref<1x64xf32, #tpu.memory_space<vmem>>, vector<1x64xf32>
    %427 = vector.broadcast %419 : f32 to vector<1x64xf32>
    %428 = arith.mulf %427, %426 : vector<1x64xf32>
    %c0_224 = arith.constant 0 : index
    %c0_225 = arith.constant 0 : index
    %429 = vector.load %arg7[%c0_224, %c0_225] : memref<1x64xf32, #tpu.memory_space<vmem>>, vector<1x64xf32>
    %430 = arith.addf %428, %429 : vector<1x64xf32>
    %431 = vector.broadcast %430 : vector<1x64xf32> to vector<8x64xf32>
    %432 = arith.addf %425, %431 : vector<8x64xf32>
    %cst_226 = arith.constant 0.000000e+00 : f32
    %433 = vector.broadcast %cst_226 : f32 to vector<8x64xf32>
    %434 = arith.maximumf %432, %433 : vector<8x64xf32>
    %c0_227 = arith.constant 0 : index
    %c0_228 = arith.constant 0 : index
    %435 = vector.load %arg8[%c0_227, %c0_228] : memref<64x64xf32, #tpu.memory_space<vmem>>, vector<64x64xf32>
    %cst_229 = arith.constant dense<0.000000e+00> : vector<8x64xf32>
    %436 = tpu.matmul %434, %435, %cst_229 {dimension_numbers = #tpu.dot_dimension_numbers<[1], [0], [0], [1], [0, 0, 1, 1], [], []>, precision = #tpu.contract_precision<fp32>} : vector<8x64xf32>, vector<64x64xf32>, vector<8x64xf32> -> vector<8x64xf32>
    %c0_230 = arith.constant 0 : index
    %c0_231 = arith.constant 0 : index
    %437 = vector.load %arg9[%c0_230, %c0_231] : memref<1x64xf32, #tpu.memory_space<vmem>>, vector<1x64xf32>
    %438 = vector.broadcast %437 : vector<1x64xf32> to vector<8x64xf32>
    %439 = arith.addf %436, %438 : vector<8x64xf32>
    %cst_232 = arith.constant 0.000000e+00 : f32
    %440 = vector.broadcast %cst_232 : f32 to vector<8x64xf32>
    %441 = arith.maximumf %439, %440 : vector<8x64xf32>
    %c0_233 = arith.constant 0 : index
    %c0_234 = arith.constant 0 : index
    %442 = vector.load %arg11[%c0_233, %c0_234] : memref<5x32xf32, #tpu.memory_space<vmem>>, vector<5x32xf32>
    %cst_235 = arith.constant 0.000000e+00 : f32
    %443 = vector.broadcast %cst_235 : f32 to vector<8x32xf32>
    %c0_236 = arith.constant 0 : index
    %c0_237 = arith.constant 0 : index
    %c0_238 = arith.constant 0 : index
    %444 = vector.load %arg10[%c0_236, %c0_237, %c0_238] : memref<5x64x32xf32, #tpu.memory_space<vmem>>, vector<1x64x32xf32>
    %445 = vector.shape_cast %444 : vector<1x64x32xf32> to vector<64x32xf32>
    %cst_239 = arith.constant dense<0.000000e+00> : vector<8x32xf32>
    %446 = tpu.matmul %441, %445, %cst_239 {dimension_numbers = #tpu.dot_dimension_numbers<[1], [0], [0], [1], [0, 0, 1, 1], [], []>, precision = #tpu.contract_precision<fp32>} : vector<8x64xf32>, vector<64x32xf32>, vector<8x32xf32> -> vector<8x32xf32>
    %447 = vector.extract_strided_slice %442 {offsets = [0, 0], sizes = [1, 32], strides = [1, 1]} : vector<5x32xf32> to vector<1x32xf32>
    %448 = vector.broadcast %447 : vector<1x32xf32> to vector<8x32xf32>
    %449 = arith.addf %446, %448 : vector<8x32xf32>
    %450 = vector.extract_strided_slice %423 {offsets = [0, 0], sizes = [8, 1], strides = [1, 1]} : vector<8x8xf32> to vector<8x1xf32>
    %451 = vector.broadcast %450 : vector<8x1xf32> to vector<8x32xf32>
    %452 = arith.mulf %451, %449 : vector<8x32xf32>
    %453 = arith.addf %443, %452 : vector<8x32xf32>
    %c1_240 = arith.constant 1 : index
    %c0_241 = arith.constant 0 : index
    %c0_242 = arith.constant 0 : index
    %454 = vector.load %arg10[%c1_240, %c0_241, %c0_242] : memref<5x64x32xf32, #tpu.memory_space<vmem>>, vector<1x64x32xf32>
    %455 = vector.shape_cast %454 : vector<1x64x32xf32> to vector<64x32xf32>
    %cst_243 = arith.constant dense<0.000000e+00> : vector<8x32xf32>
    %456 = tpu.matmul %441, %455, %cst_243 {dimension_numbers = #tpu.dot_dimension_numbers<[1], [0], [0], [1], [0, 0, 1, 1], [], []>, precision = #tpu.contract_precision<fp32>} : vector<8x64xf32>, vector<64x32xf32>, vector<8x32xf32> -> vector<8x32xf32>
    %457 = vector.extract_strided_slice %442 {offsets = [1, 0], sizes = [1, 32], strides = [1, 1]} : vector<5x32xf32> to vector<1x32xf32>
    %458 = vector.broadcast %457 : vector<1x32xf32> to vector<8x32xf32>
    %459 = arith.addf %456, %458 : vector<8x32xf32>
    %460 = vector.extract_strided_slice %423 {offsets = [0, 1], sizes = [8, 1], strides = [1, 1]} : vector<8x8xf32> to vector<8x1xf32>
    %461 = vector.broadcast %460 : vector<8x1xf32> to vector<8x32xf32>
    %462 = arith.mulf %461, %459 : vector<8x32xf32>
    %463 = arith.addf %453, %462 : vector<8x32xf32>
    %c2_244 = arith.constant 2 : index
    %c0_245 = arith.constant 0 : index
    %c0_246 = arith.constant 0 : index
    %464 = vector.load %arg10[%c2_244, %c0_245, %c0_246] : memref<5x64x32xf32, #tpu.memory_space<vmem>>, vector<1x64x32xf32>
    %465 = vector.shape_cast %464 : vector<1x64x32xf32> to vector<64x32xf32>
    %cst_247 = arith.constant dense<0.000000e+00> : vector<8x32xf32>
    %466 = tpu.matmul %441, %465, %cst_247 {dimension_numbers = #tpu.dot_dimension_numbers<[1], [0], [0], [1], [0, 0, 1, 1], [], []>, precision = #tpu.contract_precision<fp32>} : vector<8x64xf32>, vector<64x32xf32>, vector<8x32xf32> -> vector<8x32xf32>
    %467 = vector.extract_strided_slice %442 {offsets = [2, 0], sizes = [1, 32], strides = [1, 1]} : vector<5x32xf32> to vector<1x32xf32>
    %468 = vector.broadcast %467 : vector<1x32xf32> to vector<8x32xf32>
    %469 = arith.addf %466, %468 : vector<8x32xf32>
    %470 = vector.extract_strided_slice %423 {offsets = [0, 2], sizes = [8, 1], strides = [1, 1]} : vector<8x8xf32> to vector<8x1xf32>
    %471 = vector.broadcast %470 : vector<8x1xf32> to vector<8x32xf32>
    %472 = arith.mulf %471, %469 : vector<8x32xf32>
    %473 = arith.addf %463, %472 : vector<8x32xf32>
    %c3_248 = arith.constant 3 : index
    %c0_249 = arith.constant 0 : index
    %c0_250 = arith.constant 0 : index
    %474 = vector.load %arg10[%c3_248, %c0_249, %c0_250] : memref<5x64x32xf32, #tpu.memory_space<vmem>>, vector<1x64x32xf32>
    %475 = vector.shape_cast %474 : vector<1x64x32xf32> to vector<64x32xf32>
    %cst_251 = arith.constant dense<0.000000e+00> : vector<8x32xf32>
    %476 = tpu.matmul %441, %475, %cst_251 {dimension_numbers = #tpu.dot_dimension_numbers<[1], [0], [0], [1], [0, 0, 1, 1], [], []>, precision = #tpu.contract_precision<fp32>} : vector<8x64xf32>, vector<64x32xf32>, vector<8x32xf32> -> vector<8x32xf32>
    %477 = vector.extract_strided_slice %442 {offsets = [3, 0], sizes = [1, 32], strides = [1, 1]} : vector<5x32xf32> to vector<1x32xf32>
    %478 = vector.broadcast %477 : vector<1x32xf32> to vector<8x32xf32>
    %479 = arith.addf %476, %478 : vector<8x32xf32>
    %480 = vector.extract_strided_slice %423 {offsets = [0, 3], sizes = [8, 1], strides = [1, 1]} : vector<8x8xf32> to vector<8x1xf32>
    %481 = vector.broadcast %480 : vector<8x1xf32> to vector<8x32xf32>
    %482 = arith.mulf %481, %479 : vector<8x32xf32>
    %483 = arith.addf %473, %482 : vector<8x32xf32>
    %c4_252 = arith.constant 4 : index
    %c0_253 = arith.constant 0 : index
    %c0_254 = arith.constant 0 : index
    %484 = vector.load %arg10[%c4_252, %c0_253, %c0_254] : memref<5x64x32xf32, #tpu.memory_space<vmem>>, vector<1x64x32xf32>
    %485 = vector.shape_cast %484 : vector<1x64x32xf32> to vector<64x32xf32>
    %cst_255 = arith.constant dense<0.000000e+00> : vector<8x32xf32>
    %486 = tpu.matmul %441, %485, %cst_255 {dimension_numbers = #tpu.dot_dimension_numbers<[1], [0], [0], [1], [0, 0, 1, 1], [], []>, precision = #tpu.contract_precision<fp32>} : vector<8x64xf32>, vector<64x32xf32>, vector<8x32xf32> -> vector<8x32xf32>
    %487 = vector.extract_strided_slice %442 {offsets = [4, 0], sizes = [1, 32], strides = [1, 1]} : vector<5x32xf32> to vector<1x32xf32>
    %488 = vector.broadcast %487 : vector<1x32xf32> to vector<8x32xf32>
    %489 = arith.addf %486, %488 : vector<8x32xf32>
    %490 = vector.extract_strided_slice %423 {offsets = [0, 4], sizes = [8, 1], strides = [1, 1]} : vector<8x8xf32> to vector<8x1xf32>
    %491 = vector.broadcast %490 : vector<8x1xf32> to vector<8x32xf32>
    %492 = arith.mulf %491, %489 : vector<8x32xf32>
    %493 = arith.addf %483, %492 : vector<8x32xf32>
    %494 = arith.addf %409, %493 : vector<8x32xf32>
    %cst_256 = arith.constant 5.000000e-01 : f32
    %495 = vector.broadcast %cst_256 : f32 to vector<8x32xf32>
    %496 = arith.mulf %495, %494 : vector<8x32xf32>
    %497 = arith.addf %413, %496 : vector<8x32xf32>
    %c5_i32 = arith.constant 5 : i32
    %cst_257 = arith.constant 2.000000e+00 : f32
    %498 = vector.broadcast %cst_257 : f32 to vector<8x32xf32>
    %499 = arith.mulf %498, %497 : vector<8x32xf32>
    %500 = arith.subf %499, %417 : vector<8x32xf32>
    %501 = arith.addf %500, %493 : vector<8x32xf32>
    %c1_i32_258 = arith.constant 1 : i32
    %502 = arith.addi %c5_i32, %c1_i32_258 : i32
    %503 = arith.sitofp %502 : i32 to f32
    %c1_i32_259 = arith.constant 1 : i32
    %504 = arith.addi %c5_i32, %c1_i32_259 : i32
    %505 = arith.index_cast %504 : i32 to index
    %c0_260 = arith.constant 0 : index
    %c0_261 = arith.constant 0 : index
    %506 = vector.load %arg2[%505, %c0_260, %c0_261] : memref<8x8x8xf32, #tpu.memory_space<vmem>>, vector<1x8x8xf32>
    %507 = vector.shape_cast %506 : vector<1x8x8xf32> to vector<8x8xf32>
    %c0_262 = arith.constant 0 : index
    %c0_263 = arith.constant 0 : index
    %508 = vector.load %arg6[%c0_262, %c0_263] : memref<32x64xf32, #tpu.memory_space<vmem>>, vector<32x64xf32>
    %cst_264 = arith.constant dense<0.000000e+00> : vector<8x64xf32>
    %509 = tpu.matmul %501, %508, %cst_264 {dimension_numbers = #tpu.dot_dimension_numbers<[1], [0], [0], [1], [0, 0, 1, 1], [], []>, precision = #tpu.contract_precision<fp32>} : vector<8x32xf32>, vector<32x64xf32>, vector<8x64xf32> -> vector<8x64xf32>
    %c0_265 = arith.constant 0 : index
    %c0_266 = arith.constant 0 : index
    %510 = vector.load %arg5[%c0_265, %c0_266] : memref<1x64xf32, #tpu.memory_space<vmem>>, vector<1x64xf32>
    %511 = vector.broadcast %503 : f32 to vector<1x64xf32>
    %512 = arith.mulf %511, %510 : vector<1x64xf32>
    %c0_267 = arith.constant 0 : index
    %c0_268 = arith.constant 0 : index
    %513 = vector.load %arg7[%c0_267, %c0_268] : memref<1x64xf32, #tpu.memory_space<vmem>>, vector<1x64xf32>
    %514 = arith.addf %512, %513 : vector<1x64xf32>
    %515 = vector.broadcast %514 : vector<1x64xf32> to vector<8x64xf32>
    %516 = arith.addf %509, %515 : vector<8x64xf32>
    %cst_269 = arith.constant 0.000000e+00 : f32
    %517 = vector.broadcast %cst_269 : f32 to vector<8x64xf32>
    %518 = arith.maximumf %516, %517 : vector<8x64xf32>
    %c0_270 = arith.constant 0 : index
    %c0_271 = arith.constant 0 : index
    %519 = vector.load %arg8[%c0_270, %c0_271] : memref<64x64xf32, #tpu.memory_space<vmem>>, vector<64x64xf32>
    %cst_272 = arith.constant dense<0.000000e+00> : vector<8x64xf32>
    %520 = tpu.matmul %518, %519, %cst_272 {dimension_numbers = #tpu.dot_dimension_numbers<[1], [0], [0], [1], [0, 0, 1, 1], [], []>, precision = #tpu.contract_precision<fp32>} : vector<8x64xf32>, vector<64x64xf32>, vector<8x64xf32> -> vector<8x64xf32>
    %c0_273 = arith.constant 0 : index
    %c0_274 = arith.constant 0 : index
    %521 = vector.load %arg9[%c0_273, %c0_274] : memref<1x64xf32, #tpu.memory_space<vmem>>, vector<1x64xf32>
    %522 = vector.broadcast %521 : vector<1x64xf32> to vector<8x64xf32>
    %523 = arith.addf %520, %522 : vector<8x64xf32>
    %cst_275 = arith.constant 0.000000e+00 : f32
    %524 = vector.broadcast %cst_275 : f32 to vector<8x64xf32>
    %525 = arith.maximumf %523, %524 : vector<8x64xf32>
    %c0_276 = arith.constant 0 : index
    %c0_277 = arith.constant 0 : index
    %526 = vector.load %arg11[%c0_276, %c0_277] : memref<5x32xf32, #tpu.memory_space<vmem>>, vector<5x32xf32>
    %cst_278 = arith.constant 0.000000e+00 : f32
    %527 = vector.broadcast %cst_278 : f32 to vector<8x32xf32>
    %c0_279 = arith.constant 0 : index
    %c0_280 = arith.constant 0 : index
    %c0_281 = arith.constant 0 : index
    %528 = vector.load %arg10[%c0_279, %c0_280, %c0_281] : memref<5x64x32xf32, #tpu.memory_space<vmem>>, vector<1x64x32xf32>
    %529 = vector.shape_cast %528 : vector<1x64x32xf32> to vector<64x32xf32>
    %cst_282 = arith.constant dense<0.000000e+00> : vector<8x32xf32>
    %530 = tpu.matmul %525, %529, %cst_282 {dimension_numbers = #tpu.dot_dimension_numbers<[1], [0], [0], [1], [0, 0, 1, 1], [], []>, precision = #tpu.contract_precision<fp32>} : vector<8x64xf32>, vector<64x32xf32>, vector<8x32xf32> -> vector<8x32xf32>
    %531 = vector.extract_strided_slice %526 {offsets = [0, 0], sizes = [1, 32], strides = [1, 1]} : vector<5x32xf32> to vector<1x32xf32>
    %532 = vector.broadcast %531 : vector<1x32xf32> to vector<8x32xf32>
    %533 = arith.addf %530, %532 : vector<8x32xf32>
    %534 = vector.extract_strided_slice %507 {offsets = [0, 0], sizes = [8, 1], strides = [1, 1]} : vector<8x8xf32> to vector<8x1xf32>
    %535 = vector.broadcast %534 : vector<8x1xf32> to vector<8x32xf32>
    %536 = arith.mulf %535, %533 : vector<8x32xf32>
    %537 = arith.addf %527, %536 : vector<8x32xf32>
    %c1_283 = arith.constant 1 : index
    %c0_284 = arith.constant 0 : index
    %c0_285 = arith.constant 0 : index
    %538 = vector.load %arg10[%c1_283, %c0_284, %c0_285] : memref<5x64x32xf32, #tpu.memory_space<vmem>>, vector<1x64x32xf32>
    %539 = vector.shape_cast %538 : vector<1x64x32xf32> to vector<64x32xf32>
    %cst_286 = arith.constant dense<0.000000e+00> : vector<8x32xf32>
    %540 = tpu.matmul %525, %539, %cst_286 {dimension_numbers = #tpu.dot_dimension_numbers<[1], [0], [0], [1], [0, 0, 1, 1], [], []>, precision = #tpu.contract_precision<fp32>} : vector<8x64xf32>, vector<64x32xf32>, vector<8x32xf32> -> vector<8x32xf32>
    %541 = vector.extract_strided_slice %526 {offsets = [1, 0], sizes = [1, 32], strides = [1, 1]} : vector<5x32xf32> to vector<1x32xf32>
    %542 = vector.broadcast %541 : vector<1x32xf32> to vector<8x32xf32>
    %543 = arith.addf %540, %542 : vector<8x32xf32>
    %544 = vector.extract_strided_slice %507 {offsets = [0, 1], sizes = [8, 1], strides = [1, 1]} : vector<8x8xf32> to vector<8x1xf32>
    %545 = vector.broadcast %544 : vector<8x1xf32> to vector<8x32xf32>
    %546 = arith.mulf %545, %543 : vector<8x32xf32>
    %547 = arith.addf %537, %546 : vector<8x32xf32>
    %c2_287 = arith.constant 2 : index
    %c0_288 = arith.constant 0 : index
    %c0_289 = arith.constant 0 : index
    %548 = vector.load %arg10[%c2_287, %c0_288, %c0_289] : memref<5x64x32xf32, #tpu.memory_space<vmem>>, vector<1x64x32xf32>
    %549 = vector.shape_cast %548 : vector<1x64x32xf32> to vector<64x32xf32>
    %cst_290 = arith.constant dense<0.000000e+00> : vector<8x32xf32>
    %550 = tpu.matmul %525, %549, %cst_290 {dimension_numbers = #tpu.dot_dimension_numbers<[1], [0], [0], [1], [0, 0, 1, 1], [], []>, precision = #tpu.contract_precision<fp32>} : vector<8x64xf32>, vector<64x32xf32>, vector<8x32xf32> -> vector<8x32xf32>
    %551 = vector.extract_strided_slice %526 {offsets = [2, 0], sizes = [1, 32], strides = [1, 1]} : vector<5x32xf32> to vector<1x32xf32>
    %552 = vector.broadcast %551 : vector<1x32xf32> to vector<8x32xf32>
    %553 = arith.addf %550, %552 : vector<8x32xf32>
    %554 = vector.extract_strided_slice %507 {offsets = [0, 2], sizes = [8, 1], strides = [1, 1]} : vector<8x8xf32> to vector<8x1xf32>
    %555 = vector.broadcast %554 : vector<8x1xf32> to vector<8x32xf32>
    %556 = arith.mulf %555, %553 : vector<8x32xf32>
    %557 = arith.addf %547, %556 : vector<8x32xf32>
    %c3_291 = arith.constant 3 : index
    %c0_292 = arith.constant 0 : index
    %c0_293 = arith.constant 0 : index
    %558 = vector.load %arg10[%c3_291, %c0_292, %c0_293] : memref<5x64x32xf32, #tpu.memory_space<vmem>>, vector<1x64x32xf32>
    %559 = vector.shape_cast %558 : vector<1x64x32xf32> to vector<64x32xf32>
    %cst_294 = arith.constant dense<0.000000e+00> : vector<8x32xf32>
    %560 = tpu.matmul %525, %559, %cst_294 {dimension_numbers = #tpu.dot_dimension_numbers<[1], [0], [0], [1], [0, 0, 1, 1], [], []>, precision = #tpu.contract_precision<fp32>} : vector<8x64xf32>, vector<64x32xf32>, vector<8x32xf32> -> vector<8x32xf32>
    %561 = vector.extract_strided_slice %526 {offsets = [3, 0], sizes = [1, 32], strides = [1, 1]} : vector<5x32xf32> to vector<1x32xf32>
    %562 = vector.broadcast %561 : vector<1x32xf32> to vector<8x32xf32>
    %563 = arith.addf %560, %562 : vector<8x32xf32>
    %564 = vector.extract_strided_slice %507 {offsets = [0, 3], sizes = [8, 1], strides = [1, 1]} : vector<8x8xf32> to vector<8x1xf32>
    %565 = vector.broadcast %564 : vector<8x1xf32> to vector<8x32xf32>
    %566 = arith.mulf %565, %563 : vector<8x32xf32>
    %567 = arith.addf %557, %566 : vector<8x32xf32>
    %c4_295 = arith.constant 4 : index
    %c0_296 = arith.constant 0 : index
    %c0_297 = arith.constant 0 : index
    %568 = vector.load %arg10[%c4_295, %c0_296, %c0_297] : memref<5x64x32xf32, #tpu.memory_space<vmem>>, vector<1x64x32xf32>
    %569 = vector.shape_cast %568 : vector<1x64x32xf32> to vector<64x32xf32>
    %cst_298 = arith.constant dense<0.000000e+00> : vector<8x32xf32>
    %570 = tpu.matmul %525, %569, %cst_298 {dimension_numbers = #tpu.dot_dimension_numbers<[1], [0], [0], [1], [0, 0, 1, 1], [], []>, precision = #tpu.contract_precision<fp32>} : vector<8x64xf32>, vector<64x32xf32>, vector<8x32xf32> -> vector<8x32xf32>
    %571 = vector.extract_strided_slice %526 {offsets = [4, 0], sizes = [1, 32], strides = [1, 1]} : vector<5x32xf32> to vector<1x32xf32>
    %572 = vector.broadcast %571 : vector<1x32xf32> to vector<8x32xf32>
    %573 = arith.addf %570, %572 : vector<8x32xf32>
    %574 = vector.extract_strided_slice %507 {offsets = [0, 4], sizes = [8, 1], strides = [1, 1]} : vector<8x8xf32> to vector<8x1xf32>
    %575 = vector.broadcast %574 : vector<8x1xf32> to vector<8x32xf32>
    %576 = arith.mulf %575, %573 : vector<8x32xf32>
    %577 = arith.addf %567, %576 : vector<8x32xf32>
    %578 = arith.addf %493, %577 : vector<8x32xf32>
    %cst_299 = arith.constant 5.000000e-01 : f32
    %579 = vector.broadcast %cst_299 : f32 to vector<8x32xf32>
    %580 = arith.mulf %579, %578 : vector<8x32xf32>
    %581 = arith.addf %497, %580 : vector<8x32xf32>
    %c6_i32 = arith.constant 6 : i32
    %cst_300 = arith.constant 2.000000e+00 : f32
    %582 = vector.broadcast %cst_300 : f32 to vector<8x32xf32>
    %583 = arith.mulf %582, %581 : vector<8x32xf32>
    %584 = arith.subf %583, %501 : vector<8x32xf32>
    %585 = arith.addf %584, %577 : vector<8x32xf32>
    %c1_i32_301 = arith.constant 1 : i32
    %586 = arith.addi %c6_i32, %c1_i32_301 : i32
    %587 = arith.sitofp %586 : i32 to f32
    %c1_i32_302 = arith.constant 1 : i32
    %588 = arith.addi %c6_i32, %c1_i32_302 : i32
    %589 = arith.index_cast %588 : i32 to index
    %c0_303 = arith.constant 0 : index
    %c0_304 = arith.constant 0 : index
    %590 = vector.load %arg2[%589, %c0_303, %c0_304] : memref<8x8x8xf32, #tpu.memory_space<vmem>>, vector<1x8x8xf32>
    %591 = vector.shape_cast %590 : vector<1x8x8xf32> to vector<8x8xf32>
    %c0_305 = arith.constant 0 : index
    %c0_306 = arith.constant 0 : index
    %592 = vector.load %arg6[%c0_305, %c0_306] : memref<32x64xf32, #tpu.memory_space<vmem>>, vector<32x64xf32>
    %cst_307 = arith.constant dense<0.000000e+00> : vector<8x64xf32>
    %593 = tpu.matmul %585, %592, %cst_307 {dimension_numbers = #tpu.dot_dimension_numbers<[1], [0], [0], [1], [0, 0, 1, 1], [], []>, precision = #tpu.contract_precision<fp32>} : vector<8x32xf32>, vector<32x64xf32>, vector<8x64xf32> -> vector<8x64xf32>
    %c0_308 = arith.constant 0 : index
    %c0_309 = arith.constant 0 : index
    %594 = vector.load %arg5[%c0_308, %c0_309] : memref<1x64xf32, #tpu.memory_space<vmem>>, vector<1x64xf32>
    %595 = vector.broadcast %587 : f32 to vector<1x64xf32>
    %596 = arith.mulf %595, %594 : vector<1x64xf32>
    %c0_310 = arith.constant 0 : index
    %c0_311 = arith.constant 0 : index
    %597 = vector.load %arg7[%c0_310, %c0_311] : memref<1x64xf32, #tpu.memory_space<vmem>>, vector<1x64xf32>
    %598 = arith.addf %596, %597 : vector<1x64xf32>
    %599 = vector.broadcast %598 : vector<1x64xf32> to vector<8x64xf32>
    %600 = arith.addf %593, %599 : vector<8x64xf32>
    %cst_312 = arith.constant 0.000000e+00 : f32
    %601 = vector.broadcast %cst_312 : f32 to vector<8x64xf32>
    %602 = arith.maximumf %600, %601 : vector<8x64xf32>
    %c0_313 = arith.constant 0 : index
    %c0_314 = arith.constant 0 : index
    %603 = vector.load %arg8[%c0_313, %c0_314] : memref<64x64xf32, #tpu.memory_space<vmem>>, vector<64x64xf32>
    %cst_315 = arith.constant dense<0.000000e+00> : vector<8x64xf32>
    %604 = tpu.matmul %602, %603, %cst_315 {dimension_numbers = #tpu.dot_dimension_numbers<[1], [0], [0], [1], [0, 0, 1, 1], [], []>, precision = #tpu.contract_precision<fp32>} : vector<8x64xf32>, vector<64x64xf32>, vector<8x64xf32> -> vector<8x64xf32>
    %c0_316 = arith.constant 0 : index
    %c0_317 = arith.constant 0 : index
    %605 = vector.load %arg9[%c0_316, %c0_317] : memref<1x64xf32, #tpu.memory_space<vmem>>, vector<1x64xf32>
    %606 = vector.broadcast %605 : vector<1x64xf32> to vector<8x64xf32>
    %607 = arith.addf %604, %606 : vector<8x64xf32>
    %cst_318 = arith.constant 0.000000e+00 : f32
    %608 = vector.broadcast %cst_318 : f32 to vector<8x64xf32>
    %609 = arith.maximumf %607, %608 : vector<8x64xf32>
    %c0_319 = arith.constant 0 : index
    %c0_320 = arith.constant 0 : index
    %610 = vector.load %arg11[%c0_319, %c0_320] : memref<5x32xf32, #tpu.memory_space<vmem>>, vector<5x32xf32>
    %cst_321 = arith.constant 0.000000e+00 : f32
    %611 = vector.broadcast %cst_321 : f32 to vector<8x32xf32>
    %c0_322 = arith.constant 0 : index
    %c0_323 = arith.constant 0 : index
    %c0_324 = arith.constant 0 : index
    %612 = vector.load %arg10[%c0_322, %c0_323, %c0_324] : memref<5x64x32xf32, #tpu.memory_space<vmem>>, vector<1x64x32xf32>
    %613 = vector.shape_cast %612 : vector<1x64x32xf32> to vector<64x32xf32>
    %cst_325 = arith.constant dense<0.000000e+00> : vector<8x32xf32>
    %614 = tpu.matmul %609, %613, %cst_325 {dimension_numbers = #tpu.dot_dimension_numbers<[1], [0], [0], [1], [0, 0, 1, 1], [], []>, precision = #tpu.contract_precision<fp32>} : vector<8x64xf32>, vector<64x32xf32>, vector<8x32xf32> -> vector<8x32xf32>
    %615 = vector.extract_strided_slice %610 {offsets = [0, 0], sizes = [1, 32], strides = [1, 1]} : vector<5x32xf32> to vector<1x32xf32>
    %616 = vector.broadcast %615 : vector<1x32xf32> to vector<8x32xf32>
    %617 = arith.addf %614, %616 : vector<8x32xf32>
    %618 = vector.extract_strided_slice %591 {offsets = [0, 0], sizes = [8, 1], strides = [1, 1]} : vector<8x8xf32> to vector<8x1xf32>
    %619 = vector.broadcast %618 : vector<8x1xf32> to vector<8x32xf32>
    %620 = arith.mulf %619, %617 : vector<8x32xf32>
    %621 = arith.addf %611, %620 : vector<8x32xf32>
    %c1_326 = arith.constant 1 : index
    %c0_327 = arith.constant 0 : index
    %c0_328 = arith.constant 0 : index
    %622 = vector.load %arg10[%c1_326, %c0_327, %c0_328] : memref<5x64x32xf32, #tpu.memory_space<vmem>>, vector<1x64x32xf32>
    %623 = vector.shape_cast %622 : vector<1x64x32xf32> to vector<64x32xf32>
    %cst_329 = arith.constant dense<0.000000e+00> : vector<8x32xf32>
    %624 = tpu.matmul %609, %623, %cst_329 {dimension_numbers = #tpu.dot_dimension_numbers<[1], [0], [0], [1], [0, 0, 1, 1], [], []>, precision = #tpu.contract_precision<fp32>} : vector<8x64xf32>, vector<64x32xf32>, vector<8x32xf32> -> vector<8x32xf32>
    %625 = vector.extract_strided_slice %610 {offsets = [1, 0], sizes = [1, 32], strides = [1, 1]} : vector<5x32xf32> to vector<1x32xf32>
    %626 = vector.broadcast %625 : vector<1x32xf32> to vector<8x32xf32>
    %627 = arith.addf %624, %626 : vector<8x32xf32>
    %628 = vector.extract_strided_slice %591 {offsets = [0, 1], sizes = [8, 1], strides = [1, 1]} : vector<8x8xf32> to vector<8x1xf32>
    %629 = vector.broadcast %628 : vector<8x1xf32> to vector<8x32xf32>
    %630 = arith.mulf %629, %627 : vector<8x32xf32>
    %631 = arith.addf %621, %630 : vector<8x32xf32>
    %c2_330 = arith.constant 2 : index
    %c0_331 = arith.constant 0 : index
    %c0_332 = arith.constant 0 : index
    %632 = vector.load %arg10[%c2_330, %c0_331, %c0_332] : memref<5x64x32xf32, #tpu.memory_space<vmem>>, vector<1x64x32xf32>
    %633 = vector.shape_cast %632 : vector<1x64x32xf32> to vector<64x32xf32>
    %cst_333 = arith.constant dense<0.000000e+00> : vector<8x32xf32>
    %634 = tpu.matmul %609, %633, %cst_333 {dimension_numbers = #tpu.dot_dimension_numbers<[1], [0], [0], [1], [0, 0, 1, 1], [], []>, precision = #tpu.contract_precision<fp32>} : vector<8x64xf32>, vector<64x32xf32>, vector<8x32xf32> -> vector<8x32xf32>
    %635 = vector.extract_strided_slice %610 {offsets = [2, 0], sizes = [1, 32], strides = [1, 1]} : vector<5x32xf32> to vector<1x32xf32>
    %636 = vector.broadcast %635 : vector<1x32xf32> to vector<8x32xf32>
    %637 = arith.addf %634, %636 : vector<8x32xf32>
    %638 = vector.extract_strided_slice %591 {offsets = [0, 2], sizes = [8, 1], strides = [1, 1]} : vector<8x8xf32> to vector<8x1xf32>
    %639 = vector.broadcast %638 : vector<8x1xf32> to vector<8x32xf32>
    %640 = arith.mulf %639, %637 : vector<8x32xf32>
    %641 = arith.addf %631, %640 : vector<8x32xf32>
    %c3_334 = arith.constant 3 : index
    %c0_335 = arith.constant 0 : index
    %c0_336 = arith.constant 0 : index
    %642 = vector.load %arg10[%c3_334, %c0_335, %c0_336] : memref<5x64x32xf32, #tpu.memory_space<vmem>>, vector<1x64x32xf32>
    %643 = vector.shape_cast %642 : vector<1x64x32xf32> to vector<64x32xf32>
    %cst_337 = arith.constant dense<0.000000e+00> : vector<8x32xf32>
    %644 = tpu.matmul %609, %643, %cst_337 {dimension_numbers = #tpu.dot_dimension_numbers<[1], [0], [0], [1], [0, 0, 1, 1], [], []>, precision = #tpu.contract_precision<fp32>} : vector<8x64xf32>, vector<64x32xf32>, vector<8x32xf32> -> vector<8x32xf32>
    %645 = vector.extract_strided_slice %610 {offsets = [3, 0], sizes = [1, 32], strides = [1, 1]} : vector<5x32xf32> to vector<1x32xf32>
    %646 = vector.broadcast %645 : vector<1x32xf32> to vector<8x32xf32>
    %647 = arith.addf %644, %646 : vector<8x32xf32>
    %648 = vector.extract_strided_slice %591 {offsets = [0, 3], sizes = [8, 1], strides = [1, 1]} : vector<8x8xf32> to vector<8x1xf32>
    %649 = vector.broadcast %648 : vector<8x1xf32> to vector<8x32xf32>
    %650 = arith.mulf %649, %647 : vector<8x32xf32>
    %651 = arith.addf %641, %650 : vector<8x32xf32>
    %c4_338 = arith.constant 4 : index
    %c0_339 = arith.constant 0 : index
    %c0_340 = arith.constant 0 : index
    %652 = vector.load %arg10[%c4_338, %c0_339, %c0_340] : memref<5x64x32xf32, #tpu.memory_space<vmem>>, vector<1x64x32xf32>
    %653 = vector.shape_cast %652 : vector<1x64x32xf32> to vector<64x32xf32>
    %cst_341 = arith.constant dense<0.000000e+00> : vector<8x32xf32>
    %654 = tpu.matmul %609, %653, %cst_341 {dimension_numbers = #tpu.dot_dimension_numbers<[1], [0], [0], [1], [0, 0, 1, 1], [], []>, precision = #tpu.contract_precision<fp32>} : vector<8x64xf32>, vector<64x32xf32>, vector<8x32xf32> -> vector<8x32xf32>
    %655 = vector.extract_strided_slice %610 {offsets = [4, 0], sizes = [1, 32], strides = [1, 1]} : vector<5x32xf32> to vector<1x32xf32>
    %656 = vector.broadcast %655 : vector<1x32xf32> to vector<8x32xf32>
    %657 = arith.addf %654, %656 : vector<8x32xf32>
    %658 = vector.extract_strided_slice %591 {offsets = [0, 4], sizes = [8, 1], strides = [1, 1]} : vector<8x8xf32> to vector<8x1xf32>
    %659 = vector.broadcast %658 : vector<8x1xf32> to vector<8x32xf32>
    %660 = arith.mulf %659, %657 : vector<8x32xf32>
    %661 = arith.addf %651, %660 : vector<8x32xf32>
    %662 = arith.addf %577, %661 : vector<8x32xf32>
    %cst_342 = arith.constant 5.000000e-01 : f32
    %663 = vector.broadcast %cst_342 : f32 to vector<8x32xf32>
    %664 = arith.mulf %663, %662 : vector<8x32xf32>
    %665 = arith.addf %581, %664 : vector<8x32xf32>
    %c7_i32 = arith.constant 7 : i32
    %c0_343 = arith.constant 0 : index
    %c0_344 = arith.constant 0 : index
    %666 = vector.load %arg12[%c0_343, %c0_344] : memref<32x1xf32, #tpu.memory_space<vmem>>, vector<32x1xf32>
    %cst_345 = arith.constant dense<0.000000e+00> : vector<8x1xf32>
    %667 = tpu.matmul %665, %666, %cst_345 {dimension_numbers = #tpu.dot_dimension_numbers<[1], [0], [0], [1], [0, 0, 1, 1], [], []>, precision = #tpu.contract_precision<fp32>} : vector<8x32xf32>, vector<32x1xf32>, vector<8x1xf32> -> vector<8x1xf32>
    %c0_346 = arith.constant 0 : index
    %c0_347 = arith.constant 0 : index
    %668 = vector.load %arg13[%c0_346, %c0_347] : memref<1x1xf32, #tpu.memory_space<vmem>>, vector<1x1xf32>
    %669 = vector.broadcast %668 : vector<1x1xf32> to vector<8x1xf32>
    %670 = arith.addf %667, %669 : vector<8x1xf32>
    %cst_348 = arith.constant 0.000000e+00 : f32
    %671 = vector.broadcast %cst_348 : f32 to vector<8x1xf32>
    %672 = arith.subf %671, %670 : vector<8x1xf32>
    %673 = math.exp %672 : vector<8x1xf32>
    %cst_349 = arith.constant 1.000000e+00 : f32
    %674 = vector.broadcast %cst_349 : f32 to vector<8x1xf32>
    %675 = arith.addf %674, %673 : vector<8x1xf32>
    %cst_350 = arith.constant 1.000000e+00 : f32
    %676 = vector.broadcast %cst_350 : f32 to vector<8x1xf32>
    %677 = arith.divf %676, %675 : vector<8x1xf32>
    %c0_351 = arith.constant 0 : index
    %c0_352 = arith.constant 0 : index
    %678 = vector.load %arg14[%c0_351, %c0_352] : memref<8x1xf32, #tpu.memory_space<vmem>>, vector<8x1xf32>
    tpu.vector_store %arg14[%c0_351, %c0_352], %677 {strides = array<i32>} : memref<8x1xf32, #tpu.memory_space<vmem>>, vector<8x1xf32>,
    return
  }
  func.func @transform_0(%arg0: i32) -> (i32, i32) {
    %c0_i32 = arith.constant 0 : i32
    %c0_i32_0 = arith.constant 0 : i32
    return %arg0, %c0_i32 : i32, i32
  }
  func.func @transform_1(%arg0: i32) -> (i32, i32, i32) {
    %c0_i32 = arith.constant 0 : i32
    %c0_i32_0 = arith.constant 0 : i32
    %c0_i32_1 = arith.constant 0 : i32
    return %c0_i32, %arg0, %c0_i32_0 : i32, i32, i32
  }
  func.func @transform_2(%arg0: i32) -> (i32, i32) {
    %c0_i32 = arith.constant 0 : i32
    %c0_i32_0 = arith.constant 0 : i32
    %c0_i32_1 = arith.constant 0 : i32
    return %c0_i32, %c0_i32_0 : i32, i32
  }
  func.func @transform_3(%arg0: i32) -> (i32, i32) {
    %c0_i32 = arith.constant 0 : i32
    %c0_i32_0 = arith.constant 0 : i32
    %c0_i32_1 = arith.constant 0 : i32
    return %c0_i32, %c0_i32_0 : i32, i32
  }
  func.func @transform_4(%arg0: i32) -> (i32, i32) {
    %c0_i32 = arith.constant 0 : i32
    %c0_i32_0 = arith.constant 0 : i32
    %c0_i32_1 = arith.constant 0 : i32
    return %c0_i32, %c0_i32_0 : i32, i32
  }
  func.func @transform_5(%arg0: i32) -> (i32, i32) {
    %c0_i32 = arith.constant 0 : i32
    %c0_i32_0 = arith.constant 0 : i32
    %c0_i32_1 = arith.constant 0 : i32
    return %c0_i32, %c0_i32_0 : i32, i32
  }
  func.func @transform_6(%arg0: i32) -> (i32, i32) {
    %c0_i32 = arith.constant 0 : i32
    %c0_i32_0 = arith.constant 0 : i32
    %c0_i32_1 = arith.constant 0 : i32
    return %c0_i32, %c0_i32_0 : i32, i32
  }
  func.func @transform_7(%arg0: i32) -> (i32, i32) {
    %c0_i32 = arith.constant 0 : i32
    %c0_i32_0 = arith.constant 0 : i32
    %c0_i32_1 = arith.constant 0 : i32
    return %c0_i32, %c0_i32_0 : i32, i32
  }
  func.func @transform_8(%arg0: i32) -> (i32, i32) {
    %c0_i32 = arith.constant 0 : i32
    %c0_i32_0 = arith.constant 0 : i32
    %c0_i32_1 = arith.constant 0 : i32
    return %c0_i32, %c0_i32_0 : i32, i32
  }
  func.func @transform_9(%arg0: i32) -> (i32, i32, i32) {
    %c0_i32 = arith.constant 0 : i32
    %c0_i32_0 = arith.constant 0 : i32
    %c0_i32_1 = arith.constant 0 : i32
    %c0_i32_2 = arith.constant 0 : i32
    return %c0_i32, %c0_i32_0, %c0_i32_1 : i32, i32, i32
  }
  func.func @transform_10(%arg0: i32) -> (i32, i32) {
    %c0_i32 = arith.constant 0 : i32
    %c0_i32_0 = arith.constant 0 : i32
    %c0_i32_1 = arith.constant 0 : i32
    return %c0_i32, %c0_i32_0 : i32, i32
  }
  func.func @transform_11(%arg0: i32) -> (i32, i32) {
    %c0_i32 = arith.constant 0 : i32
    %c0_i32_0 = arith.constant 0 : i32
    %c0_i32_1 = arith.constant 0 : i32
    return %c0_i32, %c0_i32_0 : i32, i32
  }
  func.func @transform_12(%arg0: i32) -> (i32, i32) {
    %c0_i32 = arith.constant 0 : i32
    %c0_i32_0 = arith.constant 0 : i32
    %c0_i32_1 = arith.constant 0 : i32
    return %c0_i32, %c0_i32_0 : i32, i32
  }
  func.func @transform_13(%arg0: i32) -> (i32, i32) {
    %c0_i32 = arith.constant 0 : i32
    %c0_i32_0 = arith.constant 0 : i32
    return %arg0, %c0_i32 : i32, i32
  }
}

</mosaic_0001>

<bundles_post_ra>
// kernel: sub.1
= control target key start
LH: loop header
LB: loop body
LE: loop exit
PB: predicated region body
PF: predicated region fallthrough
CT: control target
= control target key end

     0   :  { %s166_s0 = inlined_call_operand.vmem [shape: f32[2,7,5], index: 0, kind: input, shape index: {}]   ;;  %s167_s1 = inlined_call_operand.vmem [shape: f32[2,7,5], index: 1, kind: input, shape index: {}]   ;;  %s168_s2 = inlined_call_operand.vmem [shape: f32[2,7,5], index: 2, kind: output, shape index: {}]  }
   0x1   :  { %v3_v0 = vld [vmem:[%s166_s0] sm:$0x3]  ;;  %v70_v2 = vld [vmem:[%s166_s0 + $0x2] sm:$0x3]  ;;  %v73_v5 = vld [vmem:[%s166_s0 + $0x4] sm:$0x3] }
   0x2   :  { %v4_v1 = vld [vmem:[%s167_s1] sm:$0x3]  ;;  %v71_v4 = vld [vmem:[%s167_s1 + $0x2] sm:$0x3]  ;;  %v74_v6 = vld [vmem:[%s167_s1 + $0x4] sm:$0x3] }
   0x3   :  { %v7_v3 = vsub.f32 %v3_v0, %v4_v1  ;;  %v16_v7 = vsub.f32 %v70_v2, %v71_v4  ;;  %v26_v8 = vsub.f32 %v73_v5, %v74_v6  ;;  %v76_v9 = vld [vmem:[%s166_s0 + $0x6] sm:$0x3]  ;;  %v79_v11 = vld [vmem:[%s166_s0 + $0x8] sm:$0x3]  ;;  %v82_v14 = vld [vmem:[%s166_s0 + $0xa] sm:$0x3] }
   0x4   :  { %v77_v10 = vld [vmem:[%s167_s1 + $0x6] sm:$0x3]  ;;  %v80_v13 = vld [vmem:[%s167_s1 + $0x8] sm:$0x3]  ;;  %v83_v15 = vld [vmem:[%s167_s1 + $0xa] sm:$0x3] }
   0x5   :  { %9 = vst [vmem:[%s168_s2] sm:$0x3] %v7_v3  ;;  %v36_v12 = vsub.f32 %v76_v9, %v77_v10  ;;  %72 = vst [vmem:[%s168_s2 + $0x2] sm:$0x3] %v16_v7  ;;  %v46_v16 = vsub.f32 %v79_v11, %v80_v13  ;;  %v56_v17 = vsub.f32 %v82_v14, %v83_v15  ;;  %v85_v18 = vld [vmem:[%s166_s0 + $0xc] sm:$0x3] }
   0x6   :  { %75 = vst [vmem:[%s168_s2 + $0x4] sm:$0x3] %v26_v8  ;;  %v86_v19 = vld [vmem:[%s167_s1 + $0xc] sm:$0x3] }
   0x7   :  { %78 = vst [vmem:[%s168_s2 + $0x6] sm:$0x3] %v36_v12  ;;  %v66_v20 = vsub.f32 %v85_v18, %v86_v19  ;;  %81 = vst [vmem:[%s168_s2 + $0x8] sm:$0x3] %v46_v16 }
   0x8   :  { %84 = vst [vmem:[%s168_s2 + $0xa] sm:$0x3] %v56_v17 }
   0x9   :  { %87 = vst [vmem:[%s168_s2 + $0xc] sm:$0x3] %v66_v20 }

// kernel: cde_classification_forward.1
= control target key start
LH: loop header
LB: loop body
LE: loop exit
PB: predicated region body
PF: predicated region fallthrough
CT: control target
= control target key end

     0   :  { %vm55_vm0 = vcmask 64512   ;;  %v49423_v0 = vmov 0.0   ;;  %vm44710_vm1 = vmmov 0   ;;  %v49425_v21 = vmov 0.0|0.0   ;;  %s49405_s2 = inlined_call_operand.vmem [shape: f32[8,32], index: 2, kind: input, shape index: {}]   ;;  %s49406_s0 = inlined_call_operand.vmem [shape: f32[8,8], index: 0, kind: input, shape index: {}]   ;;  %s49407_s5 = inlined_call_operand.vmem [shape: f32[32,64], index: 5, kind: input, shape index: {}]   ;;  %s49408_s3 = inlined_call_operand.vmem [shape: f32[1,32], index: 3, kind: input, shape index: {}]   ;;  %s49409_s7 = inlined_call_operand.vmem [shape: f32[64,64], index: 7, kind: input, shape index: {}]   ;;  %s49410_s9 = inlined_call_operand.vmem [shape: f32[5,64,32], index: 9, kind: input, shape index: {}]   ;;  %s49411_s4 = inlined_call_operand.vmem [shape: f32[1,64], index: 4, kind: input, shape index: {}]   ;;  %s49412_s6 = inlined_call_operand.vmem [shape: f32[1,64], index: 6, kind: input, shape index: {}]   ;;  %s49413_s8 = inlined_call_operand.vmem [shape: f32[1,64], index: 8, kind: input, shape index: {}]   ;;  %s49414_s1 = inlined_call_operand.vmem [shape: f32[8,8,8], index: 1, kind: input, shape index: {}]   ;;  %s49415_s10 = inlined_call_operand.vmem [shape: f32[5,32], index: 10, kind: input, shape index: {}]   ;;  %s49416_s11 = inlined_call_operand.vmem [shape: f32[32,1], index: 11, kind: input, shape index: {}]   ;;  %s49417_s12 = inlined_call_operand.<no memory space> [shape: f32[1,1], index: 12, kind: input, shape index: {}]   ;;  %s49418_s13 = inlined_call_operand.vmem [shape: f32[8,1], index: 13, kind: output, shape index: {}]  }
   0x1   :  { %34137 = vmatprep.subr.mxu0 %v49423_v0  ;;  %v47_v1 = vld [vmem:[%s49405_s2] sm:$0xff]  ;;  %34139 = vmatprep.mubr.msk.f32.mxu0 %vm44710_vm1, %v49423_v0  ;;  %v507_v15 = vld [vmem:[%s49407_s5 + $0x8] sm:$0xff]  ;;  %v508_v22 = vld [vmem:[%s49407_s5 + $0x10] sm:$0xff]  ;;  %vm520_vm2 = vcmask 261120   ;;  %vm1025_vm3 = vcmask 523264   ;;  %vm31210_vm4 = vcmask 7168  }
   0x2   :  { %v46_v2 = vld [vmem:[%s49406_s0] sm:$0xff]  ;;  %v60_v3 = vand.u32 4294901760, %v47_v1  ;;  %34132 = vmatprep.subr.mxu1 %v49423_v0  ;;  %34134 = vmatprep.mubr.msk.f32.mxu1 %vm44710_vm1, %v49423_v0  ;;  %v528_v17 = vand.u32 4294901760, %v507_v15  ;;  %v509_v23 = vld [vmem:[%s49407_s5 + $0x18] sm:$0xff]  ;;  %v531_v24 = vand.u32 4294901760, %v508_v22  ;;  %v1011_v61 = vld [vmem:[%s49409_s7 + $0x8] sm:$0xff] }
   0x3   :  { %v57_v4 = vsel %vm55_vm0, %v46_v2, 0  ;;  %v506_v14 = vld [vmem:[%s49407_s5] sm:$0xff]  ;;  %v534_v25 = vand.u32 4294901760, %v509_v23  ;;  %v1033_v63 = vand.u32 4294901760, %v1011_v61  ;;  %v1012_v2 = vld [vmem:[%s49409_s7 + $0x10] sm:$0xff] }
   0x4   :  { %v125_v5 = vand.u32 4294901760, %v57_v4  ;;  %v137_v6 = vsub.f32 %v47_v1, %v60_v3  ;;  %34133 = vmatpush3.msra.mxu1 %v60_v3  ;;  %v525_v16 = vand.u32 4294901760, %v506_v14  ;;  %v612_v20 = vsub.f32 %v507_v15, %v528_v17  ;;  %v31216_v49 = vld [vmem:[%s49408_s3] ss:$0 sm:$0xff]  ;;  %v1017_v15 = vld [vmem:[%s49409_s7 + $0x38] sm:$0xff] }
   0x5   :  { %40228 = vmatprep.subr.bf16.mxu1 %v49425_v21  ;;  %v44833_v28 = vpack.c.bf16 %v534_v25, %v531_v24  ;;  %v619_v31 = vsub.f32 %v508_v22, %v531_v24  ;;  %v626_v32 = vsub.f32 %v509_v23, %v534_v25  ;;  %v1010_v60 = vld [vmem:[%s49409_s7] sm:$0xff] }
   0x6   :  { %v126_v7 = vsub.f32 %v57_v4, %v125_v5  ;;  %v138_v8 = vand.u32 4294901760, %v137_v6  ;;  %v44821_v18 = vpack.c.bf16 %v528_v17, %v525_v16  ;;  %v605_v19 = vsub.f32 %v506_v14, %v525_v16  ;;  %v1016_v14 = vld [vmem:[%s49409_s7 + $0x30] sm:$0xff] }
   0x7   :  { %v613_v27 = vand.u32 4294901760, %v612_v20  ;;  %v620_v35 = vand.u32 4294901760, %v619_v31  ;;  %v627_v36 = vand.u32 4294901760, %v626_v32  ;;  %v44843_v44 = vpack.c.bf16 %v626_v32, %v619_v31 }
   0x8   :  { %v127_v9 = vand.u32 4294901760, %v126_v7  ;;  %v139_v10 = vsub.f32 %v137_v6, %v138_v8  ;;  %v606_v26 = vand.u32 4294901760, %v605_v19  ;;  %v44841_v43 = vpack.c.bf16 %v612_v20, %v605_v19 }
   0x9   :  { %v614_v30 = vsub.f32 %v612_v20, %v613_v27  ;;  %v621_v38 = vsub.f32 %v619_v31, %v620_v35  ;;  %v628_v39 = vsub.f32 %v626_v32, %v627_v36  ;;  %v44847_v46 = vpack.c.bf16 %v627_v36, %v620_v35 }
   0xa   :  { %v128_v11 = vsub.f32 %v126_v7, %v127_v9  ;;  %v140_v12 = vand.u32 4294901760, %v139_v10  ;;  %v607_v29 = vsub.f32 %v605_v19, %v606_v26  ;;  %v44845_v45 = vpack.c.bf16 %v613_v27, %v606_v26 }
   0xb   :  { %v615_v34 = vand.u32 4294901760, %v614_v30  ;;  %v622_v40 = vand.u32 4294901760, %v621_v38  ;;  %v629_v41 = vand.u32 4294901760, %v628_v39  ;;  %v1030_v62 = vand.u32 4294901760, %v1010_v60 }
   0xc   :  { %v129_v13 = vand.u32 4294901760, %v128_v11  ;;  %34138 = vmatpush3.msra.mxu0 %v140_v12  ;;  %v608_v33 = vand.u32 4294901760, %v607_v29  ;;  %v1036_v4 = vand.u32 4294901760, %v1012_v2  ;;  %v1048_v16 = vand.u32 4294901760, %v1016_v14 }
   0xd   :  { %34140 = vmatmul.mubr.f32.vlgmr.msra.gmra.mrb[0].mxu0 %v125_v5  ;;  %34142 = vmatprep.subr.mxu0 %v49423_v0  ;;  %v44839_v42 = vpack.c.bf16 %v629_v41, %v622_v40  ;;  %v44894_v1 = vpack.c.bf16 %v1033_v63, %v1030_v62  ;;  %v1114_v12 = vsub.f32 %v1010_v60, %v1030_v62  ;;  %v1051_v17 = vand.u32 4294901760, %v1017_v15 }
   0xe   :  { %34143 = vmatpush3.msra.mxu0 %v137_v6  ;;  %34144 = vmatprep.mubr.msk.f32.mxu0 %vm44710_vm1, %v49423_v0  ;;  %v44837_v37 = vpack.c.bf16 %v615_v34, %v608_v33  ;;  %v1128_v25 = vsub.f32 %v1012_v2, %v1036_v4 }
   0xf   :  { %34147 = vmatprep.subr.mxu0 %v49423_v0  ;;  %34135 = vmatmul.mubr.f32.vlgmr.msra.gmra.mrb[0].mxu1 %v129_v13  ;;  %v1121_v13 = vsub.f32 %v1011_v61, %v1033_v63  ;;  %v1115_v19 = vand.u32 4294901760, %v1114_v12  ;;  %v44924_v22 = vpack.c.bf16 %v1051_v17, %v1048_v16 }
  0x10   :  { %34170 = vmatprep.mubr.msk.f32.mxu1 %vm44710_vm1, %v49423_v0  ;;  %40230 = vmatpush3.bf16.msra.mxu1 %v44821_v18  ;;  %v1129_v30 = vand.u32 4294901760, %v1128_v25 }
  0x11   :  { %40231 = vmatprep.subr.bf16.mxu1 %v49425_v21  ;;  %v1122_v20 = vand.u32 4294901760, %v1121_v13  ;;  %v1116_v23 = vsub.f32 %v1114_v12, %v1115_v19  ;;  %v44936_v63 = vpack.c.bf16 %v1121_v13, %v1114_v12  ;;  %v1569_v12 = vld [vmem:[%s49410_s9 + $0x8] sm:$0xff] }
  0x12   :  { %v1130_v33 = vsub.f32 %v1128_v25, %v1129_v30 }
  0x13   :  { %v1123_v24 = vsub.f32 %v1121_v13, %v1122_v20  ;;  %v1117_v27 = vand.u32 4294901760, %v1116_v23  ;;  %49703 = vst [vmem:[#allocation7_spill] sm:$0xff] %v44936_v63  ;;  %v1570_v13 = vld [vmem:[%s49410_s9 + $0x10] sm:$0xff] }
  0x14   :  { %40233 = vmatpush3.bf16.msra.mxu1 %v44833_v28  ;;  %v1131_v38 = vand.u32 4294901760, %v1130_v33 }
  0x15   :  { %34145 = vmatmul.mubr.f32.vlgmr.msra.gmra.mrb[0].mxu0 %v126_v7  ;;  %40234 = vmatprep.subr.bf16.mxu1 %v49425_v21  ;;  %v1014_v7 = vld [vmem:[%s49409_s7 + $0x20] sm:$0xff]  ;;  %v1124_v29 = vand.u32 4294901760, %v1123_v24 }
  0x16   :  { %34148 = vmatpush3.msra.mxu0 %v60_v3  ;;  %34149 = vmatprep.mubr.msk.f32.mxu0 %vm44710_vm1, %v49423_v0 }
  0x17   :  { %34152 = vmatprep.subr.mxu0 %v49423_v0  ;;  %v44928_v32 = vpack.c.bf16 %v1124_v29, %v1117_v27 }
  0x19   :  { %49699 = vst [vmem:[#allocation3_spill] sm:$0xff] %v44928_v32 }
  0x1d   :  { %34150 = vmatmul.mubr.f32.vlgmr.msra.gmra.mrb[0].mxu0 %v127_v9  ;;  %v1042_v9 = vand.u32 4294901760, %v1014_v7 }
  0x1e   :  { %34153 = vmatpush3.msra.mxu0 %v138_v8  ;;  %34154 = vmatprep.mubr.msk.f32.mxu0 %vm44710_vm1, %v49423_v0  ;;  %v1015_v8 = vld [vmem:[%s49409_s7 + $0x28] sm:$0xff] }
  0x1f   :  { %34157 = vmatprep.subr.mxu0 %v49423_v0  ;;  %v1045_v10 = vand.u32 4294901760, %v1015_v8  ;;  %v1142_v35 = vsub.f32 %v1014_v7, %v1042_v9 }
  0x21   :  { %v44914_v11 = vpack.c.bf16 %v1045_v10, %v1042_v9  ;;  %v1149_v36 = vsub.f32 %v1015_v8, %v1045_v10  ;;  %v1143_v40 = vand.u32 4294901760, %v1142_v35  ;;  %v1568_v10 = vld [vmem:[%s49410_s9] sm:$0xff] }
  0x23   :  { %v1150_v41 = vand.u32 4294901760, %v1149_v36 }
  0x25   :  { %34155 = vmatmul.mubr.f32.vlgmr.msra.gmra.mrb[0].mxu0 %v125_v5  ;;  %v44948_v8 = vpack.c.bf16 %v1150_v41, %v1143_v40 }
  0x26   :  { %34158 = vmatpush3.msra.mxu0 %v60_v3  ;;  %34159 = vmatprep.mubr.msk.f32.mxu0 %vm44710_vm1, %v49423_v0  ;;  %v1013_v3 = vld [vmem:[%s49409_s7 + $0x18] sm:$0xff] }
  0x27   :  { %40264 = vmatprep.subr.bf16.mxu0 %v49425_v21  ;;  %49709 = vst [vmem:[#allocation13_spill] sm:$0xff] %v44948_v8 }
  0x2d   :  { %34160 = vmatmul.mubr.f32.vlgmr.msra.gmra.mrb[0].mxu0 %v125_v5  ;;  %v1039_v5 = vand.u32 4294901760, %v1013_v3 }
  0x2e   :  { %34244 = vmatprep.mubr.msk.f32.mxu0 %vm44710_vm1, %v49423_v0  ;;  %40266 = vmatpush3.bf16.msra.mxu0 %v44894_v1 }
  0x2f   :  { %40267 = vmatprep.subr.bf16.mxu0 %v49425_v21  ;;  %v44904_v6 = vpack.c.bf16 %v1039_v5, %v1036_v4  ;;  %v1135_v26 = vsub.f32 %v1013_v3, %v1039_v5  ;;  %v44940_v3 = vpack.c.bf16 %v1149_v36, %v1142_v35  ;;  %v44944_v5 = vpack.c.bf16 %v1122_v20, %v1115_v19 }
  0x31   :  { %v1136_v31 = vand.u32 4294901760, %v1135_v26  ;;  %v44938_v2 = vpack.c.bf16 %v1135_v26, %v1128_v25  ;;  %49705 = vst [vmem:[#allocation9_spill] sm:$0xff] %v44940_v3  ;;  %49707 = vst [vmem:[#allocation11_spill] sm:$0xff] %v44944_v5 }
  0x32   :  { %40269 = vmatpush3.bf16.msra.mxu0 %v44904_v6 }
  0x33   :  { %40270 = vmatprep.subr.bf16.mxu0 %v49425_v21  ;;  %v1137_v34 = vsub.f32 %v1135_v26, %v1136_v31  ;;  %49704 = vst [vmem:[#allocation8_spill] sm:$0xff] %v44938_v2  ;;  %v44946_v7 = vpack.c.bf16 %v1136_v31, %v1129_v30 }
  0x35   :  { %v1138_v39 = vand.u32 4294901760, %v1137_v34  ;;  %49708 = vst [vmem:[#allocation12_spill] sm:$0xff] %v44946_v7 }
  0x36   :  { %40272 = vmatpush3.bf16.msra.mxu0 %v44914_v11 }
  0x37   :  { %40273 = vmatprep.subr.bf16.mxu0 %v49425_v21 }
  0x3a   :  { %40275 = vmatpush3.bf16.msra.mxu0 %v44924_v22 }
  0x3b   :  { %40276 = vmatprep.subr.bf16.mxu0 %v49425_v21 }
  0xe2   :  { %v131_v47 = vpop.f32.mrb[0].mxu1 }
  0xe3   :  { %v34136_v48 = vpop.f32.mrb[1].mxu1  ;;  %v132_v50 = vadd.f32 %v31216_v49, %v131_v47  ;;  %v44930_v47 = vpack.c.bf16 %v1138_v39, %v1131_v38  ;;  %v1151_v49 = vsub.f32 %v1149_v36, %v1150_v41 }
  0xe4   :  { %v1144_v48 = vsub.f32 %v1142_v35, %v1143_v40 }
  0xe5   :  { %49700 = vst [vmem:[#allocation4_spill] sm:$0xff] %v44930_v47 }
 0x100   :  { %v501_v51 = vpop.f32.mrb[0].mxu0 }
 0x101   :  { %v44852_v52 = vadd.f32 %v501_v51, %v132_v50  ;;  %v34161_v53 = vpop.f32.mrb[1].mxu0  ;;  %v1156_v50 = vsub.f32 %v1016_v14, %v1048_v16  ;;  %v1163_v51 = vsub.f32 %v1017_v15, %v1051_v17  ;;  %v1584_v14 = vand.u32 4294901760, %v1568_v10  ;;  %v1571_v16 = vld [vmem:[%s49410_s9 + $0x18] sm:$0xff] }
 0x102   :  { %v1145_v53 = vand.u32 4294901760, %v1144_v48  ;;  %v1587_v15 = vand.u32 4294901760, %v1569_v12  ;;  %v1590_v17 = vand.u32 4294901760, %v1570_v13  ;;  %v1593_v19 = vand.u32 4294901760, %v1571_v16 }
 0x103   :  { %v522_v54 = vsel %vm520_vm2, %v44852_v52, 0  ;;  %v44942_v4 = vpack.c.bf16 %v1163_v51, %v1156_v50  ;;  %v44966_v23 = vsub.f32 %v1568_v10, %v1584_v14 }
 0x104   :  { %v593_v55 = vand.u32 4294901760, %v522_v54  ;;  %v44964_v20 = vpack.c.bf16 %v1587_v15, %v1584_v14  ;;  %v44968_v24 = vsub.f32 %v1569_v12, %v1587_v15  ;;  %v44970_v25 = vsub.f32 %v1570_v13, %v1590_v17 }
 0x105   :  { %49706 = vst [vmem:[#allocation10_spill] sm:$0xff] %v44942_v4  ;;  %v44972_v26 = vpack.c.bf16 %v1593_v19, %v1590_v17  ;;  %v44974_v27 = vsub.f32 %v1571_v16, %v1593_v19  ;;  %v49422_v29 = vand.u32 4294901760, %v44966_v23 }
 0x106   :  { %v594_v56 = vsub.f32 %v522_v54, %v593_v55  ;;  %v1152_v54 = vand.u32 4294901760, %v1151_v49  ;;  %v49421_v30 = vand.u32 4294901760, %v44968_v24  ;;  %v49420_v31 = vand.u32 4294901760, %v44970_v25 }
 0x107   :  { %v49419_v33 = vand.u32 4294901760, %v44974_v27  ;;  %v1670_v34 = vsub.f32 %v44966_v23, %v49422_v29  ;;  %v31222_v29 = vld [vmem:[%s49410_s9 + $0x60] sm:$0xff] }
 0x108   :  { %v595_v57 = vand.u32 4294901760, %v594_v56  ;;  %v1677_v35 = vsub.f32 %v44968_v24, %v49421_v30  ;;  %v1684_v36 = vsub.f32 %v44970_v25, %v49420_v31 }
 0x109   :  { %v1691_v38 = vsub.f32 %v44974_v27, %v49419_v33  ;;  %v1671_v39 = vand.u32 4294901760, %v1670_v34 }
 0x10a   :  { %v596_v58 = vsub.f32 %v594_v56, %v595_v57  ;;  %v1678_v40 = vand.u32 4294901760, %v1677_v35  ;;  %v1685_v41 = vand.u32 4294901760, %v1684_v36  ;;  %v1572_v35 = vld [vmem:[%s49410_s9 + $0x20] sm:$0xff]  ;;  %v1573_v36 = vld [vmem:[%s49410_s9 + $0x28] sm:$0xff] }
 0x10b   :  { %v1692_v48 = vand.u32 4294901760, %v1691_v38  ;;  %v1596_v38 = vand.u32 4294901760, %v1572_v35 }
 0x10c   :  { %v597_v59 = vand.u32 4294901760, %v596_v58  ;;  %v44992_v49 = vpack.c.bf16 %v1678_v40, %v1671_v39  ;;  %v1599_v39 = vand.u32 4294901760, %v1573_v36 }
 0x10d   :  { %v1696_v40 = vsub.f32 %v1572_v35, %v1596_v38 }
 0x10e   :  { %34171 = vmatmul.mubr.f32.vlgmr.msra.gmra.mrb[2].mxu1 %v597_v59  ;;  %49711 = vst [vmem:[#allocation15_spill] sm:$0xff] %v44992_v49 }
 0x10f   :  { %40236 = vmatpush3.bf16.msra.mxu1 %v44837_v37  ;;  %34181 = vmatprep.mubr.msk.f32.mxu1 %vm44710_vm1, %v49423_v0 }
 0x110   :  { %40237 = vmatprep.subr.bf16.mxu1 %v49425_v21 }
 0x113   :  { %40239 = vmatpush3.bf16.msra.mxu1 %v44839_v42 }
 0x114   :  { %40240 = vmatprep.subr.bf16.mxu1 %v49425_v21 }
 0x116   :  { %34182 = vmatmul.mubr.f32.vlgmr.msra.gmra.mrb[2].mxu1 %v593_v55 }
 0x117   :  { %40242 = vmatpush3.bf16.msra.mxu1 %v44841_v43  ;;  %34192 = vmatprep.mubr.msk.f32.mxu1 %vm44710_vm1, %v49423_v0 }
 0x118   :  { %40243 = vmatprep.subr.bf16.mxu1 %v49425_v21 }
 0x11b   :  { %40245 = vmatpush3.bf16.msra.mxu1 %v44843_v44 }
 0x11c   :  { %40246 = vmatprep.subr.bf16.mxu1 %v49425_v21 }
 0x11e   :  { %34193 = vmatmul.mubr.f32.vlgmr.msra.gmra.mrb[2].mxu1 %v594_v56  ;;  %v1164_v56 = vand.u32 4294901760, %v1163_v51 }
 0x11f   :  { %40248 = vmatpush3.bf16.msra.mxu1 %v44821_v18  ;;  %34203 = vmatprep.mubr.msk.f32.mxu1 %vm44710_vm1, %v49423_v0 }
 0x120   :  { %40249 = vmatprep.subr.bf16.mxu1 %v49425_v21  ;;  %v1165_v59 = vsub.f32 %v1163_v51, %v1164_v56  ;;  %v515_v51 = vlaneseq }
 0x122   :  { %v1166_v61 = vand.u32 4294901760, %v1165_v59 }
 0x123   :  { %40251 = vmatpush3.bf16.msra.mxu1 %v44833_v28 }
 0x124   :  { %40252 = vmatprep.subr.bf16.mxu1 %v49425_v21 }
 0x126   :  { %34204 = vmatmul.mubr.f32.vlgmr.msra.gmra.mrb[2].mxu1 %v595_v57  ;;  %v44932_v57 = vpack.c.bf16 %v1152_v54, %v1145_v53  ;;  %v510_v53 = vld [vmem:[%s49411_s4] sm:$0x1] }
 0x127   :  { %40254 = vmatpush3.bf16.msra.mxu1 %v44845_v45  ;;  %34214 = vmatprep.mubr.msk.f32.mxu1 %vm44710_vm1, %v49423_v0  ;;  %v511_v54 = vmul.f32 0.0, %v510_v53  ;;  %v1697_v53 = vand.u32 4294901760, %v1696_v40 }
 0x128   :  { %40255 = vmatprep.subr.bf16.mxu1 %v49425_v21  ;;  %49701 = vst [vmem:[#allocation5_spill] sm:$0xff] %v44932_v57 }
 0x12b   :  { %40257 = vmatpush3.bf16.msra.mxu1 %v44847_v46 }
 0x12c   :  { %40258 = vmatprep.subr.bf16.mxu1 %v49425_v21 }
 0x12e   :  { %34215 = vmatmul.mubr.f32.vlgmr.msra.gmra.mrb[2].mxu1 %v593_v55 }
 0x12f   :  { %40260 = vmatpush3.bf16.msra.mxu1 %v44821_v18  ;;  %34225 = vmatprep.mubr.msk.f32.mxu1 %vm44710_vm1, %v49423_v0 }
 0x130   :  { %40261 = vmatprep.subr.bf16.mxu1 %v49425_v21 }
 0x133   :  { %40263 = vmatpush3.bf16.msra.mxu1 %v44833_v28 }
 0x134   :  { %40348 = vmatprep.subr.bf16.mxu1 %v49425_v21 }
 0x136   :  { %34226 = vmatmul.mubr.f32.vlgmr.msra.gmra.mrb[2].mxu1 %v593_v55  ;;  %v1157_v55 = vand.u32 4294901760, %v1156_v50 }
 0x137   :  { %34377 = vmatprep.mubr.msk.f32.mxu1 %vm44710_vm1, %v49423_v0  ;;  %40350 = vmatpush3.bf16.msra.mxu1 %v44992_v49  ;;  %v49724_v49 = vmov 0.0  }
 0x138   :  { %v1158_v58 = vsub.f32 %v1156_v50, %v1157_v55  ;;  %v44950_v9 = vpack.c.bf16 %v1164_v56, %v1157_v55  ;;  %v44995_v50 = vpack.c.bf16 %v1692_v48, %v1685_v41  ;;  %40351 = vmatprep.subr.bf16.mxu1 %v49425_v21  ;;  %v45003_v55 = vshrl.u32 %v515_v51, 7  ;;  %v512_v56 = vld [vmem:[%s49412_s6] sm:$0x1]  ;;  %v1574_v48 = vld [vmem:[%s49410_s9 + $0x30] sm:$0xff]  ;;  %v1575_v51 = vld [vmem:[%s49410_s9 + $0x38] sm:$0xff] }
 0x139   :  { %v1703_v41 = vsub.f32 %v1573_v36, %v1599_v39 }
 0x13a   :  { %v1159_v60 = vand.u32 4294901760, %v1158_v58  ;;  %49710 = vst [vmem:[#allocation14_spill] sm:$0xff] %v44950_v9  ;;  %49712 = vst [vmem:[#allocation16_spill] sm:$0xff] %v44995_v50  ;;  %v513_v58 = vadd.f32 %v512_v56, %v511_v54  ;;  %v45009_v59 = vsub.s32 0, %v45003_v55  ;;  %v1602_v56 = vand.u32 4294901760, %v1574_v48 }
 0x13b   :  { %40353 = vmatpush3.bf16.msra.mxu1 %v44995_v50  ;;  %v1704_v54 = vand.u32 4294901760, %v1703_v41 }
 0x13c   :  { %v44934_v62 = vpack.c.bf16 %v1166_v61, %v1159_v60  ;;  %40354 = vmatprep.subr.bf16.mxu1 %v49425_v21  ;;  %v518_v60 = vrot.slane %v513_v58, %v45009_v59  ;;  %v1605_v58 = vand.u32 4294901760, %v1575_v51 }
 0x13e   :  { %49702 = vst [vmem:[#allocation6_spill] sm:$0xff] %v44934_v62 }
 0x209   :  { %v1005_v61 = vpop.f32.mrb[2].mxu1 }
 0x20a   :  { %v44010_v10 = vadd.f32 %v1005_v61, %v518_v60  ;;  %v34227_v12 = vpop.f32.mrb[3].mxu1  ;;  %v1698_v60 = vsub.f32 %v1696_v40, %v1697_v53  ;;  %v1705_v61 = vsub.f32 %v1703_v41, %v1704_v54 }
 0x20b   :  { %v1717_v12 = vsub.f32 %v1575_v51, %v1605_v58  ;;  %v45093_v51 = vpack.c.bf16 %v1605_v58, %v1602_v56 }
 0x20c   :  { %v1009_v13 = vmax.f32 %v44010_v10, 0.0  ;;  %v1710_v10 = vsub.f32 %v1574_v48, %v1602_v56  ;;  %v45089_v48 = vpack.c.bf16 %v1599_v39, %v1596_v38  ;;  %v31217_v38 = vld [vmem:[%s49413_s8] ss:$0 sm:$0xff] }
 0x20e   :  { %v1027_v14 = vsel %vm1025_vm3, %v1009_v13, 0  ;;  %v1699_v13 = vand.u32 4294901760, %v1698_v60  ;;  %v45097_v60 = vpack.c.bf16 %v1703_v41, %v1696_v40  ;;  %v45111_v40 = vpack.c.bf16 %v44968_v24, %v44966_v23 }
 0x20f   :  { %v1102_v15 = vand.u32 4294901760, %v1027_v14 }
 0x210   :  { %49715 = vst [vmem:[#allocation19_spill] sm:$0xff] %v45097_v60  ;;  %49719 = vst [vmem:[#allocation23_spill] sm:$0xff] %v45111_v40 }
 0x211   :  { %v1103_v16 = vsub.f32 %v1027_v14, %v1102_v15  ;;  %v1706_v14 = vand.u32 4294901760, %v1705_v61  ;;  %v45099_v61 = vpack.c.bf16 %v1717_v12, %v1710_v10 }
 0x213   :  { %v1104_v17 = vand.u32 4294901760, %v1103_v16  ;;  %49716 = vst [vmem:[#allocation20_spill] sm:$0xff] %v45099_v61 }
 0x215   :  { %v1105_v19 = vsub.f32 %v1103_v16, %v1104_v17 }
 0x217   :  { %v1106_v34 = vand.u32 4294901760, %v1105_v19 }
 0x219   :  { %34245 = vmatmul.mubr.f32.vlgmr.msra.gmra.mrb[2].mxu0 %v1106_v34 }
 0x21a   :  { %40278 = vmatpush3.bf16.msra.mxu0 %v44928_v32  ;;  %34263 = vmatprep.mubr.msk.f32.mxu0 %vm44710_vm1, %v49423_v0 }
 0x21b   :  { %40279 = vmatprep.subr.bf16.mxu0 %v49425_v21 }
 0x21e   :  { %40281 = vmatpush3.bf16.msra.mxu0 %v44930_v47 }
 0x21f   :  { %40282 = vmatprep.subr.bf16.mxu0 %v49425_v21 }
 0x222   :  { %40284 = vmatpush3.bf16.msra.mxu0 %v44932_v57 }
 0x223   :  { %40285 = vmatprep.subr.bf16.mxu0 %v49425_v21 }
 0x226   :  { %40287 = vmatpush3.bf16.msra.mxu0 %v44934_v62 }
 0x227   :  { %40288 = vmatprep.subr.bf16.mxu0 %v49425_v21 }
 0x229   :  { %34264 = vmatmul.mubr.f32.vlgmr.msra.gmra.mrb[2].mxu0 %v1102_v15 }
 0x22a   :  { %40290 = vmatpush3.bf16.msra.mxu0 %v44936_v63  ;;  %34282 = vmatprep.mubr.msk.f32.mxu0 %vm44710_vm1, %v49423_v0 }
 0x22b   :  { %40291 = vmatprep.subr.bf16.mxu0 %v49425_v21 }
 0x22e   :  { %40293 = vmatpush3.bf16.msra.mxu0 %v44938_v2 }
 0x22f   :  { %40294 = vmatprep.subr.bf16.mxu0 %v49425_v21 }
 0x232   :  { %40296 = vmatpush3.bf16.msra.mxu0 %v44940_v3 }
 0x233   :  { %40297 = vmatprep.subr.bf16.mxu0 %v49425_v21 }
 0x236   :  { %40299 = vmatpush3.bf16.msra.mxu0 %v44942_v4 }
 0x237   :  { %40300 = vmatprep.subr.bf16.mxu0 %v49425_v21 }
 0x239   :  { %34283 = vmatmul.mubr.f32.vlgmr.msra.gmra.mrb[2].mxu0 %v1103_v16  ;;  %v1718_v16 = vand.u32 4294901760, %v1717_v12 }
 0x23a   :  { %40302 = vmatpush3.bf16.msra.mxu0 %v44894_v1  ;;  %34301 = vmatprep.mubr.msk.f32.mxu0 %vm44710_vm1, %v49423_v0 }
 0x23b   :  { %40303 = vmatprep.subr.bf16.mxu0 %v49425_v21  ;;  %v1719_v34 = vsub.f32 %v1717_v12, %v1718_v16  ;;  %v45128_v12 = vpack.c.bf16 %v44974_v27, %v44970_v25 }
 0x23d   :  { %v1720_v36 = vand.u32 4294901760, %v1719_v34  ;;  %49720 = vst [vmem:[#allocation24_spill] sm:$0xff] %v45128_v12 }
 0x23e   :  { %40305 = vmatpush3.bf16.msra.mxu0 %v44904_v6 }
 0x23f   :  { %40306 = vmatprep.subr.bf16.mxu0 %v49425_v21 }
 0x242   :  { %40308 = vmatpush3.bf16.msra.mxu0 %v44914_v11 }
 0x243   :  { %40309 = vmatprep.subr.bf16.mxu0 %v49425_v21 }
 0x246   :  { %40311 = vmatpush3.bf16.msra.mxu0 %v44924_v22 }
 0x247   :  { %40312 = vmatprep.subr.bf16.mxu0 %v49425_v21 }
 0x249   :  { %34302 = vmatmul.mubr.f32.vlgmr.msra.gmra.mrb[2].mxu0 %v1104_v17  ;;  %v45081_v17 = vpack.c.bf16 %v1706_v14, %v1699_v13  ;;  %v45101_v13 = vpack.c.bf16 %v1704_v54, %v1697_v53  ;;  %v31218_v53 = vld [vmem:[%s49410_s9 + $0x40] sm:$0xff]  ;;  %v31219_v54 = vld [vmem:[%s49410_s9 + $0x48] sm:$0xff] }
 0x24a   :  { %40314 = vmatpush3.bf16.msra.mxu0 %v44944_v5  ;;  %34320 = vmatprep.mubr.msk.f32.mxu0 %vm44710_vm1, %v49423_v0 }
 0x24b   :  { %40315 = vmatprep.subr.bf16.mxu0 %v49425_v21  ;;  %49713 = vst [vmem:[#allocation17_spill] sm:$0xff] %v45081_v17  ;;  %40356 = vmatpush3.bf16.msra.mxu1 %v45081_v17  ;;  %49717 = vst [vmem:[#allocation21_spill] sm:$0xff] %v45101_v13  ;;  %v49723_v17 = vmov 0.0|0.0  }
 0x24c   :  { %40357 = vmatprep.subr.bf16.mxu1 %v49425_v21 }
 0x24e   :  { %40317 = vmatpush3.bf16.msra.mxu0 %v44946_v7 }
 0x24f   :  { %40318 = vmatprep.subr.bf16.mxu0 %v49425_v21 }
 0x252   :  { %40320 = vmatpush3.bf16.msra.mxu0 %v44948_v8 }
 0x253   :  { %40321 = vmatprep.subr.bf16.mxu0 %v49425_v21 }
 0x256   :  { %40323 = vmatpush3.bf16.msra.mxu0 %v44950_v9 }
 0x257   :  { %40324 = vmatprep.subr.bf16.mxu0 %v49425_v21 }
 0x259   :  { %34321 = vmatmul.mubr.f32.vlgmr.msra.gmra.mrb[2].mxu0 %v1102_v15 }
 0x25a   :  { %40326 = vmatpush3.bf16.msra.mxu0 %v44894_v1  ;;  %34339 = vmatprep.mubr.msk.f32.mxu0 %vm44710_vm1, %v49423_v0 }
 0x25b   :  { %40327 = vmatprep.subr.bf16.mxu0 %v49425_v21 }
 0x25e   :  { %40329 = vmatpush3.bf16.msra.mxu0 %v44904_v6 }
 0x25f   :  { %40330 = vmatprep.subr.bf16.mxu0 %v49425_v21 }
 0x262   :  { %40332 = vmatpush3.bf16.msra.mxu0 %v44914_v11 }
 0x263   :  { %40333 = vmatprep.subr.bf16.mxu0 %v49425_v21 }
 0x266   :  { %40335 = vmatpush3.bf16.msra.mxu0 %v44924_v22 }
 0x267   :  { %40336 = vmatprep.subr.bf16.mxu0 %v49425_v21 }
 0x269   :  { %34340 = vmatmul.mubr.f32.vlgmr.msra.gmra.mrb[2].mxu0 %v1102_v15  ;;  %v1711_v15 = vand.u32 4294901760, %v1710_v10 }
 0x26a   :  { %40338 = vmatpush3.bf16.msra.mxu0 %v44964_v20  ;;  %34358 = vmatprep.mubr.msk.f32.mxu0 %vm44710_vm1, %v49423_v0 }
 0x26b   :  { %40339 = vmatprep.subr.bf16.mxu0 %v49425_v21  ;;  %v1712_v19 = vsub.f32 %v1710_v10, %v1711_v15  ;;  %v45103_v14 = vpack.c.bf16 %v1718_v16, %v1711_v15  ;;  %v2141_v15 = vand.u32 4294901760, %v31218_v53  ;;  %v2144_v16 = vand.u32 4294901760, %v31219_v54 }
 0x26d   :  { %v1713_v35 = vand.u32 4294901760, %v1712_v19  ;;  %49718 = vst [vmem:[#allocation22_spill] sm:$0xff] %v45103_v14 }
 0x26e   :  { %40341 = vmatpush3.bf16.msra.mxu0 %v44972_v26 }
 0x26f   :  { %40342 = vmatprep.subr.bf16.mxu0 %v49425_v21  ;;  %v45085_v33 = vpack.c.bf16 %v1720_v36, %v1713_v35  ;;  %v31220_v36 = vld [vmem:[%s49410_s9 + $0x50] sm:$0xff] }
 0x271   :  { %49714 = vst [vmem:[#allocation18_spill] sm:$0xff] %v45085_v33  ;;  %40359 = vmatpush3.bf16.msra.mxu1 %v45085_v33 }
 0x272   :  { %40360 = vmatprep.subr.bf16.mxu1 %v49425_v21  ;;  %40344 = vmatpush3.bf16.msra.mxu0 %v45089_v48 }
 0x273   :  { %40345 = vmatprep.subr.bf16.mxu0 %v49425_v21 }
 0x276   :  { %40347 = vmatpush3.bf16.msra.mxu0 %v45093_v51 }
 0x277   :  { %40408 = vmatprep.subr.bf16.mxu0 %v49425_v21 }
 0x33c   :  { %v1562_v39 = vpop.f32.mrb[2].mxu0 }
 0x33d   :  { %v44011_v19 = vadd.f32 %v31217_v38, %v1562_v39  ;;  %v34341_v56 = vpop.f32.mrb[3].mxu0  ;;  %v31221_v38 = vld [vmem:[%s49410_s9 + $0x58] sm:$0xff] }
 0x33e   :  { %v45146_v56 = vsub.f32 %v31219_v54, %v2144_v16  ;;  %v2150_v31 = vand.u32 4294901760, %v31221_v38  ;;  %v31224_v54 = vld [vmem:[%s49410_s9 + $0x70] sm:$0xff] }
 0x33f   :  { %v1566_v58 = vmax.f32 %v44011_v19, 0.0  ;;  %v45144_v19 = vsub.f32 %v31218_v53, %v2141_v15  ;;  %v31223_v53 = vld [vmem:[%s49410_s9 + $0x68] sm:$0xff]  ;;  %v2159_v50 = vand.u32 4294901760, %v31224_v54 }
 0x340   :  { %v2156_v33 = vand.u32 4294901760, %v31223_v53 }
 0x341   :  { %v1581_v34 = vsel %vm1025_vm3, %v1566_v58, 0  ;;  %v45149_v58 = vpack.c.bf16 %v2144_v16, %v2141_v15  ;;  %v31225_v15 = vld [vmem:[%s49410_s9 + $0x78] sm:$0xff] }
 0x342   :  { %v45113_v41 = vand.u32 4294901760, %v1581_v34  ;;  %v2162_v16 = vand.u32 4294901760, %v31225_v15  ;;  %v45195_v7 = vsub.f32 %v31223_v53, %v2156_v33  ;;  %v45212_v53 = vsub.f32 %v31224_v54, %v2159_v50 }
 0x343   :  { %49721 = vst [vmem:[#allocation25_spill] sm:$0xff] %v45149_v58 }
 0x344   :  { %v45122_v10 = vsub.f32 %v1581_v34, %v45113_v41  ;;  %34378 = vmatmul.mubr.f32.vlgmr.msra.gmra.mrb[4].mxu1 %v45113_v41  ;;  %v2147_v34 = vand.u32 4294901760, %v31220_v36 }
 0x345   :  { %40362 = vmatpush3.bf16.msra.mxu1 %v45111_v40  ;;  %34396 = vmatprep.mubr.msk.f32.mxu1 %vm44710_vm1, %v49423_v0  ;;  %v2153_v40 = vand.u32 4294901760, %v31222_v29 }
 0x346   :  { %v45133_v35 = vand.u32 4294901760, %v45122_v10  ;;  %40363 = vmatprep.subr.bf16.mxu1 %v49425_v21  ;;  %v45169_v0 = vsub.f32 %v31220_v36, %v2147_v34  ;;  %v49725_v36 = vand.u32 4294901760, %v45144_v19 }
 0x347   :  { %v45191_v9 = vpack.c.bf16 %v2156_v33, %v2153_v40  ;;  %v45193_v8 = vsub.f32 %v31222_v29, %v2153_v40  ;;  %v49455_v40 = vand.u32 4294901760, %v45195_v7 }
 0x348   :  { %v1659_v39 = vsub.f32 %v45122_v10, %v45133_v35 }
 0x349   :  { %40365 = vmatpush3.bf16.msra.mxu1 %v45128_v12  ;;  %v45175_v12 = vpack.c.bf16 %v2150_v31, %v2147_v34  ;;  %v49452_v34 = vand.u32 4294901760, %v45169_v0  ;;  %49726 = vst [vmem:[#allocation27_spill] sm:$0xff] %v45191_v9 }
 0x34a   :  { %40366 = vmatprep.subr.bf16.mxu1 %v49425_v21  ;;  %v45152_v30 = vand.u32 4294901760, %v1659_v39  ;;  %v49447_v39 = vand.u32 4294901760, %v45146_v56  ;;  %v45171_v21 = vsub.f32 %v31221_v38, %v2150_v31  ;;  %v2227_v38 = vsub.f32 %v45144_v19, %v49725_v36 }
 0x34b   :  { %49722 = vst [vmem:[#allocation26_spill] sm:$0xff] %v45175_v12  ;;  %v45199_v36 = vpack.c.bf16 %v2162_v16, %v2159_v50  ;;  %v49730_v50 = vand.u32 4294901760, %v45193_v8 }
 0x34c   :  { %34359 = vmatmul.mubr.f32.vlgmr.msra.gmra.mrb[4].mxu0 %v45152_v30  ;;  %v2234_v31 = vsub.f32 %v45146_v56, %v49447_v39  ;;  %v2228_v39 = vand.u32 4294901760, %v2227_v38  ;;  %v49728_v5 = vand.u32 4294901760, %v45171_v21  ;;  %v45214_v38 = vsub.f32 %v31225_v15, %v2162_v16 }
 0x34d   :  { %40368 = vmatpush3.bf16.msra.mxu1 %v45097_v60  ;;  %40410 = vmatpush3.bf16.msra.mxu0 %v45149_v58  ;;  %49727 = vst [vmem:[#allocation28_spill] sm:$0xff] %v45199_v36  ;;  %v2255_v54 = vsub.f32 %v45193_v8, %v49730_v50  ;;  %v2262_v15 = vsub.f32 %v45195_v7, %v49455_v40  ;;  %v49457_v16 = vand.u32 4294901760, %v45212_v53 }
 0x34e   :  { %40369 = vmatprep.subr.bf16.mxu1 %v49723_v17  ;;  %40411 = vmatprep.subr.bf16.mxu0 %v49723_v17  ;;  %v2235_v60 = vand.u32 4294901760, %v2234_v31  ;;  %v2248_v29 = vsub.f32 %v45171_v21, %v49728_v5  ;;  %v49453_v5 = vmov 0  }
 0x34f   :  { %34472 = vmatprep.mubr.msk.f32.mxu0 %vm44710_vm1, %v49724_v49  ;;  %44652 = vset.pattern.permute.xlu0 %v49453_v5  ;;  %v49456_v5 = vand.u32 4294901760, %v45214_v38  ;;  %v2269_v50 = vsub.f32 %v45212_v53, %v49457_v16 }
 0x350   :  { %v45221_v31 = vpack.c.bf16 %v2235_v60, %v2228_v39  ;;  %v2249_v33 = vand.u32 4294901760, %v2248_v29  ;;  %v45236_v60 = vld [vmem:[%s49414_s1] sm:$0xff]  ;;  %v2256_v39 = vand.u32 4294901760, %v2255_v54  ;;  %v2263_v29 = vand.u32 4294901760, %v2262_v15 }
 0x351   :  { %40371 = vmatpush3.bf16.msra.mxu1 %v45099_v61  ;;  %40413 = vmatpush3.bf16.msra.mxu0 %v45175_v12  ;;  %v2241_v61 = vsub.f32 %v45169_v0, %v49452_v34  ;;  %v2276_v40 = vsub.f32 %v45214_v38, %v49456_v5  ;;  %v2270_v5 = vand.u32 4294901760, %v2269_v50 }
 0x352   :  { %40372 = vmatprep.subr.bf16.mxu1 %v49723_v17  ;;  %40414 = vmatprep.subr.bf16.mxu0 %v49723_v17  ;;  %49729 = vst [vmem:[#allocation29_spill] sm:$0xff] %v45221_v31  ;;  %v45264_v15 = vpack.c.bf16 %v2263_v29, %v2256_v39  ;;  %v31227_v29 = vld [vmem:[%s49410_s9 + $0x88] sm:$0xff] }
 0x353   :  { %v2242_v34 = vand.u32 4294901760, %v2241_v61  ;;  %2122 = vperm.xlu0 %44652, %v45236_v60   ;;  %v2277_v16 = vand.u32 4294901760, %v2276_v40  ;;  %v45306_v40 = vpack.c.bf16 %v45195_v7, %v45193_v8 }
 0x354   :  { %34397 = vmatmul.mubr.f32.vlgmr.msra.gmra.mrb[4].mxu1 %v45122_v10  ;;  %49735 = vst [vmem:[#allocation32_spill] sm:$0xff] %v45264_v15 }
 0x355   :  { %40374 = vmatpush3.bf16.msra.mxu1 %v44964_v20  ;;  %40416 = vmatpush3.bf16.msra.mxu0 %v45191_v9  ;;  %v45242_v61 = vpack.c.bf16 %v2249_v33, %v2242_v34  ;;  %v49732_v34 = vand.u32 4294901760, %v44966_v23  ;;  %v49733_v33 = vand.u32 4294901760, %v44968_v24  ;;  %v49736_v23 = vand.u32 4294901760, %v44970_v25  ;;  %49742 = vst [vmem:[#allocation37_spill] sm:$0xff] %v45306_v40 }
 0x356   :  { %40375 = vmatprep.subr.bf16.mxu1 %v49723_v17  ;;  %40417 = vmatprep.subr.bf16.mxu0 %v49723_v17  ;;  %v49737_v24 = vand.u32 4294901760, %v44974_v27  ;;  %v45277_v39 = vpack.c.bf16 %v2277_v16, %v2270_v5  ;;  %v45287_v25 = vpack.c.bf16 %v45146_v56, %v45144_v19  ;;  %v45296_v27 = vpack.c.bf16 %v45171_v21, %v45169_v0  ;;  %v31226_v16 = vld [vmem:[%s49410_s9 + $0x80] sm:$0xff] }
 0x357   :  { %34415 = vmatprep.mubr.msk.f32.mxu1 %vm44710_vm1, %v49724_v49  ;;  %49731 = vst [vmem:[#allocation30_spill] sm:$0xff] %v45242_v61  ;;  %v45262_v54 = vpack.c.bf16 %v49733_v33, %v49732_v34  ;;  %v45315_v5 = vpack.c.bf16 %v45214_v38, %v45212_v53  ;;  %v2697_v50 = vand.u32 4294901760, %v31226_v16  ;;  %v2700_v33 = vand.u32 4294901760, %v31227_v29 }
 0x358   :  { %v45275_v34 = vpack.c.bf16 %v49737_v24, %v49736_v23  ;;  %49739 = vst [vmem:[#allocation34_spill] sm:$0xff] %v45277_v39  ;;  %49740 = vst [vmem:[#allocation35_spill] sm:$0xff] %v45287_v25  ;;  %v31228_v23 = vld [vmem:[%s49410_s9 + $0x90] sm:$0xff]  ;;  %v31229_v24 = vld [vmem:[%s49410_s9 + $0x98] sm:$0xff] }
 0x359   :  { %40377 = vmatpush3.bf16.msra.mxu1 %v44972_v26  ;;  %40419 = vmatpush3.bf16.msra.mxu0 %v45199_v36  ;;  %49734 = vst [vmem:[#allocation31_spill] sm:$0xff] %v45262_v54  ;;  %49741 = vst [vmem:[#allocation36_spill] sm:$0xff] %v45296_v27 }
 0x35a   :  { %40378 = vmatprep.subr.bf16.mxu1 %v49723_v17  ;;  %40420 = vmatprep.subr.bf16.mxu0 %v49723_v17  ;;  %49738 = vst [vmem:[#allocation33_spill] sm:$0xff] %v45275_v34  ;;  %49743 = vst [vmem:[#allocation38_spill] sm:$0xff] %v45315_v5 }
 0x35c   :  { %34473 = vmatmul.mubr.f32.vlgmr.msra.gmra.mrb[6].mxu0 %v45152_v30 }
 0x35d   :  { %40380 = vmatpush3.bf16.msra.mxu1 %v45089_v48  ;;  %40422 = vmatpush3.bf16.msra.mxu0 %v45221_v31 }
 0x35e   :  { %40381 = vmatprep.subr.bf16.mxu1 %v49723_v17  ;;  %40423 = vmatprep.subr.bf16.mxu0 %v49723_v17 }
 0x35f   :  { %34491 = vmatprep.mubr.msk.f32.mxu0 %vm44710_vm1, %v49724_v49 }
 0x361   :  { %40383 = vmatpush3.bf16.msra.mxu1 %v45093_v51  ;;  %40425 = vmatpush3.bf16.msra.mxu0 %v45242_v61 }
 0x362   :  { %40384 = vmatprep.subr.bf16.mxu1 %v49723_v17  ;;  %40426 = vmatprep.subr.bf16.mxu0 %v49723_v17 }
 0x364   :  { %34416 = vmatmul.mubr.f32.vlgmr.msra.gmra.mrb[4].mxu1 %v45133_v35 }
 0x365   :  { %40386 = vmatpush3.bf16.msra.mxu1 %v45262_v54  ;;  %40428 = vmatpush3.bf16.msra.mxu0 %v45264_v15  ;;  %v45352_v54 = vpack.c.bf16 %v2700_v33, %v2697_v50  ;;  %v49745_v15 = vmov 0  }
 0x366   :  { %40387 = vmatprep.subr.bf16.mxu1 %v49723_v17  ;;  %40429 = vmatprep.subr.bf16.mxu0 %v49723_v17 }
 0x367   :  { %34434 = vmatprep.mubr.msk.f32.mxu1 %vm44710_vm1, %v49724_v49  ;;  %49744 = vst [vmem:[#allocation39_spill] sm:$0xff] %v45352_v54 }
 0x369   :  { %40389 = vmatpush3.bf16.msra.mxu1 %v45275_v34  ;;  %40431 = vmatpush3.bf16.msra.mxu0 %v45277_v39  ;;  %v45347_v34 = vsub.f32 %v31227_v29, %v2700_v33  ;;  %v31231_v29 = vld [vmem:[%s49410_s9 + $0xa8] sm:$0xff]  ;;  %v31233_v33 = vld [vmem:[%s49410_s9 + $0xb8] sm:$0xff] }
 0x36a   :  { %40390 = vmatprep.subr.bf16.mxu1 %v49723_v17  ;;  %40432 = vmatprep.subr.bf16.mxu0 %v49723_v17  ;;  %v2712_v4 = vand.u32 4294901760, %v31231_v29 }
 0x36b   :  { %v49751_v3 = vand.u32 4294901760, %v45347_v34 }
 0x36c   :  { %34492 = vmatmul.mubr.f32.vlgmr.msra.gmra.mrb[6].mxu0 %v45113_v41 }
 0x36d   :  { %40392 = vmatpush3.bf16.msra.mxu1 %v45101_v13  ;;  %40434 = vmatpush3.bf16.msra.mxu0 %v45287_v25  ;;  %v45345_v13 = vsub.f32 %v31226_v16, %v2697_v50  ;;  %v31230_v16 = vld [vmem:[%s49410_s9 + $0xa0] sm:$0xff]  ;;  %v31232_v50 = vld [vmem:[%s49410_s9 + $0xb0] sm:$0xff]  ;;  %v2790_v2 = vsub.f32 %v45347_v34, %v49751_v3  ;;  %v49753_v3 = vand.u32 4294901760, %v45169_v0 }
 0x36e   :  { %40393 = vmatprep.subr.bf16.mxu1 %v49723_v17  ;;  %40435 = vmatprep.subr.bf16.mxu0 %v49723_v17  ;;  %v2709_v31 = vand.u32 4294901760, %v31230_v16 }
 0x36f   :  { %34510 = vmatprep.mubr.msk.f32.mxu0 %vm44710_vm1, %v49724_v49  ;;  %v2791_v57 = vand.u32 4294901760, %v2790_v2  ;;  %v49759_v2 = vand.u32 4294901760, %v45193_v8 }
 0x371   :  { %40395 = vmatpush3.bf16.msra.mxu1 %v45103_v14  ;;  %40437 = vmatpush3.bf16.msra.mxu0 %v45296_v27  ;;  %v49470_v14 = vmov 1   ;;  %v49747_v27 = vand.u32 4294901760, %v45144_v19 }
 0x372   :  { %40396 = vmatprep.subr.bf16.mxu1 %v49723_v17  ;;  %40438 = vmatprep.subr.bf16.mxu0 %v49723_v17 }
 0x373   :  { %44653 = vset.pattern.permute.xlu0 %v49470_v14  ;;  %v2715_v14 = vand.u32 4294901760, %v31232_v50 }
 0x374   :  { %34435 = vmatmul.mubr.f32.vlgmr.msra.gmra.mrb[4].mxu1 %v45113_v41  ;;  %2678 = vperm.xlu0 %44653, %v45236_v60  }
 0x375   :  { %40398 = vmatpush3.bf16.msra.mxu1 %v44964_v20  ;;  %40440 = vmatpush3.bf16.msra.mxu0 %v45306_v40  ;;  %v2706_v40 = vand.u32 4294901760, %v31229_v24 }
 0x376   :  { %40399 = vmatprep.subr.bf16.mxu1 %v49723_v17  ;;  %40441 = vmatprep.subr.bf16.mxu0 %v49723_v17 }
 0x377   :  { %34453 = vmatprep.mubr.msk.f32.mxu1 %vm44710_vm1, %v49724_v49  ;;  %v45373_v39 = vsub.f32 %v31229_v24, %v2706_v40 }
 0x378   :  { %44657 = vset.pattern.permute.xlu0 %v49745_v15  ;;  %v2718_v15 = vand.u32 4294901760, %v31233_v33 }
 0x379   :  { %40401 = vmatpush3.bf16.msra.mxu1 %v44972_v26  ;;  %40443 = vmatpush3.bf16.msra.mxu0 %v45315_v5  ;;  %v2703_v5 = vand.u32 4294901760, %v31228_v23 }
 0x37a   :  { %40402 = vmatprep.subr.bf16.mxu1 %v49723_v17  ;;  %40444 = vmatprep.subr.bf16.mxu0 %v49723_v17  ;;  %v45414_v19 = vpack.c.bf16 %v2718_v15, %v2715_v14 }
 0x37b   :  { %v45371_v25 = vsub.f32 %v31228_v23, %v2703_v5  ;;  %v45378_v61 = vpack.c.bf16 %v2706_v40, %v2703_v5  ;;  %v49748_v23 = vand.u32 4294901760, %v45146_v56  ;;  %v49750_v40 = vand.u32 4294901760, %v45345_v13 }
 0x37c   :  { %34511 = vmatmul.mubr.f32.vlgmr.msra.gmra.mrb[6].mxu0 %v45122_v10  ;;  %v45400_v56 = vpack.c.bf16 %v2712_v4, %v2709_v31  ;;  %49756 = vst [vmem:[#allocation44_spill] sm:$0xff] %v45414_v19 }
 0x37d   :  { %40404 = vmatpush3.bf16.msra.mxu1 %v45089_v48  ;;  %40446 = vmatpush3.bf16.msra.mxu0 %v45149_v58  ;;  %49746 = vst [vmem:[#allocation40_spill] sm:$0xff] %v45378_v61  ;;  %v45386_v24 = vpack.c.bf16 %v49748_v23, %v49747_v27  ;;  %v2783_v5 = vsub.f32 %v45345_v13, %v49750_v40  ;;  %v49754_v40 = vand.u32 4294901760, %v45171_v21 }
 0x37e   :  { %40405 = vmatprep.subr.bf16.mxu1 %v49723_v17  ;;  %40447 = vmatprep.subr.bf16.mxu0 %v49723_v17  ;;  %49752 = vst [vmem:[#allocation42_spill] sm:$0xff] %v45400_v56  ;;  %v45402_v27 = vsub.f32 %v31230_v16, %v2709_v31  ;;  %v45404_v23 = vsub.f32 %v31231_v29, %v2712_v4  ;;  %v49757_v31 = vand.u32 4294901760, %v45371_v25  ;;  %v49758_v16 = vand.u32 4294901760, %v45373_v39 }
 0x37f   :  { %34529 = vmatprep.mubr.msk.f32.mxu0 %vm44710_vm1, %v49724_v49  ;;  %49749 = vst [vmem:[#allocation41_spill] sm:$0xff] %v45386_v24  ;;  %v45412_v63 = vpack.c.bf16 %v49754_v40, %v49753_v3  ;;  %v2784_v62 = vand.u32 4294901760, %v2783_v5  ;;  %v45427_v3 = vsub.f32 %v31232_v50, %v2715_v14  ;;  %v45429_v5 = vsub.f32 %v31233_v33, %v2718_v15 }
 0x380   :  { %v2797_v4 = vsub.f32 %v45371_v25, %v49757_v31  ;;  %v2804_v29 = vsub.f32 %v45373_v39, %v49758_v16  ;;  %v49498_v0 = vand.u32 4294901760, %v45402_v27  ;;  %v49760_v40 = vand.u32 4294901760, %v45195_v7 }
 0x381   :  { %40407 = vmatpush3.bf16.msra.mxu1 %v45093_v51  ;;  %40449 = vmatpush3.bf16.msra.mxu0 %v45175_v12  ;;  %49755 = vst [vmem:[#allocation43_spill] sm:$0xff] %v45412_v63  ;;  %v45441_v16 = vpack.c.bf16 %v2791_v57, %v2784_v62  ;;  %v49763_v50 = vand.u32 4294901760, %v45404_v23  ;;  %v49497_v7 = vand.u32 4294901760, %v45427_v3  ;;  %v49496_v33 = vand.u32 4294901760, %v45429_v5 }
 0x382   :  { %40450 = vmatprep.subr.bf16.mxu0 %v49723_v17  ;;  %40480 = vmatprep.subr.bf16.mxu1 %v49723_v17  ;;  %v45439_v31 = vpack.c.bf16 %v49760_v40, %v49759_v2  ;;  %v2798_v21 = vand.u32 4294901760, %v2797_v4  ;;  %v2805_v14 = vand.u32 4294901760, %v2804_v29  ;;  %v2811_v15 = vsub.f32 %v45402_v27, %v49498_v0 }
 0x383   :  { %49762 = vst [vmem:[#allocation46_spill] sm:$0xff] %v45441_v16  ;;  %v2818_v8 = vsub.f32 %v45404_v23, %v49763_v50  ;;  %v49764_v57 = vand.u32 4294901760, %v45212_v53  ;;  %v49765_v62 = vand.u32 4294901760, %v45214_v38  ;;  %v2825_v50 = vsub.f32 %v45427_v3, %v49497_v7 }
 0x384   :  { %34454 = vmatmul.mubr.f32.vlgmr.msra.gmra.mrb[4].mxu1 %v45113_v41  ;;  %49761 = vst [vmem:[#allocation45_spill] sm:$0xff] %v45439_v31  ;;  %v45462_v29 = vpack.c.bf16 %v2805_v14, %v2798_v21  ;;  %v2812_v2 = vand.u32 4294901760, %v2811_v15  ;;  %v2832_v53 = vsub.f32 %v45429_v5, %v49496_v33  ;;  %v45530_v7 = vpack.c.bf16 %v45404_v23, %v45402_v27 }
 0x385   :  { %40452 = vmatpush3.bf16.msra.mxu0 %v45191_v9  ;;  %40482 = vmatpush3.bf16.msra.mxu1 %v45352_v54  ;;  %v45460_v4 = vpack.c.bf16 %v49765_v62, %v49764_v57  ;;  %v2819_v40 = vand.u32 4294901760, %v2818_v8  ;;  %v2826_v21 = vand.u32 4294901760, %v2825_v50  ;;  %v45495_v8 = vpack.c.bf16 %v45347_v34, %v45345_v13  ;;  %v31234_v57 = vld [vmem:[%s49410_s9 + $0xc0] sm:$0xff]  ;;  %v31235_v62 = vld [vmem:[%s49410_s9 + $0xc8] sm:$0xff] }
 0x386   :  { %40453 = vmatprep.subr.bf16.mxu0 %v49723_v17  ;;  %40483 = vmatprep.subr.bf16.mxu1 %v49723_v17  ;;  %49767 = vst [vmem:[#allocation48_spill] sm:$0xff] %v45462_v29  ;;  %v2833_v14 = vand.u32 4294901760, %v2832_v53  ;;  %v3256_v50 = vand.u32 4294901760, %v31235_v62  ;;  %v31236_v53 = vld [vmem:[%s49410_s9 + $0xd0] sm:$0xff]  ;;  %49772 = vst [vmem:[#allocation53_spill] sm:$0xff] %v45530_v7 }
 0x387   :  { %34586 = vmatprep.mubr.msk.f32.mxu1 %vm44710_vm1, %v49724_v49  ;;  %49766 = vst [vmem:[#allocation47_spill] sm:$0xff] %v45460_v4  ;;  %v45478_v38 = vpack.c.bf16 %v2819_v40, %v2812_v2  ;;  %49770 = vst [vmem:[#allocation51_spill] sm:$0xff] %v45495_v8  ;;  %v45510_v2 = vpack.c.bf16 %v45373_v39, %v45371_v25  ;;  %v3253_v40 = vand.u32 4294901760, %v31234_v57 }
 0x388   :  { %v45485_v15 = vpack.c.bf16 %v2833_v14, %v2826_v21  ;;  %v31237_v21 = vld [vmem:[%s49410_s9 + $0xd8] sm:$0xff]  ;;  %v45524_v33 = vsub.f32 %v31235_v62, %v3256_v50  ;;  %v31239_v62 = vld [vmem:[%s49410_s9 + $0xe8] sm:$0xff] }
 0x389   :  { %40455 = vmatpush3.bf16.msra.mxu0 %v45199_v36  ;;  %40485 = vmatpush3.bf16.msra.mxu1 %v45378_v61  ;;  %49768 = vst [vmem:[#allocation49_spill] sm:$0xff] %v45478_v38  ;;  %49771 = vst [vmem:[#allocation52_spill] sm:$0xff] %v45510_v2  ;;  %v45522_v14 = vsub.f32 %v31234_v57, %v3253_v40  ;;  %v45532_v0 = vpack.c.bf16 %v3256_v50, %v3253_v40  ;;  %v31238_v57 = vld [vmem:[%s49410_s9 + $0xe0] sm:$0xff]  ;;  %v31240_v40 = vld [vmem:[%s49410_s9 + $0xf0] sm:$0xff] }
 0x38a   :  { %40456 = vmatprep.subr.bf16.mxu0 %v49723_v17  ;;  %40486 = vmatprep.subr.bf16.mxu1 %v49723_v17  ;;  %49769 = vst [vmem:[#allocation50_spill] sm:$0xff] %v45485_v15  ;;  %v31241_v50 = vld [vmem:[%s49410_s9 + $0xf8] sm:$0xff] }
 0x38b   :  { %49773 = vst [vmem:[#allocation54_spill] sm:$0xff] %v45532_v0 }
 0x38c   :  { %34530 = vmatmul.mubr.f32.vlgmr.msra.gmra.mrb[6].mxu0 %v45133_v35 }
 0x38d   :  { %40458 = vmatpush3.bf16.msra.mxu0 %v45386_v24  ;;  %40488 = vmatpush3.bf16.msra.mxu1 %v45400_v56  ;;  %v3268_v24 = vand.u32 4294901760, %v31239_v62 }
 0x38e   :  { %40459 = vmatprep.subr.bf16.mxu0 %v49723_v17  ;;  %40489 = vmatprep.subr.bf16.mxu1 %v49723_v17 }
 0x38f   :  { %34548 = vmatprep.mubr.msk.f32.mxu0 %vm44710_vm1, %v49724_v49 }
 0x391   :  { %40461 = vmatpush3.bf16.msra.mxu0 %v45412_v63  ;;  %40491 = vmatpush3.bf16.msra.mxu1 %v45414_v19  ;;  %v3265_v63 = vand.u32 4294901760, %v31238_v57 }
 0x392   :  { %40462 = vmatprep.subr.bf16.mxu0 %v49723_v17  ;;  %40492 = vmatprep.subr.bf16.mxu1 %v49723_v17 }
 0x394   :  { %34587 = vmatmul.mubr.f32.vlgmr.msra.gmra.mrb[6].mxu1 %v45152_v30 }
 0x395   :  { %40464 = vmatpush3.bf16.msra.mxu0 %v45439_v31  ;;  %40494 = vmatpush3.bf16.msra.mxu1 %v45441_v16 }
 0x396   :  { %40465 = vmatprep.subr.bf16.mxu0 %v49723_v17  ;;  %40495 = vmatprep.subr.bf16.mxu1 %v49723_v17 }
 0x397   :  { %34605 = vmatprep.mubr.msk.f32.mxu1 %vm44710_vm1, %v49724_v49 }
 0x399   :  { %40467 = vmatpush3.bf16.msra.mxu0 %v45460_v4  ;;  %40497 = vmatpush3.bf16.msra.mxu1 %v45462_v29  ;;  %v45559_v4 = vpack.c.bf16 %v45429_v5, %v45427_v3 }
 0x39a   :  { %40468 = vmatprep.subr.bf16.mxu0 %v49723_v17  ;;  %40498 = vmatprep.subr.bf16.mxu1 %v49723_v17 }
 0x39b   :  { %49774 = vst [vmem:[#allocation55_spill] sm:$0xff] %v45559_v4 }
 0x39c   :  { %34549 = vmatmul.mubr.f32.vlgmr.msra.gmra.mrb[6].mxu0 %v45113_v41 }
 0x39d   :  { %40470 = vmatpush3.bf16.msra.mxu0 %v45149_v58  ;;  %40500 = vmatpush3.bf16.msra.mxu1 %v45478_v38  ;;  %v3274_v38 = vand.u32 4294901760, %v31241_v50  ;;  %v45581_v58 = vsub.f32 %v31239_v62, %v3268_v24 }
 0x39e   :  { %40471 = vmatprep.subr.bf16.mxu0 %v49723_v17  ;;  %40501 = vmatprep.subr.bf16.mxu1 %v49723_v17 }
 0x39f   :  { %34567 = vmatprep.mubr.msk.f32.mxu0 %vm44710_vm1, %v49724_v49 }
 0x3a1   :  { %40473 = vmatpush3.bf16.msra.mxu0 %v45175_v12  ;;  %40503 = vmatpush3.bf16.msra.mxu1 %v45485_v15  ;;  %v3262_v15 = vand.u32 4294901760, %v31237_v21  ;;  %v45579_v12 = vsub.f32 %v31238_v57, %v3265_v63  ;;  %v49541_v57 = vand.u32 4294901760, %v45581_v58 }
 0x3a2   :  { %40474 = vmatprep.subr.bf16.mxu0 %v49723_v17  ;;  %40504 = vmatprep.subr.bf16.mxu1 %v49723_v17 }
 0x3a3   :  { %v45553_v16 = vsub.f32 %v31237_v21, %v3262_v15 }
 0x3a4   :  { %34606 = vmatmul.mubr.f32.vlgmr.msra.gmra.mrb[6].mxu1 %v45113_v41 }
 0x3a5   :  { %40476 = vmatpush3.bf16.msra.mxu0 %v45191_v9  ;;  %40506 = vmatpush3.bf16.msra.mxu1 %v45495_v8  ;;  %v3259_v8 = vand.u32 4294901760, %v31236_v53  ;;  %v45577_v9 = vpack.c.bf16 %v3268_v24, %v3265_v63  ;;  %v49779_v47 = vand.u32 4294901760, %v45553_v16 }
 0x3a6   :  { %40477 = vmatprep.subr.bf16.mxu0 %v49723_v17  ;;  %40507 = vmatprep.subr.bf16.mxu1 %v49723_v17 }
 0x3a7   :  { %34624 = vmatprep.mubr.msk.f32.mxu1 %vm44710_vm1, %v49724_v49  ;;  %v45551_v29 = vsub.f32 %v31236_v53, %v3259_v8  ;;  %v45561_v31 = vpack.c.bf16 %v3262_v15, %v3259_v8  ;;  %v3271_v53 = vand.u32 4294901760, %v31240_v40  ;;  %49777 = vst [vmem:[#allocation57_spill] sm:$0xff] %v45577_v9  ;;  %v3360_v63 = vsub.f32 %v45553_v16, %v49779_v47 }
 0x3a8   :  { %v49535_v47 = vmov 2  }
 0x3a9   :  { %40479 = vmatpush3.bf16.msra.mxu0 %v45199_v36  ;;  %40509 = vmatpush3.bf16.msra.mxu1 %v45510_v2  ;;  %v49529_v2 = vand.u32 4294901760, %v45522_v14  ;;  %49775 = vst [vmem:[#allocation56_spill] sm:$0xff] %v45561_v31  ;;  %v49534_v8 = vand.u32 4294901760, %v45551_v29  ;;  %v45598_v62 = vsub.f32 %v31240_v40, %v3271_v53  ;;  %v3361_v24 = vand.u32 4294901760, %v3360_v63 }
 0x3aa   :  { %40510 = vmatprep.subr.bf16.mxu1 %v49723_v17  ;;  %40552 = vmatprep.subr.bf16.mxu0 %v49723_v17 }
 0x3ab   :  { %v3339_v21 = vsub.f32 %v45522_v14, %v49529_v2  ;;  %v45585_v2 = vpack.c.bf16 %v3274_v38, %v3271_v53  ;;  %44654 = vset.pattern.permute.xlu1 %v49535_v47  ;;  %v49538_v53 = vand.u32 4294901760, %v45598_v62 }
 0x3ac   :  { %34568 = vmatmul.mubr.f32.vlgmr.msra.gmra.mrb[6].mxu0 %v45113_v41  ;;  %3234 = vperm.xlu1 %44654, %v45236_v60  }
 0x3ad   :  { %40512 = vmatpush3.bf16.msra.mxu1 %v45530_v7  ;;  %40554 = vmatpush3.bf16.msra.mxu0 %v45532_v0  ;;  %v49776_v7 = vand.u32 4294901760, %v45524_v33  ;;  %49778 = vst [vmem:[#allocation58_spill] sm:$0xff] %v45585_v2 }
 0x3ae   :  { %40513 = vmatprep.subr.bf16.mxu1 %v49723_v17  ;;  %40555 = vmatprep.subr.bf16.mxu0 %v49723_v17 }
 0x3af   :  { %34700 = vmatprep.mubr.msk.f32.mxu0 %vm44710_vm1, %v49724_v49  ;;  %v3346_v15 = vsub.f32 %v45524_v33, %v49776_v7  ;;  %v3340_v7 = vand.u32 4294901760, %v3339_v21  ;;  %v45600_v21 = vsub.f32 %v31241_v50, %v3274_v38  ;;  %v49781_v38 = vand.u32 4294901760, %v45579_v12 }
 0x3b0   :  { %v3374_v50 = vsub.f32 %v45581_v58, %v49541_v57 }
 0x3b1   :  { %40515 = vmatpush3.bf16.msra.mxu1 %v45559_v4  ;;  %40557 = vmatpush3.bf16.msra.mxu0 %v45561_v31  ;;  %v3347_v36 = vand.u32 4294901760, %v3346_v15  ;;  %v3353_v4 = vsub.f32 %v45551_v29, %v49534_v8  ;;  %v3367_v40 = vsub.f32 %v45579_v12, %v49781_v38  ;;  %v3381_v38 = vsub.f32 %v45598_v62, %v49538_v53 }
 0x3b2   :  { %40516 = vmatprep.subr.bf16.mxu1 %v49723_v17  ;;  %40558 = vmatprep.subr.bf16.mxu0 %v49723_v17  ;;  %v3375_v63 = vand.u32 4294901760, %v3374_v50 }
 0x3b3   :  { %v45607_v15 = vpack.c.bf16 %v3347_v36, %v3340_v7  ;;  %v3354_v8 = vand.u32 4294901760, %v3353_v4  ;;  %v49537_v36 = vand.u32 4294901760, %v45600_v21  ;;  %v3368_v7 = vand.u32 4294901760, %v3367_v40 }
 0x3b4   :  { %34625 = vmatmul.mubr.f32.vlgmr.msra.gmra.mrb[6].mxu1 %v45122_v10 }
 0x3b5   :  { %40518 = vmatpush3.bf16.msra.mxu1 %v45352_v54  ;;  %40560 = vmatpush3.bf16.msra.mxu0 %v45577_v9  ;;  %49780 = vst [vmem:[#allocation59_spill] sm:$0xff] %v45607_v15  ;;  %v45623_v4 = vpack.c.bf16 %v3361_v24, %v3354_v8  ;;  %v3388_v47 = vsub.f32 %v45600_v21, %v49537_v36  ;;  %v49783_v8 = vand.u32 4294901760, %v45345_v13  ;;  %v49784_v24 = vand.u32 4294901760, %v45347_v34 }
 0x3b6   :  { %40519 = vmatprep.subr.bf16.mxu1 %v49723_v17  ;;  %40561 = vmatprep.subr.bf16.mxu0 %v49723_v17  ;;  %v45645_v50 = vpack.c.bf16 %v3375_v63, %v3368_v7  ;;  %v3382_v36 = vand.u32 4294901760, %v3381_v38  ;;  %v49787_v13 = vand.u32 4294901760, %v45371_v25  ;;  %v49788_v34 = vand.u32 4294901760, %v45373_v39  ;;  %v31242_v38 = vld [vmem:[%s49410_s9 + $0x100] sm:$0xff] }
 0x3b7   :  { %34643 = vmatprep.mubr.msk.f32.mxu1 %vm44710_vm1, %v49724_v49  ;;  %49782 = vst [vmem:[#allocation60_spill] sm:$0xff] %v45623_v4  ;;  %v45643_v40 = vpack.c.bf16 %v49784_v24, %v49783_v8  ;;  %v3389_v53 = vand.u32 4294901760, %v3388_v47  ;;  %v49791_v47 = vand.u32 4294901760, %v45402_v27  ;;  %v49792_v25 = vand.u32 4294901760, %v45404_v23  ;;  %v31243_v24 = vld [vmem:[%s49410_s9 + $0x108] sm:$0xff] }
 0x3b8   :  { %49786 = vst [vmem:[#allocation62_spill] sm:$0xff] %v45645_v50  ;;  %v45656_v8 = vpack.c.bf16 %v49788_v34, %v49787_v13  ;;  %v49795_v27 = vand.u32 4294901760, %v45427_v3  ;;  %v49796_v23 = vand.u32 4294901760, %v45429_v5  ;;  %v45689_v63 = vpack.c.bf16 %v45553_v16, %v45551_v29 }
 0x3b9   :  { %40521 = vmatpush3.bf16.msra.mxu1 %v45378_v61  ;;  %40563 = vmatpush3.bf16.msra.mxu0 %v45585_v2  ;;  %49785 = vst [vmem:[#allocation61_spill] sm:$0xff] %v45643_v40  ;;  %v45658_v7 = vpack.c.bf16 %v3389_v53, %v3382_v36  ;;  %v45670_v39 = vpack.c.bf16 %v49792_v25, %v49791_v47  ;;  %v49539_v13 = vmov 3   ;;  %v3809_v34 = vand.u32 4294901760, %v31242_v38  ;;  %v31244_v25 = vld [vmem:[%s49410_s9 + $0x110] sm:$0xff] }
 0x3ba   :  { %40522 = vmatprep.subr.bf16.mxu1 %v49723_v17  ;;  %40564 = vmatprep.subr.bf16.mxu0 %v49723_v17  ;;  %49789 = vst [vmem:[#allocation63_spill] sm:$0xff] %v45656_v8  ;;  %v45674_v53 = vpack.c.bf16 %v45524_v33, %v45522_v14  ;;  %v45685_v36 = vpack.c.bf16 %v49796_v23, %v49795_v27  ;;  %49798 = vst [vmem:[#allocation68_spill] sm:$0xff] %v45689_v63  ;;  %v3812_v47 = vand.u32 4294901760, %v31243_v24  ;;  %v31245_v27 = vld [vmem:[%s49410_s9 + $0x118] sm:$0xff] }
 0x3bb   :  { %49790 = vst [vmem:[#allocation64_spill] sm:$0xff] %v45658_v7  ;;  %49793 = vst [vmem:[#allocation65_spill] sm:$0xff] %v45670_v39  ;;  %v45699_v3 = vpack.c.bf16 %v45581_v58, %v45579_v12  ;;  %v45708_v5 = vpack.c.bf16 %v45600_v21, %v45598_v62  ;;  %44655 = vset.pattern.permute.xlu1 %v49539_v13  ;;  %v45739_v23 = vsub.f32 %v31242_v38, %v3809_v34  ;;  %v31247_v38 = vld [vmem:[%s49410_s9 + $0x128] sm:$0xff] }
 0x3bc   :  { %34701 = vmatmul.mubr.f32.vlgmr.msra.gmra.mrb[8].mxu0 %v45152_v30  ;;  %49794 = vst [vmem:[#allocation66_spill] sm:$0xff] %v45674_v53  ;;  %49797 = vst [vmem:[#allocation67_spill] sm:$0xff] %v45685_v36  ;;  %3790 = vperm.xlu1 %44655, %v45236_v60   ;;  %v45741_v13 = vsub.f32 %v31243_v24, %v3812_v47  ;;  %v45745_v57 = vpack.c.bf16 %v3812_v47, %v3809_v34  ;;  %v31248_v24 = vld [vmem:[%s49410_s9 + $0x130] sm:$0xff]  ;;  %v31249_v34 = vld [vmem:[%s49410_s9 + $0x138] sm:$0xff]  ;;  %v49803_v47 = vand.u32 4294901760, %v45522_v14 }
 0x3bd   :  { %40524 = vmatpush3.bf16.msra.mxu1 %v45400_v56  ;;  %40566 = vmatpush3.bf16.msra.mxu0 %v45607_v15  ;;  %49799 = vst [vmem:[#allocation69_spill] sm:$0xff] %v45699_v3  ;;  %49800 = vst [vmem:[#allocation70_spill] sm:$0xff] %v45708_v5 }
 0x3be   :  { %40525 = vmatprep.subr.bf16.mxu1 %v49723_v17  ;;  %40567 = vmatprep.subr.bf16.mxu0 %v49723_v17  ;;  %49801 = vst [vmem:[#allocation71_spill] sm:$0xff] %v45745_v57 }
 0x3bf   :  { %34719 = vmatprep.mubr.msk.f32.mxu0 %vm44710_vm1, %v49724_v49 }
 0x3c1   :  { %40527 = vmatpush3.bf16.msra.mxu1 %v45414_v19  ;;  %40569 = vmatpush3.bf16.msra.mxu0 %v45623_v4  ;;  %v49807_v4 = vand.u32 4294901760, %v45741_v13 }
 0x3c2   :  { %40528 = vmatprep.subr.bf16.mxu1 %v49723_v17  ;;  %40570 = vmatprep.subr.bf16.mxu0 %v49723_v17 }
 0x3c3   :  { %v3902_v15 = vsub.f32 %v45741_v13, %v49807_v4  ;;  %v49809_v4 = vand.u32 4294901760, %v45551_v29 }
 0x3c4   :  { %34644 = vmatmul.mubr.f32.vlgmr.msra.gmra.mrb[6].mxu1 %v45133_v35 }
 0x3c5   :  { %40530 = vmatpush3.bf16.msra.mxu1 %v45643_v40  ;;  %40572 = vmatpush3.bf16.msra.mxu0 %v45645_v50  ;;  %v49804_v40 = vand.u32 4294901760, %v45524_v33  ;;  %v3830_v50 = vand.u32 4294901760, %v31249_v34 }
 0x3c6   :  { %40531 = vmatprep.subr.bf16.mxu1 %v49723_v17  ;;  %40573 = vmatprep.subr.bf16.mxu0 %v49723_v17 }
 0x3c7   :  { %34662 = vmatprep.mubr.msk.f32.mxu1 %vm44710_vm1, %v49724_v49 }
 0x3c9   :  { %40533 = vmatpush3.bf16.msra.mxu1 %v45656_v8  ;;  %40575 = vmatpush3.bf16.msra.mxu0 %v45658_v7  ;;  %v31246_v8 = vld [vmem:[%s49410_s9 + $0x120] sm:$0xff]  ;;  %v3824_v7 = vand.u32 4294901760, %v31247_v38 }
 0x3ca   :  { %40534 = vmatprep.subr.bf16.mxu1 %v49723_v17  ;;  %40576 = vmatprep.subr.bf16.mxu0 %v49723_v17 }
 0x3cc   :  { %34720 = vmatmul.mubr.f32.vlgmr.msra.gmra.mrb[8].mxu0 %v45113_v41 }
 0x3cd   :  { %40536 = vmatpush3.bf16.msra.mxu1 %v45670_v39  ;;  %40578 = vmatpush3.bf16.msra.mxu0 %v45674_v53  ;;  %v3818_v39 = vand.u32 4294901760, %v31245_v27  ;;  %v3821_v53 = vand.u32 4294901760, %v31246_v8 }
 0x3ce   :  { %40537 = vmatprep.subr.bf16.mxu1 %v49723_v17  ;;  %40579 = vmatprep.subr.bf16.mxu0 %v49723_v17 }
 0x3cf   :  { %34738 = vmatprep.mubr.msk.f32.mxu0 %vm44710_vm1, %v49724_v49  ;;  %v45792_v33 = vpack.c.bf16 %v3824_v7, %v3821_v53 }
 0x3d1   :  { %40539 = vmatpush3.bf16.msra.mxu1 %v45685_v36  ;;  %40581 = vmatpush3.bf16.msra.mxu0 %v45689_v63  ;;  %v3815_v36 = vand.u32 4294901760, %v31244_v25  ;;  %49808 = vst [vmem:[#allocation74_spill] sm:$0xff] %v45792_v33 }
 0x3d2   :  { %40540 = vmatprep.subr.bf16.mxu1 %v49723_v17  ;;  %40582 = vmatprep.subr.bf16.mxu0 %v49723_v17 }
 0x3d3   :  { %v45770_v63 = vpack.c.bf16 %v3818_v39, %v3815_v36 }
 0x3d4   :  { %34663 = vmatmul.mubr.f32.vlgmr.msra.gmra.mrb[6].mxu1 %v45113_v41 }
 0x3d5   :  { %40542 = vmatpush3.bf16.msra.mxu1 %v45352_v54  ;;  %40584 = vmatpush3.bf16.msra.mxu0 %v45699_v3  ;;  %v45766_v3 = vsub.f32 %v31245_v27, %v3818_v39  ;;  %49802 = vst [vmem:[#allocation72_spill] sm:$0xff] %v45770_v63  ;;  %v3827_v27 = vand.u32 4294901760, %v31248_v24  ;;  %v49806_v39 = vand.u32 4294901760, %v45739_v23 }
 0x3d6   :  { %40543 = vmatprep.subr.bf16.mxu1 %v49723_v17  ;;  %40585 = vmatprep.subr.bf16.mxu0 %v49723_v17 }
 0x3d7   :  { %34681 = vmatprep.mubr.msk.f32.mxu1 %vm44710_vm1, %v49724_v49  ;;  %v45806_v14 = vpack.c.bf16 %v3830_v50, %v3827_v27 }
 0x3d9   :  { %40545 = vmatpush3.bf16.msra.mxu1 %v45378_v61  ;;  %40587 = vmatpush3.bf16.msra.mxu0 %v45708_v5  ;;  %v45764_v5 = vsub.f32 %v31244_v25, %v3815_v36  ;;  %v45778_v25 = vpack.c.bf16 %v49804_v40, %v49803_v47  ;;  %v3895_v36 = vsub.f32 %v45739_v23, %v49806_v39  ;;  %v49810_v39 = vand.u32 4294901760, %v45553_v16 }
 0x3da   :  { %40546 = vmatprep.subr.bf16.mxu1 %v49723_v17  ;;  %40588 = vmatprep.subr.bf16.mxu0 %v49723_v17  ;;  %v45794_v40 = vsub.f32 %v31246_v8, %v3821_v53  ;;  %v45796_v47 = vsub.f32 %v31247_v38, %v3824_v7  ;;  %49812 = vst [vmem:[#allocation76_spill] sm:$0xff] %v45806_v14  ;;  %v3903_v61 = vand.u32 4294901760, %v3902_v15  ;;  %v49814_v53 = vand.u32 4294901760, %v45766_v3 }
 0x3db   :  { %49805 = vst [vmem:[#allocation73_spill] sm:$0xff] %v45778_v25  ;;  %v49813_v8 = vand.u32 4294901760, %v45764_v5  ;;  %v49815_v15 = vand.u32 4294901760, %v45579_v12 }
 0x3dc   :  { %34739 = vmatmul.mubr.f32.vlgmr.msra.gmra.mrb[8].mxu0 %v45122_v10  ;;  %v3916_v38 = vsub.f32 %v45766_v3, %v49814_v53  ;;  %v3922_v16 = vand.u32 4294901760, %v45794_v40 }
 0x3dd   :  { %40548 = vmatpush3.bf16.msra.mxu1 %v45400_v56  ;;  %40590 = vmatpush3.bf16.msra.mxu0 %v45532_v0  ;;  %v3896_v56 = vand.u32 4294901760, %v3895_v36  ;;  %v3909_v7 = vsub.f32 %v45764_v5, %v49813_v8  ;;  %v45821_v36 = vsub.f32 %v31249_v34, %v3830_v50  ;;  %v49819_v34 = vand.u32 4294901760, %v45796_v47 }
 0x3de   :  { %40549 = vmatprep.subr.bf16.mxu1 %v49723_v17  ;;  %40591 = vmatprep.subr.bf16.mxu0 %v49723_v17  ;;  %v3923_v50 = vsub.f32 %v45794_v40, %v3922_v16 }
 0x3df   :  { %34757 = vmatprep.mubr.msk.f32.mxu0 %vm44710_vm1, %v49724_v49  ;;  %v45833_v53 = vpack.c.bf16 %v3903_v61, %v3896_v56  ;;  %v3910_v29 = vand.u32 4294901760, %v3909_v7  ;;  %v3930_v12 = vsub.f32 %v45796_v47, %v49819_v34  ;;  %v49820_v61 = vand.u32 4294901760, %v45598_v62 }
 0x3e0   :  { %v49821_v56 = vand.u32 4294901760, %v45600_v21 }
 0x3e1   :  { %40551 = vmatpush3.bf16.msra.mxu1 %v45414_v19  ;;  %40593 = vmatpush3.bf16.msra.mxu0 %v45561_v31  ;;  %v45804_v19 = vpack.c.bf16 %v49810_v39, %v49809_v4  ;;  %v45819_v4 = vsub.f32 %v31248_v24, %v3827_v27  ;;  %v49816_v39 = vand.u32 4294901760, %v45581_v58  ;;  %49818 = vst [vmem:[#allocation78_spill] sm:$0xff] %v45833_v53  ;;  %v3917_v24 = vand.u32 4294901760, %v3916_v38 }
 0x3e2   :  { %40594 = vmatprep.subr.bf16.mxu0 %v49723_v17  ;;  %40624 = vmatprep.subr.bf16.mxu1 %v49723_v17  ;;  %v49574_v27 = vand.u32 4294901760, %v45821_v36  ;;  %v45852_v7 = vpack.c.bf16 %v49821_v56, %v49820_v61  ;;  %v49572_v61 = vmov 4   ;;  %v45908_v56 = vpack.c.bf16 %v45796_v47, %v45794_v40 }
 0x3e3   :  { %49811 = vst [vmem:[#allocation75_spill] sm:$0xff] %v45804_v19  ;;  %v45831_v8 = vpack.c.bf16 %v49816_v39, %v49815_v15  ;;  %v3936_v58 = vand.u32 4294901760, %v45819_v4  ;;  %v45854_v38 = vpack.c.bf16 %v3917_v24, %v3910_v29  ;;  %v3924_v15 = vand.u32 4294901760, %v3923_v50  ;;  %44656 = vset.pattern.permute.xlu1 %v49572_v61 }
 0x3e4   :  { %34682 = vmatmul.mubr.f32.vlgmr.msra.gmra.mrb[6].mxu1 %v45113_v41  ;;  %49822 = vst [vmem:[#allocation79_spill] sm:$0xff] %v45852_v7  ;;  %v3931_v39 = vand.u32 4294901760, %v3930_v12  ;;  %v45887_v50 = vpack.c.bf16 %v45741_v13, %v45739_v23  ;;  %v45896_v12 = vpack.c.bf16 %v45766_v3, %v45764_v5  ;;  %4346 = vperm.xlu1 %44656, %v45236_v60   ;;  %49828 = vst [vmem:[#allocation85_spill] sm:$0xff] %v45908_v56 }
 0x3e5   :  { %40596 = vmatpush3.bf16.msra.mxu0 %v45577_v9  ;;  %40626 = vmatpush3.bf16.msra.mxu1 %v45745_v57  ;;  %49817 = vst [vmem:[#allocation77_spill] sm:$0xff] %v45831_v8  ;;  %49823 = vst [vmem:[#allocation80_spill] sm:$0xff] %v45854_v38  ;;  %v3937_v34 = vsub.f32 %v45819_v4, %v3936_v58  ;;  %v45917_v60 = vpack.c.bf16 %v45821_v36, %v45819_v4  ;;  %v49835_v61 = vand.u32 4294901760, %v45766_v3 }
 0x3e6   :  { %40597 = vmatprep.subr.bf16.mxu0 %v49723_v17  ;;  %40627 = vmatprep.subr.bf16.mxu1 %v49723_v17  ;;  %v45870_v62 = vpack.c.bf16 %v3931_v39, %v3924_v15  ;;  %49826 = vst [vmem:[#allocation83_spill] sm:$0xff] %v45887_v50  ;;  %49827 = vst [vmem:[#allocation84_spill] sm:$0xff] %v45896_v12  ;;  %v49829_v15 = vmov 1   ;;  %v49839_v3 = vand.u32 4294901760, %v45821_v36 }
 0x3e7   :  { %34814 = vmatprep.mubr.msk.f32.mxu1 %vm44710_vm1, %v49724_v49  ;;  %v3938_v21 = vand.u32 4294901760, %v3937_v34  ;;  %49830 = vst [vmem:[#allocation86_spill] sm:$0xff] %v45917_v60 }
 0x3e8   :  { %49824 = vst [vmem:[#allocation81_spill] sm:$0xff] %v45870_v62  ;;  %44658 = vset.pattern.permute.xlu1 %v49829_v15 }
 0x3e9   :  { %40599 = vmatpush3.bf16.msra.mxu0 %v45585_v2  ;;  %40629 = vmatpush3.bf16.msra.mxu1 %v45770_v63 }
 0x3ea   :  { %40600 = vmatprep.subr.bf16.mxu0 %v49723_v17  ;;  %40630 = vmatprep.subr.bf16.mxu1 %v49723_v17 }
 0x3ec   :  { %34758 = vmatmul.mubr.f32.vlgmr.msra.gmra.mrb[8].mxu0 %v45133_v35 }
 0x3ed   :  { %40602 = vmatpush3.bf16.msra.mxu0 %v45778_v25  ;;  %40632 = vmatpush3.bf16.msra.mxu1 %v45792_v33 }
 0x3ee   :  { %40603 = vmatprep.subr.bf16.mxu0 %v49723_v17  ;;  %40633 = vmatprep.subr.bf16.mxu1 %v49723_v17 }
 0x3ef   :  { %34776 = vmatprep.mubr.msk.f32.mxu0 %vm44710_vm1, %v49724_v49 }
 0x3f1   :  { %40605 = vmatpush3.bf16.msra.mxu0 %v45804_v19  ;;  %40635 = vmatpush3.bf16.msra.mxu1 %v45806_v14 }
 0x3f2   :  { %40606 = vmatprep.subr.bf16.mxu0 %v49723_v17  ;;  %40636 = vmatprep.subr.bf16.mxu1 %v49723_v17 }
 0x3f4   :  { %34815 = vmatmul.mubr.f32.vlgmr.msra.gmra.mrb[8].mxu1 %v45152_v30  ;;  %v3944_v30 = vsub.f32 %v45821_v36, %v49574_v27  ;;  %v2138_v36 = vsub.s32 1, %v45003_v55 }
 0x3f5   :  { %40608 = vmatpush3.bf16.msra.mxu0 %v45831_v8  ;;  %40638 = vmatpush3.bf16.msra.mxu1 %v45833_v53 }
 0x3f6   :  { %40609 = vmatprep.subr.bf16.mxu0 %v49723_v17  ;;  %40639 = vmatprep.subr.bf16.mxu1 %v49723_v17  ;;  %v3945_v29 = vand.u32 4294901760, %v3944_v30  ;;  %v49832_v30 = vand.u32 4294901760, %v45741_v13  ;;  %v49837_v13 = vand.u32 4294901760, %v45796_v47 }
 0x3f7   :  { %34833 = vmatprep.mubr.msk.f32.mxu1 %vm44710_vm1, %v49724_v49 }
 0x3f8   :  { %v45877_v24 = vpack.c.bf16 %v3945_v29, %v3938_v21  ;;  %v49834_v29 = vand.u32 4294901760, %v45764_v5  ;;  %v45969_v5 = vpack.c.bf16 %v49839_v3, %v3936_v58  ;;  %v2123_v58 = vpop.permute.xlu0 %2122 }
 0x3f9   :  { %40611 = vmatpush3.bf16.msra.mxu0 %v45852_v7  ;;  %40641 = vmatpush3.bf16.msra.mxu1 %v45854_v38 }
 0x3fa   :  { %40612 = vmatprep.subr.bf16.mxu0 %v49723_v17  ;;  %40642 = vmatprep.subr.bf16.mxu1 %v49723_v17  ;;  %49825 = vst [vmem:[#allocation82_spill] sm:$0xff] %v45877_v24  ;;  %v45951_v27 = vpack.c.bf16 %v49835_v61, %v49834_v29  ;;  %49840 = vst [vmem:[#allocation90_spill] sm:$0xff] %v45969_v5 }
 0x3fc   :  { %34777 = vmatmul.mubr.f32.vlgmr.msra.gmra.mrb[8].mxu0 %v45113_v41  ;;  %49836 = vst [vmem:[#allocation88_spill] sm:$0xff] %v45951_v27 }
 0x3fd   :  { %40614 = vmatpush3.bf16.msra.mxu0 %v45532_v0  ;;  %40644 = vmatpush3.bf16.msra.mxu1 %v45870_v62 }
 0x3fe   :  { %40615 = vmatprep.subr.bf16.mxu0 %v49723_v17  ;;  %40645 = vmatprep.subr.bf16.mxu1 %v49723_v17 }
 0x3ff   :  { %34795 = vmatprep.mubr.msk.f32.mxu0 %vm44710_vm1, %v49724_v49 }
 0x401   :  { %40617 = vmatpush3.bf16.msra.mxu0 %v45561_v31  ;;  %40647 = vmatpush3.bf16.msra.mxu1 %v45877_v24 }
 0x402   :  { %40618 = vmatprep.subr.bf16.mxu0 %v49723_v17  ;;  %40648 = vmatprep.subr.bf16.mxu1 %v49723_v17 }
 0x404   :  { %34834 = vmatmul.mubr.f32.vlgmr.msra.gmra.mrb[8].mxu1 %v45113_v41 }
 0x405   :  { %40620 = vmatpush3.bf16.msra.mxu0 %v45577_v9  ;;  %40650 = vmatpush3.bf16.msra.mxu1 %v45887_v50 }
 0x406   :  { %40621 = vmatprep.subr.bf16.mxu0 %v49723_v17  ;;  %40651 = vmatprep.subr.bf16.mxu1 %v49723_v17 }
 0x407   :  { %34852 = vmatprep.mubr.msk.f32.mxu1 %vm44710_vm1, %v49724_v49 }
 0x409   :  { %40623 = vmatpush3.bf16.msra.mxu0 %v45585_v2  ;;  %40653 = vmatpush3.bf16.msra.mxu1 %v45896_v12 }
 0x40a   :  { %40654 = vmatprep.subr.bf16.mxu1 %v49723_v17  ;;  %40696 = vmatprep.subr.bf16.mxu0 %v49723_v17 }
 0x40c   :  { %34796 = vmatmul.mubr.f32.vlgmr.msra.gmra.mrb[8].mxu0 %v45113_v41 }
 0x40d   :  { %40656 = vmatpush3.bf16.msra.mxu1 %v45908_v56  ;;  %40698 = vmatpush3.bf16.msra.mxu0 %v44821_v18 }
 0x40e   :  { %40657 = vmatprep.subr.bf16.mxu1 %v49723_v17  ;;  %40699 = vmatprep.subr.bf16.mxu0 %v49723_v17 }
 0x40f   :  { %34920 = vmatprep.mubr.msk.f32.mxu0 %vm44710_vm1, %v49724_v49 }
 0x411   :  { %40659 = vmatpush3.bf16.msra.mxu1 %v45917_v60  ;;  %40701 = vmatpush3.bf16.msra.mxu0 %v44833_v28 }
 0x412   :  { %40660 = vmatprep.subr.bf16.mxu1 %v49723_v17  ;;  %40702 = vmatprep.subr.bf16.mxu0 %v49723_v17 }
 0x414   :  { %34853 = vmatmul.mubr.f32.vlgmr.msra.gmra.mrb[8].mxu1 %v45122_v10  ;;  %v49831_v10 = vand.u32 4294901760, %v45739_v23  ;;  %v1567_v23 = vld [vmem:[%s49415_s10] sm:$0x1f] }
 0x415   :  { %40662 = vmatpush3.bf16.msra.mxu1 %v45745_v57  ;;  %34871 = vmatprep.mubr.msk.f32.mxu1 %vm44710_vm1, %v49724_v49  ;;  %v46004_v61 = vrot.slane %v1567_v23, %v2138_v36 }
 0x416   :  { %40663 = vmatprep.subr.bf16.mxu1 %v49723_v17  ;;  %v45942_v21 = vpack.c.bf16 %v49832_v30, %v49831_v10  ;;  %v2679_v10 = vpop.permute.xlu0 %2678 }
 0x418   :  { %49833 = vst [vmem:[#allocation87_spill] sm:$0xff] %v45942_v21 }
 0x419   :  { %40665 = vmatpush3.bf16.msra.mxu1 %v45770_v63 }
 0x41a   :  { %40666 = vmatprep.subr.bf16.mxu1 %v49723_v17 }
 0x41d   :  { %40668 = vmatpush3.bf16.msra.mxu1 %v45792_v33 }
 0x41e   :  { %40669 = vmatprep.subr.bf16.mxu1 %v49723_v17 }
 0x41f   :  { %v1662_v39 = vpop.f32.mrb[4].mxu0 }
 0x420   :  { %v34360_v34 = vpop.f32.mrb[5].mxu0 }
 0x421   :  { %40671 = vmatpush3.bf16.msra.mxu1 %v45806_v14 }
 0x422   :  { %40672 = vmatprep.subr.bf16.mxu1 %v49723_v17 }
 0x424   :  { %34872 = vmatmul.mubr.f32.vlgmr.msra.gmra.mrb[8].mxu1 %v45133_v35  ;;  %v45961_v35 = vpack.c.bf16 %v49837_v13, %v3922_v16 }
 0x425   :  { %40674 = vmatpush3.bf16.msra.mxu1 %v45942_v21  ;;  %34890 = vmatprep.mubr.msk.f32.mxu1 %vm44710_vm1, %v49724_v49  ;;  %v3250_v21 = vsub.s32 3, %v45003_v55 }
 0x426   :  { %40675 = vmatprep.subr.bf16.mxu1 %v49723_v17  ;;  %49838 = vst [vmem:[#allocation89_spill] sm:$0xff] %v45961_v35 }
 0x427   :  { %v46012_v60 = vrot.slane %v1567_v23, %v3250_v21 }
 0x429   :  { %40677 = vmatpush3.bf16.msra.mxu1 %v45951_v27 }
 0x42a   :  { %40678 = vmatprep.subr.bf16.mxu1 %v49723_v17 }
 0x42d   :  { %40680 = vmatpush3.bf16.msra.mxu1 %v45961_v35  ;;  %v2694_v35 = vsub.s32 2, %v45003_v55 }
 0x42e   :  { %40681 = vmatprep.subr.bf16.mxu1 %v49723_v17 }
 0x42f   :  { %v46008_v27 = vrot.slane %v1567_v23, %v2694_v35  ;;  %v3806_v35 = vsub.s32 4, %v45003_v55 }
 0x431   :  { %40683 = vmatpush3.bf16.msra.mxu1 %v45969_v5 }
 0x432   :  { %40684 = vmatprep.subr.bf16.mxu1 %v49723_v17 }
 0x434   :  { %34891 = vmatmul.mubr.f32.vlgmr.msra.gmra.mrb[8].mxu1 %v45113_v41 }
 0x435   :  { %40686 = vmatpush3.bf16.msra.mxu1 %v45745_v57  ;;  %34909 = vmatprep.mubr.msk.f32.mxu1 %vm44710_vm1, %v49724_v49 }
 0x436   :  { %40687 = vmatprep.subr.bf16.mxu1 %v49723_v17 }
 0x439   :  { %40689 = vmatpush3.bf16.msra.mxu1 %v45770_v63 }
 0x43a   :  { %40690 = vmatprep.subr.bf16.mxu1 %v49723_v17 }
 0x43d   :  { %40692 = vmatpush3.bf16.msra.mxu1 %v45792_v33 }
 0x43e   :  { %40693 = vmatprep.subr.bf16.mxu1 %v49723_v17 }
 0x441   :  { %40695 = vmatpush3.bf16.msra.mxu1 %v45806_v14 }
 0x442   :  { %40732 = vmatprep.subr.bf16.mxu1 %v49723_v17 }
 0x444   :  { %34910 = vmatmul.mubr.f32.vlgmr.msra.gmra.mrb[8].mxu1 %v45113_v41  ;;  %v45999_v41 = vrot.slane %v1567_v23, %v45009_v59 }
 0x445   :  { %40734 = vmatpush3.bf16.msra.mxu1 %v44894_v1  ;;  %34994 = vmatprep.mubr.msk.f32.mxu1 %vm44710_vm1, %v49724_v49 }
 0x446   :  { %40735 = vmatprep.subr.bf16.mxu1 %v49723_v17  ;;  %49841 = vst [vmem:[#allocation91_spill] sm:$0xff] %v45999_v41  ;;  %v1663_v40 = vadd.f32 %v1662_v39, %v45999_v41 }
 0x449   :  { %40737 = vmatpush3.bf16.msra.mxu1 %v44904_v6 }
 0x44a   :  { %40738 = vmatprep.subr.bf16.mxu1 %v49723_v17 }
 0x44d   :  { %40740 = vmatpush3.bf16.msra.mxu1 %v44914_v11 }
 0x44e   :  { %40741 = vmatprep.subr.bf16.mxu1 %v49723_v17 }
 0x451   :  { %40743 = vmatpush3.bf16.msra.mxu1 %v44924_v22 }
 0x452   :  { %40744 = vmatprep.subr.bf16.mxu1 %v49723_v17 }
 0x457   :  { %v2116_v47 = vpop.f32.mrb[4].mxu1 }
 0x458   :  { %v44013_v16 = vadd.f32 %v2116_v47, %v1663_v40  ;;  %v34455_v4 = vpop.f32.mrb[5].mxu1  ;;  %v3235_v40 = vpop.permute.xlu1 %3234 }
 0x45a   :  { %v2125_v13 = vmul.f32 %v44013_v16, %v2123_v58 }
 0x47f   :  { %v2673_v34 = vpop.f32.mrb[6].mxu0 }
 0x480   :  { %v44014_v30 = vadd.f32 %v2673_v34, %v46004_v61  ;;  %v34569_v29 = vpop.f32.mrb[7].mxu0 }
 0x481   :  { %v3791_v29 = vpop.permute.xlu1 %3790 }
 0x482   :  { %v2681_v3 = vmul.f32 %v44014_v30, %v2679_v10 }
 0x484   :  { %v2682_v5 = vadd.f32 %v2681_v3, %v2125_v13  ;;  %v46016_v13 = vrot.slane %v1567_v23, %v3806_v35 }
 0x4b7   :  { %v3229_v39 = vpop.f32.mrb[6].mxu1 }
 0x4b8   :  { %v44015_v47 = vadd.f32 %v3229_v39, %v46008_v27  ;;  %v34683_v4 = vpop.f32.mrb[7].mxu1  ;;  %v4347_v39 = vpop.permute.xlu1 %4346 }
 0x4ba   :  { %v3237_v41 = vmul.f32 %v44015_v47, %v3235_v40 }
 0x4bc   :  { %v3238_v36 = vadd.f32 %v3237_v41, %v2682_v5  ;;  %v4351_v41 = vmul.f32 2.0, %v44852_v52 }
 0x4be   :  { %v4352_v4 = vsub.f32 %v4351_v41, %v44852_v52 }
 0x4df   :  { %v3785_v34 = vpop.f32.mrb[8].mxu0 }
 0x4e0   :  { %v44016_v16 = vadd.f32 %v3785_v34, %v46012_v60  ;;  %v34797_v58 = vpop.f32.mrb[9].mxu0 }
 0x4e2   :  { %v3793_v10 = vmul.f32 %v44016_v16, %v3791_v29 }
 0x4e4   :  { %v3794_v30 = vadd.f32 %v3793_v10, %v3238_v36  ;;  %v46071_v10 = vld [vmem:[%s49411_s4] sm:$0x1] }
 0x517   :  { %v4341_v3 = vpop.f32.mrb[8].mxu1 }
 0x518   :  { %v44017_v40 = vadd.f32 %v4341_v3, %v46016_v13  ;;  %v34911_v5 = vpop.f32.mrb[9].mxu1 }
 0x51a   :  { %v4349_v21 = vmul.f32 %v44017_v40, %v4347_v39 }
 0x51c   :  { %v46020_v47 = vadd.f32 %v4349_v21, %v3794_v30  ;;  %v46076_v30 = vld [vmem:[%s49412_s6] sm:$0x1] }
 0x51d   :  { %v4356_v35 = vadd.f32 %v46076_v30, %v46071_v10 }
 0x51e   :  { %v46024_v34 = vadd.f32 %v4352_v4, %v46020_v47 }
 0x51f   :  { %v4361_v3 = vrot.slane %v4356_v35, %v45009_v59  ;;  %v49844_v35 = vld [vmem:[#allocation6_spill] sm:$0xff] }
 0x520   :  { %v4364_v55 = vsel %vm520_vm2, %v46024_v34, 0 }
 0x521   :  { %v4435_v23 = vand.u32 4294901760, %v4364_v55 }
 0x523   :  { %v4436_v36 = vsub.f32 %v4364_v55, %v4435_v23 }
 0x525   :  { %v4437_v29 = vand.u32 4294901760, %v4436_v36 }
 0x527   :  { %v4438_v16 = vsub.f32 %v4436_v36, %v4437_v29 }
 0x529   :  { %v4439_v58 = vand.u32 4294901760, %v4438_v16  ;;  %v49842_v16 = vld [vmem:[#allocation4_spill] sm:$0xff] }
 0x52b   :  { %34921 = vmatmul.mubr.f32.vlgmr.msra.gmra.mrb[10].mxu0 %v4439_v58  ;;  %v49843_v58 = vld [vmem:[#allocation5_spill] sm:$0xff] }
 0x52c   :  { %40704 = vmatpush3.bf16.msra.mxu0 %v44837_v37  ;;  %34931 = vmatprep.mubr.msk.f32.mxu0 %vm44710_vm1, %v49724_v49 }
 0x52d   :  { %40705 = vmatprep.subr.bf16.mxu0 %v49723_v17 }
 0x530   :  { %40707 = vmatpush3.bf16.msra.mxu0 %v44839_v42 }
 0x531   :  { %40708 = vmatprep.subr.bf16.mxu0 %v49723_v17 }
 0x533   :  { %34932 = vmatmul.mubr.f32.vlgmr.msra.gmra.mrb[10].mxu0 %v4435_v23 }
 0x534   :  { %40710 = vmatpush3.bf16.msra.mxu0 %v44841_v43  ;;  %34942 = vmatprep.mubr.msk.f32.mxu0 %vm44710_vm1, %v49724_v49 }
 0x535   :  { %40711 = vmatprep.subr.bf16.mxu0 %v49723_v17 }
 0x538   :  { %40713 = vmatpush3.bf16.msra.mxu0 %v44843_v44 }
 0x539   :  { %40714 = vmatprep.subr.bf16.mxu0 %v49723_v17 }
 0x53b   :  { %34943 = vmatmul.mubr.f32.vlgmr.msra.gmra.mrb[10].mxu0 %v4436_v36 }
 0x53c   :  { %40716 = vmatpush3.bf16.msra.mxu0 %v44821_v18  ;;  %34953 = vmatprep.mubr.msk.f32.mxu0 %vm44710_vm1, %v49724_v49 }
 0x53d   :  { %40717 = vmatprep.subr.bf16.mxu0 %v49723_v17 }
 0x540   :  { %40719 = vmatpush3.bf16.msra.mxu0 %v44833_v28 }
 0x541   :  { %40720 = vmatprep.subr.bf16.mxu0 %v49723_v17 }
 0x543   :  { %34954 = vmatmul.mubr.f32.vlgmr.msra.gmra.mrb[10].mxu0 %v4437_v29 }
 0x544   :  { %40722 = vmatpush3.bf16.msra.mxu0 %v44845_v45  ;;  %34964 = vmatprep.mubr.msk.f32.mxu0 %vm44710_vm1, %v49724_v49 }
 0x545   :  { %40723 = vmatprep.subr.bf16.mxu0 %v49723_v17 }
 0x548   :  { %40725 = vmatpush3.bf16.msra.mxu0 %v44847_v46 }
 0x549   :  { %40726 = vmatprep.subr.bf16.mxu0 %v49723_v17 }
 0x54b   :  { %34965 = vmatmul.mubr.f32.vlgmr.msra.gmra.mrb[10].mxu0 %v4435_v23 }
 0x54c   :  { %40728 = vmatpush3.bf16.msra.mxu0 %v44821_v18  ;;  %34975 = vmatprep.mubr.msk.f32.mxu0 %vm44710_vm1, %v49724_v49 }
 0x54d   :  { %40729 = vmatprep.subr.bf16.mxu0 %v49723_v17 }
 0x550   :  { %40731 = vmatpush3.bf16.msra.mxu0 %v44833_v28 }
 0x551   :  { %40804 = vmatprep.subr.bf16.mxu0 %v49723_v17 }
 0x553   :  { %34976 = vmatmul.mubr.f32.vlgmr.msra.gmra.mrb[10].mxu0 %v4435_v23 }
 0x554   :  { %40806 = vmatpush3.bf16.msra.mxu0 %v44964_v20  ;;  %35108 = vmatprep.mubr.msk.f32.mxu0 %vm44710_vm1, %v49724_v49 }
 0x555   :  { %40807 = vmatprep.subr.bf16.mxu0 %v49723_v17 }
 0x558   :  { %40809 = vmatpush3.bf16.msra.mxu0 %v44972_v26 }
 0x559   :  { %40810 = vmatprep.subr.bf16.mxu0 %v49723_v17 }
 0x55c   :  { %40812 = vmatpush3.bf16.msra.mxu0 %v45089_v48 }
 0x55d   :  { %40813 = vmatprep.subr.bf16.mxu0 %v49723_v17 }
 0x560   :  { %40815 = vmatpush3.bf16.msra.mxu0 %v45093_v51 }
 0x561   :  { %40816 = vmatprep.subr.bf16.mxu0 %v49723_v17 }
 0x626   :  { %v4847_v39 = vpop.f32.mrb[10].mxu0 }
 0x627   :  { %v44018_v40 = vadd.f32 %v4847_v39, %v4361_v3  ;;  %v34977_v5 = vpop.f32.mrb[11].mxu0  ;;  %v49845_v3 = vld [vmem:[#allocation7_spill] sm:$0xff]  ;;  %v49846_v39 = vld [vmem:[#allocation8_spill] sm:$0xff] }
 0x628   :  { %v49848_v5 = vld [vmem:[#allocation10_spill] sm:$0xff] }
 0x629   :  { %v4851_v41 = vmax.f32 %v44018_v40, 0.0  ;;  %v49847_v40 = vld [vmem:[#allocation9_spill] sm:$0xff] }
 0x62b   :  { %v4853_v21 = vsel %vm1025_vm3, %v4851_v41, 0  ;;  %v49849_v41 = vld [vmem:[#allocation11_spill] sm:$0xff] }
 0x62c   :  { %v4928_v4 = vand.u32 4294901760, %v4853_v21 }
 0x62e   :  { %v4929_v55 = vsub.f32 %v4853_v21, %v4928_v4  ;;  %v49850_v21 = vld [vmem:[#allocation12_spill] sm:$0xff] }
 0x630   :  { %v4930_v23 = vand.u32 4294901760, %v4929_v55 }
 0x632   :  { %v4931_v36 = vsub.f32 %v4929_v55, %v4930_v23 }
 0x634   :  { %v4932_v29 = vand.u32 4294901760, %v4931_v36  ;;  %v49852_v36 = vld [vmem:[#allocation14_spill] sm:$0xff] }
 0x636   :  { %34995 = vmatmul.mubr.f32.vlgmr.msra.gmra.mrb[10].mxu1 %v4932_v29  ;;  %v49854_v29 = vld [vmem:[#allocation26_spill] sm:$0xff] }
 0x637   :  { %40746 = vmatpush3.bf16.msra.mxu1 %v44928_v32  ;;  %35013 = vmatprep.mubr.msk.f32.mxu1 %vm44710_vm1, %v49724_v49 }
 0x638   :  { %40747 = vmatprep.subr.bf16.mxu1 %v49723_v17 }
 0x63b   :  { %40749 = vmatpush3.bf16.msra.mxu1 %v49842_v16 }
 0x63c   :  { %40750 = vmatprep.subr.bf16.mxu1 %v49723_v17 }
 0x63f   :  { %40752 = vmatpush3.bf16.msra.mxu1 %v49843_v58 }
 0x640   :  { %40753 = vmatprep.subr.bf16.mxu1 %v49723_v17 }
 0x643   :  { %40755 = vmatpush3.bf16.msra.mxu1 %v49844_v35 }
 0x644   :  { %40756 = vmatprep.subr.bf16.mxu1 %v49723_v17 }
 0x646   :  { %35014 = vmatmul.mubr.f32.vlgmr.msra.gmra.mrb[10].mxu1 %v4928_v4 }
 0x647   :  { %40758 = vmatpush3.bf16.msra.mxu1 %v49845_v3  ;;  %35032 = vmatprep.mubr.msk.f32.mxu1 %vm44710_vm1, %v49724_v49 }
 0x648   :  { %40759 = vmatprep.subr.bf16.mxu1 %v49723_v17 }
 0x64b   :  { %40761 = vmatpush3.bf16.msra.mxu1 %v49846_v39 }
 0x64c   :  { %40762 = vmatprep.subr.bf16.mxu1 %v49723_v17 }
 0x64f   :  { %40764 = vmatpush3.bf16.msra.mxu1 %v49847_v40 }
 0x650   :  { %40765 = vmatprep.subr.bf16.mxu1 %v49723_v17 }
 0x653   :  { %40767 = vmatpush3.bf16.msra.mxu1 %v49848_v5 }
 0x654   :  { %40768 = vmatprep.subr.bf16.mxu1 %v49723_v17 }
 0x656   :  { %35033 = vmatmul.mubr.f32.vlgmr.msra.gmra.mrb[10].mxu1 %v4929_v55  ;;  %v49851_v55 = vld [vmem:[#allocation13_spill] sm:$0xff] }
 0x657   :  { %40770 = vmatpush3.bf16.msra.mxu1 %v44894_v1  ;;  %35051 = vmatprep.mubr.msk.f32.mxu1 %vm44710_vm1, %v49724_v49 }
 0x658   :  { %40771 = vmatprep.subr.bf16.mxu1 %v49723_v17 }
 0x65b   :  { %40773 = vmatpush3.bf16.msra.mxu1 %v44904_v6 }
 0x65c   :  { %40774 = vmatprep.subr.bf16.mxu1 %v49723_v17 }
 0x65f   :  { %40776 = vmatpush3.bf16.msra.mxu1 %v44914_v11 }
 0x660   :  { %40777 = vmatprep.subr.bf16.mxu1 %v49723_v17 }
 0x663   :  { %40779 = vmatpush3.bf16.msra.mxu1 %v44924_v22 }
 0x664   :  { %40780 = vmatprep.subr.bf16.mxu1 %v49723_v17 }
 0x666   :  { %35052 = vmatmul.mubr.f32.vlgmr.msra.gmra.mrb[10].mxu1 %v4930_v23  ;;  %v49853_v23 = vld [vmem:[#allocation25_spill] sm:$0xff] }
 0x667   :  { %40782 = vmatpush3.bf16.msra.mxu1 %v49849_v41  ;;  %35070 = vmatprep.mubr.msk.f32.mxu1 %vm44710_vm1, %v49724_v49 }
 0x668   :  { %40783 = vmatprep.subr.bf16.mxu1 %v49723_v17 }
 0x66b   :  { %40785 = vmatpush3.bf16.msra.mxu1 %v49850_v21  ;;  %v46145_v21 = vld [vmem:[%s49413_s8] ss:$0 sm:$0xff] }
 0x66c   :  { %40786 = vmatprep.subr.bf16.mxu1 %v49723_v17  ;;  %49857 = vst [vmem:[#allocation25_spill] sm:$0xff] %v46145_v21 }
 0x66f   :  { %40788 = vmatpush3.bf16.msra.mxu1 %v49851_v55  ;;  %v49856_v55 = vld [vmem:[#allocation28_spill] sm:$0xff] }
 0x670   :  { %40789 = vmatprep.subr.bf16.mxu1 %v49723_v17 }
 0x673   :  { %40791 = vmatpush3.bf16.msra.mxu1 %v49852_v36  ;;  %v49855_v36 = vld [vmem:[#allocation27_spill] sm:$0xff] }
 0x674   :  { %40792 = vmatprep.subr.bf16.mxu1 %v49723_v17 }
 0x676   :  { %35071 = vmatmul.mubr.f32.vlgmr.msra.gmra.mrb[10].mxu1 %v4928_v4 }
 0x677   :  { %40794 = vmatpush3.bf16.msra.mxu1 %v44894_v1  ;;  %35089 = vmatprep.mubr.msk.f32.mxu1 %vm44710_vm1, %v49724_v49 }
 0x678   :  { %40795 = vmatprep.subr.bf16.mxu1 %v49723_v17 }
 0x67b   :  { %40797 = vmatpush3.bf16.msra.mxu1 %v44904_v6 }
 0x67c   :  { %40798 = vmatprep.subr.bf16.mxu1 %v49723_v17 }
 0x67f   :  { %40800 = vmatpush3.bf16.msra.mxu1 %v44914_v11 }
 0x680   :  { %40801 = vmatprep.subr.bf16.mxu1 %v49723_v17 }
 0x683   :  { %40803 = vmatpush3.bf16.msra.mxu1 %v44924_v22 }
 0x684   :  { %40876 = vmatprep.subr.bf16.mxu1 %v49723_v17 }
 0x686   :  { %35090 = vmatmul.mubr.f32.vlgmr.msra.gmra.mrb[10].mxu1 %v4928_v4 }
 0x687   :  { %40878 = vmatpush3.bf16.msra.mxu1 %v49853_v23  ;;  %35222 = vmatprep.mubr.msk.f32.mxu1 %vm44710_vm1, %v49724_v49 }
 0x688   :  { %40879 = vmatprep.subr.bf16.mxu1 %v49723_v17 }
 0x68b   :  { %40881 = vmatpush3.bf16.msra.mxu1 %v49854_v29 }
 0x68c   :  { %40882 = vmatprep.subr.bf16.mxu1 %v49723_v17 }
 0x68f   :  { %40884 = vmatpush3.bf16.msra.mxu1 %v49855_v36 }
 0x690   :  { %40885 = vmatprep.subr.bf16.mxu1 %v49723_v17 }
 0x693   :  { %40887 = vmatpush3.bf16.msra.mxu1 %v49856_v55 }
 0x694   :  { %40888 = vmatprep.subr.bf16.mxu1 %v49723_v17 }
 0x759   :  { %v5388_v4 = vpop.f32.mrb[10].mxu1 }
 0x75a   :  { %v44019_v41 = vadd.f32 %v46145_v21, %v5388_v4  ;;  %v35091_v5 = vpop.f32.mrb[11].mxu1  ;;  %v49863_v4 = vld [vmem:[#allocation32_spill] sm:$0xff]  ;;  %v49895_v21 = vld [vmem:[#allocation50_spill] sm:$0xff] }
 0x75b   :  { %v49858_v5 = vld [vmem:[#allocation15_spill] sm:$0xff] }
 0x75c   :  { %v5392_v40 = vmax.f32 %v44019_v41, 0.0  ;;  %v49862_v41 = vld [vmem:[#allocation17_spill] sm:$0xff] }
 0x75e   :  { %v5394_v39 = vsel %vm1025_vm3, %v5392_v40, 0  ;;  %v49859_v40 = vld [vmem:[#allocation29_spill] sm:$0xff] }
 0x75f   :  { %v46149_v3 = vand.u32 4294901760, %v5394_v39 }
 0x761   :  { %v46152_v35 = vsub.f32 %v5394_v39, %v46149_v3  ;;  %v49861_v39 = vld [vmem:[#allocation30_spill] sm:$0xff] }
 0x763   :  { %v46155_v58 = vand.u32 4294901760, %v46152_v35 }
 0x765   :  { %v5472_v16 = vsub.f32 %v46152_v35, %v46155_v58 }
 0x767   :  { %v46159_v32 = vand.u32 4294901760, %v5472_v16  ;;  %v49860_v16 = vld [vmem:[#allocation16_spill] sm:$0xff] }
 0x769   :  { %35109 = vmatmul.mubr.f32.vlgmr.msra.gmra.mrb[12].mxu0 %v46159_v32  ;;  %35223 = vmatmul.mubr.f32.vlgmr.msra.gmra.mrb[12].mxu1 %v46159_v32 }
 0x76a   :  { %40818 = vmatpush3.bf16.msra.mxu0 %v49858_v5  ;;  %40890 = vmatpush3.bf16.msra.mxu1 %v49859_v40  ;;  %v49864_v40 = vld [vmem:[#allocation18_spill] sm:$0xff] }
 0x76b   :  { %40819 = vmatprep.subr.bf16.mxu0 %v49723_v17  ;;  %40891 = vmatprep.subr.bf16.mxu1 %v49723_v17  ;;  %v49865_v5 = vld [vmem:[#allocation34_spill] sm:$0xff] }
 0x76c   :  { %35127 = vmatprep.mubr.msk.f32.mxu0 %vm44710_vm1, %v49724_v49  ;;  %35241 = vmatprep.mubr.msk.f32.mxu1 %vm44710_vm1, %v49724_v49 }
 0x76e   :  { %40821 = vmatpush3.bf16.msra.mxu0 %v49860_v16  ;;  %40893 = vmatpush3.bf16.msra.mxu1 %v49861_v39  ;;  %v49866_v39 = vld [vmem:[#allocation23_spill] sm:$0xff]  ;;  %v49873_v16 = vld [vmem:[#allocation38_spill] sm:$0xff] }
 0x76f   :  { %40822 = vmatprep.subr.bf16.mxu0 %v49723_v17  ;;  %40894 = vmatprep.subr.bf16.mxu1 %v49723_v17 }
 0x772   :  { %40824 = vmatpush3.bf16.msra.mxu0 %v49862_v41  ;;  %40896 = vmatpush3.bf16.msra.mxu1 %v49863_v4  ;;  %v49867_v41 = vld [vmem:[#allocation35_spill] sm:$0xff]  ;;  %v49872_v4 = vld [vmem:[#allocation20_spill] sm:$0xff] }
 0x773   :  { %40825 = vmatprep.subr.bf16.mxu0 %v49723_v17  ;;  %40897 = vmatprep.subr.bf16.mxu1 %v49723_v17 }
 0x776   :  { %40827 = vmatpush3.bf16.msra.mxu0 %v49864_v40  ;;  %40899 = vmatpush3.bf16.msra.mxu1 %v49865_v5  ;;  %v49868_v5 = vld [vmem:[#allocation24_spill] sm:$0xff] }
 0x777   :  { %40828 = vmatprep.subr.bf16.mxu0 %v49723_v17  ;;  %40900 = vmatprep.subr.bf16.mxu1 %v49723_v17  ;;  %v49869_v40 = vld [vmem:[#allocation36_spill] sm:$0xff] }
 0x779   :  { %35128 = vmatmul.mubr.f32.vlgmr.msra.gmra.mrb[12].mxu0 %v46149_v3  ;;  %35242 = vmatmul.mubr.f32.vlgmr.msra.gmra.mrb[12].mxu1 %v46149_v3 }
 0x77a   :  { %40830 = vmatpush3.bf16.msra.mxu0 %v49866_v39  ;;  %40902 = vmatpush3.bf16.msra.mxu1 %v49867_v41  ;;  %v49870_v39 = vld [vmem:[#allocation19_spill] sm:$0xff]  ;;  %v49871_v41 = vld [vmem:[#allocation37_spill] sm:$0xff] }
 0x77b   :  { %40831 = vmatprep.subr.bf16.mxu0 %v49723_v17  ;;  %40903 = vmatprep.subr.bf16.mxu1 %v49723_v17 }
 0x77c   :  { %35146 = vmatprep.mubr.msk.f32.mxu0 %vm44710_vm1, %v49724_v49  ;;  %35260 = vmatprep.mubr.msk.f32.mxu1 %vm44710_vm1, %v49724_v49 }
 0x77e   :  { %40833 = vmatpush3.bf16.msra.mxu0 %v49868_v5  ;;  %40905 = vmatpush3.bf16.msra.mxu1 %v49869_v40  ;;  %v49877_v40 = vld [vmem:[#allocation41_spill] sm:$0xff]  ;;  %v49880_v5 = vld [vmem:[#allocation43_spill] sm:$0xff] }
 0x77f   :  { %40834 = vmatprep.subr.bf16.mxu0 %v49723_v17  ;;  %40906 = vmatprep.subr.bf16.mxu1 %v49723_v17 }
 0x782   :  { %40836 = vmatpush3.bf16.msra.mxu0 %v49870_v39  ;;  %40908 = vmatpush3.bf16.msra.mxu1 %v49871_v41  ;;  %v49875_v41 = vmov 3   ;;  %v49876_v39 = vld [vmem:[#allocation31_spill] sm:$0xff] }
 0x783   :  { %40837 = vmatprep.subr.bf16.mxu0 %v49723_v17  ;;  %40909 = vmatprep.subr.bf16.mxu1 %v49723_v17 }
 0x786   :  { %40839 = vmatpush3.bf16.msra.mxu0 %v49872_v4  ;;  %40911 = vmatpush3.bf16.msra.mxu1 %v49873_v16  ;;  %v31250_v16 = vld [vmem:[%s49414_s1 + $0x8] sm:$0xff]  ;;  %v49874_v4 = vmov 2  }
 0x787   :  { %40840 = vmatprep.subr.bf16.mxu0 %v49723_v17  ;;  %40912 = vmatprep.subr.bf16.mxu1 %v49723_v17 }
 0x788   :  { %6478 = vperm.xlu1 %44658, %v31250_v16   ;;  %5935 = vperm.xlu0 %44657, %v31250_v16  }
 0x789   :  { %35147 = vmatmul.mubr.f32.vlgmr.msra.gmra.mrb[12].mxu0 %v46152_v35  ;;  %35261 = vmatmul.mubr.f32.vlgmr.msra.gmra.mrb[12].mxu1 %v46152_v35 }
 0x78a   :  { %40842 = vmatpush3.bf16.msra.mxu0 %v44964_v20  ;;  %40914 = vmatpush3.bf16.msra.mxu1 %v49853_v23 }
 0x78b   :  { %40843 = vmatprep.subr.bf16.mxu0 %v49723_v17  ;;  %40915 = vmatprep.subr.bf16.mxu1 %v49723_v17 }
 0x78c   :  { %35165 = vmatprep.mubr.msk.f32.mxu0 %vm44710_vm1, %v49724_v49  ;;  %35279 = vmatprep.mubr.msk.f32.mxu1 %vm44710_vm1, %v49724_v49 }
 0x78d   :  { %44659 = vset.pattern.permute.xlu1 %v49874_v4  ;;  %44660 = vset.pattern.permute.xlu0 %v49875_v41  ;;  %v49878_v41 = vmov 4   ;;  %v49879_v4 = vld [vmem:[#allocation33_spill] sm:$0xff] }
 0x78e   :  { %40845 = vmatpush3.bf16.msra.mxu0 %v44972_v26  ;;  %40917 = vmatpush3.bf16.msra.mxu1 %v49854_v29 }
 0x78f   :  { %40846 = vmatprep.subr.bf16.mxu0 %v49723_v17  ;;  %40918 = vmatprep.subr.bf16.mxu1 %v49723_v17 }
 0x790   :  { %7021 = vperm.xlu1 %44659, %v31250_v16   ;;  %7564 = vperm.xlu0 %44660, %v31250_v16  }
 0x792   :  { %40848 = vmatpush3.bf16.msra.mxu0 %v45089_v48  ;;  %40920 = vmatpush3.bf16.msra.mxu1 %v49855_v36 }
 0x793   :  { %40849 = vmatprep.subr.bf16.mxu0 %v49723_v17  ;;  %40921 = vmatprep.subr.bf16.mxu1 %v49723_v17 }
 0x794   :  { %44661 = vset.pattern.permute.xlu1 %v49878_v41  ;;  %44663 = vset.pattern.permute.xlu0 %v49829_v15  ;;  %v49883_v41 = vmov 0   ;;  %v49884_v15 = vld [vmem:[#allocation22_spill] sm:$0xff] }
 0x795   :  { %8107 = vperm.xlu1 %44661, %v31250_v16   ;;  %v49886_v16 = vld [vmem:[#allocation40_spill] sm:$0xff] }
 0x796   :  { %40851 = vmatpush3.bf16.msra.mxu0 %v45093_v51  ;;  %40923 = vmatpush3.bf16.msra.mxu1 %v49856_v55 }
 0x797   :  { %40852 = vmatprep.subr.bf16.mxu0 %v49723_v17  ;;  %40924 = vmatprep.subr.bf16.mxu1 %v49723_v17 }
 0x799   :  { %35166 = vmatmul.mubr.f32.vlgmr.msra.gmra.mrb[12].mxu0 %v46155_v58  ;;  %35280 = vmatmul.mubr.f32.vlgmr.msra.gmra.mrb[12].mxu1 %v46155_v58 }
 0x79a   :  { %40854 = vmatpush3.bf16.msra.mxu0 %v49876_v39  ;;  %40926 = vmatpush3.bf16.msra.mxu1 %v49877_v40  ;;  %v49881_v40 = vld [vmem:[#allocation21_spill] sm:$0xff] }
 0x79b   :  { %40855 = vmatprep.subr.bf16.mxu0 %v49723_v17  ;;  %40927 = vmatprep.subr.bf16.mxu1 %v49723_v17  ;;  %v49882_v39 = vld [vmem:[#allocation45_spill] sm:$0xff] }
 0x79c   :  { %35184 = vmatprep.mubr.msk.f32.mxu0 %vm44710_vm1, %v49724_v49  ;;  %35298 = vmatprep.mubr.msk.f32.mxu1 %vm44710_vm1, %v49724_v49 }
 0x79d   :  { %44662 = vset.pattern.permute.xlu1 %v49883_v41  ;;  %v49889_v41 = vld [vmem:[#allocation46_spill] sm:$0xff] }
 0x79e   :  { %40857 = vmatpush3.bf16.msra.mxu0 %v49879_v4  ;;  %40929 = vmatpush3.bf16.msra.mxu1 %v49880_v5  ;;  %v49885_v4 = vld [vmem:[#allocation47_spill] sm:$0xff]  ;;  %v49892_v5 = vld [vmem:[#allocation60_spill] sm:$0xff] }
 0x79f   :  { %40858 = vmatprep.subr.bf16.mxu0 %v49723_v17  ;;  %40930 = vmatprep.subr.bf16.mxu1 %v49723_v17 }
 0x7a2   :  { %40860 = vmatpush3.bf16.msra.mxu0 %v49881_v40  ;;  %40932 = vmatpush3.bf16.msra.mxu1 %v49882_v39  ;;  %v49890_v39 = vld [vmem:[#allocation59_spill] sm:$0xff]  ;;  %v49891_v40 = vld [vmem:[#allocation48_spill] sm:$0xff] }
 0x7a3   :  { %40861 = vmatprep.subr.bf16.mxu0 %v49723_v17  ;;  %40933 = vmatprep.subr.bf16.mxu1 %v49723_v17 }
 0x7a6   :  { %40863 = vmatpush3.bf16.msra.mxu0 %v49884_v15  ;;  %40935 = vmatpush3.bf16.msra.mxu1 %v49885_v4  ;;  %v49887_v4 = vld [vmem:[#allocation42_spill] sm:$0xff]  ;;  %v49888_v15 = vld [vmem:[#allocation44_spill] sm:$0xff] }
 0x7a7   :  { %40864 = vmatprep.subr.bf16.mxu0 %v49723_v17  ;;  %40936 = vmatprep.subr.bf16.mxu1 %v49723_v17 }
 0x7a9   :  { %35185 = vmatmul.mubr.f32.vlgmr.msra.gmra.mrb[12].mxu0 %v46149_v3  ;;  %35299 = vmatmul.mubr.f32.vlgmr.msra.gmra.mrb[12].mxu1 %v46149_v3 }
 0x7aa   :  { %40866 = vmatpush3.bf16.msra.mxu0 %v44964_v20  ;;  %40938 = vmatpush3.bf16.msra.mxu1 %v49853_v23 }
 0x7ab   :  { %40867 = vmatprep.subr.bf16.mxu0 %v49723_v17  ;;  %40939 = vmatprep.subr.bf16.mxu1 %v49723_v17 }
 0x7ac   :  { %35203 = vmatprep.mubr.msk.f32.mxu0 %vm44710_vm1, %v49724_v49  ;;  %35317 = vmatprep.mubr.msk.f32.mxu1 %vm44710_vm1, %v49724_v49 }
 0x7ae   :  { %40869 = vmatpush3.bf16.msra.mxu0 %v44972_v26  ;;  %40941 = vmatpush3.bf16.msra.mxu1 %v49854_v29 }
 0x7af   :  { %40870 = vmatprep.subr.bf16.mxu0 %v49723_v17  ;;  %40942 = vmatprep.subr.bf16.mxu1 %v49723_v17 }
 0x7b2   :  { %40872 = vmatpush3.bf16.msra.mxu0 %v45089_v48  ;;  %40944 = vmatpush3.bf16.msra.mxu1 %v49855_v36 }
 0x7b3   :  { %40873 = vmatprep.subr.bf16.mxu0 %v49723_v17  ;;  %40945 = vmatprep.subr.bf16.mxu1 %v49723_v17 }
 0x7b6   :  { %40875 = vmatpush3.bf16.msra.mxu0 %v45093_v51  ;;  %40947 = vmatpush3.bf16.msra.mxu1 %v49856_v55  ;;  %v49896_v55 = vld [vmem:[#allocation64_spill] sm:$0xff] }
 0x7b7   :  { %40948 = vmatprep.subr.bf16.mxu0 %v49723_v17  ;;  %41020 = vmatprep.subr.bf16.mxu1 %v49723_v17 }
 0x7b9   :  { %35204 = vmatmul.mubr.f32.vlgmr.msra.gmra.mrb[12].mxu0 %v46149_v3  ;;  %35318 = vmatmul.mubr.f32.vlgmr.msra.gmra.mrb[12].mxu1 %v46149_v3 }
 0x7ba   :  { %40950 = vmatpush3.bf16.msra.mxu0 %v45352_v54  ;;  %41022 = vmatpush3.bf16.msra.mxu1 %v45532_v0 }
 0x7bb   :  { %40951 = vmatprep.subr.bf16.mxu0 %v49723_v17  ;;  %41023 = vmatprep.subr.bf16.mxu1 %v49723_v17 }
 0x7bc   :  { %35336 = vmatprep.mubr.msk.f32.mxu0 %vm44710_vm1, %v49724_v49  ;;  %35450 = vmatprep.mubr.msk.f32.mxu1 %vm44710_vm1, %v49724_v49 }
 0x7be   :  { %40953 = vmatpush3.bf16.msra.mxu0 %v49886_v16  ;;  %41025 = vmatpush3.bf16.msra.mxu1 %v45561_v31 }
 0x7bf   :  { %40954 = vmatprep.subr.bf16.mxu0 %v49723_v17  ;;  %41026 = vmatprep.subr.bf16.mxu1 %v49723_v17 }
 0x7c2   :  { %40956 = vmatpush3.bf16.msra.mxu0 %v49887_v4  ;;  %41028 = vmatpush3.bf16.msra.mxu1 %v45577_v9 }
 0x7c3   :  { %40957 = vmatprep.subr.bf16.mxu0 %v49723_v17  ;;  %41029 = vmatprep.subr.bf16.mxu1 %v49723_v17 }
 0x7c6   :  { %40959 = vmatpush3.bf16.msra.mxu0 %v49888_v15  ;;  %41031 = vmatpush3.bf16.msra.mxu1 %v45585_v2 }
 0x7c7   :  { %40960 = vmatprep.subr.bf16.mxu0 %v49723_v17  ;;  %41032 = vmatprep.subr.bf16.mxu1 %v49723_v17 }
 0x7c9   :  { %35337 = vmatmul.mubr.f32.vlgmr.msra.gmra.mrb[14].mxu0 %v46159_v32  ;;  %35451 = vmatmul.mubr.f32.vlgmr.msra.gmra.mrb[14].mxu1 %v46159_v32 }
 0x7ca   :  { %40962 = vmatpush3.bf16.msra.mxu0 %v49889_v41  ;;  %41034 = vmatpush3.bf16.msra.mxu1 %v49890_v39  ;;  %v49893_v41 = vld [vmem:[#allocation49_spill] sm:$0xff]  ;;  %v49894_v39 = vld [vmem:[#allocation62_spill] sm:$0xff] }
 0x7cb   :  { %40963 = vmatprep.subr.bf16.mxu0 %v49723_v17  ;;  %41035 = vmatprep.subr.bf16.mxu1 %v49723_v17 }
 0x7cc   :  { %35355 = vmatprep.mubr.msk.f32.mxu0 %vm44710_vm1, %v49724_v49  ;;  %35469 = vmatprep.mubr.msk.f32.mxu1 %vm44710_vm1, %v49724_v49 }
 0x7ce   :  { %40965 = vmatpush3.bf16.msra.mxu0 %v49891_v40  ;;  %41037 = vmatpush3.bf16.msra.mxu1 %v49892_v5  ;;  %v49897_v5 = vld [vmem:[#allocation51_spill] sm:$0xff]  ;;  %v49904_v40 = vld [vmem:[#allocation70_spill] sm:$0xff] }
 0x7cf   :  { %40966 = vmatprep.subr.bf16.mxu0 %v49723_v17  ;;  %41038 = vmatprep.subr.bf16.mxu1 %v49723_v17 }
 0x7d2   :  { %40968 = vmatpush3.bf16.msra.mxu0 %v49893_v41  ;;  %41040 = vmatpush3.bf16.msra.mxu1 %v49894_v39  ;;  %v49898_v41 = vld [vmem:[#allocation66_spill] sm:$0xff]  ;;  %v49903_v39 = vld [vmem:[#allocation55_spill] sm:$0xff] }
 0x7d3   :  { %40969 = vmatprep.subr.bf16.mxu0 %v49723_v17  ;;  %41041 = vmatprep.subr.bf16.mxu1 %v49723_v17 }
 0x7d6   :  { %40971 = vmatpush3.bf16.msra.mxu0 %v49895_v21  ;;  %41043 = vmatpush3.bf16.msra.mxu1 %v49896_v55  ;;  %v49899_v55 = vld [vmem:[#allocation52_spill] sm:$0xff] }
 0x7d7   :  { %40972 = vmatprep.subr.bf16.mxu0 %v49723_v17  ;;  %41044 = vmatprep.subr.bf16.mxu1 %v49723_v17  ;;  %v49900_v21 = vld [vmem:[#allocation68_spill] sm:$0xff] }
 0x7d9   :  { %35356 = vmatmul.mubr.f32.vlgmr.msra.gmra.mrb[14].mxu0 %v46149_v3  ;;  %35470 = vmatmul.mubr.f32.vlgmr.msra.gmra.mrb[14].mxu1 %v46149_v3 }
 0x7da   :  { %40974 = vmatpush3.bf16.msra.mxu0 %v49897_v5  ;;  %41046 = vmatpush3.bf16.msra.mxu1 %v49898_v41  ;;  %v49901_v5 = vld [vmem:[#allocation53_spill] sm:$0xff] }
 0x7db   :  { %40975 = vmatprep.subr.bf16.mxu0 %v49723_v17  ;;  %41047 = vmatprep.subr.bf16.mxu1 %v49723_v17  ;;  %v49902_v41 = vld [vmem:[#allocation69_spill] sm:$0xff] }
 0x7dc   :  { %35374 = vmatprep.mubr.msk.f32.mxu0 %vm44710_vm1, %v49724_v49  ;;  %35488 = vmatprep.mubr.msk.f32.mxu1 %vm44710_vm1, %v49724_v49 }
 0x7de   :  { %40977 = vmatpush3.bf16.msra.mxu0 %v49899_v55  ;;  %41049 = vmatpush3.bf16.msra.mxu1 %v49900_v21 }
 0x7df   :  { %40978 = vmatprep.subr.bf16.mxu0 %v49723_v17  ;;  %41050 = vmatprep.subr.bf16.mxu1 %v49723_v17 }
 0x7e2   :  { %40980 = vmatpush3.bf16.msra.mxu0 %v49901_v5  ;;  %41052 = vmatpush3.bf16.msra.mxu1 %v49902_v41 }
 0x7e3   :  { %40981 = vmatprep.subr.bf16.mxu0 %v49723_v17  ;;  %41053 = vmatprep.subr.bf16.mxu1 %v49723_v17 }
 0x7e6   :  { %40983 = vmatpush3.bf16.msra.mxu0 %v49903_v39  ;;  %41055 = vmatpush3.bf16.msra.mxu1 %v49904_v40  ;;  %v49905_v40 = vld [vmem:[#allocation61_spill] sm:$0xff]  ;;  %v49906_v39 = vld [vmem:[#allocation63_spill] sm:$0xff] }
 0x7e7   :  { %40984 = vmatprep.subr.bf16.mxu0 %v49723_v17  ;;  %41056 = vmatprep.subr.bf16.mxu1 %v49723_v17 }
 0x7e9   :  { %35375 = vmatmul.mubr.f32.vlgmr.msra.gmra.mrb[14].mxu0 %v46152_v35  ;;  %35489 = vmatmul.mubr.f32.vlgmr.msra.gmra.mrb[14].mxu1 %v46152_v35 }
 0x7ea   :  { %40986 = vmatpush3.bf16.msra.mxu0 %v45352_v54  ;;  %41058 = vmatpush3.bf16.msra.mxu1 %v45532_v0 }
 0x7eb   :  { %40987 = vmatprep.subr.bf16.mxu0 %v49723_v17  ;;  %41059 = vmatprep.subr.bf16.mxu1 %v49723_v17 }
 0x7ec   :  { %35393 = vmatprep.mubr.msk.f32.mxu0 %vm44710_vm1, %v49724_v49  ;;  %35507 = vmatprep.mubr.msk.f32.mxu1 %vm44710_vm1, %v49724_v49 }
 0x7ee   :  { %40989 = vmatpush3.bf16.msra.mxu0 %v49886_v16  ;;  %41061 = vmatpush3.bf16.msra.mxu1 %v45561_v31 }
 0x7ef   :  { %40990 = vmatprep.subr.bf16.mxu0 %v49723_v17  ;;  %41062 = vmatprep.subr.bf16.mxu1 %v49723_v17 }
 0x7f2   :  { %40992 = vmatpush3.bf16.msra.mxu0 %v49887_v4  ;;  %41064 = vmatpush3.bf16.msra.mxu1 %v45577_v9 }
 0x7f3   :  { %40993 = vmatprep.subr.bf16.mxu0 %v49723_v17  ;;  %41065 = vmatprep.subr.bf16.mxu1 %v49723_v17 }
 0x7f6   :  { %40995 = vmatpush3.bf16.msra.mxu0 %v49888_v15  ;;  %41067 = vmatpush3.bf16.msra.mxu1 %v45585_v2 }
 0x7f7   :  { %40996 = vmatprep.subr.bf16.mxu0 %v49723_v17  ;;  %41068 = vmatprep.subr.bf16.mxu1 %v49723_v17 }
 0x7f9   :  { %35394 = vmatmul.mubr.f32.vlgmr.msra.gmra.mrb[14].mxu0 %v46155_v58  ;;  %35508 = vmatmul.mubr.f32.vlgmr.msra.gmra.mrb[14].mxu1 %v46155_v58 }
 0x7fa   :  { %40998 = vmatpush3.bf16.msra.mxu0 %v49905_v40  ;;  %41070 = vmatpush3.bf16.msra.mxu1 %v45778_v25  ;;  %v49907_v40 = vld [vmem:[#allocation65_spill] sm:$0xff]  ;;  %v49908_v25 = vld [vmem:[#allocation67_spill] sm:$0xff] }
 0x7fb   :  { %40999 = vmatprep.subr.bf16.mxu0 %v49723_v17  ;;  %41071 = vmatprep.subr.bf16.mxu1 %v49723_v17 }
 0x7fc   :  { %35412 = vmatprep.mubr.msk.f32.mxu0 %vm44710_vm1, %v49724_v49  ;;  %35526 = vmatprep.mubr.msk.f32.mxu1 %vm44710_vm1, %v49724_v49 }
 0x7fe   :  { %41001 = vmatpush3.bf16.msra.mxu0 %v49906_v39  ;;  %41073 = vmatpush3.bf16.msra.mxu1 %v45804_v19 }
 0x7ff   :  { %41002 = vmatprep.subr.bf16.mxu0 %v49723_v17  ;;  %41074 = vmatprep.subr.bf16.mxu1 %v49723_v17 }
 0x802   :  { %41004 = vmatpush3.bf16.msra.mxu0 %v49907_v40  ;;  %41076 = vmatpush3.bf16.msra.mxu1 %v45831_v8 }
 0x803   :  { %41005 = vmatprep.subr.bf16.mxu0 %v49723_v17  ;;  %41077 = vmatprep.subr.bf16.mxu1 %v49723_v17 }
 0x806   :  { %41007 = vmatpush3.bf16.msra.mxu0 %v49908_v25  ;;  %41079 = vmatpush3.bf16.msra.mxu1 %v45852_v7 }
 0x807   :  { %41008 = vmatprep.subr.bf16.mxu0 %v49723_v17  ;;  %41080 = vmatprep.subr.bf16.mxu1 %v49723_v17 }
 0x809   :  { %35413 = vmatmul.mubr.f32.vlgmr.msra.gmra.mrb[14].mxu0 %v46149_v3  ;;  %35527 = vmatmul.mubr.f32.vlgmr.msra.gmra.mrb[14].mxu1 %v46149_v3 }
 0x80a   :  { %41010 = vmatpush3.bf16.msra.mxu0 %v45352_v54  ;;  %41082 = vmatpush3.bf16.msra.mxu1 %v45532_v0 }
 0x80b   :  { %41011 = vmatprep.subr.bf16.mxu0 %v49723_v17  ;;  %41083 = vmatprep.subr.bf16.mxu1 %v49723_v17 }
 0x80c   :  { %35431 = vmatprep.mubr.msk.f32.mxu0 %vm44710_vm1, %v49724_v49  ;;  %35545 = vmatprep.mubr.msk.f32.mxu1 %vm44710_vm1, %v49724_v49 }
 0x80e   :  { %41013 = vmatpush3.bf16.msra.mxu0 %v49886_v16  ;;  %41085 = vmatpush3.bf16.msra.mxu1 %v45561_v31 }
 0x80f   :  { %41014 = vmatprep.subr.bf16.mxu0 %v49723_v17  ;;  %41086 = vmatprep.subr.bf16.mxu1 %v49723_v17 }
 0x812   :  { %41016 = vmatpush3.bf16.msra.mxu0 %v49887_v4  ;;  %41088 = vmatpush3.bf16.msra.mxu1 %v45577_v9 }
 0x813   :  { %41017 = vmatprep.subr.bf16.mxu0 %v49723_v17  ;;  %41089 = vmatprep.subr.bf16.mxu1 %v49723_v17 }
 0x816   :  { %41019 = vmatpush3.bf16.msra.mxu0 %v49888_v15  ;;  %41091 = vmatpush3.bf16.msra.mxu1 %v45585_v2 }
 0x817   :  { %41092 = vmatprep.subr.bf16.mxu0 %v49723_v17  ;;  %41164 = vmatprep.subr.bf16.mxu1 %v49723_v17 }
 0x819   :  { %35432 = vmatmul.mubr.f32.vlgmr.msra.gmra.mrb[14].mxu0 %v46149_v3  ;;  %35546 = vmatmul.mubr.f32.vlgmr.msra.gmra.mrb[14].mxu1 %v46149_v3 }
 0x81a   :  { %41094 = vmatpush3.bf16.msra.mxu0 %v45745_v57  ;;  %35564 = vmatprep.mubr.msk.f32.mxu0 %vm44710_vm1, %v49724_v49 }
 0x81b   :  { %41095 = vmatprep.subr.bf16.mxu0 %v49723_v17  ;;  %41166 = vmatpush3.bf16.msra.mxu1 %v44821_v18 }
 0x81c   :  { %41167 = vmatprep.subr.bf16.mxu1 %v49723_v17  ;;  %35670 = vmatprep.mubr.msk.f32.mxu1 %vm44710_vm1, %v49724_v49 }
 0x81e   :  { %41097 = vmatpush3.bf16.msra.mxu0 %v45770_v63 }
 0x81f   :  { %41098 = vmatprep.subr.bf16.mxu0 %v49723_v17  ;;  %41169 = vmatpush3.bf16.msra.mxu1 %v44833_v28 }
 0x820   :  { %41170 = vmatprep.subr.bf16.mxu1 %v49723_v17 }
 0x822   :  { %41100 = vmatpush3.bf16.msra.mxu0 %v45792_v33 }
 0x823   :  { %41101 = vmatprep.subr.bf16.mxu0 %v49723_v17 }
 0x826   :  { %41103 = vmatpush3.bf16.msra.mxu0 %v45806_v14 }
 0x827   :  { %41104 = vmatprep.subr.bf16.mxu0 %v49723_v17 }
 0x829   :  { %35565 = vmatmul.mubr.f32.vlgmr.msra.gmra.mrb[16].mxu0 %v46159_v32  ;;  %v49909_v32 = vld [vmem:[#allocation86_spill] sm:$0xff] }
 0x82a   :  { %41106 = vmatpush3.bf16.msra.mxu0 %v45833_v53  ;;  %35583 = vmatprep.mubr.msk.f32.mxu0 %vm44710_vm1, %v49724_v49 }
 0x82b   :  { %41107 = vmatprep.subr.bf16.mxu0 %v49723_v17 }
 0x82e   :  { %41109 = vmatpush3.bf16.msra.mxu0 %v45854_v38 }
 0x82f   :  { %41110 = vmatprep.subr.bf16.mxu0 %v49723_v17 }
 0x832   :  { %41112 = vmatpush3.bf16.msra.mxu0 %v45870_v62 }
 0x833   :  { %41113 = vmatprep.subr.bf16.mxu0 %v49723_v17 }
 0x836   :  { %41115 = vmatpush3.bf16.msra.mxu0 %v45877_v24 }
 0x837   :  { %41116 = vmatprep.subr.bf16.mxu0 %v49723_v17 }
 0x839   :  { %35584 = vmatmul.mubr.f32.vlgmr.msra.gmra.mrb[16].mxu0 %v46149_v3 }
 0x83a   :  { %41118 = vmatpush3.bf16.msra.mxu0 %v45887_v50  ;;  %35602 = vmatprep.mubr.msk.f32.mxu0 %vm44710_vm1, %v49724_v49 }
 0x83b   :  { %41119 = vmatprep.subr.bf16.mxu0 %v49723_v17 }
 0x83e   :  { %41121 = vmatpush3.bf16.msra.mxu0 %v45896_v12  ;;  %v49913_v12 = vld [vmem:[#allocation90_spill] sm:$0xff] }
 0x83f   :  { %41122 = vmatprep.subr.bf16.mxu0 %v49723_v17 }
 0x842   :  { %41124 = vmatpush3.bf16.msra.mxu0 %v45908_v56  ;;  %v49912_v56 = vld [vmem:[#allocation89_spill] sm:$0xff] }
 0x843   :  { %41125 = vmatprep.subr.bf16.mxu0 %v49723_v17 }
 0x846   :  { %41127 = vmatpush3.bf16.msra.mxu0 %v49909_v32  ;;  %v49911_v32 = vld [vmem:[#allocation88_spill] sm:$0xff] }
 0x847   :  { %41128 = vmatprep.subr.bf16.mxu0 %v49723_v17 }
 0x849   :  { %35603 = vmatmul.mubr.f32.vlgmr.msra.gmra.mrb[16].mxu0 %v46152_v35  ;;  %v49910_v35 = vld [vmem:[#allocation87_spill] sm:$0xff] }
 0x84a   :  { %41130 = vmatpush3.bf16.msra.mxu0 %v45745_v57  ;;  %35621 = vmatprep.mubr.msk.f32.mxu0 %vm44710_vm1, %v49724_v49 }
 0x84b   :  { %41131 = vmatprep.subr.bf16.mxu0 %v49723_v17 }
 0x84e   :  { %41133 = vmatpush3.bf16.msra.mxu0 %v45770_v63 }
 0x84f   :  { %41134 = vmatprep.subr.bf16.mxu0 %v49723_v17 }
 0x852   :  { %41136 = vmatpush3.bf16.msra.mxu0 %v45792_v33 }
 0x853   :  { %41137 = vmatprep.subr.bf16.mxu0 %v49723_v17 }
 0x856   :  { %41139 = vmatpush3.bf16.msra.mxu0 %v45806_v14 }
 0x857   :  { %41140 = vmatprep.subr.bf16.mxu0 %v49723_v17 }
 0x859   :  { %35622 = vmatmul.mubr.f32.vlgmr.msra.gmra.mrb[16].mxu0 %v46155_v58  ;;  %v6479_v58 = vpop.permute.xlu1 %6478 }
 0x85a   :  { %41142 = vmatpush3.bf16.msra.mxu0 %v49910_v35  ;;  %35640 = vmatprep.mubr.msk.f32.mxu0 %vm44710_vm1, %v49724_v49 }
 0x85b   :  { %41143 = vmatprep.subr.bf16.mxu0 %v49723_v17 }
 0x85e   :  { %41145 = vmatpush3.bf16.msra.mxu0 %v49911_v32  ;;  %v49914_v32 = vld [vmem:[#allocation91_spill] sm:$0xff] }
 0x85f   :  { %41146 = vmatprep.subr.bf16.mxu0 %v49723_v17 }
 0x862   :  { %41148 = vmatpush3.bf16.msra.mxu0 %v49912_v56 }
 0x863   :  { %41149 = vmatprep.subr.bf16.mxu0 %v49723_v17 }
 0x866   :  { %41151 = vmatpush3.bf16.msra.mxu0 %v49913_v12 }
 0x867   :  { %41152 = vmatprep.subr.bf16.mxu0 %v49723_v17 }
 0x869   :  { %35641 = vmatmul.mubr.f32.vlgmr.msra.gmra.mrb[16].mxu0 %v46149_v3 }
 0x86a   :  { %41154 = vmatpush3.bf16.msra.mxu0 %v45745_v57  ;;  %35659 = vmatprep.mubr.msk.f32.mxu0 %vm44710_vm1, %v49724_v49 }
 0x86b   :  { %41155 = vmatprep.subr.bf16.mxu0 %v49723_v17 }
 0x86e   :  { %41157 = vmatpush3.bf16.msra.mxu0 %v45770_v63 }
 0x86f   :  { %41158 = vmatprep.subr.bf16.mxu0 %v49723_v17 }
 0x872   :  { %41160 = vmatpush3.bf16.msra.mxu0 %v45792_v33  ;;  %v7022_v33 = vpop.permute.xlu1 %7021 }
 0x873   :  { %41161 = vmatprep.subr.bf16.mxu0 %v49723_v17 }
 0x876   :  { %41163 = vmatpush3.bf16.msra.mxu0 %v45806_v14 }
 0x877   :  { %41200 = vmatprep.subr.bf16.mxu0 %v49723_v17 }
 0x879   :  { %35660 = vmatmul.mubr.f32.vlgmr.msra.gmra.mrb[16].mxu0 %v46149_v3  ;;  %v5936_v3 = vpop.permute.xlu0 %5935 }
 0x87a   :  { %41202 = vmatpush3.bf16.msra.mxu0 %v44894_v1  ;;  %35744 = vmatprep.mubr.msk.f32.mxu0 %vm44710_vm1, %v49724_v49 }
 0x87b   :  { %41203 = vmatprep.subr.bf16.mxu0 %v49723_v17 }
 0x87d   :  { %v7565_v19 = vpop.permute.xlu0 %7564 }
 0x87e   :  { %41205 = vmatpush3.bf16.msra.mxu0 %v44904_v6 }
 0x87f   :  { %41206 = vmatprep.subr.bf16.mxu0 %v49723_v17 }
 0x882   :  { %41208 = vmatpush3.bf16.msra.mxu0 %v44914_v11 }
 0x883   :  { %41209 = vmatprep.subr.bf16.mxu0 %v49723_v17 }
 0x886   :  { %41211 = vmatpush3.bf16.msra.mxu0 %v44924_v22 }
 0x887   :  { %41212 = vmatprep.subr.bf16.mxu0 %v49723_v17 }
 0x88c   :  { %v5929_v12 = vpop.f32.mrb[12].mxu0  ;;  %v6473_v56 = vpop.f32.mrb[12].mxu1 }
 0x88d   :  { %v44020_v35 = vadd.f32 %v5929_v12, %v49914_v32  ;;  %v44021_v50 = vadd.f32 %v6473_v56, %v46004_v61  ;;  %v35205_v24 = vpop.f32.mrb[13].mxu0  ;;  %v35319_v62 = vpop.f32.mrb[13].mxu1 }
 0x88e   :  { %v8108_v24 = vpop.permute.xlu1 %8107 }
 0x88f   :  { %v6481_v38 = vmul.f32 %v44021_v50, %v6479_v58  ;;  %v5938_v53 = vmul.f32 %v44020_v35, %v5936_v3 }
 0x891   :  { %v6482_v14 = vadd.f32 %v6481_v38, %v5938_v53 }
 0x8ec   :  { %v7016_v63 = vpop.f32.mrb[14].mxu0  ;;  %v7559_v57 = vpop.f32.mrb[14].mxu1 }
 0x8ed   :  { %v44022_v7 = vadd.f32 %v7016_v63, %v46008_v27  ;;  %v44023_v25 = vadd.f32 %v7559_v57, %v46012_v60  ;;  %v35433_v8 = vpop.f32.mrb[15].mxu0  ;;  %v35547_v40 = vpop.f32.mrb[15].mxu1 }
 0x8ef   :  { %v7024_v39 = vmul.f32 %v44022_v7, %v7022_v33  ;;  %v7567_v12 = vmul.f32 %v44023_v25, %v7565_v19 }
 0x8f1   :  { %v7025_v41 = vadd.f32 %v7024_v39, %v6482_v14 }
 0x8f3   :  { %v7568_v32 = vadd.f32 %v7567_v12, %v7025_v41 }
 0x94c   :  { %v8102_v56 = vpop.f32.mrb[16].mxu0 }
 0x94d   :  { %v44024_v62 = vadd.f32 %v8102_v56, %v46016_v13  ;;  %v35661_v50 = vpop.f32.mrb[17].mxu0 }
 0x94f   :  { %v8110_v53 = vmul.f32 %v44024_v62, %v8108_v24 }
 0x951   :  { %v46500_v38 = vadd.f32 %v8110_v53, %v7568_v32 }
 0x953   :  { %v8112_v63 = vadd.f32 %v46500_v38, %v46020_v47 }
 0x955   :  { %v8113_v35 = vmul.f32 0.5, %v8112_v63 }
 0x957   :  { %v46505_v57 = vadd.f32 %v44852_v52, %v8113_v35  ;;  %v8120_v52 = vmul.f32 2.0, %v46071_v10  ;;  %v49915_v35 = vld [vmem:[#allocation3_spill] sm:$0xff]  ;;  %v49916_v10 = vld [vmem:[#allocation4_spill] sm:$0xff] }
 0x959   :  { %v8115_v33 = vmul.f32 2.0, %v46505_v57  ;;  %v8121_v47 = vadd.f32 %v46076_v30, %v8120_v52  ;;  %v49917_v30 = vld [vmem:[#allocation5_spill] sm:$0xff]  ;;  %v49926_v52 = vld [vmem:[#allocation14_spill] sm:$0xff] }
 0x95b   :  { %v8116_v19 = vsub.f32 %v8115_v33, %v46024_v34  ;;  %v8126_v34 = vrot.slane %v8121_v47, %v45009_v59  ;;  %v49918_v33 = vld [vmem:[#allocation6_spill] sm:$0xff]  ;;  %v49927_v47 = vld [vmem:[#allocation28_spill] sm:$0xff] }
 0x95d   :  { %v46510_v25 = vadd.f32 %v8116_v19, %v46500_v38  ;;  %v49919_v19 = vld [vmem:[#allocation7_spill] sm:$0xff] }
 0x95f   :  { %v8129_v14 = vsel %vm520_vm2, %v46510_v25, 0 }
 0x960   :  { %v8200_v8 = vand.u32 4294901760, %v8129_v14 }
 0x962   :  { %v8201_v7 = vsub.f32 %v8129_v14, %v8200_v8  ;;  %v49920_v14 = vld [vmem:[#allocation8_spill] sm:$0xff] }
 0x964   :  { %v8202_v40 = vand.u32 4294901760, %v8201_v7 }
 0x966   :  { %v8203_v39 = vsub.f32 %v8201_v7, %v8202_v40 }
 0x968   :  { %v8204_v41 = vand.u32 4294901760, %v8203_v39  ;;  %v49924_v39 = vld [vmem:[#allocation12_spill] sm:$0xff] }
 0x96a   :  { %35671 = vmatmul.mubr.f32.vlgmr.msra.gmra.mrb[16].mxu1 %v8204_v41  ;;  %v49925_v41 = vld [vmem:[#allocation13_spill] sm:$0xff] }
 0x96b   :  { %41172 = vmatpush3.bf16.msra.mxu1 %v44837_v37  ;;  %35681 = vmatprep.mubr.msk.f32.mxu1 %vm44710_vm1, %v49724_v49 }
 0x96c   :  { %41173 = vmatprep.subr.bf16.mxu1 %v49723_v17 }
 0x96f   :  { %41175 = vmatpush3.bf16.msra.mxu1 %v44839_v42 }
 0x970   :  { %41176 = vmatprep.subr.bf16.mxu1 %v49723_v17 }
 0x972   :  { %35682 = vmatmul.mubr.f32.vlgmr.msra.gmra.mrb[16].mxu1 %v8200_v8 }
 0x973   :  { %41178 = vmatpush3.bf16.msra.mxu1 %v44841_v43  ;;  %35692 = vmatprep.mubr.msk.f32.mxu1 %vm44710_vm1, %v49724_v49 }
 0x974   :  { %41179 = vmatprep.subr.bf16.mxu1 %v49723_v17 }
 0x977   :  { %41181 = vmatpush3.bf16.msra.mxu1 %v44843_v44 }
 0x978   :  { %41182 = vmatprep.subr.bf16.mxu1 %v49723_v17 }
 0x97a   :  { %35693 = vmatmul.mubr.f32.vlgmr.msra.gmra.mrb[16].mxu1 %v8201_v7  ;;  %v49922_v7 = vld [vmem:[#allocation10_spill] sm:$0xff] }
 0x97b   :  { %41184 = vmatpush3.bf16.msra.mxu1 %v44821_v18  ;;  %35703 = vmatprep.mubr.msk.f32.mxu1 %vm44710_vm1, %v49724_v49 }
 0x97c   :  { %41185 = vmatprep.subr.bf16.mxu1 %v49723_v17 }
 0x97f   :  { %41187 = vmatpush3.bf16.msra.mxu1 %v44833_v28 }
 0x980   :  { %41188 = vmatprep.subr.bf16.mxu1 %v49723_v17 }
 0x982   :  { %35704 = vmatmul.mubr.f32.vlgmr.msra.gmra.mrb[16].mxu1 %v8202_v40  ;;  %v49923_v40 = vld [vmem:[#allocation11_spill] sm:$0xff] }
 0x983   :  { %41190 = vmatpush3.bf16.msra.mxu1 %v44845_v45  ;;  %35714 = vmatprep.mubr.msk.f32.mxu1 %vm44710_vm1, %v49724_v49 }
 0x984   :  { %41191 = vmatprep.subr.bf16.mxu1 %v49723_v17 }
 0x987   :  { %41193 = vmatpush3.bf16.msra.mxu1 %v44847_v46 }
 0x988   :  { %41194 = vmatprep.subr.bf16.mxu1 %v49723_v17 }
 0x98a   :  { %35715 = vmatmul.mubr.f32.vlgmr.msra.gmra.mrb[16].mxu1 %v8200_v8 }
 0x98b   :  { %41196 = vmatpush3.bf16.msra.mxu1 %v44821_v18  ;;  %35725 = vmatprep.mubr.msk.f32.mxu1 %vm44710_vm1, %v49724_v49 }
 0x98c   :  { %41197 = vmatprep.subr.bf16.mxu1 %v49723_v17 }
 0x98f   :  { %41199 = vmatpush3.bf16.msra.mxu1 %v44833_v28 }
 0x990   :  { %41272 = vmatprep.subr.bf16.mxu1 %v49723_v17 }
 0x992   :  { %35726 = vmatmul.mubr.f32.vlgmr.msra.gmra.mrb[16].mxu1 %v8200_v8  ;;  %v49921_v8 = vld [vmem:[#allocation9_spill] sm:$0xff] }
 0x993   :  { %41274 = vmatpush3.bf16.msra.mxu1 %v44964_v20  ;;  %35858 = vmatprep.mubr.msk.f32.mxu1 %vm44710_vm1, %v49724_v49 }
 0x994   :  { %41275 = vmatprep.subr.bf16.mxu1 %v49723_v17 }
 0x997   :  { %41277 = vmatpush3.bf16.msra.mxu1 %v44972_v26 }
 0x998   :  { %41278 = vmatprep.subr.bf16.mxu1 %v49723_v17 }
 0x99b   :  { %41280 = vmatpush3.bf16.msra.mxu1 %v45089_v48 }
 0x99c   :  { %41281 = vmatprep.subr.bf16.mxu1 %v49723_v17 }
 0x99f   :  { %41283 = vmatpush3.bf16.msra.mxu1 %v45093_v51 }
 0x9a0   :  { %41284 = vmatprep.subr.bf16.mxu1 %v49723_v17 }
 0xa65   :  { %v8612_v32 = vpop.f32.mrb[16].mxu1 }
 0xa66   :  { %v44025_v58 = vadd.f32 %v8612_v32, %v8126_v34  ;;  %v35727_v3 = vpop.f32.mrb[17].mxu1  ;;  %v49928_v32 = vld [vmem:[#allocation25_spill] sm:$0xff] }
 0xa68   :  { %v8616_v12 = vmax.f32 %v44025_v58, 0.0 }
 0xa6a   :  { %v8618_v56 = vsel %vm1025_vm3, %v8616_v12, 0 }
 0xa6b   :  { %v8693_v24 = vand.u32 4294901760, %v8618_v56 }
 0xa6d   :  { %v8694_v62 = vsub.f32 %v8618_v56, %v8693_v24 }
 0xa6f   :  { %v8695_v50 = vand.u32 4294901760, %v8694_v62 }
 0xa71   :  { %v8696_v53 = vsub.f32 %v8694_v62, %v8695_v50 }
 0xa73   :  { %v8697_v63 = vand.u32 4294901760, %v8696_v53 }
 0xa75   :  { %35745 = vmatmul.mubr.f32.vlgmr.msra.gmra.mrb[18].mxu0 %v8697_v63 }
 0xa76   :  { %41214 = vmatpush3.bf16.msra.mxu0 %v49915_v35  ;;  %35763 = vmatprep.mubr.msk.f32.mxu0 %vm44710_vm1, %v49724_v49 }
 0xa77   :  { %41215 = vmatprep.subr.bf16.mxu0 %v49723_v17 }
 0xa7a   :  { %41217 = vmatpush3.bf16.msra.mxu0 %v49916_v10 }
 0xa7b   :  { %41218 = vmatprep.subr.bf16.mxu0 %v49723_v17 }
 0xa7e   :  { %41220 = vmatpush3.bf16.msra.mxu0 %v49917_v30 }
 0xa7f   :  { %41221 = vmatprep.subr.bf16.mxu0 %v49723_v17 }
 0xa82   :  { %41223 = vmatpush3.bf16.msra.mxu0 %v49918_v33 }
 0xa83   :  { %41224 = vmatprep.subr.bf16.mxu0 %v49723_v17 }
 0xa85   :  { %35764 = vmatmul.mubr.f32.vlgmr.msra.gmra.mrb[18].mxu0 %v8693_v24 }
 0xa86   :  { %41226 = vmatpush3.bf16.msra.mxu0 %v49919_v19  ;;  %35782 = vmatprep.mubr.msk.f32.mxu0 %vm44710_vm1, %v49724_v49 }
 0xa87   :  { %41227 = vmatprep.subr.bf16.mxu0 %v49723_v17 }
 0xa8a   :  { %41229 = vmatpush3.bf16.msra.mxu0 %v49920_v14 }
 0xa8b   :  { %41230 = vmatprep.subr.bf16.mxu0 %v49723_v17 }
 0xa8e   :  { %41232 = vmatpush3.bf16.msra.mxu0 %v49921_v8 }
 0xa8f   :  { %41233 = vmatprep.subr.bf16.mxu0 %v49723_v17 }
 0xa92   :  { %41235 = vmatpush3.bf16.msra.mxu0 %v49922_v7 }
 0xa93   :  { %41236 = vmatprep.subr.bf16.mxu0 %v49723_v17 }
 0xa95   :  { %35783 = vmatmul.mubr.f32.vlgmr.msra.gmra.mrb[18].mxu0 %v8694_v62 }
 0xa96   :  { %41238 = vmatpush3.bf16.msra.mxu0 %v44894_v1  ;;  %35801 = vmatprep.mubr.msk.f32.mxu0 %vm44710_vm1, %v49724_v49 }
 0xa97   :  { %41239 = vmatprep.subr.bf16.mxu0 %v49723_v17 }
 0xa9a   :  { %41241 = vmatpush3.bf16.msra.mxu0 %v44904_v6 }
 0xa9b   :  { %41242 = vmatprep.subr.bf16.mxu0 %v49723_v17 }
 0xa9e   :  { %41244 = vmatpush3.bf16.msra.mxu0 %v44914_v11 }
 0xa9f   :  { %41245 = vmatprep.subr.bf16.mxu0 %v49723_v17 }
 0xaa2   :  { %41247 = vmatpush3.bf16.msra.mxu0 %v44924_v22 }
 0xaa3   :  { %41248 = vmatprep.subr.bf16.mxu0 %v49723_v17 }
 0xaa5   :  { %35802 = vmatmul.mubr.f32.vlgmr.msra.gmra.mrb[18].mxu0 %v8695_v50 }
 0xaa6   :  { %41250 = vmatpush3.bf16.msra.mxu0 %v49923_v40  ;;  %35820 = vmatprep.mubr.msk.f32.mxu0 %vm44710_vm1, %v49724_v49 }
 0xaa7   :  { %41251 = vmatprep.subr.bf16.mxu0 %v49723_v17 }
 0xaaa   :  { %41253 = vmatpush3.bf16.msra.mxu0 %v49924_v39 }
 0xaab   :  { %41254 = vmatprep.subr.bf16.mxu0 %v49723_v17 }
 0xaae   :  { %41256 = vmatpush3.bf16.msra.mxu0 %v49925_v41 }
 0xaaf   :  { %41257 = vmatprep.subr.bf16.mxu0 %v49723_v17 }
 0xab2   :  { %41259 = vmatpush3.bf16.msra.mxu0 %v49926_v52 }
 0xab3   :  { %41260 = vmatprep.subr.bf16.mxu0 %v49723_v17 }
 0xab5   :  { %35821 = vmatmul.mubr.f32.vlgmr.msra.gmra.mrb[18].mxu0 %v8693_v24 }
 0xab6   :  { %41262 = vmatpush3.bf16.msra.mxu0 %v44894_v1  ;;  %35839 = vmatprep.mubr.msk.f32.mxu0 %vm44710_vm1, %v49724_v49 }
 0xab7   :  { %41263 = vmatprep.subr.bf16.mxu0 %v49723_v17 }
 0xaba   :  { %41265 = vmatpush3.bf16.msra.mxu0 %v44904_v6 }
 0xabb   :  { %41266 = vmatprep.subr.bf16.mxu0 %v49723_v17 }
 0xabe   :  { %41268 = vmatpush3.bf16.msra.mxu0 %v44914_v11 }
 0xabf   :  { %41269 = vmatprep.subr.bf16.mxu0 %v49723_v17 }
 0xac2   :  { %41271 = vmatpush3.bf16.msra.mxu0 %v44924_v22 }
 0xac3   :  { %41344 = vmatprep.subr.bf16.mxu0 %v49723_v17 }
 0xac5   :  { %35840 = vmatmul.mubr.f32.vlgmr.msra.gmra.mrb[18].mxu0 %v8693_v24 }
 0xac6   :  { %41346 = vmatpush3.bf16.msra.mxu0 %v49853_v23  ;;  %35972 = vmatprep.mubr.msk.f32.mxu0 %vm44710_vm1, %v49724_v49 }
 0xac7   :  { %41347 = vmatprep.subr.bf16.mxu0 %v49723_v17 }
 0xaca   :  { %41349 = vmatpush3.bf16.msra.mxu0 %v49854_v29 }
 0xacb   :  { %41350 = vmatprep.subr.bf16.mxu0 %v49723_v17 }
 0xace   :  { %41352 = vmatpush3.bf16.msra.mxu0 %v49855_v36 }
 0xacf   :  { %41353 = vmatprep.subr.bf16.mxu0 %v49723_v17 }
 0xad2   :  { %41355 = vmatpush3.bf16.msra.mxu0 %v49927_v47 }
 0xad3   :  { %41356 = vmatprep.subr.bf16.mxu0 %v49723_v17 }
 0xb98   :  { %v9153_v34 = vpop.f32.mrb[18].mxu0 }
 0xb99   :  { %v44026_v58 = vadd.f32 %v49928_v32, %v9153_v34  ;;  %v35841_v3 = vpop.f32.mrb[19].mxu0  ;;  %v49929_v34 = vld [vmem:[#allocation15_spill] sm:$0xff]  ;;  %v49930_v32 = vld [vmem:[#allocation29_spill] sm:$0xff] }
 0xb9a   :  { %v49932_v3 = vld [vmem:[#allocation30_spill] sm:$0xff] }
 0xb9b   :  { %v9157_v12 = vmax.f32 %v44026_v58, 0.0  ;;  %v49931_v58 = vld [vmem:[#allocation16_spill] sm:$0xff] }
 0xb9d   :  { %v9159_v56 = vsel %vm1025_vm3, %v9157_v12, 0  ;;  %v49933_v12 = vld [vmem:[#allocation17_spill] sm:$0xff] }
 0xb9e   :  { %v46620_v24 = vand.u32 4294901760, %v9159_v56 }
 0xba0   :  { %v46623_v62 = vsub.f32 %v9159_v56, %v46620_v24  ;;  %v49934_v56 = vld [vmem:[#allocation32_spill] sm:$0xff] }
 0xba2   :  { %v46626_v50 = vand.u32 4294901760, %v46623_v62 }
 0xba4   :  { %v9237_v53 = vsub.f32 %v46623_v62, %v46626_v50 }
 0xba6   :  { %v46630_v63 = vand.u32 4294901760, %v9237_v53  ;;  %v49935_v53 = vld [vmem:[#allocation18_spill] sm:$0xff] }
 0xba8   :  { %35859 = vmatmul.mubr.f32.vlgmr.msra.gmra.mrb[18].mxu1 %v46630_v63  ;;  %35973 = vmatmul.mubr.f32.vlgmr.msra.gmra.mrb[20].mxu0 %v46630_v63 }
 0xba9   :  { %41286 = vmatpush3.bf16.msra.mxu1 %v49929_v34  ;;  %41358 = vmatpush3.bf16.msra.mxu0 %v49930_v32  ;;  %v49936_v32 = vld [vmem:[#allocation34_spill] sm:$0xff]  ;;  %v49951_v34 = vld [vmem:[#allocation43_spill] sm:$0xff] }
 0xbaa   :  { %41287 = vmatprep.subr.bf16.mxu1 %v49723_v17  ;;  %41359 = vmatprep.subr.bf16.mxu0 %v49723_v17 }
 0xbab   :  { %35877 = vmatprep.mubr.msk.f32.mxu1 %vm44710_vm1, %v49724_v49  ;;  %35991 = vmatprep.mubr.msk.f32.mxu0 %vm44710_vm1, %v49724_v49 }
 0xbad   :  { %41289 = vmatpush3.bf16.msra.mxu1 %v49931_v58  ;;  %41361 = vmatpush3.bf16.msra.mxu0 %v49932_v3  ;;  %v49937_v3 = vld [vmem:[#allocation23_spill] sm:$0xff]  ;;  %v49944_v58 = vld [vmem:[#allocation38_spill] sm:$0xff] }
 0xbae   :  { %41290 = vmatprep.subr.bf16.mxu1 %v49723_v17  ;;  %41362 = vmatprep.subr.bf16.mxu0 %v49723_v17 }
 0xbb1   :  { %41292 = vmatpush3.bf16.msra.mxu1 %v49933_v12  ;;  %41364 = vmatpush3.bf16.msra.mxu0 %v49934_v56  ;;  %v49938_v12 = vld [vmem:[#allocation35_spill] sm:$0xff]  ;;  %v49943_v56 = vld [vmem:[#allocation20_spill] sm:$0xff] }
 0xbb2   :  { %41293 = vmatprep.subr.bf16.mxu1 %v49723_v17  ;;  %41365 = vmatprep.subr.bf16.mxu0 %v49723_v17 }
 0xbb5   :  { %41295 = vmatpush3.bf16.msra.mxu1 %v49935_v53  ;;  %41367 = vmatpush3.bf16.msra.mxu0 %v49936_v32  ;;  %v49939_v32 = vld [vmem:[#allocation24_spill] sm:$0xff] }
 0xbb6   :  { %41296 = vmatprep.subr.bf16.mxu1 %v49723_v17  ;;  %41368 = vmatprep.subr.bf16.mxu0 %v49723_v17  ;;  %v49940_v53 = vld [vmem:[#allocation36_spill] sm:$0xff] }
 0xbb8   :  { %35878 = vmatmul.mubr.f32.vlgmr.msra.gmra.mrb[18].mxu1 %v46620_v24  ;;  %35992 = vmatmul.mubr.f32.vlgmr.msra.gmra.mrb[20].mxu0 %v46620_v24 }
 0xbb9   :  { %41298 = vmatpush3.bf16.msra.mxu1 %v49937_v3  ;;  %41370 = vmatpush3.bf16.msra.mxu0 %v49938_v12  ;;  %v49941_v3 = vld [vmem:[#allocation19_spill] sm:$0xff]  ;;  %v49942_v12 = vld [vmem:[#allocation37_spill] sm:$0xff] }
 0xbba   :  { %41299 = vmatprep.subr.bf16.mxu1 %v49723_v17  ;;  %41371 = vmatprep.subr.bf16.mxu0 %v49723_v17 }
 0xbbb   :  { %35896 = vmatprep.mubr.msk.f32.mxu1 %vm44710_vm1, %v49724_v49  ;;  %36010 = vmatprep.mubr.msk.f32.mxu0 %vm44710_vm1, %v49724_v49 }
 0xbbd   :  { %41301 = vmatpush3.bf16.msra.mxu1 %v49939_v32  ;;  %41373 = vmatpush3.bf16.msra.mxu0 %v49940_v53  ;;  %v49948_v53 = vld [vmem:[#allocation41_spill] sm:$0xff] }
 0xbbe   :  { %41302 = vmatprep.subr.bf16.mxu1 %v49723_v17  ;;  %41374 = vmatprep.subr.bf16.mxu0 %v49723_v17  ;;  %v49950_v32 = vld [vmem:[#allocation33_spill] sm:$0xff] }
 0xbc1   :  { %41304 = vmatpush3.bf16.msra.mxu1 %v49941_v3  ;;  %41376 = vmatpush3.bf16.msra.mxu0 %v49942_v12  ;;  %v49946_v12 = vmov 4   ;;  %v49947_v3 = vld [vmem:[#allocation31_spill] sm:$0xff] }
 0xbc2   :  { %41305 = vmatprep.subr.bf16.mxu1 %v49723_v17  ;;  %41377 = vmatprep.subr.bf16.mxu0 %v49723_v17 }
 0xbc5   :  { %41307 = vmatpush3.bf16.msra.mxu1 %v49943_v56  ;;  %41379 = vmatpush3.bf16.msra.mxu0 %v49944_v58  ;;  %v31251_v58 = vld [vmem:[%s49414_s1 + $0x10] sm:$0xff]  ;;  %v49945_v56 = vmov 2  }
 0xbc6   :  { %41308 = vmatprep.subr.bf16.mxu1 %v49723_v17  ;;  %41380 = vmatprep.subr.bf16.mxu0 %v49723_v17 }
 0xbc7   :  { %9700 = vperm.xlu1 %44662, %v31251_v58   ;;  %10243 = vperm.xlu0 %44663, %v31251_v58  }
 0xbc8   :  { %35897 = vmatmul.mubr.f32.vlgmr.msra.gmra.mrb[18].mxu1 %v46623_v62  ;;  %36011 = vmatmul.mubr.f32.vlgmr.msra.gmra.mrb[20].mxu0 %v46623_v62 }
 0xbc9   :  { %41310 = vmatpush3.bf16.msra.mxu1 %v44964_v20  ;;  %41382 = vmatpush3.bf16.msra.mxu0 %v49853_v23 }
 0xbca   :  { %41311 = vmatprep.subr.bf16.mxu1 %v49723_v17  ;;  %41383 = vmatprep.subr.bf16.mxu0 %v49723_v17 }
 0xbcb   :  { %35915 = vmatprep.mubr.msk.f32.mxu1 %vm44710_vm1, %v49724_v49  ;;  %36029 = vmatprep.mubr.msk.f32.mxu0 %vm44710_vm1, %v49724_v49 }
 0xbcc   :  { %44664 = vset.pattern.permute.xlu1 %v49945_v56  ;;  %44666 = vset.pattern.permute.xlu0 %v49946_v12  ;;  %v49949_v12 = vmov 3  }
 0xbcd   :  { %41313 = vmatpush3.bf16.msra.mxu1 %v44972_v26  ;;  %41385 = vmatpush3.bf16.msra.mxu0 %v49854_v29 }
 0xbce   :  { %41314 = vmatprep.subr.bf16.mxu1 %v49723_v17  ;;  %41386 = vmatprep.subr.bf16.mxu0 %v49723_v17 }
 0xbcf   :  { %10786 = vperm.xlu1 %44664, %v31251_v58   ;;  %11872 = vperm.xlu0 %44666, %v31251_v58  }
 0xbd1   :  { %41316 = vmatpush3.bf16.msra.mxu1 %v45089_v48  ;;  %41388 = vmatpush3.bf16.msra.mxu0 %v49855_v36 }
 0xbd2   :  { %41317 = vmatprep.subr.bf16.mxu1 %v49723_v17  ;;  %41389 = vmatprep.subr.bf16.mxu0 %v49723_v17 }
 0xbd3   :  { %44665 = vset.pattern.permute.xlu1 %v49949_v12  ;;  %44669 = vset.pattern.permute.xlu0 %v49945_v56  ;;  %v49954_v12 = vmov 0   ;;  %v49955_v56 = vld [vmem:[#allocation22_spill] sm:$0xff] }
 0xbd4   :  { %11329 = vperm.xlu1 %44665, %v31251_v58   ;;  %v49957_v58 = vld [vmem:[#allocation46_spill] sm:$0xff] }
 0xbd5   :  { %41319 = vmatpush3.bf16.msra.mxu1 %v45093_v51  ;;  %41391 = vmatpush3.bf16.msra.mxu0 %v49927_v47 }
 0xbd6   :  { %41320 = vmatprep.subr.bf16.mxu1 %v49723_v17  ;;  %41392 = vmatprep.subr.bf16.mxu0 %v49723_v17 }
 0xbd8   :  { %35916 = vmatmul.mubr.f32.vlgmr.msra.gmra.mrb[18].mxu1 %v46626_v50  ;;  %36030 = vmatmul.mubr.f32.vlgmr.msra.gmra.mrb[20].mxu0 %v46626_v50 }
 0xbd9   :  { %41322 = vmatpush3.bf16.msra.mxu1 %v49947_v3  ;;  %41394 = vmatpush3.bf16.msra.mxu0 %v49948_v53  ;;  %v49952_v53 = vld [vmem:[#allocation21_spill] sm:$0xff] }
 0xbda   :  { %41323 = vmatprep.subr.bf16.mxu1 %v49723_v17  ;;  %41395 = vmatprep.subr.bf16.mxu0 %v49723_v17  ;;  %v49953_v3 = vld [vmem:[#allocation45_spill] sm:$0xff] }
 0xbdb   :  { %35934 = vmatprep.mubr.msk.f32.mxu1 %vm44710_vm1, %v49724_v49  ;;  %36048 = vmatprep.mubr.msk.f32.mxu0 %vm44710_vm1, %v49724_v49 }
 0xbdc   :  { %44667 = vset.pattern.permute.xlu1 %v49954_v12 }
 0xbdd   :  { %41325 = vmatpush3.bf16.msra.mxu1 %v49950_v32  ;;  %41397 = vmatpush3.bf16.msra.mxu0 %v49951_v34  ;;  %v49956_v32 = vld [vmem:[#allocation47_spill] sm:$0xff]  ;;  %v49964_v34 = vld [vmem:[#allocation64_spill] sm:$0xff] }
 0xbde   :  { %41326 = vmatprep.subr.bf16.mxu1 %v49723_v17  ;;  %41398 = vmatprep.subr.bf16.mxu0 %v49723_v17 }
 0xbe1   :  { %41328 = vmatpush3.bf16.msra.mxu1 %v49952_v53  ;;  %41400 = vmatpush3.bf16.msra.mxu0 %v49953_v3  ;;  %v49960_v3 = vld [vmem:[#allocation60_spill] sm:$0xff]  ;;  %v49963_v53 = vld [vmem:[#allocation50_spill] sm:$0xff] }
 0xbe2   :  { %41329 = vmatprep.subr.bf16.mxu1 %v49723_v17  ;;  %41401 = vmatprep.subr.bf16.mxu0 %v49723_v17 }
 0xbe5   :  { %41331 = vmatpush3.bf16.msra.mxu1 %v49955_v56  ;;  %41403 = vmatpush3.bf16.msra.mxu0 %v49956_v32  ;;  %v49958_v32 = vld [vmem:[#allocation59_spill] sm:$0xff]  ;;  %v49959_v56 = vld [vmem:[#allocation48_spill] sm:$0xff] }
 0xbe6   :  { %41332 = vmatprep.subr.bf16.mxu1 %v49723_v17  ;;  %41404 = vmatprep.subr.bf16.mxu0 %v49723_v17 }
 0xbe8   :  { %35935 = vmatmul.mubr.f32.vlgmr.msra.gmra.mrb[18].mxu1 %v46620_v24  ;;  %36049 = vmatmul.mubr.f32.vlgmr.msra.gmra.mrb[20].mxu0 %v46620_v24 }
 0xbe9   :  { %41334 = vmatpush3.bf16.msra.mxu1 %v44964_v20  ;;  %41406 = vmatpush3.bf16.msra.mxu0 %v49853_v23 }
 0xbea   :  { %41335 = vmatprep.subr.bf16.mxu1 %v49723_v17  ;;  %41407 = vmatprep.subr.bf16.mxu0 %v49723_v17 }
 0xbeb   :  { %35953 = vmatprep.mubr.msk.f32.mxu1 %vm44710_vm1, %v49724_v49  ;;  %36067 = vmatprep.mubr.msk.f32.mxu0 %vm44710_vm1, %v49724_v49 }
 0xbed   :  { %41337 = vmatpush3.bf16.msra.mxu1 %v44972_v26  ;;  %41409 = vmatpush3.bf16.msra.mxu0 %v49854_v29 }
 0xbee   :  { %41338 = vmatprep.subr.bf16.mxu1 %v49723_v17  ;;  %41410 = vmatprep.subr.bf16.mxu0 %v49723_v17 }
 0xbf1   :  { %41340 = vmatpush3.bf16.msra.mxu1 %v45089_v48  ;;  %41412 = vmatpush3.bf16.msra.mxu0 %v49855_v36 }
 0xbf2   :  { %41341 = vmatprep.subr.bf16.mxu1 %v49723_v17  ;;  %41413 = vmatprep.subr.bf16.mxu0 %v49723_v17 }
 0xbf5   :  { %41343 = vmatpush3.bf16.msra.mxu1 %v45093_v51  ;;  %41415 = vmatpush3.bf16.msra.mxu0 %v49927_v47 }
 0xbf6   :  { %41416 = vmatprep.subr.bf16.mxu1 %v49723_v17  ;;  %41488 = vmatprep.subr.bf16.mxu0 %v49723_v17 }
 0xbf8   :  { %35954 = vmatmul.mubr.f32.vlgmr.msra.gmra.mrb[18].mxu1 %v46620_v24  ;;  %36068 = vmatmul.mubr.f32.vlgmr.msra.gmra.mrb[20].mxu0 %v46620_v24 }
 0xbf9   :  { %41418 = vmatpush3.bf16.msra.mxu1 %v45352_v54  ;;  %41490 = vmatpush3.bf16.msra.mxu0 %v45532_v0 }
 0xbfa   :  { %41419 = vmatprep.subr.bf16.mxu1 %v49723_v17  ;;  %41491 = vmatprep.subr.bf16.mxu0 %v49723_v17 }
 0xbfb   :  { %36086 = vmatprep.mubr.msk.f32.mxu1 %vm44710_vm1, %v49724_v49  ;;  %36200 = vmatprep.mubr.msk.f32.mxu0 %vm44710_vm1, %v49724_v49 }
 0xbfd   :  { %41421 = vmatpush3.bf16.msra.mxu1 %v49886_v16  ;;  %41493 = vmatpush3.bf16.msra.mxu0 %v45561_v31 }
 0xbfe   :  { %41422 = vmatprep.subr.bf16.mxu1 %v49723_v17  ;;  %41494 = vmatprep.subr.bf16.mxu0 %v49723_v17 }
 0xc01   :  { %41424 = vmatpush3.bf16.msra.mxu1 %v49887_v4  ;;  %41496 = vmatpush3.bf16.msra.mxu0 %v45577_v9 }
 0xc02   :  { %41425 = vmatprep.subr.bf16.mxu1 %v49723_v17  ;;  %41497 = vmatprep.subr.bf16.mxu0 %v49723_v17 }
 0xc05   :  { %41427 = vmatpush3.bf16.msra.mxu1 %v49888_v15  ;;  %41499 = vmatpush3.bf16.msra.mxu0 %v45585_v2 }
 0xc06   :  { %41428 = vmatprep.subr.bf16.mxu1 %v49723_v17  ;;  %41500 = vmatprep.subr.bf16.mxu0 %v49723_v17 }
 0xc08   :  { %36087 = vmatmul.mubr.f32.vlgmr.msra.gmra.mrb[20].mxu1 %v46630_v63  ;;  %36201 = vmatmul.mubr.f32.vlgmr.msra.gmra.mrb[22].mxu0 %v46630_v63 }
 0xc09   :  { %41430 = vmatpush3.bf16.msra.mxu1 %v49957_v58  ;;  %41502 = vmatpush3.bf16.msra.mxu0 %v49958_v32  ;;  %v49961_v58 = vld [vmem:[#allocation49_spill] sm:$0xff]  ;;  %v49962_v32 = vld [vmem:[#allocation62_spill] sm:$0xff] }
 0xc0a   :  { %41431 = vmatprep.subr.bf16.mxu1 %v49723_v17  ;;  %41503 = vmatprep.subr.bf16.mxu0 %v49723_v17 }
 0xc0b   :  { %36105 = vmatprep.mubr.msk.f32.mxu1 %vm44710_vm1, %v49724_v49  ;;  %36219 = vmatprep.mubr.msk.f32.mxu0 %vm44710_vm1, %v49724_v49 }
 0xc0d   :  { %41433 = vmatpush3.bf16.msra.mxu1 %v49959_v56  ;;  %41505 = vmatpush3.bf16.msra.mxu0 %v49960_v3  ;;  %v49965_v3 = vld [vmem:[#allocation51_spill] sm:$0xff] }
 0xc0e   :  { %41434 = vmatprep.subr.bf16.mxu1 %v49723_v17  ;;  %41506 = vmatprep.subr.bf16.mxu0 %v49723_v17 }
 0xc11   :  { %41436 = vmatpush3.bf16.msra.mxu1 %v49961_v58  ;;  %41508 = vmatpush3.bf16.msra.mxu0 %v49962_v32  ;;  %v49966_v58 = vld [vmem:[#allocation66_spill] sm:$0xff] }
 0xc12   :  { %41437 = vmatprep.subr.bf16.mxu1 %v49723_v17  ;;  %41509 = vmatprep.subr.bf16.mxu0 %v49723_v17  ;;  %v49985_v32 = vld [vmem:[#allocation82_spill] sm:$0xff] }
 0xc15   :  { %41439 = vmatpush3.bf16.msra.mxu1 %v49963_v53  ;;  %41511 = vmatpush3.bf16.msra.mxu0 %v49964_v34  ;;  %v49969_v34 = vld [vmem:[#allocation70_spill] sm:$0xff]  ;;  %v49984_v53 = vld [vmem:[#allocation81_spill] sm:$0xff] }
 0xc16   :  { %41440 = vmatprep.subr.bf16.mxu1 %v49723_v17  ;;  %41512 = vmatprep.subr.bf16.mxu0 %v49723_v17 }
 0xc18   :  { %36106 = vmatmul.mubr.f32.vlgmr.msra.gmra.mrb[20].mxu1 %v46620_v24  ;;  %36220 = vmatmul.mubr.f32.vlgmr.msra.gmra.mrb[22].mxu0 %v46620_v24 }
 0xc19   :  { %41442 = vmatpush3.bf16.msra.mxu1 %v49965_v3  ;;  %41514 = vmatpush3.bf16.msra.mxu0 %v49966_v58  ;;  %v49967_v58 = vld [vmem:[#allocation69_spill] sm:$0xff]  ;;  %v49968_v3 = vld [vmem:[#allocation55_spill] sm:$0xff] }
 0xc1a   :  { %41443 = vmatprep.subr.bf16.mxu1 %v49723_v17  ;;  %41515 = vmatprep.subr.bf16.mxu0 %v49723_v17 }
 0xc1b   :  { %36124 = vmatprep.mubr.msk.f32.mxu1 %vm44710_vm1, %v49724_v49  ;;  %36238 = vmatprep.mubr.msk.f32.mxu0 %vm44710_vm1, %v49724_v49 }
 0xc1d   :  { %41445 = vmatpush3.bf16.msra.mxu1 %v49899_v55  ;;  %41517 = vmatpush3.bf16.msra.mxu0 %v49900_v21  ;;  %v49976_v21 = vld [vmem:[#allocation67_spill] sm:$0xff] }
 0xc1e   :  { %41446 = vmatprep.subr.bf16.mxu1 %v49723_v17  ;;  %41518 = vmatprep.subr.bf16.mxu0 %v49723_v17  ;;  %v49977_v55 = vld [vmem:[#allocation79_spill] sm:$0xff] }
 0xc21   :  { %41448 = vmatpush3.bf16.msra.mxu1 %v49901_v5  ;;  %41520 = vmatpush3.bf16.msra.mxu0 %v49967_v58  ;;  %v49972_v58 = vld [vmem:[#allocation63_spill] sm:$0xff] }
 0xc22   :  { %41449 = vmatprep.subr.bf16.mxu1 %v49723_v17  ;;  %41521 = vmatprep.subr.bf16.mxu0 %v49723_v17  ;;  %v49973_v5 = vld [vmem:[#allocation75_spill] sm:$0xff] }
 0xc25   :  { %41451 = vmatpush3.bf16.msra.mxu1 %v49968_v3  ;;  %41523 = vmatpush3.bf16.msra.mxu0 %v49969_v34  ;;  %v49970_v34 = vld [vmem:[#allocation61_spill] sm:$0xff] }
 0xc26   :  { %41452 = vmatprep.subr.bf16.mxu1 %v49723_v17  ;;  %41524 = vmatprep.subr.bf16.mxu0 %v49723_v17  ;;  %v49971_v3 = vld [vmem:[#allocation73_spill] sm:$0xff] }
 0xc28   :  { %36125 = vmatmul.mubr.f32.vlgmr.msra.gmra.mrb[20].mxu1 %v46623_v62  ;;  %36239 = vmatmul.mubr.f32.vlgmr.msra.gmra.mrb[22].mxu0 %v46623_v62 }
 0xc29   :  { %41454 = vmatpush3.bf16.msra.mxu1 %v45352_v54  ;;  %41526 = vmatpush3.bf16.msra.mxu0 %v45532_v0 }
 0xc2a   :  { %41455 = vmatprep.subr.bf16.mxu1 %v49723_v17  ;;  %41527 = vmatprep.subr.bf16.mxu0 %v49723_v17 }
 0xc2b   :  { %36143 = vmatprep.mubr.msk.f32.mxu1 %vm44710_vm1, %v49724_v49  ;;  %36257 = vmatprep.mubr.msk.f32.mxu0 %vm44710_vm1, %v49724_v49 }
 0xc2d   :  { %41457 = vmatpush3.bf16.msra.mxu1 %v49886_v16  ;;  %41529 = vmatpush3.bf16.msra.mxu0 %v45561_v31 }
 0xc2e   :  { %41458 = vmatprep.subr.bf16.mxu1 %v49723_v17  ;;  %41530 = vmatprep.subr.bf16.mxu0 %v49723_v17 }
 0xc31   :  { %41460 = vmatpush3.bf16.msra.mxu1 %v49887_v4  ;;  %41532 = vmatpush3.bf16.msra.mxu0 %v45577_v9 }
 0xc32   :  { %41461 = vmatprep.subr.bf16.mxu1 %v49723_v17  ;;  %41533 = vmatprep.subr.bf16.mxu0 %v49723_v17 }
 0xc35   :  { %41463 = vmatpush3.bf16.msra.mxu1 %v49888_v15  ;;  %41535 = vmatpush3.bf16.msra.mxu0 %v45585_v2 }
 0xc36   :  { %41464 = vmatprep.subr.bf16.mxu1 %v49723_v17  ;;  %41536 = vmatprep.subr.bf16.mxu0 %v49723_v17 }
 0xc38   :  { %36144 = vmatmul.mubr.f32.vlgmr.msra.gmra.mrb[20].mxu1 %v46626_v50  ;;  %36258 = vmatmul.mubr.f32.vlgmr.msra.gmra.mrb[22].mxu0 %v46626_v50 }
 0xc39   :  { %41466 = vmatpush3.bf16.msra.mxu1 %v49970_v34  ;;  %41538 = vmatpush3.bf16.msra.mxu0 %v49971_v3  ;;  %v49974_v34 = vld [vmem:[#allocation65_spill] sm:$0xff] }
 0xc3a   :  { %41467 = vmatprep.subr.bf16.mxu1 %v49723_v17  ;;  %41539 = vmatprep.subr.bf16.mxu0 %v49723_v17  ;;  %v49975_v3 = vld [vmem:[#allocation77_spill] sm:$0xff] }
 0xc3b   :  { %36162 = vmatprep.mubr.msk.f32.mxu1 %vm44710_vm1, %v49724_v49  ;;  %36276 = vmatprep.mubr.msk.f32.mxu0 %vm44710_vm1, %v49724_v49 }
 0xc3d   :  { %41469 = vmatpush3.bf16.msra.mxu1 %v49972_v58  ;;  %41541 = vmatpush3.bf16.msra.mxu0 %v49973_v5  ;;  %v49982_v5 = vld [vmem:[#allocation78_spill] sm:$0xff]  ;;  %v49983_v58 = vld [vmem:[#allocation80_spill] sm:$0xff] }
 0xc3e   :  { %41470 = vmatprep.subr.bf16.mxu1 %v49723_v17  ;;  %41542 = vmatprep.subr.bf16.mxu0 %v49723_v17 }
 0xc41   :  { %41472 = vmatpush3.bf16.msra.mxu1 %v49974_v34  ;;  %41544 = vmatpush3.bf16.msra.mxu0 %v49975_v3  ;;  %v49980_v3 = vld [vmem:[#allocation74_spill] sm:$0xff]  ;;  %v49981_v34 = vld [vmem:[#allocation76_spill] sm:$0xff] }
 0xc42   :  { %41473 = vmatprep.subr.bf16.mxu1 %v49723_v17  ;;  %41545 = vmatprep.subr.bf16.mxu0 %v49723_v17 }
 0xc45   :  { %41475 = vmatpush3.bf16.msra.mxu1 %v49976_v21  ;;  %41547 = vmatpush3.bf16.msra.mxu0 %v49977_v55  ;;  %v49978_v55 = vld [vmem:[#allocation71_spill] sm:$0xff]  ;;  %v49979_v21 = vld [vmem:[#allocation72_spill] sm:$0xff] }
 0xc46   :  { %41476 = vmatprep.subr.bf16.mxu1 %v49723_v17  ;;  %41548 = vmatprep.subr.bf16.mxu0 %v49723_v17 }
 0xc48   :  { %36163 = vmatmul.mubr.f32.vlgmr.msra.gmra.mrb[20].mxu1 %v46620_v24  ;;  %36277 = vmatmul.mubr.f32.vlgmr.msra.gmra.mrb[22].mxu0 %v46620_v24 }
 0xc49   :  { %41478 = vmatpush3.bf16.msra.mxu1 %v45352_v54  ;;  %41550 = vmatpush3.bf16.msra.mxu0 %v45532_v0 }
 0xc4a   :  { %41479 = vmatprep.subr.bf16.mxu1 %v49723_v17  ;;  %41551 = vmatprep.subr.bf16.mxu0 %v49723_v17 }
 0xc4b   :  { %36181 = vmatprep.mubr.msk.f32.mxu1 %vm44710_vm1, %v49724_v49  ;;  %36295 = vmatprep.mubr.msk.f32.mxu0 %vm44710_vm1, %v49724_v49 }
 0xc4d   :  { %41481 = vmatpush3.bf16.msra.mxu1 %v49886_v16  ;;  %41553 = vmatpush3.bf16.msra.mxu0 %v45561_v31 }
 0xc4e   :  { %41482 = vmatprep.subr.bf16.mxu1 %v49723_v17  ;;  %41554 = vmatprep.subr.bf16.mxu0 %v49723_v17 }
 0xc51   :  { %41484 = vmatpush3.bf16.msra.mxu1 %v49887_v4  ;;  %41556 = vmatpush3.bf16.msra.mxu0 %v45577_v9 }
 0xc52   :  { %41485 = vmatprep.subr.bf16.mxu1 %v49723_v17  ;;  %41557 = vmatprep.subr.bf16.mxu0 %v49723_v17 }
 0xc55   :  { %41487 = vmatpush3.bf16.msra.mxu1 %v49888_v15  ;;  %41559 = vmatpush3.bf16.msra.mxu0 %v45585_v2 }
 0xc56   :  { %41560 = vmatprep.subr.bf16.mxu1 %v49723_v17  ;;  %41632 = vmatprep.subr.bf16.mxu0 %v49723_v17 }
 0xc58   :  { %36182 = vmatmul.mubr.f32.vlgmr.msra.gmra.mrb[20].mxu1 %v46620_v24  ;;  %36296 = vmatmul.mubr.f32.vlgmr.msra.gmra.mrb[22].mxu0 %v46620_v24 }
 0xc59   :  { %41562 = vmatpush3.bf16.msra.mxu1 %v49978_v55  ;;  %36314 = vmatprep.mubr.msk.f32.mxu1 %vm44710_vm1, %v49724_v49 }
 0xc5a   :  { %41563 = vmatprep.subr.bf16.mxu1 %v49723_v17  ;;  %41634 = vmatpush3.bf16.msra.mxu0 %v44821_v18 }
 0xc5b   :  { %41635 = vmatprep.subr.bf16.mxu0 %v49723_v17  ;;  %36420 = vmatprep.mubr.msk.f32.mxu0 %vm44710_vm1, %v49724_v49 }
 0xc5d   :  { %41565 = vmatpush3.bf16.msra.mxu1 %v49979_v21 }
 0xc5e   :  { %41566 = vmatprep.subr.bf16.mxu1 %v49723_v17  ;;  %41637 = vmatpush3.bf16.msra.mxu0 %v44833_v28 }
 0xc5f   :  { %41638 = vmatprep.subr.bf16.mxu0 %v49723_v17 }
 0xc61   :  { %41568 = vmatpush3.bf16.msra.mxu1 %v49980_v3 }
 0xc62   :  { %41569 = vmatprep.subr.bf16.mxu1 %v49723_v17 }
 0xc65   :  { %41571 = vmatpush3.bf16.msra.mxu1 %v49981_v34 }
 0xc66   :  { %41572 = vmatprep.subr.bf16.mxu1 %v49723_v17 }
 0xc68   :  { %36315 = vmatmul.mubr.f32.vlgmr.msra.gmra.mrb[22].mxu1 %v46630_v63  ;;  %v49986_v63 = vld [vmem:[#allocation83_spill] sm:$0xff] }
 0xc69   :  { %41574 = vmatpush3.bf16.msra.mxu1 %v49982_v5  ;;  %36333 = vmatprep.mubr.msk.f32.mxu1 %vm44710_vm1, %v49724_v49 }
 0xc6a   :  { %41575 = vmatprep.subr.bf16.mxu1 %v49723_v17 }
 0xc6d   :  { %41577 = vmatpush3.bf16.msra.mxu1 %v49983_v58  ;;  %v49987_v58 = vld [vmem:[#allocation84_spill] sm:$0xff] }
 0xc6e   :  { %41578 = vmatprep.subr.bf16.mxu1 %v49723_v17 }
 0xc71   :  { %41580 = vmatpush3.bf16.msra.mxu1 %v49984_v53  ;;  %v49988_v53 = vld [vmem:[#allocation85_spill] sm:$0xff] }
 0xc72   :  { %41581 = vmatprep.subr.bf16.mxu1 %v49723_v17 }
 0xc75   :  { %41583 = vmatpush3.bf16.msra.mxu1 %v49985_v32  ;;  %v49989_v32 = vld [vmem:[#allocation86_spill] sm:$0xff] }
 0xc76   :  { %41584 = vmatprep.subr.bf16.mxu1 %v49723_v17 }
 0xc78   :  { %36334 = vmatmul.mubr.f32.vlgmr.msra.gmra.mrb[22].mxu1 %v46620_v24 }
 0xc79   :  { %41586 = vmatpush3.bf16.msra.mxu1 %v49986_v63  ;;  %36352 = vmatprep.mubr.msk.f32.mxu1 %vm44710_vm1, %v49724_v49 }
 0xc7a   :  { %41587 = vmatprep.subr.bf16.mxu1 %v49723_v17 }
 0xc7d   :  { %41589 = vmatpush3.bf16.msra.mxu1 %v49987_v58  ;;  %v49993_v58 = vld [vmem:[#allocation90_spill] sm:$0xff] }
 0xc7e   :  { %41590 = vmatprep.subr.bf16.mxu1 %v49723_v17 }
 0xc81   :  { %41592 = vmatpush3.bf16.msra.mxu1 %v49988_v53  ;;  %v49992_v53 = vld [vmem:[#allocation89_spill] sm:$0xff] }
 0xc82   :  { %41593 = vmatprep.subr.bf16.mxu1 %v49723_v17 }
 0xc85   :  { %41595 = vmatpush3.bf16.msra.mxu1 %v49989_v32  ;;  %v49991_v32 = vld [vmem:[#allocation88_spill] sm:$0xff] }
 0xc86   :  { %41596 = vmatprep.subr.bf16.mxu1 %v49723_v17 }
 0xc88   :  { %36353 = vmatmul.mubr.f32.vlgmr.msra.gmra.mrb[22].mxu1 %v46623_v62  ;;  %v49990_v62 = vld [vmem:[#allocation87_spill] sm:$0xff] }
 0xc89   :  { %41598 = vmatpush3.bf16.msra.mxu1 %v49978_v55  ;;  %36371 = vmatprep.mubr.msk.f32.mxu1 %vm44710_vm1, %v49724_v49 }
 0xc8a   :  { %41599 = vmatprep.subr.bf16.mxu1 %v49723_v17 }
 0xc8d   :  { %41601 = vmatpush3.bf16.msra.mxu1 %v49979_v21 }
 0xc8e   :  { %41602 = vmatprep.subr.bf16.mxu1 %v49723_v17 }
 0xc91   :  { %41604 = vmatpush3.bf16.msra.mxu1 %v49980_v3 }
 0xc92   :  { %41605 = vmatprep.subr.bf16.mxu1 %v49723_v17 }
 0xc95   :  { %41607 = vmatpush3.bf16.msra.mxu1 %v49981_v34 }
 0xc96   :  { %41608 = vmatprep.subr.bf16.mxu1 %v49723_v17 }
 0xc98   :  { %36372 = vmatmul.mubr.f32.vlgmr.msra.gmra.mrb[22].mxu1 %v46626_v50  ;;  %v10244_v50 = vpop.permute.xlu0 %10243 }
 0xc99   :  { %41610 = vmatpush3.bf16.msra.mxu1 %v49990_v62  ;;  %36390 = vmatprep.mubr.msk.f32.mxu1 %vm44710_vm1, %v49724_v49 }
 0xc9a   :  { %41611 = vmatprep.subr.bf16.mxu1 %v49723_v17 }
 0xc9d   :  { %41613 = vmatpush3.bf16.msra.mxu1 %v49991_v32  ;;  %v49994_v32 = vld [vmem:[#allocation91_spill] sm:$0xff] }
 0xc9e   :  { %41614 = vmatprep.subr.bf16.mxu1 %v49723_v17 }
 0xca1   :  { %41616 = vmatpush3.bf16.msra.mxu1 %v49992_v53 }
 0xca2   :  { %41617 = vmatprep.subr.bf16.mxu1 %v49723_v17 }
 0xca5   :  { %41619 = vmatpush3.bf16.msra.mxu1 %v49993_v58 }
 0xca6   :  { %41620 = vmatprep.subr.bf16.mxu1 %v49723_v17 }
 0xca8   :  { %36391 = vmatmul.mubr.f32.vlgmr.msra.gmra.mrb[22].mxu1 %v46620_v24 }
 0xca9   :  { %41622 = vmatpush3.bf16.msra.mxu1 %v49978_v55  ;;  %36409 = vmatprep.mubr.msk.f32.mxu1 %vm44710_vm1, %v49724_v49 }
 0xcaa   :  { %41623 = vmatprep.subr.bf16.mxu1 %v49723_v17 }
 0xcad   :  { %41625 = vmatpush3.bf16.msra.mxu1 %v49979_v21 }
 0xcae   :  { %41626 = vmatprep.subr.bf16.mxu1 %v49723_v17 }
 0xcb1   :  { %41628 = vmatpush3.bf16.msra.mxu1 %v49980_v3 }
 0xcb2   :  { %41629 = vmatprep.subr.bf16.mxu1 %v49723_v17 }
 0xcb5   :  { %41631 = vmatpush3.bf16.msra.mxu1 %v49981_v34 }
 0xcb6   :  { %41668 = vmatprep.subr.bf16.mxu1 %v49723_v17 }
 0xcb8   :  { %36410 = vmatmul.mubr.f32.vlgmr.msra.gmra.mrb[22].mxu1 %v46620_v24  ;;  %v9701_v24 = vpop.permute.xlu1 %9700 }
 0xcb9   :  { %41670 = vmatpush3.bf16.msra.mxu1 %v44894_v1  ;;  %36494 = vmatprep.mubr.msk.f32.mxu1 %vm44710_vm1, %v49724_v49 }
 0xcba   :  { %41671 = vmatprep.subr.bf16.mxu1 %v49723_v17 }
 0xcbc   :  { %v10787_v56 = vpop.permute.xlu1 %10786 }
 0xcbd   :  { %41673 = vmatpush3.bf16.msra.mxu1 %v44904_v6 }
 0xcbe   :  { %41674 = vmatprep.subr.bf16.mxu1 %v49723_v17 }
 0xcc0   :  { %v11330_v0 = vpop.permute.xlu1 %11329 }
 0xcc1   :  { %41676 = vmatpush3.bf16.msra.mxu1 %v44914_v11 }
 0xcc2   :  { %41677 = vmatprep.subr.bf16.mxu1 %v49723_v17 }
 0xcc5   :  { %41679 = vmatpush3.bf16.msra.mxu1 %v44924_v22 }
 0xcc6   :  { %41680 = vmatprep.subr.bf16.mxu1 %v49723_v17 }
 0xccb   :  { %v9694_v58 = vpop.f32.mrb[18].mxu1  ;;  %v10238_v53 = vpop.f32.mrb[20].mxu0 }
 0xccc   :  { %v44027_v62 = vadd.f32 %v9694_v58, %v49994_v32  ;;  %v44028_v63 = vadd.f32 %v10238_v53, %v46004_v61  ;;  %v35955_v5 = vpop.f32.mrb[19].mxu1  ;;  %v36069_v34 = vpop.f32.mrb[21].mxu0 }
 0xccd   :  { %v11873_v5 = vpop.permute.xlu0 %11872 }
 0xcce   :  { %v9703_v3 = vmul.f32 %v44027_v62, %v9701_v24  ;;  %v10246_v21 = vmul.f32 %v44028_v63, %v10244_v50 }
 0xcd0   :  { %v10247_v55 = vadd.f32 %v10246_v21, %v9703_v3 }
 0xd2b   :  { %v10781_v2 = vpop.f32.mrb[20].mxu1  ;;  %v11324_v15 = vpop.f32.mrb[22].mxu0 }
 0xd2c   :  { %v44029_v9 = vadd.f32 %v10781_v2, %v46008_v27  ;;  %v44030_v4 = vadd.f32 %v11324_v15, %v46012_v60  ;;  %v36183_v31 = vpop.f32.mrb[21].mxu1  ;;  %v36297_v16 = vpop.f32.mrb[23].mxu0 }
 0xd2e   :  { %v10789_v54 = vmul.f32 %v44029_v9, %v10787_v56  ;;  %v11332_v58 = vmul.f32 %v44030_v4, %v11330_v0 }
 0xd30   :  { %v10790_v12 = vadd.f32 %v10789_v54, %v10247_v55 }
 0xd32   :  { %v11333_v32 = vadd.f32 %v11332_v58, %v10790_v12 }
 0xd8b   :  { %v11867_v53 = vpop.f32.mrb[22].mxu1 }
 0xd8c   :  { %v44031_v34 = vadd.f32 %v11867_v53, %v46016_v13  ;;  %v36411_v63 = vpop.f32.mrb[23].mxu1 }
 0xd8e   :  { %v11875_v21 = vmul.f32 %v44031_v34, %v11873_v5 }
 0xd90   :  { %v46971_v3 = vadd.f32 %v11875_v21, %v11333_v32 }
 0xd92   :  { %v11877_v2 = vadd.f32 %v46971_v3, %v46500_v38  ;;  %v47028_v38 = vld [vmem:[%s49411_s4] sm:$0x1] }
 0xd94   :  { %v11878_v62 = vmul.f32 0.5, %v11877_v2 }
 0xd96   :  { %v46976_v31 = vadd.f32 %v11878_v62, %v46505_v57  ;;  %v11885_v57 = vmul.f32 3.0, %v47028_v38 }
 0xd98   :  { %v11880_v9 = vmul.f32 2.0, %v46976_v31 }
 0xd9a   :  { %v11881_v54 = vsub.f32 %v11880_v9, %v46510_v25  ;;  %v47034_v25 = vld [vmem:[%s49412_s6] sm:$0x1] }
 0xd9b   :  { %v11886_v56 = vadd.f32 %v47034_v25, %v11885_v57 }
 0xd9c   :  { %v46981_v0 = vadd.f32 %v11881_v54, %v46971_v3 }
 0xd9d   :  { %v11891_v24 = vrot.slane %v11886_v56, %v45009_v59 }
 0xd9e   :  { %v11894_v15 = vsel %vm520_vm2, %v46981_v0, 0 }
 0xd9f   :  { %v11965_v55 = vand.u32 4294901760, %v11894_v15 }
 0xda1   :  { %v11966_v4 = vsub.f32 %v11894_v15, %v11965_v55  ;;  %v47102_v15 = vld [vmem:[%s49413_s8] ss:$0 sm:$0xff] }
 0xda2   :  { %49995 = vst [vmem:[#allocation26_spill] sm:$0xff] %v47102_v15 }
 0xda3   :  { %v11967_v16 = vand.u32 4294901760, %v11966_v4 }
 0xda5   :  { %v11968_v32 = vsub.f32 %v11966_v4, %v11967_v16 }
 0xda7   :  { %v11969_v12 = vand.u32 4294901760, %v11968_v32 }
 0xda9   :  { %36421 = vmatmul.mubr.f32.vlgmr.msra.gmra.mrb[24].mxu0 %v11969_v12 }
 0xdaa   :  { %41640 = vmatpush3.bf16.msra.mxu0 %v44837_v37  ;;  %36431 = vmatprep.mubr.msk.f32.mxu0 %vm44710_vm1, %v49724_v49 }
 0xdab   :  { %41641 = vmatprep.subr.bf16.mxu0 %v49723_v17 }
 0xdae   :  { %41643 = vmatpush3.bf16.msra.mxu0 %v44839_v42 }
 0xdaf   :  { %41644 = vmatprep.subr.bf16.mxu0 %v49723_v17 }
 0xdb1   :  { %36432 = vmatmul.mubr.f32.vlgmr.msra.gmra.mrb[24].mxu0 %v11965_v55 }
 0xdb2   :  { %41646 = vmatpush3.bf16.msra.mxu0 %v44841_v43  ;;  %36442 = vmatprep.mubr.msk.f32.mxu0 %vm44710_vm1, %v49724_v49 }
 0xdb3   :  { %41647 = vmatprep.subr.bf16.mxu0 %v49723_v17 }
 0xdb6   :  { %41649 = vmatpush3.bf16.msra.mxu0 %v44843_v44 }
 0xdb7   :  { %41650 = vmatprep.subr.bf16.mxu0 %v49723_v17 }
 0xdb9   :  { %36443 = vmatmul.mubr.f32.vlgmr.msra.gmra.mrb[24].mxu0 %v11966_v4 }
 0xdba   :  { %41652 = vmatpush3.bf16.msra.mxu0 %v44821_v18  ;;  %36453 = vmatprep.mubr.msk.f32.mxu0 %vm44710_vm1, %v49724_v49 }
 0xdbb   :  { %41653 = vmatprep.subr.bf16.mxu0 %v49723_v17 }
 0xdbe   :  { %41655 = vmatpush3.bf16.msra.mxu0 %v44833_v28 }
 0xdbf   :  { %41656 = vmatprep.subr.bf16.mxu0 %v49723_v17 }
 0xdc1   :  { %36454 = vmatmul.mubr.f32.vlgmr.msra.gmra.mrb[24].mxu0 %v11967_v16 }
 0xdc2   :  { %41658 = vmatpush3.bf16.msra.mxu0 %v44845_v45  ;;  %36464 = vmatprep.mubr.msk.f32.mxu0 %vm44710_vm1, %v49724_v49 }
 0xdc3   :  { %41659 = vmatprep.subr.bf16.mxu0 %v49723_v17 }
 0xdc6   :  { %41661 = vmatpush3.bf16.msra.mxu0 %v44847_v46 }
 0xdc7   :  { %41662 = vmatprep.subr.bf16.mxu0 %v49723_v17 }
 0xdc9   :  { %36465 = vmatmul.mubr.f32.vlgmr.msra.gmra.mrb[24].mxu0 %v11965_v55 }
 0xdca   :  { %41664 = vmatpush3.bf16.msra.mxu0 %v44821_v18  ;;  %36475 = vmatprep.mubr.msk.f32.mxu0 %vm44710_vm1, %v49724_v49 }
 0xdcb   :  { %41665 = vmatprep.subr.bf16.mxu0 %v49723_v17 }
 0xdce   :  { %41667 = vmatpush3.bf16.msra.mxu0 %v44833_v28 }
 0xdcf   :  { %41740 = vmatprep.subr.bf16.mxu0 %v49723_v17 }
 0xdd1   :  { %36476 = vmatmul.mubr.f32.vlgmr.msra.gmra.mrb[24].mxu0 %v11965_v55 }
 0xdd2   :  { %41742 = vmatpush3.bf16.msra.mxu0 %v44964_v20  ;;  %36608 = vmatprep.mubr.msk.f32.mxu0 %vm44710_vm1, %v49724_v49 }
 0xdd3   :  { %41743 = vmatprep.subr.bf16.mxu0 %v49723_v17 }
 0xdd6   :  { %41745 = vmatpush3.bf16.msra.mxu0 %v44972_v26 }
 0xdd7   :  { %41746 = vmatprep.subr.bf16.mxu0 %v49723_v17 }
 0xdda   :  { %41748 = vmatpush3.bf16.msra.mxu0 %v45089_v48 }
 0xddb   :  { %41749 = vmatprep.subr.bf16.mxu0 %v49723_v17 }
 0xdde   :  { %41751 = vmatpush3.bf16.msra.mxu0 %v45093_v51 }
 0xddf   :  { %41752 = vmatprep.subr.bf16.mxu0 %v49723_v17 }
 0xea4   :  { %v12377_v50 = vpop.f32.mrb[24].mxu0 }
 0xea5   :  { %v44032_v58 = vadd.f32 %v12377_v50, %v11891_v24  ;;  %v36477_v53 = vpop.f32.mrb[25].mxu0 }
 0xea6   :  { %v49997_v53 = vld [vmem:[#allocation29_spill] sm:$0xff] }
 0xea7   :  { %v12381_v5 = vmax.f32 %v44032_v58, 0.0  ;;  %v49996_v58 = vld [vmem:[#allocation15_spill] sm:$0xff] }
 0xea9   :  { %v12383_v34 = vsel %vm1025_vm3, %v12381_v5, 0  ;;  %v49998_v5 = vld [vmem:[#allocation16_spill] sm:$0xff] }
 0xeaa   :  { %v12458_v63 = vand.u32 4294901760, %v12383_v34 }
 0xeac   :  { %v12459_v21 = vsub.f32 %v12383_v34, %v12458_v63  ;;  %v49999_v34 = vld [vmem:[#allocation30_spill] sm:$0xff] }
 0xeae   :  { %v12460_v2 = vand.u32 4294901760, %v12459_v21 }
 0xeb0   :  { %v12461_v62 = vsub.f32 %v12459_v21, %v12460_v2 }
 0xeb2   :  { %v12462_v9 = vand.u32 4294901760, %v12461_v62  ;;  %v50003_v62 = vld [vmem:[#allocation34_spill] sm:$0xff] }
 0xeb4   :  { %36495 = vmatmul.mubr.f32.vlgmr.msra.gmra.mrb[24].mxu1 %v12462_v9  ;;  %v50004_v9 = vld [vmem:[#allocation23_spill] sm:$0xff] }
 0xeb5   :  { %41682 = vmatpush3.bf16.msra.mxu1 %v49915_v35  ;;  %36513 = vmatprep.mubr.msk.f32.mxu1 %vm44710_vm1, %v49724_v49 }
 0xeb6   :  { %41683 = vmatprep.subr.bf16.mxu1 %v49723_v17 }
 0xeb9   :  { %41685 = vmatpush3.bf16.msra.mxu1 %v49916_v10 }
 0xeba   :  { %41686 = vmatprep.subr.bf16.mxu1 %v49723_v17 }
 0xebd   :  { %41688 = vmatpush3.bf16.msra.mxu1 %v49917_v30 }
 0xebe   :  { %41689 = vmatprep.subr.bf16.mxu1 %v49723_v17 }
 0xec1   :  { %41691 = vmatpush3.bf16.msra.mxu1 %v49918_v33 }
 0xec2   :  { %41692 = vmatprep.subr.bf16.mxu1 %v49723_v17 }
 0xec4   :  { %36514 = vmatmul.mubr.f32.vlgmr.msra.gmra.mrb[24].mxu1 %v12458_v63 }
 0xec5   :  { %41694 = vmatpush3.bf16.msra.mxu1 %v49919_v19  ;;  %36532 = vmatprep.mubr.msk.f32.mxu1 %vm44710_vm1, %v49724_v49 }
 0xec6   :  { %41695 = vmatprep.subr.bf16.mxu1 %v49723_v17 }
 0xec9   :  { %41697 = vmatpush3.bf16.msra.mxu1 %v49920_v14 }
 0xeca   :  { %41698 = vmatprep.subr.bf16.mxu1 %v49723_v17 }
 0xecd   :  { %41700 = vmatpush3.bf16.msra.mxu1 %v49921_v8 }
 0xece   :  { %41701 = vmatprep.subr.bf16.mxu1 %v49723_v17 }
 0xed1   :  { %41703 = vmatpush3.bf16.msra.mxu1 %v49922_v7 }
 0xed2   :  { %41704 = vmatprep.subr.bf16.mxu1 %v49723_v17 }
 0xed4   :  { %36533 = vmatmul.mubr.f32.vlgmr.msra.gmra.mrb[24].mxu1 %v12459_v21  ;;  %v50001_v21 = vld [vmem:[#allocation32_spill] sm:$0xff] }
 0xed5   :  { %41706 = vmatpush3.bf16.msra.mxu1 %v44894_v1  ;;  %36551 = vmatprep.mubr.msk.f32.mxu1 %vm44710_vm1, %v49724_v49 }
 0xed6   :  { %41707 = vmatprep.subr.bf16.mxu1 %v49723_v17 }
 0xed9   :  { %41709 = vmatpush3.bf16.msra.mxu1 %v44904_v6 }
 0xeda   :  { %41710 = vmatprep.subr.bf16.mxu1 %v49723_v17 }
 0xedd   :  { %41712 = vmatpush3.bf16.msra.mxu1 %v44914_v11 }
 0xede   :  { %41713 = vmatprep.subr.bf16.mxu1 %v49723_v17 }
 0xee1   :  { %41715 = vmatpush3.bf16.msra.mxu1 %v44924_v22 }
 0xee2   :  { %41716 = vmatprep.subr.bf16.mxu1 %v49723_v17 }
 0xee4   :  { %36552 = vmatmul.mubr.f32.vlgmr.msra.gmra.mrb[24].mxu1 %v12460_v2  ;;  %v50002_v2 = vld [vmem:[#allocation18_spill] sm:$0xff] }
 0xee5   :  { %41718 = vmatpush3.bf16.msra.mxu1 %v49923_v40  ;;  %36570 = vmatprep.mubr.msk.f32.mxu1 %vm44710_vm1, %v49724_v49 }
 0xee6   :  { %41719 = vmatprep.subr.bf16.mxu1 %v49723_v17 }
 0xee9   :  { %41721 = vmatpush3.bf16.msra.mxu1 %v49924_v39 }
 0xeea   :  { %41722 = vmatprep.subr.bf16.mxu1 %v49723_v17 }
 0xeed   :  { %41724 = vmatpush3.bf16.msra.mxu1 %v49925_v41 }
 0xeee   :  { %41725 = vmatprep.subr.bf16.mxu1 %v49723_v17 }
 0xef1   :  { %41727 = vmatpush3.bf16.msra.mxu1 %v49926_v52 }
 0xef2   :  { %41728 = vmatprep.subr.bf16.mxu1 %v49723_v17 }
 0xef4   :  { %36571 = vmatmul.mubr.f32.vlgmr.msra.gmra.mrb[24].mxu1 %v12458_v63 }
 0xef5   :  { %41730 = vmatpush3.bf16.msra.mxu1 %v44894_v1  ;;  %36589 = vmatprep.mubr.msk.f32.mxu1 %vm44710_vm1, %v49724_v49 }
 0xef6   :  { %41731 = vmatprep.subr.bf16.mxu1 %v49723_v17 }
 0xef9   :  { %41733 = vmatpush3.bf16.msra.mxu1 %v44904_v6 }
 0xefa   :  { %41734 = vmatprep.subr.bf16.mxu1 %v49723_v17 }
 0xefd   :  { %41736 = vmatpush3.bf16.msra.mxu1 %v44914_v11 }
 0xefe   :  { %41737 = vmatprep.subr.bf16.mxu1 %v49723_v17 }
 0xf01   :  { %41739 = vmatpush3.bf16.msra.mxu1 %v44924_v22 }
 0xf02   :  { %41812 = vmatprep.subr.bf16.mxu1 %v49723_v17 }
 0xf04   :  { %36590 = vmatmul.mubr.f32.vlgmr.msra.gmra.mrb[24].mxu1 %v12458_v63  ;;  %v50000_v63 = vld [vmem:[#allocation17_spill] sm:$0xff] }
 0xf05   :  { %41814 = vmatpush3.bf16.msra.mxu1 %v49853_v23  ;;  %36722 = vmatprep.mubr.msk.f32.mxu1 %vm44710_vm1, %v49724_v49 }
 0xf06   :  { %41815 = vmatprep.subr.bf16.mxu1 %v49723_v17 }
 0xf09   :  { %41817 = vmatpush3.bf16.msra.mxu1 %v49854_v29 }
 0xf0a   :  { %41818 = vmatprep.subr.bf16.mxu1 %v49723_v17 }
 0xf0d   :  { %41820 = vmatpush3.bf16.msra.mxu1 %v49855_v36 }
 0xf0e   :  { %41821 = vmatprep.subr.bf16.mxu1 %v49723_v17 }
 0xf11   :  { %41823 = vmatpush3.bf16.msra.mxu1 %v49927_v47 }
 0xf12   :  { %41824 = vmatprep.subr.bf16.mxu1 %v49723_v17 }
 0xfd7   :  { %v12918_v54 = vpop.f32.mrb[24].mxu1 }
 0xfd8   :  { %v44033_v55 = vadd.f32 %v47102_v15, %v12918_v54  ;;  %v36591_v4 = vpop.f32.mrb[25].mxu1  ;;  %v50005_v54 = vld [vmem:[#allocation35_spill] sm:$0xff] }
 0xfd9   :  { %v50007_v4 = vld [vmem:[#allocation36_spill] sm:$0xff] }
 0xfda   :  { %v12922_v16 = vmax.f32 %v44033_v55, 0.0  ;;  %v50006_v55 = vld [vmem:[#allocation24_spill] sm:$0xff] }
 0xfdc   :  { %v12924_v32 = vsel %vm1025_vm3, %v12922_v16, 0  ;;  %v50008_v16 = vld [vmem:[#allocation19_spill] sm:$0xff] }
 0xfdd   :  { %v47106_v12 = vand.u32 4294901760, %v12924_v32 }
 0xfdf   :  { %v47109_v57 = vsub.f32 %v12924_v32, %v47106_v12  ;;  %v50009_v32 = vld [vmem:[#allocation37_spill] sm:$0xff] }
 0xfe1   :  { %v47112_v56 = vand.u32 4294901760, %v47109_v57 }
 0xfe3   :  { %v13002_v24 = vsub.f32 %v47109_v57, %v47112_v56 }
 0xfe5   :  { %v47116_v50 = vand.u32 4294901760, %v13002_v24  ;;  %v50010_v24 = vld [vmem:[#allocation20_spill] sm:$0xff] }
 0xfe7   :  { %36609 = vmatmul.mubr.f32.vlgmr.msra.gmra.mrb[26].mxu0 %v47116_v50  ;;  %36723 = vmatmul.mubr.f32.vlgmr.msra.gmra.mrb[26].mxu1 %v47116_v50 }
 0xfe8   :  { %41754 = vmatpush3.bf16.msra.mxu0 %v49996_v58  ;;  %41826 = vmatpush3.bf16.msra.mxu1 %v49997_v53  ;;  %v50039_v53 = vld [vmem:[#allocation64_spill] sm:$0xff] }
 0xfe9   :  { %41755 = vmatprep.subr.bf16.mxu0 %v49723_v17  ;;  %41827 = vmatprep.subr.bf16.mxu1 %v49723_v17 }
 0xfea   :  { %36627 = vmatprep.mubr.msk.f32.mxu0 %vm44710_vm1, %v49724_v49  ;;  %36741 = vmatprep.mubr.msk.f32.mxu1 %vm44710_vm1, %v49724_v49 }
 0xfec   :  { %41757 = vmatpush3.bf16.msra.mxu0 %v49998_v5  ;;  %41829 = vmatpush3.bf16.msra.mxu1 %v49999_v34  ;;  %v50035_v34 = vld [vmem:[#allocation60_spill] sm:$0xff]  ;;  %v50038_v5 = vld [vmem:[#allocation50_spill] sm:$0xff] }
 0xfed   :  { %41758 = vmatprep.subr.bf16.mxu0 %v49723_v17  ;;  %41830 = vmatprep.subr.bf16.mxu1 %v49723_v17 }
 0xff0   :  { %41760 = vmatpush3.bf16.msra.mxu0 %v50000_v63  ;;  %41832 = vmatpush3.bf16.msra.mxu1 %v50001_v21  ;;  %v50033_v21 = vld [vmem:[#allocation59_spill] sm:$0xff]  ;;  %v50034_v63 = vld [vmem:[#allocation48_spill] sm:$0xff] }
 0xff1   :  { %41761 = vmatprep.subr.bf16.mxu0 %v49723_v17  ;;  %41833 = vmatprep.subr.bf16.mxu1 %v49723_v17 }
 0xff4   :  { %41763 = vmatpush3.bf16.msra.mxu0 %v50002_v2  ;;  %41835 = vmatpush3.bf16.msra.mxu1 %v50003_v62  ;;  %v50022_v62 = vld [vmem:[#allocation22_spill] sm:$0xff] }
 0xff5   :  { %41764 = vmatprep.subr.bf16.mxu0 %v49723_v17  ;;  %41836 = vmatprep.subr.bf16.mxu1 %v49723_v17  ;;  %v50032_v2 = vld [vmem:[#allocation46_spill] sm:$0xff] }
 0xff7   :  { %36628 = vmatmul.mubr.f32.vlgmr.msra.gmra.mrb[26].mxu0 %v47106_v12  ;;  %36742 = vmatmul.mubr.f32.vlgmr.msra.gmra.mrb[26].mxu1 %v47106_v12 }
 0xff8   :  { %41766 = vmatpush3.bf16.msra.mxu0 %v50004_v9  ;;  %41838 = vmatpush3.bf16.msra.mxu1 %v50005_v54  ;;  %v50011_v54 = vld [vmem:[#allocation38_spill] sm:$0xff]  ;;  %v50021_v9 = vld [vmem:[#allocation45_spill] sm:$0xff] }
 0xff9   :  { %41767 = vmatprep.subr.bf16.mxu0 %v49723_v17  ;;  %41839 = vmatprep.subr.bf16.mxu1 %v49723_v17 }
 0xffa   :  { %36646 = vmatprep.mubr.msk.f32.mxu0 %vm44710_vm1, %v49724_v49  ;;  %36760 = vmatprep.mubr.msk.f32.mxu1 %vm44710_vm1, %v49724_v49 }
 0xffc   :  { %41769 = vmatpush3.bf16.msra.mxu0 %v50006_v55  ;;  %41841 = vmatpush3.bf16.msra.mxu1 %v50007_v4  ;;  %v50016_v4 = vld [vmem:[#allocation41_spill] sm:$0xff]  ;;  %v50018_v55 = vld [vmem:[#allocation43_spill] sm:$0xff] }
 0xffd   :  { %41770 = vmatprep.subr.bf16.mxu0 %v49723_v17  ;;  %41842 = vmatprep.subr.bf16.mxu1 %v49723_v17 }
0x1000   :  { %41772 = vmatpush3.bf16.msra.mxu0 %v50008_v16  ;;  %41844 = vmatpush3.bf16.msra.mxu1 %v50009_v32  ;;  %v31252_v32 = vld [vmem:[%s49414_s1 + $0x18] sm:$0xff]  ;;  %v50014_v16 = vmov 3  }
0x1001   :  { %41773 = vmatprep.subr.bf16.mxu0 %v49723_v17  ;;  %41845 = vmatprep.subr.bf16.mxu1 %v49723_v17 }
0x1002   :  { %13465 = vperm.xlu1 %44667, %v31252_v32   ;;  %14551 = vperm.xlu0 %44669, %v31252_v32  }
0x1004   :  { %41775 = vmatpush3.bf16.msra.mxu0 %v50010_v24  ;;  %41847 = vmatpush3.bf16.msra.mxu1 %v50011_v54  ;;  %v50012_v54 = vmov 1   ;;  %v50013_v24 = vmov 0  }
0x1005   :  { %41776 = vmatprep.subr.bf16.mxu0 %v49723_v17  ;;  %41848 = vmatprep.subr.bf16.mxu1 %v49723_v17 }
0x1006   :  { %44668 = vset.pattern.permute.xlu1 %v50012_v54  ;;  %44672 = vset.pattern.permute.xlu0 %v50013_v24  ;;  %v50015_v24 = vld [vmem:[#allocation31_spill] sm:$0xff] }
0x1007   :  { %36647 = vmatmul.mubr.f32.vlgmr.msra.gmra.mrb[26].mxu0 %v47109_v57  ;;  %36761 = vmatmul.mubr.f32.vlgmr.msra.gmra.mrb[26].mxu1 %v47109_v57 }
0x1008   :  { %41778 = vmatpush3.bf16.msra.mxu0 %v44964_v20  ;;  %41850 = vmatpush3.bf16.msra.mxu1 %v49853_v23 }
0x1009   :  { %41779 = vmatprep.subr.bf16.mxu0 %v49723_v17  ;;  %41851 = vmatprep.subr.bf16.mxu1 %v49723_v17 }
0x100a   :  { %36665 = vmatprep.mubr.msk.f32.mxu0 %vm44710_vm1, %v49724_v49  ;;  %36779 = vmatprep.mubr.msk.f32.mxu1 %vm44710_vm1, %v49724_v49 }
0x100b   :  { %14008 = vperm.xlu1 %44668, %v31252_v32  }
0x100c   :  { %41781 = vmatpush3.bf16.msra.mxu0 %v44972_v26  ;;  %41853 = vmatpush3.bf16.msra.mxu1 %v49854_v29 }
0x100d   :  { %41782 = vmatprep.subr.bf16.mxu0 %v49723_v17  ;;  %41854 = vmatprep.subr.bf16.mxu1 %v49723_v17 }
0x100f   :  { %44670 = vset.pattern.permute.xlu1 %v50014_v16  ;;  %v50017_v16 = vld [vmem:[#allocation33_spill] sm:$0xff] }
0x1010   :  { %41784 = vmatpush3.bf16.msra.mxu0 %v45089_v48  ;;  %41856 = vmatpush3.bf16.msra.mxu1 %v49855_v36 }
0x1011   :  { %41785 = vmatprep.subr.bf16.mxu0 %v49723_v17  ;;  %41857 = vmatprep.subr.bf16.mxu1 %v49723_v17 }
0x1012   :  { %15094 = vperm.xlu1 %44670, %v31252_v32  }
0x1014   :  { %41787 = vmatpush3.bf16.msra.mxu0 %v45093_v51  ;;  %41859 = vmatpush3.bf16.msra.mxu1 %v49927_v47 }
0x1015   :  { %41788 = vmatprep.subr.bf16.mxu0 %v49723_v17  ;;  %41860 = vmatprep.subr.bf16.mxu1 %v49723_v17 }
0x1017   :  { %36666 = vmatmul.mubr.f32.vlgmr.msra.gmra.mrb[26].mxu0 %v47112_v56  ;;  %36780 = vmatmul.mubr.f32.vlgmr.msra.gmra.mrb[26].mxu1 %v47112_v56 }
0x1018   :  { %41790 = vmatpush3.bf16.msra.mxu0 %v50015_v24  ;;  %41862 = vmatpush3.bf16.msra.mxu1 %v50016_v4  ;;  %v50019_v4 = vmov 4   ;;  %v50020_v24 = vld [vmem:[#allocation21_spill] sm:$0xff] }
0x1019   :  { %41791 = vmatprep.subr.bf16.mxu0 %v49723_v17  ;;  %41863 = vmatprep.subr.bf16.mxu1 %v49723_v17 }
0x101a   :  { %36684 = vmatprep.mubr.msk.f32.mxu0 %vm44710_vm1, %v49724_v49  ;;  %36798 = vmatprep.mubr.msk.f32.mxu1 %vm44710_vm1, %v49724_v49 }
0x101b   :  { %44671 = vset.pattern.permute.xlu1 %v50019_v4  ;;  %v50031_v4 = vld [vmem:[#allocation58_spill] sm:$0xff] }
0x101c   :  { %41793 = vmatpush3.bf16.msra.mxu0 %v50017_v16  ;;  %41865 = vmatpush3.bf16.msra.mxu1 %v50018_v55  ;;  %v50023_v16 = vld [vmem:[#allocation47_spill] sm:$0xff]  ;;  %v50029_v55 = vld [vmem:[#allocation57_spill] sm:$0xff] }
0x101d   :  { %41794 = vmatprep.subr.bf16.mxu0 %v49723_v17  ;;  %41866 = vmatprep.subr.bf16.mxu1 %v49723_v17 }
0x101e   :  { %15637 = vperm.xlu1 %44671, %v31252_v32   ;;  %v50024_v32 = vld [vmem:[#allocation39_spill] sm:$0xff] }
0x1020   :  { %41796 = vmatpush3.bf16.msra.mxu0 %v50020_v24  ;;  %41868 = vmatpush3.bf16.msra.mxu1 %v50021_v9  ;;  %v50027_v9 = vld [vmem:[#allocation56_spill] sm:$0xff]  ;;  %v50028_v24 = vld [vmem:[#allocation42_spill] sm:$0xff] }
0x1021   :  { %41797 = vmatprep.subr.bf16.mxu0 %v49723_v17  ;;  %41869 = vmatprep.subr.bf16.mxu1 %v49723_v17 }
0x1022   :  { %44673 = vset.pattern.permute.xlu1 %v50012_v54  ;;  %v50030_v54 = vld [vmem:[#allocation44_spill] sm:$0xff] }
0x1024   :  { %41799 = vmatpush3.bf16.msra.mxu0 %v50022_v62  ;;  %41871 = vmatpush3.bf16.msra.mxu1 %v50023_v16  ;;  %v50025_v16 = vld [vmem:[#allocation54_spill] sm:$0xff]  ;;  %v50026_v62 = vld [vmem:[#allocation40_spill] sm:$0xff] }
0x1025   :  { %41800 = vmatprep.subr.bf16.mxu0 %v49723_v17  ;;  %41872 = vmatprep.subr.bf16.mxu1 %v49723_v17 }
0x1027   :  { %36685 = vmatmul.mubr.f32.vlgmr.msra.gmra.mrb[26].mxu0 %v47106_v12  ;;  %36799 = vmatmul.mubr.f32.vlgmr.msra.gmra.mrb[26].mxu1 %v47106_v12 }
0x1028   :  { %41802 = vmatpush3.bf16.msra.mxu0 %v44964_v20  ;;  %41874 = vmatpush3.bf16.msra.mxu1 %v49853_v23 }
0x1029   :  { %41803 = vmatprep.subr.bf16.mxu0 %v49723_v17  ;;  %41875 = vmatprep.subr.bf16.mxu1 %v49723_v17 }
0x102a   :  { %36703 = vmatprep.mubr.msk.f32.mxu0 %vm44710_vm1, %v49724_v49  ;;  %36817 = vmatprep.mubr.msk.f32.mxu1 %vm44710_vm1, %v49724_v49 }
0x102c   :  { %41805 = vmatpush3.bf16.msra.mxu0 %v44972_v26  ;;  %41877 = vmatpush3.bf16.msra.mxu1 %v49854_v29 }
0x102d   :  { %41806 = vmatprep.subr.bf16.mxu0 %v49723_v17  ;;  %41878 = vmatprep.subr.bf16.mxu1 %v49723_v17 }
0x1030   :  { %41808 = vmatpush3.bf16.msra.mxu0 %v45089_v48  ;;  %41880 = vmatpush3.bf16.msra.mxu1 %v49855_v36 }
0x1031   :  { %41809 = vmatprep.subr.bf16.mxu0 %v49723_v17  ;;  %41881 = vmatprep.subr.bf16.mxu1 %v49723_v17 }
0x1034   :  { %41811 = vmatpush3.bf16.msra.mxu0 %v45093_v51  ;;  %41883 = vmatpush3.bf16.msra.mxu1 %v49927_v47 }
0x1035   :  { %41884 = vmatprep.subr.bf16.mxu0 %v49723_v17  ;;  %41956 = vmatprep.subr.bf16.mxu1 %v49723_v17 }
0x1037   :  { %36704 = vmatmul.mubr.f32.vlgmr.msra.gmra.mrb[26].mxu0 %v47106_v12  ;;  %36818 = vmatmul.mubr.f32.vlgmr.msra.gmra.mrb[26].mxu1 %v47106_v12 }
0x1038   :  { %41886 = vmatpush3.bf16.msra.mxu0 %v50024_v32  ;;  %41958 = vmatpush3.bf16.msra.mxu1 %v50025_v16 }
0x1039   :  { %41887 = vmatprep.subr.bf16.mxu0 %v49723_v17  ;;  %41959 = vmatprep.subr.bf16.mxu1 %v49723_v17 }
0x103a   :  { %36836 = vmatprep.mubr.msk.f32.mxu0 %vm44710_vm1, %v49724_v49  ;;  %36950 = vmatprep.mubr.msk.f32.mxu1 %vm44710_vm1, %v49724_v49 }
0x103c   :  { %41889 = vmatpush3.bf16.msra.mxu0 %v50026_v62  ;;  %41961 = vmatpush3.bf16.msra.mxu1 %v50027_v9 }
0x103d   :  { %41890 = vmatprep.subr.bf16.mxu0 %v49723_v17  ;;  %41962 = vmatprep.subr.bf16.mxu1 %v49723_v17 }
0x1040   :  { %41892 = vmatpush3.bf16.msra.mxu0 %v50028_v24  ;;  %41964 = vmatpush3.bf16.msra.mxu1 %v50029_v55 }
0x1041   :  { %41893 = vmatprep.subr.bf16.mxu0 %v49723_v17  ;;  %41965 = vmatprep.subr.bf16.mxu1 %v49723_v17 }
0x1044   :  { %41895 = vmatpush3.bf16.msra.mxu0 %v50030_v54  ;;  %41967 = vmatpush3.bf16.msra.mxu1 %v50031_v4 }
0x1045   :  { %41896 = vmatprep.subr.bf16.mxu0 %v49723_v17  ;;  %41968 = vmatprep.subr.bf16.mxu1 %v49723_v17 }
0x1047   :  { %36837 = vmatmul.mubr.f32.vlgmr.msra.gmra.mrb[28].mxu0 %v47116_v50  ;;  %36951 = vmatmul.mubr.f32.vlgmr.msra.gmra.mrb[28].mxu1 %v47116_v50 }
0x1048   :  { %41898 = vmatpush3.bf16.msra.mxu0 %v50032_v2  ;;  %41970 = vmatpush3.bf16.msra.mxu1 %v50033_v21  ;;  %v50036_v2 = vld [vmem:[#allocation49_spill] sm:$0xff]  ;;  %v50037_v21 = vld [vmem:[#allocation62_spill] sm:$0xff] }
0x1049   :  { %41899 = vmatprep.subr.bf16.mxu0 %v49723_v17  ;;  %41971 = vmatprep.subr.bf16.mxu1 %v49723_v17 }
0x104a   :  { %36855 = vmatprep.mubr.msk.f32.mxu0 %vm44710_vm1, %v49724_v49  ;;  %36969 = vmatprep.mubr.msk.f32.mxu1 %vm44710_vm1, %v49724_v49 }
0x104c   :  { %41901 = vmatpush3.bf16.msra.mxu0 %v50034_v63  ;;  %41973 = vmatpush3.bf16.msra.mxu1 %v50035_v34  ;;  %v50040_v34 = vld [vmem:[#allocation51_spill] sm:$0xff]  ;;  %v50047_v63 = vld [vmem:[#allocation70_spill] sm:$0xff] }
0x104d   :  { %41902 = vmatprep.subr.bf16.mxu0 %v49723_v17  ;;  %41974 = vmatprep.subr.bf16.mxu1 %v49723_v17 }
0x1050   :  { %41904 = vmatpush3.bf16.msra.mxu0 %v50036_v2  ;;  %41976 = vmatpush3.bf16.msra.mxu1 %v50037_v21  ;;  %v50041_v2 = vld [vmem:[#allocation66_spill] sm:$0xff]  ;;  %v50046_v21 = vld [vmem:[#allocation55_spill] sm:$0xff] }
0x1051   :  { %41905 = vmatprep.subr.bf16.mxu0 %v49723_v17  ;;  %41977 = vmatprep.subr.bf16.mxu1 %v49723_v17 }
0x1054   :  { %41907 = vmatpush3.bf16.msra.mxu0 %v50038_v5  ;;  %41979 = vmatpush3.bf16.msra.mxu1 %v50039_v53  ;;  %v50042_v53 = vld [vmem:[#allocation52_spill] sm:$0xff] }
0x1055   :  { %41908 = vmatprep.subr.bf16.mxu0 %v49723_v17  ;;  %41980 = vmatprep.subr.bf16.mxu1 %v49723_v17  ;;  %v50043_v5 = vld [vmem:[#allocation68_spill] sm:$0xff] }
0x1057   :  { %36856 = vmatmul.mubr.f32.vlgmr.msra.gmra.mrb[28].mxu0 %v47106_v12  ;;  %36970 = vmatmul.mubr.f32.vlgmr.msra.gmra.mrb[28].mxu1 %v47106_v12 }
0x1058   :  { %41910 = vmatpush3.bf16.msra.mxu0 %v50040_v34  ;;  %41982 = vmatpush3.bf16.msra.mxu1 %v50041_v2  ;;  %v50044_v34 = vld [vmem:[#allocation53_spill] sm:$0xff] }
0x1059   :  { %41911 = vmatprep.subr.bf16.mxu0 %v49723_v17  ;;  %41983 = vmatprep.subr.bf16.mxu1 %v49723_v17  ;;  %v50045_v2 = vld [vmem:[#allocation69_spill] sm:$0xff] }
0x105a   :  { %36874 = vmatprep.mubr.msk.f32.mxu0 %vm44710_vm1, %v49724_v49  ;;  %36988 = vmatprep.mubr.msk.f32.mxu1 %vm44710_vm1, %v49724_v49 }
0x105c   :  { %41913 = vmatpush3.bf16.msra.mxu0 %v50042_v53  ;;  %41985 = vmatpush3.bf16.msra.mxu1 %v50043_v5  ;;  %v50054_v5 = vld [vmem:[#allocation67_spill] sm:$0xff] }
0x105d   :  { %41914 = vmatprep.subr.bf16.mxu0 %v49723_v17  ;;  %41986 = vmatprep.subr.bf16.mxu1 %v49723_v17  ;;  %v50055_v53 = vld [vmem:[#allocation79_spill] sm:$0xff] }
0x1060   :  { %41916 = vmatpush3.bf16.msra.mxu0 %v50044_v34  ;;  %41988 = vmatpush3.bf16.msra.mxu1 %v50045_v2  ;;  %v50050_v2 = vld [vmem:[#allocation63_spill] sm:$0xff] }
0x1061   :  { %41917 = vmatprep.subr.bf16.mxu0 %v49723_v17  ;;  %41989 = vmatprep.subr.bf16.mxu1 %v49723_v17  ;;  %v50051_v34 = vld [vmem:[#allocation75_spill] sm:$0xff] }
0x1064   :  { %41919 = vmatpush3.bf16.msra.mxu0 %v50046_v21  ;;  %41991 = vmatpush3.bf16.msra.mxu1 %v50047_v63  ;;  %v50048_v63 = vld [vmem:[#allocation61_spill] sm:$0xff] }
0x1065   :  { %41920 = vmatprep.subr.bf16.mxu0 %v49723_v17  ;;  %41992 = vmatprep.subr.bf16.mxu1 %v49723_v17  ;;  %v50049_v21 = vld [vmem:[#allocation73_spill] sm:$0xff] }
0x1067   :  { %36875 = vmatmul.mubr.f32.vlgmr.msra.gmra.mrb[28].mxu0 %v47109_v57  ;;  %36989 = vmatmul.mubr.f32.vlgmr.msra.gmra.mrb[28].mxu1 %v47109_v57 }
0x1068   :  { %41922 = vmatpush3.bf16.msra.mxu0 %v50024_v32  ;;  %41994 = vmatpush3.bf16.msra.mxu1 %v50025_v16 }
0x1069   :  { %41923 = vmatprep.subr.bf16.mxu0 %v49723_v17  ;;  %41995 = vmatprep.subr.bf16.mxu1 %v49723_v17 }
0x106a   :  { %36893 = vmatprep.mubr.msk.f32.mxu0 %vm44710_vm1, %v49724_v49  ;;  %37007 = vmatprep.mubr.msk.f32.mxu1 %vm44710_vm1, %v49724_v49 }
0x106c   :  { %41925 = vmatpush3.bf16.msra.mxu0 %v50026_v62  ;;  %41997 = vmatpush3.bf16.msra.mxu1 %v50027_v9 }
0x106d   :  { %41926 = vmatprep.subr.bf16.mxu0 %v49723_v17  ;;  %41998 = vmatprep.subr.bf16.mxu1 %v49723_v17 }
0x1070   :  { %41928 = vmatpush3.bf16.msra.mxu0 %v50028_v24  ;;  %42000 = vmatpush3.bf16.msra.mxu1 %v50029_v55 }
0x1071   :  { %41929 = vmatprep.subr.bf16.mxu0 %v49723_v17  ;;  %42001 = vmatprep.subr.bf16.mxu1 %v49723_v17 }
0x1074   :  { %41931 = vmatpush3.bf16.msra.mxu0 %v50030_v54  ;;  %42003 = vmatpush3.bf16.msra.mxu1 %v50031_v4 }
0x1075   :  { %41932 = vmatprep.subr.bf16.mxu0 %v49723_v17  ;;  %42004 = vmatprep.subr.bf16.mxu1 %v49723_v17 }
0x1077   :  { %36894 = vmatmul.mubr.f32.vlgmr.msra.gmra.mrb[28].mxu0 %v47112_v56  ;;  %37008 = vmatmul.mubr.f32.vlgmr.msra.gmra.mrb[28].mxu1 %v47112_v56 }
0x1078   :  { %41934 = vmatpush3.bf16.msra.mxu0 %v50048_v63  ;;  %42006 = vmatpush3.bf16.msra.mxu1 %v50049_v21  ;;  %v50052_v63 = vld [vmem:[#allocation65_spill] sm:$0xff] }
0x1079   :  { %41935 = vmatprep.subr.bf16.mxu0 %v49723_v17  ;;  %42007 = vmatprep.subr.bf16.mxu1 %v49723_v17  ;;  %v50053_v21 = vld [vmem:[#allocation77_spill] sm:$0xff] }
0x107a   :  { %36912 = vmatprep.mubr.msk.f32.mxu0 %vm44710_vm1, %v49724_v49  ;;  %37026 = vmatprep.mubr.msk.f32.mxu1 %vm44710_vm1, %v49724_v49 }
0x107c   :  { %41937 = vmatpush3.bf16.msra.mxu0 %v50050_v2  ;;  %42009 = vmatpush3.bf16.msra.mxu1 %v50051_v34  ;;  %v50060_v34 = vld [vmem:[#allocation78_spill] sm:$0xff]  ;;  %v50061_v2 = vld [vmem:[#allocation80_spill] sm:$0xff] }
0x107d   :  { %41938 = vmatprep.subr.bf16.mxu0 %v49723_v17  ;;  %42010 = vmatprep.subr.bf16.mxu1 %v49723_v17 }
0x1080   :  { %41940 = vmatpush3.bf16.msra.mxu0 %v50052_v63  ;;  %42012 = vmatpush3.bf16.msra.mxu1 %v50053_v21  ;;  %v50058_v21 = vld [vmem:[#allocation74_spill] sm:$0xff]  ;;  %v50059_v63 = vld [vmem:[#allocation76_spill] sm:$0xff] }
0x1081   :  { %41941 = vmatprep.subr.bf16.mxu0 %v49723_v17  ;;  %42013 = vmatprep.subr.bf16.mxu1 %v49723_v17 }
0x1084   :  { %41943 = vmatpush3.bf16.msra.mxu0 %v50054_v5  ;;  %42015 = vmatpush3.bf16.msra.mxu1 %v50055_v53  ;;  %v50056_v53 = vld [vmem:[#allocation71_spill] sm:$0xff]  ;;  %v50057_v5 = vld [vmem:[#allocation72_spill] sm:$0xff] }
0x1085   :  { %41944 = vmatprep.subr.bf16.mxu0 %v49723_v17  ;;  %42016 = vmatprep.subr.bf16.mxu1 %v49723_v17 }
0x1087   :  { %36913 = vmatmul.mubr.f32.vlgmr.msra.gmra.mrb[28].mxu0 %v47106_v12  ;;  %37027 = vmatmul.mubr.f32.vlgmr.msra.gmra.mrb[28].mxu1 %v47106_v12 }
0x1088   :  { %41946 = vmatpush3.bf16.msra.mxu0 %v50024_v32  ;;  %42018 = vmatpush3.bf16.msra.mxu1 %v50025_v16 }
0x1089   :  { %41947 = vmatprep.subr.bf16.mxu0 %v49723_v17  ;;  %42019 = vmatprep.subr.bf16.mxu1 %v49723_v17 }
0x108a   :  { %36931 = vmatprep.mubr.msk.f32.mxu0 %vm44710_vm1, %v49724_v49  ;;  %37045 = vmatprep.mubr.msk.f32.mxu1 %vm44710_vm1, %v49724_v49 }
0x108c   :  { %41949 = vmatpush3.bf16.msra.mxu0 %v50026_v62  ;;  %42021 = vmatpush3.bf16.msra.mxu1 %v50027_v9 }
0x108d   :  { %41950 = vmatprep.subr.bf16.mxu0 %v49723_v17  ;;  %42022 = vmatprep.subr.bf16.mxu1 %v49723_v17 }
0x1090   :  { %41952 = vmatpush3.bf16.msra.mxu0 %v50028_v24  ;;  %42024 = vmatpush3.bf16.msra.mxu1 %v50029_v55  ;;  %v14552_v55 = vpop.permute.xlu0 %14551 }
0x1091   :  { %41953 = vmatprep.subr.bf16.mxu0 %v49723_v17  ;;  %42025 = vmatprep.subr.bf16.mxu1 %v49723_v17 }
0x1094   :  { %41955 = vmatpush3.bf16.msra.mxu0 %v50030_v54  ;;  %42027 = vmatpush3.bf16.msra.mxu1 %v50031_v4  ;;  %v50062_v4 = vld [vmem:[#allocation81_spill] sm:$0xff]  ;;  %v50063_v54 = vld [vmem:[#allocation82_spill] sm:$0xff] }
0x1095   :  { %42028 = vmatprep.subr.bf16.mxu0 %v49723_v17  ;;  %42100 = vmatprep.subr.bf16.mxu1 %v49723_v17 }
0x1097   :  { %36932 = vmatmul.mubr.f32.vlgmr.msra.gmra.mrb[28].mxu0 %v47106_v12  ;;  %37046 = vmatmul.mubr.f32.vlgmr.msra.gmra.mrb[28].mxu1 %v47106_v12 }
0x1098   :  { %42030 = vmatpush3.bf16.msra.mxu0 %v50056_v53  ;;  %37064 = vmatprep.mubr.msk.f32.mxu0 %vm44710_vm1, %v49724_v49 }
0x1099   :  { %42031 = vmatprep.subr.bf16.mxu0 %v49723_v17  ;;  %42102 = vmatpush3.bf16.msra.mxu1 %v44821_v18 }
0x109a   :  { %42103 = vmatprep.subr.bf16.mxu1 %v49723_v17  ;;  %37170 = vmatprep.mubr.msk.f32.mxu1 %vm44710_vm1, %v49724_v49 }
0x109c   :  { %42033 = vmatpush3.bf16.msra.mxu0 %v50057_v5 }
0x109d   :  { %42034 = vmatprep.subr.bf16.mxu0 %v49723_v17  ;;  %42105 = vmatpush3.bf16.msra.mxu1 %v44833_v28 }
0x109e   :  { %42106 = vmatprep.subr.bf16.mxu1 %v49723_v17 }
0x10a0   :  { %42036 = vmatpush3.bf16.msra.mxu0 %v50058_v21 }
0x10a1   :  { %42037 = vmatprep.subr.bf16.mxu0 %v49723_v17 }
0x10a4   :  { %42039 = vmatpush3.bf16.msra.mxu0 %v50059_v63 }
0x10a5   :  { %42040 = vmatprep.subr.bf16.mxu0 %v49723_v17 }
0x10a7   :  { %37065 = vmatmul.mubr.f32.vlgmr.msra.gmra.mrb[30].mxu0 %v47116_v50  ;;  %v50064_v50 = vld [vmem:[#allocation83_spill] sm:$0xff] }
0x10a8   :  { %42042 = vmatpush3.bf16.msra.mxu0 %v50060_v34  ;;  %37083 = vmatprep.mubr.msk.f32.mxu0 %vm44710_vm1, %v49724_v49 }
0x10a9   :  { %42043 = vmatprep.subr.bf16.mxu0 %v49723_v17 }
0x10ac   :  { %42045 = vmatpush3.bf16.msra.mxu0 %v50061_v2  ;;  %v50065_v2 = vld [vmem:[#allocation84_spill] sm:$0xff] }
0x10ad   :  { %42046 = vmatprep.subr.bf16.mxu0 %v49723_v17 }
0x10b0   :  { %42048 = vmatpush3.bf16.msra.mxu0 %v50062_v4  ;;  %v50066_v4 = vld [vmem:[#allocation85_spill] sm:$0xff] }
0x10b1   :  { %42049 = vmatprep.subr.bf16.mxu0 %v49723_v17 }
0x10b4   :  { %42051 = vmatpush3.bf16.msra.mxu0 %v50063_v54  ;;  %v50067_v54 = vld [vmem:[#allocation86_spill] sm:$0xff] }
0x10b5   :  { %42052 = vmatprep.subr.bf16.mxu0 %v49723_v17 }
0x10b7   :  { %37084 = vmatmul.mubr.f32.vlgmr.msra.gmra.mrb[30].mxu0 %v47106_v12 }
0x10b8   :  { %42054 = vmatpush3.bf16.msra.mxu0 %v50064_v50  ;;  %37102 = vmatprep.mubr.msk.f32.mxu0 %vm44710_vm1, %v49724_v49 }
0x10b9   :  { %42055 = vmatprep.subr.bf16.mxu0 %v49723_v17 }
0x10bc   :  { %42057 = vmatpush3.bf16.msra.mxu0 %v50065_v2  ;;  %v50071_v2 = vld [vmem:[#allocation90_spill] sm:$0xff] }
0x10bd   :  { %42058 = vmatprep.subr.bf16.mxu0 %v49723_v17 }
0x10c0   :  { %42060 = vmatpush3.bf16.msra.mxu0 %v50066_v4  ;;  %v50070_v4 = vld [vmem:[#allocation89_spill] sm:$0xff] }
0x10c1   :  { %42061 = vmatprep.subr.bf16.mxu0 %v49723_v17 }
0x10c4   :  { %42063 = vmatpush3.bf16.msra.mxu0 %v50067_v54  ;;  %v50069_v54 = vld [vmem:[#allocation88_spill] sm:$0xff] }
0x10c5   :  { %42064 = vmatprep.subr.bf16.mxu0 %v49723_v17 }
0x10c7   :  { %37103 = vmatmul.mubr.f32.vlgmr.msra.gmra.mrb[30].mxu0 %v47109_v57  ;;  %v50068_v57 = vld [vmem:[#allocation87_spill] sm:$0xff] }
0x10c8   :  { %42066 = vmatpush3.bf16.msra.mxu0 %v50056_v53  ;;  %37121 = vmatprep.mubr.msk.f32.mxu0 %vm44710_vm1, %v49724_v49 }
0x10c9   :  { %42067 = vmatprep.subr.bf16.mxu0 %v49723_v17 }
0x10cc   :  { %42069 = vmatpush3.bf16.msra.mxu0 %v50057_v5 }
0x10cd   :  { %42070 = vmatprep.subr.bf16.mxu0 %v49723_v17 }
0x10d0   :  { %42072 = vmatpush3.bf16.msra.mxu0 %v50058_v21 }
0x10d1   :  { %42073 = vmatprep.subr.bf16.mxu0 %v49723_v17 }
0x10d4   :  { %42075 = vmatpush3.bf16.msra.mxu0 %v50059_v63 }
0x10d5   :  { %42076 = vmatprep.subr.bf16.mxu0 %v49723_v17 }
0x10d7   :  { %37122 = vmatmul.mubr.f32.vlgmr.msra.gmra.mrb[30].mxu0 %v47112_v56  ;;  %v13466_v56 = vpop.permute.xlu1 %13465 }
0x10d8   :  { %42078 = vmatpush3.bf16.msra.mxu0 %v50068_v57  ;;  %37140 = vmatprep.mubr.msk.f32.mxu0 %vm44710_vm1, %v49724_v49 }
0x10d9   :  { %42079 = vmatprep.subr.bf16.mxu0 %v49723_v17 }
0x10dc   :  { %42081 = vmatpush3.bf16.msra.mxu0 %v50069_v54  ;;  %v50072_v54 = vld [vmem:[#allocation91_spill] sm:$0xff] }
0x10dd   :  { %42082 = vmatprep.subr.bf16.mxu0 %v49723_v17 }
0x10e0   :  { %42084 = vmatpush3.bf16.msra.mxu0 %v50070_v4 }
0x10e1   :  { %42085 = vmatprep.subr.bf16.mxu0 %v49723_v17 }
0x10e4   :  { %42087 = vmatpush3.bf16.msra.mxu0 %v50071_v2 }
0x10e5   :  { %42088 = vmatprep.subr.bf16.mxu0 %v49723_v17 }
0x10e7   :  { %37141 = vmatmul.mubr.f32.vlgmr.msra.gmra.mrb[30].mxu0 %v47106_v12 }
0x10e8   :  { %42090 = vmatpush3.bf16.msra.mxu0 %v50056_v53  ;;  %37159 = vmatprep.mubr.msk.f32.mxu0 %vm44710_vm1, %v49724_v49 }
0x10e9   :  { %42091 = vmatprep.subr.bf16.mxu0 %v49723_v17 }
0x10ec   :  { %42093 = vmatpush3.bf16.msra.mxu0 %v50057_v5 }
0x10ed   :  { %42094 = vmatprep.subr.bf16.mxu0 %v49723_v17 }
0x10f0   :  { %42096 = vmatpush3.bf16.msra.mxu0 %v50058_v21 }
0x10f1   :  { %42097 = vmatprep.subr.bf16.mxu0 %v49723_v17 }
0x10f4   :  { %42099 = vmatpush3.bf16.msra.mxu0 %v50059_v63 }
0x10f5   :  { %42136 = vmatprep.subr.bf16.mxu0 %v49723_v17 }
0x10f7   :  { %37160 = vmatmul.mubr.f32.vlgmr.msra.gmra.mrb[30].mxu0 %v47106_v12  ;;  %v14009_v12 = vpop.permute.xlu1 %14008 }
0x10f8   :  { %42138 = vmatpush3.bf16.msra.mxu0 %v44894_v1  ;;  %37244 = vmatprep.mubr.msk.f32.mxu0 %vm44710_vm1, %v49724_v49 }
0x10f9   :  { %42139 = vmatprep.subr.bf16.mxu0 %v49723_v17 }
0x10fb   :  { %v15095_v15 = vpop.permute.xlu1 %15094 }
0x10fc   :  { %42141 = vmatpush3.bf16.msra.mxu0 %v44904_v6 }
0x10fd   :  { %42142 = vmatprep.subr.bf16.mxu0 %v49723_v17 }
0x1100   :  { %42144 = vmatpush3.bf16.msra.mxu0 %v44914_v11 }
0x1101   :  { %42145 = vmatprep.subr.bf16.mxu0 %v49723_v17 }
0x1104   :  { %42147 = vmatpush3.bf16.msra.mxu0 %v44924_v22 }
0x1105   :  { %42148 = vmatprep.subr.bf16.mxu0 %v49723_v17 }
0x110a   :  { %v13459_v2 = vpop.f32.mrb[26].mxu0  ;;  %v14003_v4 = vpop.f32.mrb[26].mxu1 }
0x110b   :  { %v44034_v57 = vadd.f32 %v13459_v2, %v50072_v54  ;;  %v44035_v50 = vadd.f32 %v14003_v4, %v46004_v61  ;;  %v36705_v34 = vpop.f32.mrb[27].mxu0  ;;  %v36819_v63 = vpop.f32.mrb[27].mxu1 }
0x110c   :  { %v15638_v34 = vpop.permute.xlu1 %15637 }
0x110d   :  { %v13468_v21 = vmul.f32 %v44034_v57, %v13466_v56  ;;  %v14011_v5 = vmul.f32 %v44035_v50, %v14009_v12 }
0x110f   :  { %v14012_v53 = vadd.f32 %v14011_v5, %v13468_v21 }
0x116a   :  { %v14546_v24 = vpop.f32.mrb[28].mxu0  ;;  %v15089_v9 = vpop.f32.mrb[28].mxu1 }
0x116b   :  { %v44036_v62 = vadd.f32 %v14546_v24, %v46008_v27  ;;  %v44037_v16 = vadd.f32 %v15089_v9, %v46012_v60  ;;  %v36933_v32 = vpop.f32.mrb[29].mxu0  ;;  %v37047_v58 = vpop.f32.mrb[29].mxu1 }
0x116d   :  { %v14554_v47 = vmul.f32 %v44036_v62, %v14552_v55  ;;  %v15097_v36 = vmul.f32 %v44037_v16, %v15095_v15 }
0x116f   :  { %v14555_v2 = vadd.f32 %v14554_v47, %v14012_v53 }
0x1171   :  { %v15098_v54 = vadd.f32 %v15097_v36, %v14555_v2 }
0x11ca   :  { %v15632_v4 = vpop.f32.mrb[30].mxu0 }
0x11cb   :  { %v44038_v63 = vadd.f32 %v15632_v4, %v46016_v13  ;;  %v37161_v50 = vpop.f32.mrb[31].mxu0 }
0x11cd   :  { %v15640_v5 = vmul.f32 %v44038_v63, %v15638_v34 }
0x11cf   :  { %v47457_v21 = vadd.f32 %v15640_v5, %v15098_v54 }
0x11d1   :  { %v15642_v24 = vadd.f32 %v47457_v21, %v46971_v3  ;;  %v15650_v3 = vmul.f32 4.0, %v47028_v38  ;;  %v50073_v38 = vld [vmem:[#allocation27_spill] sm:$0xff] }
0x11d3   :  { %v15643_v57 = vmul.f32 0.5, %v15642_v24 }
0x11d5   :  { %v47462_v9 = vadd.f32 %v15643_v57, %v46976_v31  ;;  %v15651_v31 = vadd.f32 %v47034_v25, %v15650_v3  ;;  %v50074_v25 = vld [vmem:[#allocation28_spill] sm:$0xff] }
0x11d7   :  { %v15645_v58 = vmul.f32 2.0, %v47462_v9 }
0x11d9   :  { %v15646_v47 = vsub.f32 %v15645_v58, %v46981_v0  ;;  %v15656_v0 = vrot.slane %v15651_v31, %v45009_v59  ;;  %v50075_v58 = vld [vmem:[#allocation26_spill] sm:$0xff] }
0x11db   :  { %v47467_v36 = vadd.f32 %v15646_v47, %v47457_v21 }
0x11dd   :  { %v15659_v15 = vsel %vm520_vm2, %v47467_v36, 0 }
0x11de   :  { %v15730_v53 = vand.u32 4294901760, %v15659_v15 }
0x11e0   :  { %v15731_v62 = vsub.f32 %v15659_v15, %v15730_v53 }
0x11e2   :  { %v15732_v54 = vand.u32 4294901760, %v15731_v62 }
0x11e4   :  { %v15733_v55 = vsub.f32 %v15731_v62, %v15732_v54 }
0x11e6   :  { %v15734_v16 = vand.u32 4294901760, %v15733_v55 }
0x11e8   :  { %37171 = vmatmul.mubr.f32.vlgmr.msra.gmra.mrb[30].mxu1 %v15734_v16 }
0x11e9   :  { %42108 = vmatpush3.bf16.msra.mxu1 %v44837_v37  ;;  %37181 = vmatprep.mubr.msk.f32.mxu1 %vm44710_vm1, %v49724_v49 }
0x11ea   :  { %42109 = vmatprep.subr.bf16.mxu1 %v49723_v17 }
0x11ed   :  { %42111 = vmatpush3.bf16.msra.mxu1 %v44839_v42 }
0x11ee   :  { %42112 = vmatprep.subr.bf16.mxu1 %v49723_v17 }
0x11f0   :  { %37182 = vmatmul.mubr.f32.vlgmr.msra.gmra.mrb[30].mxu1 %v15730_v53 }
0x11f1   :  { %42114 = vmatpush3.bf16.msra.mxu1 %v44841_v43  ;;  %37192 = vmatprep.mubr.msk.f32.mxu1 %vm44710_vm1, %v49724_v49 }
0x11f2   :  { %42115 = vmatprep.subr.bf16.mxu1 %v49723_v17 }
0x11f5   :  { %42117 = vmatpush3.bf16.msra.mxu1 %v44843_v44 }
0x11f6   :  { %42118 = vmatprep.subr.bf16.mxu1 %v49723_v17 }
0x11f8   :  { %37193 = vmatmul.mubr.f32.vlgmr.msra.gmra.mrb[30].mxu1 %v15731_v62 }
0x11f9   :  { %42120 = vmatpush3.bf16.msra.mxu1 %v44821_v18  ;;  %37203 = vmatprep.mubr.msk.f32.mxu1 %vm44710_vm1, %v49724_v49 }
0x11fa   :  { %42121 = vmatprep.subr.bf16.mxu1 %v49723_v17 }
0x11fd   :  { %42123 = vmatpush3.bf16.msra.mxu1 %v44833_v28 }
0x11fe   :  { %42124 = vmatprep.subr.bf16.mxu1 %v49723_v17 }
0x1200   :  { %37204 = vmatmul.mubr.f32.vlgmr.msra.gmra.mrb[30].mxu1 %v15732_v54 }
0x1201   :  { %42126 = vmatpush3.bf16.msra.mxu1 %v44845_v45  ;;  %37214 = vmatprep.mubr.msk.f32.mxu1 %vm44710_vm1, %v49724_v49 }
0x1202   :  { %42127 = vmatprep.subr.bf16.mxu1 %v49723_v17 }
0x1205   :  { %42129 = vmatpush3.bf16.msra.mxu1 %v44847_v46 }
0x1206   :  { %42130 = vmatprep.subr.bf16.mxu1 %v49723_v17 }
0x1208   :  { %37215 = vmatmul.mubr.f32.vlgmr.msra.gmra.mrb[30].mxu1 %v15730_v53 }
0x1209   :  { %42132 = vmatpush3.bf16.msra.mxu1 %v44821_v18  ;;  %37225 = vmatprep.mubr.msk.f32.mxu1 %vm44710_vm1, %v49724_v49 }
0x120a   :  { %42133 = vmatprep.subr.bf16.mxu1 %v49723_v17 }
0x120d   :  { %42135 = vmatpush3.bf16.msra.mxu1 %v44833_v28 }
0x120e   :  { %42208 = vmatprep.subr.bf16.mxu1 %v49723_v17 }
0x1210   :  { %37226 = vmatmul.mubr.f32.vlgmr.msra.gmra.mrb[30].mxu1 %v15730_v53 }
0x1211   :  { %42210 = vmatpush3.bf16.msra.mxu1 %v44964_v20  ;;  %37358 = vmatprep.mubr.msk.f32.mxu1 %vm44710_vm1, %v49724_v49 }
0x1212   :  { %42211 = vmatprep.subr.bf16.mxu1 %v49723_v17 }
0x1215   :  { %42213 = vmatpush3.bf16.msra.mxu1 %v44972_v26 }
0x1216   :  { %42214 = vmatprep.subr.bf16.mxu1 %v49723_v17 }
0x1219   :  { %42216 = vmatpush3.bf16.msra.mxu1 %v45089_v48 }
0x121a   :  { %42217 = vmatprep.subr.bf16.mxu1 %v49723_v17 }
0x121d   :  { %42219 = vmatpush3.bf16.msra.mxu1 %v45093_v51 }
0x121e   :  { %42220 = vmatprep.subr.bf16.mxu1 %v49723_v17 }
0x12e3   :  { %v16142_v32 = vpop.f32.mrb[30].mxu1 }
0x12e4   :  { %v44039_v56 = vadd.f32 %v16142_v32, %v15656_v0  ;;  %v37227_v12 = vpop.f32.mrb[31].mxu1  ;;  %v50076_v0 = vld [vmem:[#allocation15_spill] sm:$0xff]  ;;  %v50077_v32 = vld [vmem:[#allocation29_spill] sm:$0xff] }
0x12e5   :  { %v50079_v12 = vld [vmem:[#allocation30_spill] sm:$0xff] }
0x12e6   :  { %v16146_v2 = vmax.f32 %v44039_v56, 0.0  ;;  %v50078_v56 = vld [vmem:[#allocation16_spill] sm:$0xff] }
0x12e8   :  { %v16148_v4 = vsel %vm1025_vm3, %v16146_v2, 0  ;;  %v50080_v2 = vld [vmem:[#allocation17_spill] sm:$0xff] }
0x12e9   :  { %v16223_v34 = vand.u32 4294901760, %v16148_v4 }
0x12eb   :  { %v16224_v63 = vsub.f32 %v16148_v4, %v16223_v34  ;;  %v50081_v4 = vld [vmem:[#allocation32_spill] sm:$0xff] }
0x12ed   :  { %v16225_v50 = vand.u32 4294901760, %v16224_v63 }
0x12ef   :  { %v16226_v5 = vsub.f32 %v16224_v63, %v16225_v50 }
0x12f1   :  { %v16227_v24 = vand.u32 4294901760, %v16226_v5  ;;  %v50085_v5 = vld [vmem:[#allocation35_spill] sm:$0xff] }
0x12f3   :  { %37245 = vmatmul.mubr.f32.vlgmr.msra.gmra.mrb[32].mxu0 %v16227_v24  ;;  %v50086_v24 = vld [vmem:[#allocation24_spill] sm:$0xff] }
0x12f4   :  { %42150 = vmatpush3.bf16.msra.mxu0 %v49915_v35  ;;  %37263 = vmatprep.mubr.msk.f32.mxu0 %vm44710_vm1, %v49724_v49 }
0x12f5   :  { %42151 = vmatprep.subr.bf16.mxu0 %v49723_v17 }
0x12f8   :  { %42153 = vmatpush3.bf16.msra.mxu0 %v49916_v10 }
0x12f9   :  { %42154 = vmatprep.subr.bf16.mxu0 %v49723_v17 }
0x12fc   :  { %42156 = vmatpush3.bf16.msra.mxu0 %v49917_v30 }
0x12fd   :  { %42157 = vmatprep.subr.bf16.mxu0 %v49723_v17 }
0x1300   :  { %42159 = vmatpush3.bf16.msra.mxu0 %v49918_v33 }
0x1301   :  { %42160 = vmatprep.subr.bf16.mxu0 %v49723_v17 }
0x1303   :  { %37264 = vmatmul.mubr.f32.vlgmr.msra.gmra.mrb[32].mxu0 %v16223_v34 }
0x1304   :  { %42162 = vmatpush3.bf16.msra.mxu0 %v49919_v19  ;;  %37282 = vmatprep.mubr.msk.f32.mxu0 %vm44710_vm1, %v49724_v49 }
0x1305   :  { %42163 = vmatprep.subr.bf16.mxu0 %v49723_v17 }
0x1308   :  { %42165 = vmatpush3.bf16.msra.mxu0 %v49920_v14 }
0x1309   :  { %42166 = vmatprep.subr.bf16.mxu0 %v49723_v17 }
0x130c   :  { %42168 = vmatpush3.bf16.msra.mxu0 %v49921_v8 }
0x130d   :  { %42169 = vmatprep.subr.bf16.mxu0 %v49723_v17 }
0x1310   :  { %42171 = vmatpush3.bf16.msra.mxu0 %v49922_v7 }
0x1311   :  { %42172 = vmatprep.subr.bf16.mxu0 %v49723_v17 }
0x1313   :  { %37283 = vmatmul.mubr.f32.vlgmr.msra.gmra.mrb[32].mxu0 %v16224_v63  ;;  %v50083_v63 = vld [vmem:[#allocation34_spill] sm:$0xff] }
0x1314   :  { %42174 = vmatpush3.bf16.msra.mxu0 %v44894_v1  ;;  %37301 = vmatprep.mubr.msk.f32.mxu0 %vm44710_vm1, %v49724_v49 }
0x1315   :  { %42175 = vmatprep.subr.bf16.mxu0 %v49723_v17 }
0x1318   :  { %42177 = vmatpush3.bf16.msra.mxu0 %v44904_v6 }
0x1319   :  { %42178 = vmatprep.subr.bf16.mxu0 %v49723_v17 }
0x131c   :  { %42180 = vmatpush3.bf16.msra.mxu0 %v44914_v11 }
0x131d   :  { %42181 = vmatprep.subr.bf16.mxu0 %v49723_v17 }
0x1320   :  { %42183 = vmatpush3.bf16.msra.mxu0 %v44924_v22 }
0x1321   :  { %42184 = vmatprep.subr.bf16.mxu0 %v49723_v17 }
0x1323   :  { %37302 = vmatmul.mubr.f32.vlgmr.msra.gmra.mrb[32].mxu0 %v16225_v50  ;;  %v50084_v50 = vld [vmem:[#allocation23_spill] sm:$0xff] }
0x1324   :  { %42186 = vmatpush3.bf16.msra.mxu0 %v49923_v40  ;;  %37320 = vmatprep.mubr.msk.f32.mxu0 %vm44710_vm1, %v49724_v49 }
0x1325   :  { %42187 = vmatprep.subr.bf16.mxu0 %v49723_v17 }
0x1328   :  { %42189 = vmatpush3.bf16.msra.mxu0 %v49924_v39 }
0x1329   :  { %42190 = vmatprep.subr.bf16.mxu0 %v49723_v17 }
0x132c   :  { %42192 = vmatpush3.bf16.msra.mxu0 %v49925_v41 }
0x132d   :  { %42193 = vmatprep.subr.bf16.mxu0 %v49723_v17 }
0x1330   :  { %42195 = vmatpush3.bf16.msra.mxu0 %v49926_v52 }
0x1331   :  { %42196 = vmatprep.subr.bf16.mxu0 %v49723_v17 }
0x1333   :  { %37321 = vmatmul.mubr.f32.vlgmr.msra.gmra.mrb[32].mxu0 %v16223_v34 }
0x1334   :  { %42198 = vmatpush3.bf16.msra.mxu0 %v44894_v1  ;;  %37339 = vmatprep.mubr.msk.f32.mxu0 %vm44710_vm1, %v49724_v49 }
0x1335   :  { %42199 = vmatprep.subr.bf16.mxu0 %v49723_v17 }
0x1338   :  { %42201 = vmatpush3.bf16.msra.mxu0 %v44904_v6 }
0x1339   :  { %42202 = vmatprep.subr.bf16.mxu0 %v49723_v17 }
0x133c   :  { %42204 = vmatpush3.bf16.msra.mxu0 %v44914_v11 }
0x133d   :  { %42205 = vmatprep.subr.bf16.mxu0 %v49723_v17 }
0x1340   :  { %42207 = vmatpush3.bf16.msra.mxu0 %v44924_v22 }
0x1341   :  { %42280 = vmatprep.subr.bf16.mxu0 %v49723_v17 }
0x1343   :  { %37340 = vmatmul.mubr.f32.vlgmr.msra.gmra.mrb[32].mxu0 %v16223_v34  ;;  %v50082_v34 = vld [vmem:[#allocation18_spill] sm:$0xff] }
0x1344   :  { %42282 = vmatpush3.bf16.msra.mxu0 %v49853_v23  ;;  %37472 = vmatprep.mubr.msk.f32.mxu0 %vm44710_vm1, %v49724_v49 }
0x1345   :  { %42283 = vmatprep.subr.bf16.mxu0 %v49723_v17 }
0x1348   :  { %42285 = vmatpush3.bf16.msra.mxu0 %v49854_v29 }
0x1349   :  { %42286 = vmatprep.subr.bf16.mxu0 %v49723_v17 }
0x134c   :  { %42288 = vmatpush3.bf16.msra.mxu0 %v50073_v38 }
0x134d   :  { %42289 = vmatprep.subr.bf16.mxu0 %v49723_v17 }
0x1350   :  { %42291 = vmatpush3.bf16.msra.mxu0 %v50074_v25 }
0x1351   :  { %42292 = vmatprep.subr.bf16.mxu0 %v49723_v17 }
0x1416   :  { %v16683_v57 = vpop.f32.mrb[32].mxu0 }
0x1417   :  { %v44040_v47 = vadd.f32 %v50075_v58, %v16683_v57  ;;  %v37341_v15 = vpop.f32.mrb[33].mxu0  ;;  %v50087_v57 = vld [vmem:[#allocation36_spill] sm:$0xff]  ;;  %v50088_v58 = vld [vmem:[#allocation19_spill] sm:$0xff] }
0x1418   :  { %v50090_v15 = vld [vmem:[#allocation20_spill] sm:$0xff] }
0x1419   :  { %v16687_v53 = vmax.f32 %v44040_v47, 0.0  ;;  %v50089_v47 = vld [vmem:[#allocation37_spill] sm:$0xff] }
0x141b   :  { %v16689_v62 = vsel %vm1025_vm3, %v16687_v53, 0  ;;  %v50091_v53 = vld [vmem:[#allocation38_spill] sm:$0xff] }
0x141c   :  { %v47577_v54 = vand.u32 4294901760, %v16689_v62 }
0x141e   :  { %v47580_v55 = vsub.f32 %v16689_v62, %v47577_v54  ;;  %v31253_v62 = vld [vmem:[%s49414_s1 + $0x20] sm:$0xff] }
0x141f   :  { %17773 = vperm.xlu1 %44673, %v31253_v62   ;;  %17230 = vperm.xlu0 %44672, %v31253_v62  }
0x1420   :  { %v47583_v16 = vand.u32 4294901760, %v47580_v55 }
0x1422   :  { %v16767_v3 = vsub.f32 %v47580_v55, %v47583_v16 }
0x1424   :  { %v47587_v31 = vand.u32 4294901760, %v16767_v3  ;;  %v50092_v3 = vmov 2  }
0x1425   :  { %44674 = vset.pattern.permute.xlu1 %v50092_v3  ;;  %v50097_v3 = vmov 1  }
0x1426   :  { %37359 = vmatmul.mubr.f32.vlgmr.msra.gmra.mrb[32].mxu1 %v47587_v31  ;;  %37473 = vmatmul.mubr.f32.vlgmr.msra.gmra.mrb[34].mxu0 %v47587_v31 }
0x1427   :  { %42222 = vmatpush3.bf16.msra.mxu1 %v50076_v0  ;;  %42294 = vmatpush3.bf16.msra.mxu0 %v50077_v32 }
0x1428   :  { %42223 = vmatprep.subr.bf16.mxu1 %v49723_v17  ;;  %42295 = vmatprep.subr.bf16.mxu0 %v49723_v17 }
0x1429   :  { %37377 = vmatprep.mubr.msk.f32.mxu1 %vm44710_vm1, %v49724_v49  ;;  %37491 = vmatprep.mubr.msk.f32.mxu0 %vm44710_vm1, %v49724_v49 }
0x142a   :  { %18316 = vperm.xlu1 %44674, %v31253_v62  }
0x142b   :  { %42225 = vmatpush3.bf16.msra.mxu1 %v50078_v56  ;;  %42297 = vmatpush3.bf16.msra.mxu0 %v50079_v12 }
0x142c   :  { %42226 = vmatprep.subr.bf16.mxu1 %v49723_v17  ;;  %42298 = vmatprep.subr.bf16.mxu0 %v49723_v17 }
0x142f   :  { %42228 = vmatpush3.bf16.msra.mxu1 %v50080_v2  ;;  %42300 = vmatpush3.bf16.msra.mxu0 %v50081_v4  ;;  %v50119_v4 = vld [vmem:[#allocation50_spill] sm:$0xff]  ;;  %v50120_v2 = vld [vmem:[#allocation64_spill] sm:$0xff] }
0x1430   :  { %42229 = vmatprep.subr.bf16.mxu1 %v49723_v17  ;;  %42301 = vmatprep.subr.bf16.mxu0 %v49723_v17 }
0x1433   :  { %42231 = vmatpush3.bf16.msra.mxu1 %v50082_v34  ;;  %42303 = vmatpush3.bf16.msra.mxu0 %v50083_v63  ;;  %v50115_v63 = vld [vmem:[#allocation48_spill] sm:$0xff] }
0x1434   :  { %42232 = vmatprep.subr.bf16.mxu1 %v49723_v17  ;;  %42304 = vmatprep.subr.bf16.mxu0 %v49723_v17  ;;  %v50116_v34 = vld [vmem:[#allocation60_spill] sm:$0xff] }
0x1436   :  { %37378 = vmatmul.mubr.f32.vlgmr.msra.gmra.mrb[32].mxu1 %v47577_v54  ;;  %37492 = vmatmul.mubr.f32.vlgmr.msra.gmra.mrb[34].mxu0 %v47577_v54 }
0x1437   :  { %42234 = vmatpush3.bf16.msra.mxu1 %v50084_v50  ;;  %42306 = vmatpush3.bf16.msra.mxu0 %v50085_v5  ;;  %v50113_v5 = vld [vmem:[#allocation46_spill] sm:$0xff]  ;;  %v50114_v50 = vld [vmem:[#allocation59_spill] sm:$0xff] }
0x1438   :  { %42235 = vmatprep.subr.bf16.mxu1 %v49723_v17  ;;  %42307 = vmatprep.subr.bf16.mxu0 %v49723_v17 }
0x1439   :  { %37396 = vmatprep.mubr.msk.f32.mxu1 %vm44710_vm1, %v49724_v49  ;;  %37510 = vmatprep.mubr.msk.f32.mxu0 %vm44710_vm1, %v49724_v49 }
0x143b   :  { %42237 = vmatpush3.bf16.msra.mxu1 %v50086_v24  ;;  %42309 = vmatpush3.bf16.msra.mxu0 %v50087_v57  ;;  %v50099_v57 = vld [vmem:[#allocation43_spill] sm:$0xff]  ;;  %v50112_v24 = vld [vmem:[#allocation58_spill] sm:$0xff] }
0x143c   :  { %42238 = vmatprep.subr.bf16.mxu1 %v49723_v17  ;;  %42310 = vmatprep.subr.bf16.mxu0 %v49723_v17 }
0x143f   :  { %42240 = vmatpush3.bf16.msra.mxu1 %v50088_v58  ;;  %42312 = vmatpush3.bf16.msra.mxu0 %v50089_v47  ;;  %v50095_v47 = vld [vmem:[#allocation41_spill] sm:$0xff] }
0x1440   :  { %42241 = vmatprep.subr.bf16.mxu1 %v49723_v17  ;;  %42313 = vmatprep.subr.bf16.mxu0 %v49723_v17  ;;  %v50098_v58 = vld [vmem:[#allocation33_spill] sm:$0xff] }
0x1443   :  { %42243 = vmatpush3.bf16.msra.mxu1 %v50090_v15  ;;  %42315 = vmatpush3.bf16.msra.mxu0 %v50091_v53  ;;  %v50093_v53 = vmov 3   ;;  %v50094_v15 = vld [vmem:[#allocation31_spill] sm:$0xff] }
0x1444   :  { %42244 = vmatprep.subr.bf16.mxu1 %v49723_v17  ;;  %42316 = vmatprep.subr.bf16.mxu0 %v49723_v17 }
0x1445   :  { %44675 = vset.pattern.permute.xlu0 %v50093_v53  ;;  %v50096_v53 = vmov 4  }
0x1446   :  { %37397 = vmatmul.mubr.f32.vlgmr.msra.gmra.mrb[32].mxu1 %v47580_v55  ;;  %37511 = vmatmul.mubr.f32.vlgmr.msra.gmra.mrb[34].mxu0 %v47580_v55 }
0x1447   :  { %42246 = vmatpush3.bf16.msra.mxu1 %v44964_v20  ;;  %42318 = vmatpush3.bf16.msra.mxu0 %v49853_v23 }
0x1448   :  { %42247 = vmatprep.subr.bf16.mxu1 %v49723_v17  ;;  %42319 = vmatprep.subr.bf16.mxu0 %v49723_v17 }
0x1449   :  { %37415 = vmatprep.mubr.msk.f32.mxu1 %vm44710_vm1, %v49724_v49  ;;  %37529 = vmatprep.mubr.msk.f32.mxu0 %vm44710_vm1, %v49724_v49 }
0x144a   :  { %18859 = vperm.xlu0 %44675, %v31253_v62   ;;  %44676 = vset.pattern.permute.xlu1 %v50096_v53  ;;  %v50102_v53 = vmov 0  }
0x144b   :  { %42249 = vmatpush3.bf16.msra.mxu1 %v44972_v26  ;;  %42321 = vmatpush3.bf16.msra.mxu0 %v49854_v29 }
0x144c   :  { %42250 = vmatprep.subr.bf16.mxu1 %v49723_v17  ;;  %42322 = vmatprep.subr.bf16.mxu0 %v49723_v17 }
0x144d   :  { %19402 = vperm.xlu1 %44676, %v31253_v62   ;;  %v50105_v62 = vld [vmem:[#allocation39_spill] sm:$0xff] }
0x144e   :  { %44678 = vset.pattern.permute.xlu0 %v50097_v3  ;;  %v50103_v3 = vld [vmem:[#allocation22_spill] sm:$0xff] }
0x144f   :  { %42252 = vmatpush3.bf16.msra.mxu1 %v45089_v48  ;;  %42324 = vmatpush3.bf16.msra.mxu0 %v50073_v38 }
0x1450   :  { %42253 = vmatprep.subr.bf16.mxu1 %v49723_v17  ;;  %42325 = vmatprep.subr.bf16.mxu0 %v49723_v17 }
0x1451   :  { %44677 = vset.pattern.permute.xlu1 %v50102_v53  ;;  %v50108_v53 = vld [vmem:[#allocation56_spill] sm:$0xff] }
0x1453   :  { %42255 = vmatpush3.bf16.msra.mxu1 %v45093_v51  ;;  %42327 = vmatpush3.bf16.msra.mxu0 %v50074_v25 }
0x1454   :  { %42256 = vmatprep.subr.bf16.mxu1 %v49723_v17  ;;  %42328 = vmatprep.subr.bf16.mxu0 %v49723_v17 }
0x1456   :  { %37416 = vmatmul.mubr.f32.vlgmr.msra.gmra.mrb[32].mxu1 %v47583_v16  ;;  %37530 = vmatmul.mubr.f32.vlgmr.msra.gmra.mrb[34].mxu0 %v47583_v16 }
0x1457   :  { %42258 = vmatpush3.bf16.msra.mxu1 %v50094_v15  ;;  %42330 = vmatpush3.bf16.msra.mxu0 %v50095_v47  ;;  %v50100_v47 = vld [vmem:[#allocation21_spill] sm:$0xff] }
0x1458   :  { %42259 = vmatprep.subr.bf16.mxu1 %v49723_v17  ;;  %42331 = vmatprep.subr.bf16.mxu0 %v49723_v17  ;;  %v50101_v15 = vld [vmem:[#allocation45_spill] sm:$0xff] }
0x1459   :  { %37434 = vmatprep.mubr.msk.f32.mxu1 %vm44710_vm1, %v49724_v49  ;;  %37548 = vmatprep.mubr.msk.f32.mxu0 %vm44710_vm1, %v49724_v49 }
0x145b   :  { %42261 = vmatpush3.bf16.msra.mxu1 %v50098_v58  ;;  %42333 = vmatpush3.bf16.msra.mxu0 %v50099_v57  ;;  %v50104_v58 = vld [vmem:[#allocation47_spill] sm:$0xff]  ;;  %v50111_v57 = vld [vmem:[#allocation44_spill] sm:$0xff] }
0x145c   :  { %42262 = vmatprep.subr.bf16.mxu1 %v49723_v17  ;;  %42334 = vmatprep.subr.bf16.mxu0 %v49723_v17 }
0x145f   :  { %42264 = vmatpush3.bf16.msra.mxu1 %v50100_v47  ;;  %42336 = vmatpush3.bf16.msra.mxu0 %v50101_v15  ;;  %v50109_v15 = vld [vmem:[#allocation42_spill] sm:$0xff]  ;;  %v50110_v47 = vld [vmem:[#allocation57_spill] sm:$0xff] }
0x1460   :  { %42265 = vmatprep.subr.bf16.mxu1 %v49723_v17  ;;  %42337 = vmatprep.subr.bf16.mxu0 %v49723_v17 }
0x1463   :  { %42267 = vmatpush3.bf16.msra.mxu1 %v50103_v3  ;;  %42339 = vmatpush3.bf16.msra.mxu0 %v50104_v58  ;;  %v50106_v58 = vld [vmem:[#allocation54_spill] sm:$0xff]  ;;  %v50107_v3 = vld [vmem:[#allocation40_spill] sm:$0xff] }
0x1464   :  { %42268 = vmatprep.subr.bf16.mxu1 %v49723_v17  ;;  %42340 = vmatprep.subr.bf16.mxu0 %v49723_v17 }
0x1466   :  { %37435 = vmatmul.mubr.f32.vlgmr.msra.gmra.mrb[32].mxu1 %v47577_v54  ;;  %37549 = vmatmul.mubr.f32.vlgmr.msra.gmra.mrb[34].mxu0 %v47577_v54 }
0x1467   :  { %42270 = vmatpush3.bf16.msra.mxu1 %v44964_v20  ;;  %42342 = vmatpush3.bf16.msra.mxu0 %v49853_v23 }
0x1468   :  { %42271 = vmatprep.subr.bf16.mxu1 %v49723_v17  ;;  %42343 = vmatprep.subr.bf16.mxu0 %v49723_v17 }
0x1469   :  { %37453 = vmatprep.mubr.msk.f32.mxu1 %vm44710_vm1, %v49724_v49  ;;  %37567 = vmatprep.mubr.msk.f32.mxu0 %vm44710_vm1, %v49724_v49 }
0x146b   :  { %42273 = vmatpush3.bf16.msra.mxu1 %v44972_v26  ;;  %42345 = vmatpush3.bf16.msra.mxu0 %v49854_v29 }
0x146c   :  { %42274 = vmatprep.subr.bf16.mxu1 %v49723_v17  ;;  %42346 = vmatprep.subr.bf16.mxu0 %v49723_v17 }
0x146f   :  { %42276 = vmatpush3.bf16.msra.mxu1 %v45089_v48  ;;  %42348 = vmatpush3.bf16.msra.mxu0 %v50073_v38 }
0x1470   :  { %42277 = vmatprep.subr.bf16.mxu1 %v49723_v17  ;;  %42349 = vmatprep.subr.bf16.mxu0 %v49723_v17 }
0x1473   :  { %42279 = vmatpush3.bf16.msra.mxu1 %v45093_v51  ;;  %42351 = vmatpush3.bf16.msra.mxu0 %v50074_v25 }
0x1474   :  { %42352 = vmatprep.subr.bf16.mxu1 %v49723_v17  ;;  %42424 = vmatprep.subr.bf16.mxu0 %v49723_v17 }
0x1476   :  { %37454 = vmatmul.mubr.f32.vlgmr.msra.gmra.mrb[32].mxu1 %v47577_v54  ;;  %37568 = vmatmul.mubr.f32.vlgmr.msra.gmra.mrb[34].mxu0 %v47577_v54 }
0x1477   :  { %42354 = vmatpush3.bf16.msra.mxu1 %v50105_v62  ;;  %42426 = vmatpush3.bf16.msra.mxu0 %v50106_v58 }
0x1478   :  { %42355 = vmatprep.subr.bf16.mxu1 %v49723_v17  ;;  %42427 = vmatprep.subr.bf16.mxu0 %v49723_v17 }
0x1479   :  { %37586 = vmatprep.mubr.msk.f32.mxu1 %vm44710_vm1, %v49724_v49  ;;  %37700 = vmatprep.mubr.msk.f32.mxu0 %vm44710_vm1, %v49724_v49 }
0x147b   :  { %42357 = vmatpush3.bf16.msra.mxu1 %v50107_v3  ;;  %42429 = vmatpush3.bf16.msra.mxu0 %v50108_v53 }
0x147c   :  { %42358 = vmatprep.subr.bf16.mxu1 %v49723_v17  ;;  %42430 = vmatprep.subr.bf16.mxu0 %v49723_v17 }
0x147f   :  { %42360 = vmatpush3.bf16.msra.mxu1 %v50109_v15  ;;  %42432 = vmatpush3.bf16.msra.mxu0 %v50110_v47 }
0x1480   :  { %42361 = vmatprep.subr.bf16.mxu1 %v49723_v17  ;;  %42433 = vmatprep.subr.bf16.mxu0 %v49723_v17 }
0x1483   :  { %42363 = vmatpush3.bf16.msra.mxu1 %v50111_v57  ;;  %42435 = vmatpush3.bf16.msra.mxu0 %v50112_v24 }
0x1484   :  { %42364 = vmatprep.subr.bf16.mxu1 %v49723_v17  ;;  %42436 = vmatprep.subr.bf16.mxu0 %v49723_v17 }
0x1486   :  { %37587 = vmatmul.mubr.f32.vlgmr.msra.gmra.mrb[34].mxu1 %v47587_v31  ;;  %37701 = vmatmul.mubr.f32.vlgmr.msra.gmra.mrb[36].mxu0 %v47587_v31 }
0x1487   :  { %42366 = vmatpush3.bf16.msra.mxu1 %v50113_v5  ;;  %42438 = vmatpush3.bf16.msra.mxu0 %v50114_v50  ;;  %v50117_v5 = vld [vmem:[#allocation49_spill] sm:$0xff]  ;;  %v50118_v50 = vld [vmem:[#allocation62_spill] sm:$0xff] }
0x1488   :  { %42367 = vmatprep.subr.bf16.mxu1 %v49723_v17  ;;  %42439 = vmatprep.subr.bf16.mxu0 %v49723_v17 }
0x1489   :  { %37605 = vmatprep.mubr.msk.f32.mxu1 %vm44710_vm1, %v49724_v49  ;;  %37719 = vmatprep.mubr.msk.f32.mxu0 %vm44710_vm1, %v49724_v49 }
0x148b   :  { %42369 = vmatpush3.bf16.msra.mxu1 %v50115_v63  ;;  %42441 = vmatpush3.bf16.msra.mxu0 %v50116_v34  ;;  %v50121_v34 = vld [vmem:[#allocation51_spill] sm:$0xff]  ;;  %v50128_v63 = vld [vmem:[#allocation70_spill] sm:$0xff] }
0x148c   :  { %42370 = vmatprep.subr.bf16.mxu1 %v49723_v17  ;;  %42442 = vmatprep.subr.bf16.mxu0 %v49723_v17 }
0x148f   :  { %42372 = vmatpush3.bf16.msra.mxu1 %v50117_v5  ;;  %42444 = vmatpush3.bf16.msra.mxu0 %v50118_v50  ;;  %v50122_v5 = vld [vmem:[#allocation66_spill] sm:$0xff]  ;;  %v50127_v50 = vld [vmem:[#allocation55_spill] sm:$0xff] }
0x1490   :  { %42373 = vmatprep.subr.bf16.mxu1 %v49723_v17  ;;  %42445 = vmatprep.subr.bf16.mxu0 %v49723_v17 }
0x1493   :  { %42375 = vmatpush3.bf16.msra.mxu1 %v50119_v4  ;;  %42447 = vmatpush3.bf16.msra.mxu0 %v50120_v2  ;;  %v50123_v2 = vld [vmem:[#allocation52_spill] sm:$0xff] }
0x1494   :  { %42376 = vmatprep.subr.bf16.mxu1 %v49723_v17  ;;  %42448 = vmatprep.subr.bf16.mxu0 %v49723_v17  ;;  %v50124_v4 = vld [vmem:[#allocation68_spill] sm:$0xff] }
0x1496   :  { %37606 = vmatmul.mubr.f32.vlgmr.msra.gmra.mrb[34].mxu1 %v47577_v54  ;;  %37720 = vmatmul.mubr.f32.vlgmr.msra.gmra.mrb[36].mxu0 %v47577_v54 }
0x1497   :  { %42378 = vmatpush3.bf16.msra.mxu1 %v50121_v34  ;;  %42450 = vmatpush3.bf16.msra.mxu0 %v50122_v5  ;;  %v50125_v34 = vld [vmem:[#allocation53_spill] sm:$0xff] }
0x1498   :  { %42379 = vmatprep.subr.bf16.mxu1 %v49723_v17  ;;  %42451 = vmatprep.subr.bf16.mxu0 %v49723_v17  ;;  %v50126_v5 = vld [vmem:[#allocation69_spill] sm:$0xff] }
0x1499   :  { %37624 = vmatprep.mubr.msk.f32.mxu1 %vm44710_vm1, %v49724_v49  ;;  %37738 = vmatprep.mubr.msk.f32.mxu0 %vm44710_vm1, %v49724_v49 }
0x149b   :  { %42381 = vmatpush3.bf16.msra.mxu1 %v50123_v2  ;;  %42453 = vmatpush3.bf16.msra.mxu0 %v50124_v4  ;;  %v50135_v4 = vld [vmem:[#allocation67_spill] sm:$0xff] }
0x149c   :  { %42382 = vmatprep.subr.bf16.mxu1 %v49723_v17  ;;  %42454 = vmatprep.subr.bf16.mxu0 %v49723_v17  ;;  %v50136_v2 = vld [vmem:[#allocation79_spill] sm:$0xff] }
0x149f   :  { %42384 = vmatpush3.bf16.msra.mxu1 %v50125_v34  ;;  %42456 = vmatpush3.bf16.msra.mxu0 %v50126_v5  ;;  %v50131_v5 = vld [vmem:[#allocation63_spill] sm:$0xff] }
0x14a0   :  { %42385 = vmatprep.subr.bf16.mxu1 %v49723_v17  ;;  %42457 = vmatprep.subr.bf16.mxu0 %v49723_v17  ;;  %v50132_v34 = vld [vmem:[#allocation75_spill] sm:$0xff] }
0x14a3   :  { %42387 = vmatpush3.bf16.msra.mxu1 %v50127_v50  ;;  %42459 = vmatpush3.bf16.msra.mxu0 %v50128_v63  ;;  %v50129_v63 = vld [vmem:[#allocation61_spill] sm:$0xff] }
0x14a4   :  { %42388 = vmatprep.subr.bf16.mxu1 %v49723_v17  ;;  %42460 = vmatprep.subr.bf16.mxu0 %v49723_v17  ;;  %v50130_v50 = vld [vmem:[#allocation73_spill] sm:$0xff] }
0x14a6   :  { %37625 = vmatmul.mubr.f32.vlgmr.msra.gmra.mrb[34].mxu1 %v47580_v55  ;;  %37739 = vmatmul.mubr.f32.vlgmr.msra.gmra.mrb[36].mxu0 %v47580_v55 }
0x14a7   :  { %42390 = vmatpush3.bf16.msra.mxu1 %v50105_v62  ;;  %42462 = vmatpush3.bf16.msra.mxu0 %v50106_v58 }
0x14a8   :  { %42391 = vmatprep.subr.bf16.mxu1 %v49723_v17  ;;  %42463 = vmatprep.subr.bf16.mxu0 %v49723_v17 }
0x14a9   :  { %37643 = vmatprep.mubr.msk.f32.mxu1 %vm44710_vm1, %v49724_v49  ;;  %37757 = vmatprep.mubr.msk.f32.mxu0 %vm44710_vm1, %v49724_v49 }
0x14ab   :  { %42393 = vmatpush3.bf16.msra.mxu1 %v50107_v3  ;;  %42465 = vmatpush3.bf16.msra.mxu0 %v50108_v53 }
0x14ac   :  { %42394 = vmatprep.subr.bf16.mxu1 %v49723_v17  ;;  %42466 = vmatprep.subr.bf16.mxu0 %v49723_v17 }
0x14af   :  { %42396 = vmatpush3.bf16.msra.mxu1 %v50109_v15  ;;  %42468 = vmatpush3.bf16.msra.mxu0 %v50110_v47 }
0x14b0   :  { %42397 = vmatprep.subr.bf16.mxu1 %v49723_v17  ;;  %42469 = vmatprep.subr.bf16.mxu0 %v49723_v17 }
0x14b3   :  { %42399 = vmatpush3.bf16.msra.mxu1 %v50111_v57  ;;  %42471 = vmatpush3.bf16.msra.mxu0 %v50112_v24 }
0x14b4   :  { %42400 = vmatprep.subr.bf16.mxu1 %v49723_v17  ;;  %42472 = vmatprep.subr.bf16.mxu0 %v49723_v17 }
0x14b6   :  { %37644 = vmatmul.mubr.f32.vlgmr.msra.gmra.mrb[34].mxu1 %v47583_v16  ;;  %37758 = vmatmul.mubr.f32.vlgmr.msra.gmra.mrb[36].mxu0 %v47583_v16 }
0x14b7   :  { %42402 = vmatpush3.bf16.msra.mxu1 %v50129_v63  ;;  %42474 = vmatpush3.bf16.msra.mxu0 %v50130_v50  ;;  %v50133_v63 = vld [vmem:[#allocation65_spill] sm:$0xff] }
0x14b8   :  { %42403 = vmatprep.subr.bf16.mxu1 %v49723_v17  ;;  %42475 = vmatprep.subr.bf16.mxu0 %v49723_v17  ;;  %v50134_v50 = vld [vmem:[#allocation77_spill] sm:$0xff] }
0x14b9   :  { %37662 = vmatprep.mubr.msk.f32.mxu1 %vm44710_vm1, %v49724_v49  ;;  %37776 = vmatprep.mubr.msk.f32.mxu0 %vm44710_vm1, %v49724_v49 }
0x14bb   :  { %42405 = vmatpush3.bf16.msra.mxu1 %v50131_v5  ;;  %42477 = vmatpush3.bf16.msra.mxu0 %v50132_v34  ;;  %v50141_v34 = vld [vmem:[#allocation78_spill] sm:$0xff]  ;;  %v50142_v5 = vld [vmem:[#allocation80_spill] sm:$0xff] }
0x14bc   :  { %42406 = vmatprep.subr.bf16.mxu1 %v49723_v17  ;;  %42478 = vmatprep.subr.bf16.mxu0 %v49723_v17 }
0x14bf   :  { %42408 = vmatpush3.bf16.msra.mxu1 %v50133_v63  ;;  %42480 = vmatpush3.bf16.msra.mxu0 %v50134_v50  ;;  %v50139_v50 = vld [vmem:[#allocation74_spill] sm:$0xff]  ;;  %v50140_v63 = vld [vmem:[#allocation76_spill] sm:$0xff] }
0x14c0   :  { %42409 = vmatprep.subr.bf16.mxu1 %v49723_v17  ;;  %42481 = vmatprep.subr.bf16.mxu0 %v49723_v17 }
0x14c3   :  { %42411 = vmatpush3.bf16.msra.mxu1 %v50135_v4  ;;  %42483 = vmatpush3.bf16.msra.mxu0 %v50136_v2  ;;  %v50137_v2 = vld [vmem:[#allocation71_spill] sm:$0xff]  ;;  %v50138_v4 = vld [vmem:[#allocation72_spill] sm:$0xff] }
0x14c4   :  { %42412 = vmatprep.subr.bf16.mxu1 %v49723_v17  ;;  %42484 = vmatprep.subr.bf16.mxu0 %v49723_v17 }
0x14c6   :  { %37663 = vmatmul.mubr.f32.vlgmr.msra.gmra.mrb[34].mxu1 %v47577_v54  ;;  %37777 = vmatmul.mubr.f32.vlgmr.msra.gmra.mrb[36].mxu0 %v47577_v54 }
0x14c7   :  { %42414 = vmatpush3.bf16.msra.mxu1 %v50105_v62  ;;  %42486 = vmatpush3.bf16.msra.mxu0 %v50106_v58 }
0x14c8   :  { %42415 = vmatprep.subr.bf16.mxu1 %v49723_v17  ;;  %42487 = vmatprep.subr.bf16.mxu0 %v49723_v17 }
0x14c9   :  { %37681 = vmatprep.mubr.msk.f32.mxu1 %vm44710_vm1, %v49724_v49  ;;  %37795 = vmatprep.mubr.msk.f32.mxu0 %vm44710_vm1, %v49724_v49 }
0x14cb   :  { %42417 = vmatpush3.bf16.msra.mxu1 %v50107_v3  ;;  %42489 = vmatpush3.bf16.msra.mxu0 %v50108_v53 }
0x14cc   :  { %42418 = vmatprep.subr.bf16.mxu1 %v49723_v17  ;;  %42490 = vmatprep.subr.bf16.mxu0 %v49723_v17 }
0x14cf   :  { %42420 = vmatpush3.bf16.msra.mxu1 %v50109_v15  ;;  %42492 = vmatpush3.bf16.msra.mxu0 %v50110_v47 }
0x14d0   :  { %42421 = vmatprep.subr.bf16.mxu1 %v49723_v17  ;;  %42493 = vmatprep.subr.bf16.mxu0 %v49723_v17 }
0x14d3   :  { %42423 = vmatpush3.bf16.msra.mxu1 %v50111_v57  ;;  %42495 = vmatpush3.bf16.msra.mxu0 %v50112_v24  ;;  %v50143_v24 = vld [vmem:[#allocation81_spill] sm:$0xff]  ;;  %v50144_v57 = vld [vmem:[#allocation82_spill] sm:$0xff] }
0x14d4   :  { %42496 = vmatprep.subr.bf16.mxu1 %v49723_v17  ;;  %42568 = vmatprep.subr.bf16.mxu0 %v49723_v17 }
0x14d6   :  { %37682 = vmatmul.mubr.f32.vlgmr.msra.gmra.mrb[34].mxu1 %v47577_v54  ;;  %37796 = vmatmul.mubr.f32.vlgmr.msra.gmra.mrb[36].mxu0 %v47577_v54 }
0x14d7   :  { %42498 = vmatpush3.bf16.msra.mxu1 %v50137_v2  ;;  %37814 = vmatprep.mubr.msk.f32.mxu1 %vm44710_vm1, %v49724_v49 }
0x14d8   :  { %42499 = vmatprep.subr.bf16.mxu1 %v49723_v17  ;;  %42570 = vmatpush3.bf16.msra.mxu0 %v44821_v18 }
0x14d9   :  { %42571 = vmatprep.subr.bf16.mxu0 %v49723_v17  ;;  %37920 = vmatprep.mubr.msk.f32.mxu0 %vm44710_vm1, %v49724_v49 }
0x14db   :  { %42501 = vmatpush3.bf16.msra.mxu1 %v50138_v4 }
0x14dc   :  { %42502 = vmatprep.subr.bf16.mxu1 %v49723_v17  ;;  %42573 = vmatpush3.bf16.msra.mxu0 %v44833_v28 }
0x14dd   :  { %42574 = vmatprep.subr.bf16.mxu0 %v49723_v17 }
0x14df   :  { %42504 = vmatpush3.bf16.msra.mxu1 %v50139_v50 }
0x14e0   :  { %42505 = vmatprep.subr.bf16.mxu1 %v49723_v17 }
0x14e3   :  { %42507 = vmatpush3.bf16.msra.mxu1 %v50140_v63 }
0x14e4   :  { %42508 = vmatprep.subr.bf16.mxu1 %v49723_v17 }
0x14e6   :  { %37815 = vmatmul.mubr.f32.vlgmr.msra.gmra.mrb[36].mxu1 %v47587_v31  ;;  %v50145_v31 = vld [vmem:[#allocation83_spill] sm:$0xff] }
0x14e7   :  { %42510 = vmatpush3.bf16.msra.mxu1 %v50141_v34  ;;  %37833 = vmatprep.mubr.msk.f32.mxu1 %vm44710_vm1, %v49724_v49 }
0x14e8   :  { %42511 = vmatprep.subr.bf16.mxu1 %v49723_v17 }
0x14eb   :  { %42513 = vmatpush3.bf16.msra.mxu1 %v50142_v5  ;;  %v50146_v5 = vld [vmem:[#allocation84_spill] sm:$0xff] }
0x14ec   :  { %42514 = vmatprep.subr.bf16.mxu1 %v49723_v17 }
0x14ef   :  { %42516 = vmatpush3.bf16.msra.mxu1 %v50143_v24  ;;  %v50147_v24 = vld [vmem:[#allocation85_spill] sm:$0xff] }
0x14f0   :  { %42517 = vmatprep.subr.bf16.mxu1 %v49723_v17 }
0x14f3   :  { %42519 = vmatpush3.bf16.msra.mxu1 %v50144_v57  ;;  %v50148_v57 = vld [vmem:[#allocation86_spill] sm:$0xff] }
0x14f4   :  { %42520 = vmatprep.subr.bf16.mxu1 %v49723_v17 }
0x14f6   :  { %37834 = vmatmul.mubr.f32.vlgmr.msra.gmra.mrb[36].mxu1 %v47577_v54 }
0x14f7   :  { %42522 = vmatpush3.bf16.msra.mxu1 %v50145_v31  ;;  %37852 = vmatprep.mubr.msk.f32.mxu1 %vm44710_vm1, %v49724_v49 }
0x14f8   :  { %42523 = vmatprep.subr.bf16.mxu1 %v49723_v17 }
0x14fb   :  { %42525 = vmatpush3.bf16.msra.mxu1 %v50146_v5  ;;  %v50152_v5 = vld [vmem:[#allocation90_spill] sm:$0xff] }
0x14fc   :  { %42526 = vmatprep.subr.bf16.mxu1 %v49723_v17 }
0x14ff   :  { %42528 = vmatpush3.bf16.msra.mxu1 %v50147_v24  ;;  %v50151_v24 = vld [vmem:[#allocation89_spill] sm:$0xff] }
0x1500   :  { %42529 = vmatprep.subr.bf16.mxu1 %v49723_v17 }
0x1503   :  { %42531 = vmatpush3.bf16.msra.mxu1 %v50148_v57  ;;  %v50150_v57 = vld [vmem:[#allocation88_spill] sm:$0xff] }
0x1504   :  { %42532 = vmatprep.subr.bf16.mxu1 %v49723_v17 }
0x1506   :  { %37853 = vmatmul.mubr.f32.vlgmr.msra.gmra.mrb[36].mxu1 %v47580_v55  ;;  %v50149_v55 = vld [vmem:[#allocation87_spill] sm:$0xff] }
0x1507   :  { %42534 = vmatpush3.bf16.msra.mxu1 %v50137_v2  ;;  %37871 = vmatprep.mubr.msk.f32.mxu1 %vm44710_vm1, %v49724_v49 }
0x1508   :  { %42535 = vmatprep.subr.bf16.mxu1 %v49723_v17 }
0x150b   :  { %42537 = vmatpush3.bf16.msra.mxu1 %v50138_v4 }
0x150c   :  { %42538 = vmatprep.subr.bf16.mxu1 %v49723_v17 }
0x150f   :  { %42540 = vmatpush3.bf16.msra.mxu1 %v50139_v50 }
0x1510   :  { %42541 = vmatprep.subr.bf16.mxu1 %v49723_v17 }
0x1513   :  { %42543 = vmatpush3.bf16.msra.mxu1 %v50140_v63 }
0x1514   :  { %42544 = vmatprep.subr.bf16.mxu1 %v49723_v17 }
0x1516   :  { %37872 = vmatmul.mubr.f32.vlgmr.msra.gmra.mrb[36].mxu1 %v47583_v16  ;;  %v17231_v16 = vpop.permute.xlu0 %17230 }
0x1517   :  { %42546 = vmatpush3.bf16.msra.mxu1 %v50149_v55  ;;  %37890 = vmatprep.mubr.msk.f32.mxu1 %vm44710_vm1, %v49724_v49 }
0x1518   :  { %42547 = vmatprep.subr.bf16.mxu1 %v49723_v17 }
0x151a   :  { %v18860_v56 = vpop.permute.xlu0 %18859 }
0x151b   :  { %42549 = vmatpush3.bf16.msra.mxu1 %v50150_v57  ;;  %v50153_v57 = vld [vmem:[#allocation91_spill] sm:$0xff] }
0x151c   :  { %42550 = vmatprep.subr.bf16.mxu1 %v49723_v17 }
0x151f   :  { %42552 = vmatpush3.bf16.msra.mxu1 %v50151_v24 }
0x1520   :  { %42553 = vmatprep.subr.bf16.mxu1 %v49723_v17 }
0x1523   :  { %42555 = vmatpush3.bf16.msra.mxu1 %v50152_v5 }
0x1524   :  { %42556 = vmatprep.subr.bf16.mxu1 %v49723_v17 }
0x1526   :  { %37891 = vmatmul.mubr.f32.vlgmr.msra.gmra.mrb[36].mxu1 %v47577_v54 }
0x1527   :  { %42558 = vmatpush3.bf16.msra.mxu1 %v50137_v2  ;;  %37909 = vmatprep.mubr.msk.f32.mxu1 %vm44710_vm1, %v49724_v49 }
0x1528   :  { %42559 = vmatprep.subr.bf16.mxu1 %v49723_v17 }
0x152b   :  { %42561 = vmatpush3.bf16.msra.mxu1 %v50138_v4 }
0x152c   :  { %42562 = vmatprep.subr.bf16.mxu1 %v49723_v17 }
0x152f   :  { %42564 = vmatpush3.bf16.msra.mxu1 %v50139_v50 }
0x1530   :  { %42565 = vmatprep.subr.bf16.mxu1 %v49723_v17 }
0x1533   :  { %42567 = vmatpush3.bf16.msra.mxu1 %v50140_v63 }
0x1534   :  { %42604 = vmatprep.subr.bf16.mxu1 %v49723_v17 }
0x1536   :  { %37910 = vmatmul.mubr.f32.vlgmr.msra.gmra.mrb[36].mxu1 %v47577_v54  ;;  %v17774_v54 = vpop.permute.xlu1 %17773 }
0x1537   :  { %42606 = vmatpush3.bf16.msra.mxu1 %v44894_v1  ;;  %37994 = vmatprep.mubr.msk.f32.mxu1 %vm44710_vm1, %v49724_v49 }
0x1538   :  { %42607 = vmatprep.subr.bf16.mxu1 %v49723_v17 }
0x153a   :  { %v18317_v47 = vpop.permute.xlu1 %18316 }
0x153b   :  { %42609 = vmatpush3.bf16.msra.mxu1 %v44904_v6 }
0x153c   :  { %42610 = vmatprep.subr.bf16.mxu1 %v49723_v17 }
0x153f   :  { %42612 = vmatpush3.bf16.msra.mxu1 %v44914_v11 }
0x1540   :  { %42613 = vmatprep.subr.bf16.mxu1 %v49723_v17 }
0x1543   :  { %42615 = vmatpush3.bf16.msra.mxu1 %v44924_v22 }
0x1544   :  { %42616 = vmatprep.subr.bf16.mxu1 %v49723_v17 }
0x1549   :  { %v17224_v5 = vpop.f32.mrb[32].mxu1  ;;  %v17768_v24 = vpop.f32.mrb[34].mxu0 }
0x154a   :  { %v44041_v55 = vadd.f32 %v17224_v5, %v50153_v57  ;;  %v44042_v31 = vadd.f32 %v17768_v24, %v46004_v61  ;;  %v37455_v34 = vpop.f32.mrb[33].mxu1  ;;  %v37569_v63 = vpop.f32.mrb[35].mxu0 }
0x154b   :  { %v19403_v34 = vpop.permute.xlu1 %19402 }
0x154c   :  { %v17776_v50 = vmul.f32 %v44042_v31, %v17774_v54  ;;  %v17233_v4 = vmul.f32 %v44041_v55, %v17231_v16 }
0x154e   :  { %v17777_v2 = vadd.f32 %v17776_v50, %v17233_v4 }
0x15a9   :  { %v18311_v15 = vpop.f32.mrb[34].mxu1  ;;  %v18854_v53 = vpop.f32.mrb[36].mxu0 }
0x15aa   :  { %v44043_v3 = vadd.f32 %v18311_v15, %v46008_v27  ;;  %v44044_v58 = vadd.f32 %v18854_v53, %v46012_v60  ;;  %v37683_v62 = vpop.f32.mrb[35].mxu1  ;;  %v37797_v12 = vpop.f32.mrb[37].mxu0 }
0x15ac   :  { %v18319_v32 = vmul.f32 %v44043_v3, %v18317_v47  ;;  %v18862_v5 = vmul.f32 %v44044_v58, %v18860_v56 }
0x15ae   :  { %v18320_v0 = vadd.f32 %v18319_v32, %v17777_v2 }
0x15b0   :  { %v18863_v57 = vadd.f32 %v18862_v5, %v18320_v0 }
0x1609   :  { %v19397_v24 = vpop.f32.mrb[36].mxu1 }
0x160a   :  { %v44045_v63 = vadd.f32 %v19397_v24, %v46016_v13  ;;  %v37911_v31 = vpop.f32.mrb[37].mxu1 }
0x160c   :  { %v19405_v4 = vmul.f32 %v44045_v63, %v19403_v34 }
0x160e   :  { %v47928_v50 = vadd.f32 %v19405_v4, %v18863_v57 }
0x1610   :  { %v19407_v15 = vadd.f32 %v47928_v50, %v47457_v21  ;;  %v47985_v21 = vld [vmem:[%s49411_s4] sm:$0x1] }
0x1612   :  { %v19408_v55 = vmul.f32 0.5, %v19407_v15 }
0x1614   :  { %v47933_v53 = vadd.f32 %v19408_v55, %v47462_v9  ;;  %v19415_v9 = vmul.f32 5.0, %v47985_v21 }
0x1616   :  { %v19410_v12 = vmul.f32 2.0, %v47933_v53 }
0x1618   :  { %v19411_v32 = vsub.f32 %v19410_v12, %v47467_v36  ;;  %v47991_v36 = vld [vmem:[%s49412_s6] sm:$0x1] }
0x1619   :  { %v19416_v62 = vadd.f32 %v47991_v36, %v19415_v9 }
0x161a   :  { %v47938_v0 = vadd.f32 %v19411_v32, %v47928_v50 }
0x161b   :  { %v19421_v54 = vrot.slane %v19416_v62, %v45009_v59 }
0x161c   :  { %v19424_v56 = vsel %vm520_vm2, %v47938_v0, 0 }
0x161d   :  { %v19495_v2 = vand.u32 4294901760, %v19424_v56 }
0x161f   :  { %v19496_v57 = vsub.f32 %v19424_v56, %v19495_v2  ;;  %v48059_v56 = vld [vmem:[%s49413_s8] ss:$0 sm:$0xff] }
0x1620   :  { %50154 = vst [vmem:[#allocation3_spill] sm:$0xff] %v48059_v56 }
0x1621   :  { %v19497_v58 = vand.u32 4294901760, %v19496_v57 }
0x1623   :  { %v19498_v47 = vsub.f32 %v19496_v57, %v19497_v58 }
0x1625   :  { %v19499_v3 = vand.u32 4294901760, %v19498_v47 }
0x1627   :  { %37921 = vmatmul.mubr.f32.vlgmr.msra.gmra.mrb[38].mxu0 %v19499_v3 }
0x1628   :  { %42576 = vmatpush3.bf16.msra.mxu0 %v44837_v37  ;;  %37931 = vmatprep.mubr.msk.f32.mxu0 %vm44710_vm1, %v49724_v49 }
0x1629   :  { %42577 = vmatprep.subr.bf16.mxu0 %v49723_v17 }
0x162c   :  { %42579 = vmatpush3.bf16.msra.mxu0 %v44839_v42 }
0x162d   :  { %42580 = vmatprep.subr.bf16.mxu0 %v49723_v17 }
0x162f   :  { %37932 = vmatmul.mubr.f32.vlgmr.msra.gmra.mrb[38].mxu0 %v19495_v2 }
0x1630   :  { %42582 = vmatpush3.bf16.msra.mxu0 %v44841_v43  ;;  %37942 = vmatprep.mubr.msk.f32.mxu0 %vm44710_vm1, %v49724_v49 }
0x1631   :  { %42583 = vmatprep.subr.bf16.mxu0 %v49723_v17 }
0x1634   :  { %42585 = vmatpush3.bf16.msra.mxu0 %v44843_v44 }
0x1635   :  { %42586 = vmatprep.subr.bf16.mxu0 %v49723_v17 }
0x1637   :  { %37943 = vmatmul.mubr.f32.vlgmr.msra.gmra.mrb[38].mxu0 %v19496_v57 }
0x1638   :  { %42588 = vmatpush3.bf16.msra.mxu0 %v44821_v18  ;;  %37953 = vmatprep.mubr.msk.f32.mxu0 %vm44710_vm1, %v49724_v49 }
0x1639   :  { %42589 = vmatprep.subr.bf16.mxu0 %v49723_v17 }
0x163c   :  { %42591 = vmatpush3.bf16.msra.mxu0 %v44833_v28 }
0x163d   :  { %42592 = vmatprep.subr.bf16.mxu0 %v49723_v17 }
0x163f   :  { %37954 = vmatmul.mubr.f32.vlgmr.msra.gmra.mrb[38].mxu0 %v19497_v58 }
0x1640   :  { %42594 = vmatpush3.bf16.msra.mxu0 %v44845_v45  ;;  %37964 = vmatprep.mubr.msk.f32.mxu0 %vm44710_vm1, %v49724_v49 }
0x1641   :  { %42595 = vmatprep.subr.bf16.mxu0 %v49723_v17 }
0x1644   :  { %42597 = vmatpush3.bf16.msra.mxu0 %v44847_v46 }
0x1645   :  { %42598 = vmatprep.subr.bf16.mxu0 %v49723_v17 }
0x1647   :  { %37965 = vmatmul.mubr.f32.vlgmr.msra.gmra.mrb[38].mxu0 %v19495_v2 }
0x1648   :  { %42600 = vmatpush3.bf16.msra.mxu0 %v44821_v18  ;;  %37975 = vmatprep.mubr.msk.f32.mxu0 %vm44710_vm1, %v49724_v49 }
0x1649   :  { %42601 = vmatprep.subr.bf16.mxu0 %v49723_v17 }
0x164c   :  { %42603 = vmatpush3.bf16.msra.mxu0 %v44833_v28 }
0x164d   :  { %42676 = vmatprep.subr.bf16.mxu0 %v49723_v17 }
0x164f   :  { %37976 = vmatmul.mubr.f32.vlgmr.msra.gmra.mrb[38].mxu0 %v19495_v2 }
0x1650   :  { %42678 = vmatpush3.bf16.msra.mxu0 %v44964_v20  ;;  %38108 = vmatprep.mubr.msk.f32.mxu0 %vm44710_vm1, %v49724_v49 }
0x1651   :  { %42679 = vmatprep.subr.bf16.mxu0 %v49723_v17 }
0x1654   :  { %42681 = vmatpush3.bf16.msra.mxu0 %v44972_v26 }
0x1655   :  { %42682 = vmatprep.subr.bf16.mxu0 %v49723_v17 }
0x1658   :  { %42684 = vmatpush3.bf16.msra.mxu0 %v45089_v48 }
0x1659   :  { %42685 = vmatprep.subr.bf16.mxu0 %v49723_v17 }
0x165c   :  { %42687 = vmatpush3.bf16.msra.mxu0 %v45093_v51 }
0x165d   :  { %42688 = vmatprep.subr.bf16.mxu0 %v49723_v17 }
0x1722   :  { %v19907_v16 = vpop.f32.mrb[38].mxu0 }
0x1723   :  { %v44046_v5 = vadd.f32 %v19907_v16, %v19421_v54  ;;  %v37977_v24 = vpop.f32.mrb[39].mxu0 }
0x1724   :  { %v50156_v24 = vld [vmem:[#allocation29_spill] sm:$0xff] }
0x1725   :  { %v19911_v34 = vmax.f32 %v44046_v5, 0.0  ;;  %v50155_v5 = vld [vmem:[#allocation15_spill] sm:$0xff] }
0x1727   :  { %v19913_v63 = vsel %vm1025_vm3, %v19911_v34, 0  ;;  %v50157_v34 = vld [vmem:[#allocation16_spill] sm:$0xff] }
0x1728   :  { %v19988_v31 = vand.u32 4294901760, %v19913_v63 }
0x172a   :  { %v19989_v4 = vsub.f32 %v19913_v63, %v19988_v31  ;;  %v50158_v63 = vld [vmem:[#allocation30_spill] sm:$0xff] }
0x172c   :  { %v19990_v15 = vand.u32 4294901760, %v19989_v4 }
0x172e   :  { %v19991_v55 = vsub.f32 %v19989_v4, %v19990_v15 }
0x1730   :  { %v19992_v12 = vand.u32 4294901760, %v19991_v55  ;;  %v50162_v55 = vld [vmem:[#allocation34_spill] sm:$0xff] }
0x1732   :  { %37995 = vmatmul.mubr.f32.vlgmr.msra.gmra.mrb[38].mxu1 %v19992_v12  ;;  %v50163_v12 = vld [vmem:[#allocation23_spill] sm:$0xff] }
0x1733   :  { %42618 = vmatpush3.bf16.msra.mxu1 %v49915_v35  ;;  %38013 = vmatprep.mubr.msk.f32.mxu1 %vm44710_vm1, %v49724_v49 }
0x1734   :  { %42619 = vmatprep.subr.bf16.mxu1 %v49723_v17 }
0x1737   :  { %42621 = vmatpush3.bf16.msra.mxu1 %v49916_v10 }
0x1738   :  { %42622 = vmatprep.subr.bf16.mxu1 %v49723_v17 }
0x173b   :  { %42624 = vmatpush3.bf16.msra.mxu1 %v49917_v30 }
0x173c   :  { %42625 = vmatprep.subr.bf16.mxu1 %v49723_v17 }
0x173f   :  { %42627 = vmatpush3.bf16.msra.mxu1 %v49918_v33 }
0x1740   :  { %42628 = vmatprep.subr.bf16.mxu1 %v49723_v17 }
0x1742   :  { %38014 = vmatmul.mubr.f32.vlgmr.msra.gmra.mrb[38].mxu1 %v19988_v31 }
0x1743   :  { %42630 = vmatpush3.bf16.msra.mxu1 %v49919_v19  ;;  %38032 = vmatprep.mubr.msk.f32.mxu1 %vm44710_vm1, %v49724_v49 }
0x1744   :  { %42631 = vmatprep.subr.bf16.mxu1 %v49723_v17 }
0x1747   :  { %42633 = vmatpush3.bf16.msra.mxu1 %v49920_v14 }
0x1748   :  { %42634 = vmatprep.subr.bf16.mxu1 %v49723_v17 }
0x174b   :  { %42636 = vmatpush3.bf16.msra.mxu1 %v49921_v8 }
0x174c   :  { %42637 = vmatprep.subr.bf16.mxu1 %v49723_v17 }
0x174f   :  { %42639 = vmatpush3.bf16.msra.mxu1 %v49922_v7 }
0x1750   :  { %42640 = vmatprep.subr.bf16.mxu1 %v49723_v17 }
0x1752   :  { %38033 = vmatmul.mubr.f32.vlgmr.msra.gmra.mrb[38].mxu1 %v19989_v4  ;;  %v50160_v4 = vld [vmem:[#allocation32_spill] sm:$0xff] }
0x1753   :  { %42642 = vmatpush3.bf16.msra.mxu1 %v44894_v1  ;;  %38051 = vmatprep.mubr.msk.f32.mxu1 %vm44710_vm1, %v49724_v49 }
0x1754   :  { %42643 = vmatprep.subr.bf16.mxu1 %v49723_v17 }
0x1757   :  { %42645 = vmatpush3.bf16.msra.mxu1 %v44904_v6 }
0x1758   :  { %42646 = vmatprep.subr.bf16.mxu1 %v49723_v17 }
0x175b   :  { %42648 = vmatpush3.bf16.msra.mxu1 %v44914_v11 }
0x175c   :  { %42649 = vmatprep.subr.bf16.mxu1 %v49723_v17 }
0x175f   :  { %42651 = vmatpush3.bf16.msra.mxu1 %v44924_v22 }
0x1760   :  { %42652 = vmatprep.subr.bf16.mxu1 %v49723_v17 }
0x1762   :  { %38052 = vmatmul.mubr.f32.vlgmr.msra.gmra.mrb[38].mxu1 %v19990_v15  ;;  %v50161_v15 = vld [vmem:[#allocation18_spill] sm:$0xff] }
0x1763   :  { %42654 = vmatpush3.bf16.msra.mxu1 %v49923_v40  ;;  %38070 = vmatprep.mubr.msk.f32.mxu1 %vm44710_vm1, %v49724_v49 }
0x1764   :  { %42655 = vmatprep.subr.bf16.mxu1 %v49723_v17 }
0x1767   :  { %42657 = vmatpush3.bf16.msra.mxu1 %v49924_v39 }
0x1768   :  { %42658 = vmatprep.subr.bf16.mxu1 %v49723_v17 }
0x176b   :  { %42660 = vmatpush3.bf16.msra.mxu1 %v49925_v41 }
0x176c   :  { %42661 = vmatprep.subr.bf16.mxu1 %v49723_v17 }
0x176f   :  { %42663 = vmatpush3.bf16.msra.mxu1 %v49926_v52 }
0x1770   :  { %42664 = vmatprep.subr.bf16.mxu1 %v49723_v17 }
0x1772   :  { %38071 = vmatmul.mubr.f32.vlgmr.msra.gmra.mrb[38].mxu1 %v19988_v31 }
0x1773   :  { %42666 = vmatpush3.bf16.msra.mxu1 %v44894_v1  ;;  %38089 = vmatprep.mubr.msk.f32.mxu1 %vm44710_vm1, %v49724_v49 }
0x1774   :  { %42667 = vmatprep.subr.bf16.mxu1 %v49723_v17 }
0x1777   :  { %42669 = vmatpush3.bf16.msra.mxu1 %v44904_v6 }
0x1778   :  { %42670 = vmatprep.subr.bf16.mxu1 %v49723_v17 }
0x177b   :  { %42672 = vmatpush3.bf16.msra.mxu1 %v44914_v11 }
0x177c   :  { %42673 = vmatprep.subr.bf16.mxu1 %v49723_v17 }
0x177f   :  { %42675 = vmatpush3.bf16.msra.mxu1 %v44924_v22 }
0x1780   :  { %42748 = vmatprep.subr.bf16.mxu1 %v49723_v17 }
0x1782   :  { %38090 = vmatmul.mubr.f32.vlgmr.msra.gmra.mrb[38].mxu1 %v19988_v31  ;;  %v50159_v31 = vld [vmem:[#allocation17_spill] sm:$0xff] }
0x1783   :  { %42750 = vmatpush3.bf16.msra.mxu1 %v49853_v23  ;;  %38222 = vmatprep.mubr.msk.f32.mxu1 %vm44710_vm1, %v49724_v49 }
0x1784   :  { %42751 = vmatprep.subr.bf16.mxu1 %v49723_v17 }
0x1787   :  { %42753 = vmatpush3.bf16.msra.mxu1 %v49854_v29 }
0x1788   :  { %42754 = vmatprep.subr.bf16.mxu1 %v49723_v17 }
0x178b   :  { %42756 = vmatpush3.bf16.msra.mxu1 %v50073_v38 }
0x178c   :  { %42757 = vmatprep.subr.bf16.mxu1 %v49723_v17 }
0x178f   :  { %42759 = vmatpush3.bf16.msra.mxu1 %v50074_v25 }
0x1790   :  { %42760 = vmatprep.subr.bf16.mxu1 %v49723_v17 }
0x1855   :  { %v20448_v32 = vpop.f32.mrb[38].mxu1 }
0x1856   :  { %v44047_v2 = vadd.f32 %v48059_v56, %v20448_v32  ;;  %v38091_v57 = vpop.f32.mrb[39].mxu1  ;;  %v50164_v32 = vld [vmem:[#allocation35_spill] sm:$0xff] }
0x1857   :  { %v50166_v57 = vld [vmem:[#allocation36_spill] sm:$0xff] }
0x1858   :  { %v20452_v58 = vmax.f32 %v44047_v2, 0.0  ;;  %v50165_v2 = vld [vmem:[#allocation24_spill] sm:$0xff] }
0x185a   :  { %v20454_v47 = vsel %vm1025_vm3, %v20452_v58, 0  ;;  %v50167_v58 = vld [vmem:[#allocation19_spill] sm:$0xff] }
0x185b   :  { %v48063_v3 = vand.u32 4294901760, %v20454_v47 }
0x185d   :  { %v48066_v9 = vsub.f32 %v20454_v47, %v48063_v3  ;;  %v50168_v47 = vld [vmem:[#allocation37_spill] sm:$0xff] }
0x185f   :  { %v48069_v62 = vand.u32 4294901760, %v48066_v9 }
0x1861   :  { %v20532_v54 = vsub.f32 %v48066_v9, %v48069_v62 }
0x1863   :  { %v48073_v16 = vand.u32 4294901760, %v20532_v54  ;;  %v50169_v54 = vld [vmem:[#allocation20_spill] sm:$0xff] }
0x1865   :  { %38109 = vmatmul.mubr.f32.vlgmr.msra.gmra.mrb[40].mxu0 %v48073_v16  ;;  %38223 = vmatmul.mubr.f32.vlgmr.msra.gmra.mrb[40].mxu1 %v48073_v16 }
0x1866   :  { %42690 = vmatpush3.bf16.msra.mxu0 %v50155_v5  ;;  %42762 = vmatpush3.bf16.msra.mxu1 %v50156_v24  ;;  %v50198_v24 = vld [vmem:[#allocation64_spill] sm:$0xff] }
0x1867   :  { %42691 = vmatprep.subr.bf16.mxu0 %v49723_v17  ;;  %42763 = vmatprep.subr.bf16.mxu1 %v49723_v17 }
0x1868   :  { %38127 = vmatprep.mubr.msk.f32.mxu0 %vm44710_vm1, %v49724_v49  ;;  %38241 = vmatprep.mubr.msk.f32.mxu1 %vm44710_vm1, %v49724_v49 }
0x186a   :  { %42693 = vmatpush3.bf16.msra.mxu0 %v50157_v34  ;;  %42765 = vmatpush3.bf16.msra.mxu1 %v50158_v63  ;;  %v50194_v63 = vld [vmem:[#allocation60_spill] sm:$0xff]  ;;  %v50197_v34 = vld [vmem:[#allocation50_spill] sm:$0xff] }
0x186b   :  { %42694 = vmatprep.subr.bf16.mxu0 %v49723_v17  ;;  %42766 = vmatprep.subr.bf16.mxu1 %v49723_v17 }
0x186e   :  { %42696 = vmatpush3.bf16.msra.mxu0 %v50159_v31  ;;  %42768 = vmatpush3.bf16.msra.mxu1 %v50160_v4  ;;  %v50192_v4 = vld [vmem:[#allocation59_spill] sm:$0xff]  ;;  %v50193_v31 = vld [vmem:[#allocation48_spill] sm:$0xff] }
0x186f   :  { %42697 = vmatprep.subr.bf16.mxu0 %v49723_v17  ;;  %42769 = vmatprep.subr.bf16.mxu1 %v49723_v17 }
0x1872   :  { %42699 = vmatpush3.bf16.msra.mxu0 %v50161_v15  ;;  %42771 = vmatpush3.bf16.msra.mxu1 %v50162_v55  ;;  %v50190_v55 = vld [vmem:[#allocation58_spill] sm:$0xff] }
0x1873   :  { %42700 = vmatprep.subr.bf16.mxu0 %v49723_v17  ;;  %42772 = vmatprep.subr.bf16.mxu1 %v49723_v17  ;;  %v50191_v15 = vld [vmem:[#allocation46_spill] sm:$0xff] }
0x1875   :  { %38128 = vmatmul.mubr.f32.vlgmr.msra.gmra.mrb[40].mxu0 %v48063_v3  ;;  %38242 = vmatmul.mubr.f32.vlgmr.msra.gmra.mrb[40].mxu1 %v48063_v3 }
0x1876   :  { %42702 = vmatpush3.bf16.msra.mxu0 %v50163_v12  ;;  %42774 = vmatpush3.bf16.msra.mxu1 %v50164_v32  ;;  %v50170_v32 = vld [vmem:[#allocation38_spill] sm:$0xff]  ;;  %v50177_v12 = vld [vmem:[#allocation43_spill] sm:$0xff] }
0x1877   :  { %42703 = vmatprep.subr.bf16.mxu0 %v49723_v17  ;;  %42775 = vmatprep.subr.bf16.mxu1 %v49723_v17 }
0x1878   :  { %38146 = vmatprep.mubr.msk.f32.mxu0 %vm44710_vm1, %v49724_v49  ;;  %38260 = vmatprep.mubr.msk.f32.mxu1 %vm44710_vm1, %v49724_v49 }
0x187a   :  { %42705 = vmatpush3.bf16.msra.mxu0 %v50165_v2  ;;  %42777 = vmatpush3.bf16.msra.mxu1 %v50166_v57  ;;  %v50174_v57 = vld [vmem:[#allocation41_spill] sm:$0xff] }
0x187b   :  { %42706 = vmatprep.subr.bf16.mxu0 %v49723_v17  ;;  %42778 = vmatprep.subr.bf16.mxu1 %v49723_v17  ;;  %v50176_v2 = vld [vmem:[#allocation33_spill] sm:$0xff] }
0x187e   :  { %42708 = vmatpush3.bf16.msra.mxu0 %v50167_v58  ;;  %42780 = vmatpush3.bf16.msra.mxu1 %v50168_v47  ;;  %v50172_v47 = vmov 4   ;;  %v50173_v58 = vld [vmem:[#allocation31_spill] sm:$0xff] }
0x187f   :  { %42709 = vmatprep.subr.bf16.mxu0 %v49723_v17  ;;  %42781 = vmatprep.subr.bf16.mxu1 %v49723_v17 }
0x1882   :  { %42711 = vmatpush3.bf16.msra.mxu0 %v50169_v54  ;;  %42783 = vmatpush3.bf16.msra.mxu1 %v50170_v32  ;;  %v31254_v32 = vld [vmem:[%s49414_s1 + $0x28] sm:$0xff]  ;;  %v50171_v54 = vmov 2  }
0x1883   :  { %42712 = vmatprep.subr.bf16.mxu0 %v49723_v17  ;;  %42784 = vmatprep.subr.bf16.mxu1 %v49723_v17 }
0x1884   :  { %20995 = vperm.xlu1 %44677, %v31254_v32   ;;  %21538 = vperm.xlu0 %44678, %v31254_v32  }
0x1885   :  { %38147 = vmatmul.mubr.f32.vlgmr.msra.gmra.mrb[40].mxu0 %v48066_v9  ;;  %38261 = vmatmul.mubr.f32.vlgmr.msra.gmra.mrb[40].mxu1 %v48066_v9 }
0x1886   :  { %42714 = vmatpush3.bf16.msra.mxu0 %v44964_v20  ;;  %42786 = vmatpush3.bf16.msra.mxu1 %v49853_v23 }
0x1887   :  { %42715 = vmatprep.subr.bf16.mxu0 %v49723_v17  ;;  %42787 = vmatprep.subr.bf16.mxu1 %v49723_v17 }
0x1888   :  { %38165 = vmatprep.mubr.msk.f32.mxu0 %vm44710_vm1, %v49724_v49  ;;  %38279 = vmatprep.mubr.msk.f32.mxu1 %vm44710_vm1, %v49724_v49 }
0x1889   :  { %44679 = vset.pattern.permute.xlu1 %v50171_v54  ;;  %44681 = vset.pattern.permute.xlu0 %v50172_v47  ;;  %v50175_v47 = vmov 3  }
0x188a   :  { %42717 = vmatpush3.bf16.msra.mxu0 %v44972_v26  ;;  %42789 = vmatpush3.bf16.msra.mxu1 %v49854_v29 }
0x188b   :  { %42718 = vmatprep.subr.bf16.mxu0 %v49723_v17  ;;  %42790 = vmatprep.subr.bf16.mxu1 %v49723_v17 }
0x188c   :  { %22081 = vperm.xlu1 %44679, %v31254_v32   ;;  %23167 = vperm.xlu0 %44681, %v31254_v32  }
0x188e   :  { %42720 = vmatpush3.bf16.msra.mxu0 %v45089_v48  ;;  %42792 = vmatpush3.bf16.msra.mxu1 %v50073_v38 }
0x188f   :  { %42721 = vmatprep.subr.bf16.mxu0 %v49723_v17  ;;  %42793 = vmatprep.subr.bf16.mxu1 %v49723_v17 }
0x1890   :  { %44680 = vset.pattern.permute.xlu1 %v50175_v47  ;;  %44684 = vset.pattern.permute.xlu0 %v50171_v54  ;;  %v50180_v47 = vmov 0   ;;  %v50181_v54 = vld [vmem:[#allocation22_spill] sm:$0xff] }
0x1891   :  { %22624 = vperm.xlu1 %44680, %v31254_v32   ;;  %v50183_v32 = vld [vmem:[#allocation39_spill] sm:$0xff] }
0x1892   :  { %42723 = vmatpush3.bf16.msra.mxu0 %v45093_v51  ;;  %42795 = vmatpush3.bf16.msra.mxu1 %v50074_v25 }
0x1893   :  { %42724 = vmatprep.subr.bf16.mxu0 %v49723_v17  ;;  %42796 = vmatprep.subr.bf16.mxu1 %v49723_v17 }
0x1895   :  { %38166 = vmatmul.mubr.f32.vlgmr.msra.gmra.mrb[40].mxu0 %v48069_v62  ;;  %38280 = vmatmul.mubr.f32.vlgmr.msra.gmra.mrb[40].mxu1 %v48069_v62 }
0x1896   :  { %42726 = vmatpush3.bf16.msra.mxu0 %v50173_v58  ;;  %42798 = vmatpush3.bf16.msra.mxu1 %v50174_v57  ;;  %v50178_v57 = vld [vmem:[#allocation21_spill] sm:$0xff] }
0x1897   :  { %42727 = vmatprep.subr.bf16.mxu0 %v49723_v17  ;;  %42799 = vmatprep.subr.bf16.mxu1 %v49723_v17  ;;  %v50179_v58 = vld [vmem:[#allocation45_spill] sm:$0xff] }
0x1898   :  { %38184 = vmatprep.mubr.msk.f32.mxu0 %vm44710_vm1, %v49724_v49  ;;  %38298 = vmatprep.mubr.msk.f32.mxu1 %vm44710_vm1, %v49724_v49 }
0x1899   :  { %44682 = vset.pattern.permute.xlu1 %v50180_v47  ;;  %v50189_v47 = vld [vmem:[#allocation44_spill] sm:$0xff] }
0x189a   :  { %42729 = vmatpush3.bf16.msra.mxu0 %v50176_v2  ;;  %42801 = vmatpush3.bf16.msra.mxu1 %v50177_v12  ;;  %v50182_v2 = vld [vmem:[#allocation47_spill] sm:$0xff]  ;;  %v50188_v12 = vld [vmem:[#allocation57_spill] sm:$0xff] }
0x189b   :  { %42730 = vmatprep.subr.bf16.mxu0 %v49723_v17  ;;  %42802 = vmatprep.subr.bf16.mxu1 %v49723_v17 }
0x189e   :  { %42732 = vmatpush3.bf16.msra.mxu0 %v50178_v57  ;;  %42804 = vmatpush3.bf16.msra.mxu1 %v50179_v58  ;;  %v50186_v58 = vld [vmem:[#allocation56_spill] sm:$0xff]  ;;  %v50187_v57 = vld [vmem:[#allocation42_spill] sm:$0xff] }
0x189f   :  { %42733 = vmatprep.subr.bf16.mxu0 %v49723_v17  ;;  %42805 = vmatprep.subr.bf16.mxu1 %v49723_v17 }
0x18a2   :  { %42735 = vmatpush3.bf16.msra.mxu0 %v50181_v54  ;;  %42807 = vmatpush3.bf16.msra.mxu1 %v50182_v2  ;;  %v50184_v2 = vld [vmem:[#allocation54_spill] sm:$0xff]  ;;  %v50185_v54 = vld [vmem:[#allocation40_spill] sm:$0xff] }
0x18a3   :  { %42736 = vmatprep.subr.bf16.mxu0 %v49723_v17  ;;  %42808 = vmatprep.subr.bf16.mxu1 %v49723_v17 }
0x18a5   :  { %38185 = vmatmul.mubr.f32.vlgmr.msra.gmra.mrb[40].mxu0 %v48063_v3  ;;  %38299 = vmatmul.mubr.f32.vlgmr.msra.gmra.mrb[40].mxu1 %v48063_v3 }
0x18a6   :  { %42738 = vmatpush3.bf16.msra.mxu0 %v44964_v20  ;;  %42810 = vmatpush3.bf16.msra.mxu1 %v49853_v23 }
0x18a7   :  { %42739 = vmatprep.subr.bf16.mxu0 %v49723_v17  ;;  %42811 = vmatprep.subr.bf16.mxu1 %v49723_v17 }
0x18a8   :  { %38203 = vmatprep.mubr.msk.f32.mxu0 %vm44710_vm1, %v49724_v49  ;;  %38317 = vmatprep.mubr.msk.f32.mxu1 %vm44710_vm1, %v49724_v49 }
0x18aa   :  { %42741 = vmatpush3.bf16.msra.mxu0 %v44972_v26  ;;  %42813 = vmatpush3.bf16.msra.mxu1 %v49854_v29 }
0x18ab   :  { %42742 = vmatprep.subr.bf16.mxu0 %v49723_v17  ;;  %42814 = vmatprep.subr.bf16.mxu1 %v49723_v17 }
0x18ae   :  { %42744 = vmatpush3.bf16.msra.mxu0 %v45089_v48  ;;  %42816 = vmatpush3.bf16.msra.mxu1 %v50073_v38 }
0x18af   :  { %42745 = vmatprep.subr.bf16.mxu0 %v49723_v17  ;;  %42817 = vmatprep.subr.bf16.mxu1 %v49723_v17 }
0x18b2   :  { %42747 = vmatpush3.bf16.msra.mxu0 %v45093_v51  ;;  %42819 = vmatpush3.bf16.msra.mxu1 %v50074_v25 }
0x18b3   :  { %42820 = vmatprep.subr.bf16.mxu0 %v49723_v17  ;;  %42892 = vmatprep.subr.bf16.mxu1 %v49723_v17 }
0x18b5   :  { %38204 = vmatmul.mubr.f32.vlgmr.msra.gmra.mrb[40].mxu0 %v48063_v3  ;;  %38318 = vmatmul.mubr.f32.vlgmr.msra.gmra.mrb[40].mxu1 %v48063_v3 }
0x18b6   :  { %42822 = vmatpush3.bf16.msra.mxu0 %v50183_v32  ;;  %42894 = vmatpush3.bf16.msra.mxu1 %v50184_v2 }
0x18b7   :  { %42823 = vmatprep.subr.bf16.mxu0 %v49723_v17  ;;  %42895 = vmatprep.subr.bf16.mxu1 %v49723_v17 }
0x18b8   :  { %38336 = vmatprep.mubr.msk.f32.mxu0 %vm44710_vm1, %v49724_v49  ;;  %38450 = vmatprep.mubr.msk.f32.mxu1 %vm44710_vm1, %v49724_v49 }
0x18ba   :  { %42825 = vmatpush3.bf16.msra.mxu0 %v50185_v54  ;;  %42897 = vmatpush3.bf16.msra.mxu1 %v50186_v58 }
0x18bb   :  { %42826 = vmatprep.subr.bf16.mxu0 %v49723_v17  ;;  %42898 = vmatprep.subr.bf16.mxu1 %v49723_v17 }
0x18be   :  { %42828 = vmatpush3.bf16.msra.mxu0 %v50187_v57  ;;  %42900 = vmatpush3.bf16.msra.mxu1 %v50188_v12 }
0x18bf   :  { %42829 = vmatprep.subr.bf16.mxu0 %v49723_v17  ;;  %42901 = vmatprep.subr.bf16.mxu1 %v49723_v17 }
0x18c2   :  { %42831 = vmatpush3.bf16.msra.mxu0 %v50189_v47  ;;  %42903 = vmatpush3.bf16.msra.mxu1 %v50190_v55 }
0x18c3   :  { %42832 = vmatprep.subr.bf16.mxu0 %v49723_v17  ;;  %42904 = vmatprep.subr.bf16.mxu1 %v49723_v17 }
0x18c5   :  { %38337 = vmatmul.mubr.f32.vlgmr.msra.gmra.mrb[42].mxu0 %v48073_v16  ;;  %38451 = vmatmul.mubr.f32.vlgmr.msra.gmra.mrb[42].mxu1 %v48073_v16 }
0x18c6   :  { %42834 = vmatpush3.bf16.msra.mxu0 %v50191_v15  ;;  %42906 = vmatpush3.bf16.msra.mxu1 %v50192_v4  ;;  %v50195_v15 = vld [vmem:[#allocation49_spill] sm:$0xff]  ;;  %v50196_v4 = vld [vmem:[#allocation62_spill] sm:$0xff] }
0x18c7   :  { %42835 = vmatprep.subr.bf16.mxu0 %v49723_v17  ;;  %42907 = vmatprep.subr.bf16.mxu1 %v49723_v17 }
0x18c8   :  { %38355 = vmatprep.mubr.msk.f32.mxu0 %vm44710_vm1, %v49724_v49  ;;  %38469 = vmatprep.mubr.msk.f32.mxu1 %vm44710_vm1, %v49724_v49 }
0x18ca   :  { %42837 = vmatpush3.bf16.msra.mxu0 %v50193_v31  ;;  %42909 = vmatpush3.bf16.msra.mxu1 %v50194_v63  ;;  %v50199_v63 = vld [vmem:[#allocation51_spill] sm:$0xff]  ;;  %v50206_v31 = vld [vmem:[#allocation70_spill] sm:$0xff] }
0x18cb   :  { %42838 = vmatprep.subr.bf16.mxu0 %v49723_v17  ;;  %42910 = vmatprep.subr.bf16.mxu1 %v49723_v17 }
0x18ce   :  { %42840 = vmatpush3.bf16.msra.mxu0 %v50195_v15  ;;  %42912 = vmatpush3.bf16.msra.mxu1 %v50196_v4  ;;  %v50200_v15 = vld [vmem:[#allocation66_spill] sm:$0xff]  ;;  %v50205_v4 = vld [vmem:[#allocation55_spill] sm:$0xff] }
0x18cf   :  { %42841 = vmatprep.subr.bf16.mxu0 %v49723_v17  ;;  %42913 = vmatprep.subr.bf16.mxu1 %v49723_v17 }
0x18d2   :  { %42843 = vmatpush3.bf16.msra.mxu0 %v50197_v34  ;;  %42915 = vmatpush3.bf16.msra.mxu1 %v50198_v24  ;;  %v50201_v24 = vld [vmem:[#allocation52_spill] sm:$0xff] }
0x18d3   :  { %42844 = vmatprep.subr.bf16.mxu0 %v49723_v17  ;;  %42916 = vmatprep.subr.bf16.mxu1 %v49723_v17  ;;  %v50202_v34 = vld [vmem:[#allocation68_spill] sm:$0xff] }
0x18d5   :  { %38356 = vmatmul.mubr.f32.vlgmr.msra.gmra.mrb[42].mxu0 %v48063_v3  ;;  %38470 = vmatmul.mubr.f32.vlgmr.msra.gmra.mrb[42].mxu1 %v48063_v3 }
0x18d6   :  { %42846 = vmatpush3.bf16.msra.mxu0 %v50199_v63  ;;  %42918 = vmatpush3.bf16.msra.mxu1 %v50200_v15  ;;  %v50203_v63 = vld [vmem:[#allocation53_spill] sm:$0xff] }
0x18d7   :  { %42847 = vmatprep.subr.bf16.mxu0 %v49723_v17  ;;  %42919 = vmatprep.subr.bf16.mxu1 %v49723_v17  ;;  %v50204_v15 = vld [vmem:[#allocation69_spill] sm:$0xff] }
0x18d8   :  { %38374 = vmatprep.mubr.msk.f32.mxu0 %vm44710_vm1, %v49724_v49  ;;  %38488 = vmatprep.mubr.msk.f32.mxu1 %vm44710_vm1, %v49724_v49 }
0x18da   :  { %42849 = vmatpush3.bf16.msra.mxu0 %v50201_v24  ;;  %42921 = vmatpush3.bf16.msra.mxu1 %v50202_v34  ;;  %v50213_v34 = vld [vmem:[#allocation67_spill] sm:$0xff] }
0x18db   :  { %42850 = vmatprep.subr.bf16.mxu0 %v49723_v17  ;;  %42922 = vmatprep.subr.bf16.mxu1 %v49723_v17  ;;  %v50214_v24 = vld [vmem:[#allocation79_spill] sm:$0xff] }
0x18de   :  { %42852 = vmatpush3.bf16.msra.mxu0 %v50203_v63  ;;  %42924 = vmatpush3.bf16.msra.mxu1 %v50204_v15  ;;  %v50209_v15 = vld [vmem:[#allocation63_spill] sm:$0xff] }
0x18df   :  { %42853 = vmatprep.subr.bf16.mxu0 %v49723_v17  ;;  %42925 = vmatprep.subr.bf16.mxu1 %v49723_v17  ;;  %v50210_v63 = vld [vmem:[#allocation75_spill] sm:$0xff] }
0x18e2   :  { %42855 = vmatpush3.bf16.msra.mxu0 %v50205_v4  ;;  %42927 = vmatpush3.bf16.msra.mxu1 %v50206_v31  ;;  %v50207_v31 = vld [vmem:[#allocation61_spill] sm:$0xff] }
0x18e3   :  { %42856 = vmatprep.subr.bf16.mxu0 %v49723_v17  ;;  %42928 = vmatprep.subr.bf16.mxu1 %v49723_v17  ;;  %v50208_v4 = vld [vmem:[#allocation73_spill] sm:$0xff] }
0x18e5   :  { %38375 = vmatmul.mubr.f32.vlgmr.msra.gmra.mrb[42].mxu0 %v48066_v9  ;;  %38489 = vmatmul.mubr.f32.vlgmr.msra.gmra.mrb[42].mxu1 %v48066_v9 }
0x18e6   :  { %42858 = vmatpush3.bf16.msra.mxu0 %v50183_v32  ;;  %42930 = vmatpush3.bf16.msra.mxu1 %v50184_v2 }
0x18e7   :  { %42859 = vmatprep.subr.bf16.mxu0 %v49723_v17  ;;  %42931 = vmatprep.subr.bf16.mxu1 %v49723_v17 }
0x18e8   :  { %38393 = vmatprep.mubr.msk.f32.mxu0 %vm44710_vm1, %v49724_v49  ;;  %38507 = vmatprep.mubr.msk.f32.mxu1 %vm44710_vm1, %v49724_v49 }
0x18ea   :  { %42861 = vmatpush3.bf16.msra.mxu0 %v50185_v54  ;;  %42933 = vmatpush3.bf16.msra.mxu1 %v50186_v58 }
0x18eb   :  { %42862 = vmatprep.subr.bf16.mxu0 %v49723_v17  ;;  %42934 = vmatprep.subr.bf16.mxu1 %v49723_v17 }
0x18ee   :  { %42864 = vmatpush3.bf16.msra.mxu0 %v50187_v57  ;;  %42936 = vmatpush3.bf16.msra.mxu1 %v50188_v12 }
0x18ef   :  { %42865 = vmatprep.subr.bf16.mxu0 %v49723_v17  ;;  %42937 = vmatprep.subr.bf16.mxu1 %v49723_v17 }
0x18f2   :  { %42867 = vmatpush3.bf16.msra.mxu0 %v50189_v47  ;;  %42939 = vmatpush3.bf16.msra.mxu1 %v50190_v55 }
0x18f3   :  { %42868 = vmatprep.subr.bf16.mxu0 %v49723_v17  ;;  %42940 = vmatprep.subr.bf16.mxu1 %v49723_v17 }
0x18f5   :  { %38394 = vmatmul.mubr.f32.vlgmr.msra.gmra.mrb[42].mxu0 %v48069_v62  ;;  %38508 = vmatmul.mubr.f32.vlgmr.msra.gmra.mrb[42].mxu1 %v48069_v62 }
0x18f6   :  { %42870 = vmatpush3.bf16.msra.mxu0 %v50207_v31  ;;  %42942 = vmatpush3.bf16.msra.mxu1 %v50208_v4  ;;  %v50211_v31 = vld [vmem:[#allocation65_spill] sm:$0xff] }
0x18f7   :  { %42871 = vmatprep.subr.bf16.mxu0 %v49723_v17  ;;  %42943 = vmatprep.subr.bf16.mxu1 %v49723_v17  ;;  %v50212_v4 = vld [vmem:[#allocation77_spill] sm:$0xff] }
0x18f8   :  { %38412 = vmatprep.mubr.msk.f32.mxu0 %vm44710_vm1, %v49724_v49  ;;  %38526 = vmatprep.mubr.msk.f32.mxu1 %vm44710_vm1, %v49724_v49 }
0x18fa   :  { %42873 = vmatpush3.bf16.msra.mxu0 %v50209_v15  ;;  %42945 = vmatpush3.bf16.msra.mxu1 %v50210_v63  ;;  %v50219_v63 = vld [vmem:[#allocation78_spill] sm:$0xff]  ;;  %v50220_v15 = vld [vmem:[#allocation80_spill] sm:$0xff] }
0x18fb   :  { %42874 = vmatprep.subr.bf16.mxu0 %v49723_v17  ;;  %42946 = vmatprep.subr.bf16.mxu1 %v49723_v17 }
0x18fe   :  { %42876 = vmatpush3.bf16.msra.mxu0 %v50211_v31  ;;  %42948 = vmatpush3.bf16.msra.mxu1 %v50212_v4  ;;  %v50217_v4 = vld [vmem:[#allocation74_spill] sm:$0xff]  ;;  %v50218_v31 = vld [vmem:[#allocation76_spill] sm:$0xff] }
0x18ff   :  { %42877 = vmatprep.subr.bf16.mxu0 %v49723_v17  ;;  %42949 = vmatprep.subr.bf16.mxu1 %v49723_v17 }
0x1902   :  { %42879 = vmatpush3.bf16.msra.mxu0 %v50213_v34  ;;  %42951 = vmatpush3.bf16.msra.mxu1 %v50214_v24  ;;  %v50215_v24 = vld [vmem:[#allocation71_spill] sm:$0xff]  ;;  %v50216_v34 = vld [vmem:[#allocation72_spill] sm:$0xff] }
0x1903   :  { %42880 = vmatprep.subr.bf16.mxu0 %v49723_v17  ;;  %42952 = vmatprep.subr.bf16.mxu1 %v49723_v17 }
0x1905   :  { %38413 = vmatmul.mubr.f32.vlgmr.msra.gmra.mrb[42].mxu0 %v48063_v3  ;;  %38527 = vmatmul.mubr.f32.vlgmr.msra.gmra.mrb[42].mxu1 %v48063_v3 }
0x1906   :  { %42882 = vmatpush3.bf16.msra.mxu0 %v50183_v32  ;;  %42954 = vmatpush3.bf16.msra.mxu1 %v50184_v2 }
0x1907   :  { %42883 = vmatprep.subr.bf16.mxu0 %v49723_v17  ;;  %42955 = vmatprep.subr.bf16.mxu1 %v49723_v17 }
0x1908   :  { %38431 = vmatprep.mubr.msk.f32.mxu0 %vm44710_vm1, %v49724_v49  ;;  %38545 = vmatprep.mubr.msk.f32.mxu1 %vm44710_vm1, %v49724_v49 }
0x190a   :  { %42885 = vmatpush3.bf16.msra.mxu0 %v50185_v54  ;;  %42957 = vmatpush3.bf16.msra.mxu1 %v50186_v58 }
0x190b   :  { %42886 = vmatprep.subr.bf16.mxu0 %v49723_v17  ;;  %42958 = vmatprep.subr.bf16.mxu1 %v49723_v17 }
0x190e   :  { %42888 = vmatpush3.bf16.msra.mxu0 %v50187_v57  ;;  %42960 = vmatpush3.bf16.msra.mxu1 %v50188_v12 }
0x190f   :  { %42889 = vmatprep.subr.bf16.mxu0 %v49723_v17  ;;  %42961 = vmatprep.subr.bf16.mxu1 %v49723_v17 }
0x1912   :  { %42891 = vmatpush3.bf16.msra.mxu0 %v50189_v47  ;;  %42963 = vmatpush3.bf16.msra.mxu1 %v50190_v55  ;;  %v50221_v55 = vld [vmem:[#allocation81_spill] sm:$0xff]  ;;  %v50222_v47 = vld [vmem:[#allocation82_spill] sm:$0xff] }
0x1913   :  { %42964 = vmatprep.subr.bf16.mxu0 %v49723_v17  ;;  %43036 = vmatprep.subr.bf16.mxu1 %v49723_v17 }
0x1915   :  { %38432 = vmatmul.mubr.f32.vlgmr.msra.gmra.mrb[42].mxu0 %v48063_v3  ;;  %38546 = vmatmul.mubr.f32.vlgmr.msra.gmra.mrb[42].mxu1 %v48063_v3 }
0x1916   :  { %42966 = vmatpush3.bf16.msra.mxu0 %v50215_v24  ;;  %38564 = vmatprep.mubr.msk.f32.mxu0 %vm44710_vm1, %v49724_v49 }
0x1917   :  { %42967 = vmatprep.subr.bf16.mxu0 %v49723_v17  ;;  %43038 = vmatpush3.bf16.msra.mxu1 %v44821_v18 }
0x1918   :  { %43039 = vmatprep.subr.bf16.mxu1 %v49723_v17  ;;  %38670 = vmatprep.mubr.msk.f32.mxu1 %vm44710_vm1, %v49724_v49 }
0x191a   :  { %42969 = vmatpush3.bf16.msra.mxu0 %v50216_v34 }
0x191b   :  { %42970 = vmatprep.subr.bf16.mxu0 %v49723_v17  ;;  %43041 = vmatpush3.bf16.msra.mxu1 %v44833_v28 }
0x191c   :  { %43042 = vmatprep.subr.bf16.mxu1 %v49723_v17 }
0x191e   :  { %42972 = vmatpush3.bf16.msra.mxu0 %v50217_v4 }
0x191f   :  { %42973 = vmatprep.subr.bf16.mxu0 %v49723_v17 }
0x1922   :  { %42975 = vmatpush3.bf16.msra.mxu0 %v50218_v31 }
0x1923   :  { %42976 = vmatprep.subr.bf16.mxu0 %v49723_v17 }
0x1925   :  { %38565 = vmatmul.mubr.f32.vlgmr.msra.gmra.mrb[44].mxu0 %v48073_v16  ;;  %v50223_v16 = vld [vmem:[#allocation83_spill] sm:$0xff] }
0x1926   :  { %42978 = vmatpush3.bf16.msra.mxu0 %v50219_v63  ;;  %38583 = vmatprep.mubr.msk.f32.mxu0 %vm44710_vm1, %v49724_v49 }
0x1927   :  { %42979 = vmatprep.subr.bf16.mxu0 %v49723_v17 }
0x192a   :  { %42981 = vmatpush3.bf16.msra.mxu0 %v50220_v15  ;;  %v50224_v15 = vld [vmem:[#allocation84_spill] sm:$0xff] }
0x192b   :  { %42982 = vmatprep.subr.bf16.mxu0 %v49723_v17 }
0x192e   :  { %42984 = vmatpush3.bf16.msra.mxu0 %v50221_v55  ;;  %v50225_v55 = vld [vmem:[#allocation85_spill] sm:$0xff] }
0x192f   :  { %42985 = vmatprep.subr.bf16.mxu0 %v49723_v17 }
0x1932   :  { %42987 = vmatpush3.bf16.msra.mxu0 %v50222_v47  ;;  %v50226_v47 = vld [vmem:[#allocation86_spill] sm:$0xff] }
0x1933   :  { %42988 = vmatprep.subr.bf16.mxu0 %v49723_v17 }
0x1935   :  { %38584 = vmatmul.mubr.f32.vlgmr.msra.gmra.mrb[44].mxu0 %v48063_v3 }
0x1936   :  { %42990 = vmatpush3.bf16.msra.mxu0 %v50223_v16  ;;  %38602 = vmatprep.mubr.msk.f32.mxu0 %vm44710_vm1, %v49724_v49 }
0x1937   :  { %42991 = vmatprep.subr.bf16.mxu0 %v49723_v17 }
0x193a   :  { %42993 = vmatpush3.bf16.msra.mxu0 %v50224_v15  ;;  %v50230_v15 = vld [vmem:[#allocation90_spill] sm:$0xff] }
0x193b   :  { %42994 = vmatprep.subr.bf16.mxu0 %v49723_v17 }
0x193e   :  { %42996 = vmatpush3.bf16.msra.mxu0 %v50225_v55  ;;  %v50229_v55 = vld [vmem:[#allocation89_spill] sm:$0xff] }
0x193f   :  { %42997 = vmatprep.subr.bf16.mxu0 %v49723_v17 }
0x1942   :  { %42999 = vmatpush3.bf16.msra.mxu0 %v50226_v47  ;;  %v50228_v47 = vld [vmem:[#allocation88_spill] sm:$0xff] }
0x1943   :  { %43000 = vmatprep.subr.bf16.mxu0 %v49723_v17 }
0x1945   :  { %38603 = vmatmul.mubr.f32.vlgmr.msra.gmra.mrb[44].mxu0 %v48066_v9  ;;  %v50227_v9 = vld [vmem:[#allocation87_spill] sm:$0xff] }
0x1946   :  { %43002 = vmatpush3.bf16.msra.mxu0 %v50215_v24  ;;  %38621 = vmatprep.mubr.msk.f32.mxu0 %vm44710_vm1, %v49724_v49 }
0x1947   :  { %43003 = vmatprep.subr.bf16.mxu0 %v49723_v17 }
0x194a   :  { %43005 = vmatpush3.bf16.msra.mxu0 %v50216_v34 }
0x194b   :  { %43006 = vmatprep.subr.bf16.mxu0 %v49723_v17 }
0x194e   :  { %43008 = vmatpush3.bf16.msra.mxu0 %v50217_v4 }
0x194f   :  { %43009 = vmatprep.subr.bf16.mxu0 %v49723_v17 }
0x1952   :  { %43011 = vmatpush3.bf16.msra.mxu0 %v50218_v31 }
0x1953   :  { %43012 = vmatprep.subr.bf16.mxu0 %v49723_v17 }
0x1955   :  { %38622 = vmatmul.mubr.f32.vlgmr.msra.gmra.mrb[44].mxu0 %v48069_v62  ;;  %v21539_v62 = vpop.permute.xlu0 %21538 }
0x1956   :  { %43014 = vmatpush3.bf16.msra.mxu0 %v50227_v9  ;;  %38640 = vmatprep.mubr.msk.f32.mxu0 %vm44710_vm1, %v49724_v49 }
0x1957   :  { %43015 = vmatprep.subr.bf16.mxu0 %v49723_v17 }
0x195a   :  { %43017 = vmatpush3.bf16.msra.mxu0 %v50228_v47  ;;  %v50231_v47 = vld [vmem:[#allocation91_spill] sm:$0xff] }
0x195b   :  { %43018 = vmatprep.subr.bf16.mxu0 %v49723_v17 }
0x195e   :  { %43020 = vmatpush3.bf16.msra.mxu0 %v50229_v55 }
0x195f   :  { %43021 = vmatprep.subr.bf16.mxu0 %v49723_v17 }
0x1962   :  { %43023 = vmatpush3.bf16.msra.mxu0 %v50230_v15 }
0x1963   :  { %43024 = vmatprep.subr.bf16.mxu0 %v49723_v17 }
0x1965   :  { %38641 = vmatmul.mubr.f32.vlgmr.msra.gmra.mrb[44].mxu0 %v48063_v3 }
0x1966   :  { %43026 = vmatpush3.bf16.msra.mxu0 %v50215_v24  ;;  %38659 = vmatprep.mubr.msk.f32.mxu0 %vm44710_vm1, %v49724_v49 }
0x1967   :  { %43027 = vmatprep.subr.bf16.mxu0 %v49723_v17 }
0x196a   :  { %43029 = vmatpush3.bf16.msra.mxu0 %v50216_v34 }
0x196b   :  { %43030 = vmatprep.subr.bf16.mxu0 %v49723_v17 }
0x196e   :  { %43032 = vmatpush3.bf16.msra.mxu0 %v50217_v4 }
0x196f   :  { %43033 = vmatprep.subr.bf16.mxu0 %v49723_v17 }
0x1972   :  { %43035 = vmatpush3.bf16.msra.mxu0 %v50218_v31 }
0x1973   :  { %43072 = vmatprep.subr.bf16.mxu0 %v49723_v17 }
0x1975   :  { %38660 = vmatmul.mubr.f32.vlgmr.msra.gmra.mrb[44].mxu0 %v48063_v3  ;;  %v20996_v3 = vpop.permute.xlu1 %20995 }
0x1976   :  { %43074 = vmatpush3.bf16.msra.mxu0 %v44894_v1  ;;  %38744 = vmatprep.mubr.msk.f32.mxu0 %vm44710_vm1, %v49724_v49 }
0x1977   :  { %43075 = vmatprep.subr.bf16.mxu0 %v49723_v17 }
0x1979   :  { %v22082_v12 = vpop.permute.xlu1 %22081 }
0x197a   :  { %43077 = vmatpush3.bf16.msra.mxu0 %v44904_v6 }
0x197b   :  { %43078 = vmatprep.subr.bf16.mxu0 %v49723_v17 }
0x197d   :  { %v22625_v56 = vpop.permute.xlu1 %22624 }
0x197e   :  { %43080 = vmatpush3.bf16.msra.mxu0 %v44914_v11 }
0x197f   :  { %43081 = vmatprep.subr.bf16.mxu0 %v49723_v17 }
0x1982   :  { %43083 = vmatpush3.bf16.msra.mxu0 %v44924_v22 }
0x1983   :  { %43084 = vmatprep.subr.bf16.mxu0 %v49723_v17 }
0x1988   :  { %v20989_v15 = vpop.f32.mrb[40].mxu0  ;;  %v21533_v55 = vpop.f32.mrb[40].mxu1 }
0x1989   :  { %v44048_v9 = vadd.f32 %v20989_v15, %v50231_v47  ;;  %v44049_v16 = vadd.f32 %v21533_v55, %v46004_v61  ;;  %v38205_v63 = vpop.f32.mrb[41].mxu0  ;;  %v38319_v31 = vpop.f32.mrb[41].mxu1 }
0x198a   :  { %v23168_v63 = vpop.permute.xlu0 %23167 }
0x198b   :  { %v20998_v4 = vmul.f32 %v44048_v9, %v20996_v3  ;;  %v21541_v34 = vmul.f32 %v44049_v16, %v21539_v62 }
0x198d   :  { %v21542_v24 = vadd.f32 %v21541_v34, %v20998_v4 }
0x19e8   :  { %v22076_v57 = vpop.f32.mrb[42].mxu0  ;;  %v22619_v58 = vpop.f32.mrb[42].mxu1 }
0x19e9   :  { %v44050_v54 = vadd.f32 %v22076_v57, %v46008_v27  ;;  %v44051_v2 = vadd.f32 %v22619_v58, %v46012_v60  ;;  %v38433_v32 = vpop.f32.mrb[43].mxu0  ;;  %v38547_v5 = vpop.f32.mrb[43].mxu1 }
0x19eb   :  { %v22084_v25 = vmul.f32 %v44050_v54, %v22082_v12  ;;  %v22627_v15 = vmul.f32 %v44051_v2, %v22625_v56 }
0x19ed   :  { %v22085_v38 = vadd.f32 %v22084_v25, %v21542_v24 }
0x19ef   :  { %v22628_v47 = vadd.f32 %v22627_v15, %v22085_v38 }
0x1a48   :  { %v23162_v55 = vpop.f32.mrb[44].mxu0 }
0x1a49   :  { %v44052_v31 = vadd.f32 %v23162_v55, %v46016_v13  ;;  %v38661_v16 = vpop.f32.mrb[45].mxu0 }
0x1a4b   :  { %v23170_v34 = vmul.f32 %v44052_v31, %v23168_v63 }
0x1a4d   :  { %v48414_v4 = vadd.f32 %v23170_v34, %v22628_v47 }
0x1a4f   :  { %v23172_v57 = vadd.f32 %v48414_v4, %v47928_v50  ;;  %v23180_v50 = vmul.f32 6.0, %v47985_v21  ;;  %v50232_v21 = vld [vmem:[#allocation27_spill] sm:$0xff] }
0x1a51   :  { %v23173_v9 = vmul.f32 0.5, %v23172_v57 }
0x1a53   :  { %v48419_v58 = vadd.f32 %v23173_v9, %v47933_v53  ;;  %v23181_v53 = vadd.f32 %v47991_v36, %v23180_v50  ;;  %v50233_v36 = vld [vmem:[#allocation28_spill] sm:$0xff] }
0x1a55   :  { %v23175_v5 = vmul.f32 2.0, %v48419_v58 }
0x1a57   :  { %v23176_v25 = vsub.f32 %v23175_v5, %v47938_v0  ;;  %v23186_v0 = vrot.slane %v23181_v53, %v45009_v59  ;;  %v50234_v5 = vld [vmem:[#allocation3_spill] sm:$0xff] }
0x1a59   :  { %v48424_v38 = vadd.f32 %v23176_v25, %v48414_v4 }
0x1a5b   :  { %v23189_v56 = vsel %vm520_vm2, %v48424_v38, 0 }
0x1a5c   :  { %v23260_v24 = vand.u32 4294901760, %v23189_v56 }
0x1a5e   :  { %v23261_v12 = vsub.f32 %v23189_v56, %v23260_v24 }
0x1a60   :  { %v23262_v2 = vand.u32 4294901760, %v23261_v12 }
0x1a62   :  { %v23263_v47 = vsub.f32 %v23261_v12, %v23262_v2 }
0x1a64   :  { %v23264_v54 = vand.u32 4294901760, %v23263_v47 }
0x1a66   :  { %38671 = vmatmul.mubr.f32.vlgmr.msra.gmra.mrb[44].mxu1 %v23264_v54 }
0x1a67   :  { %43044 = vmatpush3.bf16.msra.mxu1 %v44837_v37  ;;  %38681 = vmatprep.mubr.msk.f32.mxu1 %vm44710_vm1, %v49724_v49 }
0x1a68   :  { %43045 = vmatprep.subr.bf16.mxu1 %v49723_v17 }
0x1a6b   :  { %43047 = vmatpush3.bf16.msra.mxu1 %v44839_v42 }
0x1a6c   :  { %43048 = vmatprep.subr.bf16.mxu1 %v49723_v17 }
0x1a6e   :  { %38682 = vmatmul.mubr.f32.vlgmr.msra.gmra.mrb[44].mxu1 %v23260_v24 }
0x1a6f   :  { %43050 = vmatpush3.bf16.msra.mxu1 %v44841_v43  ;;  %38692 = vmatprep.mubr.msk.f32.mxu1 %vm44710_vm1, %v49724_v49 }
0x1a70   :  { %43051 = vmatprep.subr.bf16.mxu1 %v49723_v17 }
0x1a73   :  { %43053 = vmatpush3.bf16.msra.mxu1 %v44843_v44 }
0x1a74   :  { %43054 = vmatprep.subr.bf16.mxu1 %v49723_v17 }
0x1a76   :  { %38693 = vmatmul.mubr.f32.vlgmr.msra.gmra.mrb[44].mxu1 %v23261_v12 }
0x1a77   :  { %43056 = vmatpush3.bf16.msra.mxu1 %v44821_v18  ;;  %38703 = vmatprep.mubr.msk.f32.mxu1 %vm44710_vm1, %v49724_v49 }
0x1a78   :  { %43057 = vmatprep.subr.bf16.mxu1 %v49723_v17 }
0x1a7b   :  { %43059 = vmatpush3.bf16.msra.mxu1 %v44833_v28 }
0x1a7c   :  { %43060 = vmatprep.subr.bf16.mxu1 %v49723_v17 }
0x1a7e   :  { %38704 = vmatmul.mubr.f32.vlgmr.msra.gmra.mrb[44].mxu1 %v23262_v2 }
0x1a7f   :  { %43062 = vmatpush3.bf16.msra.mxu1 %v44845_v45  ;;  %38714 = vmatprep.mubr.msk.f32.mxu1 %vm44710_vm1, %v49724_v49 }
0x1a80   :  { %43063 = vmatprep.subr.bf16.mxu1 %v49723_v17 }
0x1a83   :  { %43065 = vmatpush3.bf16.msra.mxu1 %v44847_v46 }
0x1a84   :  { %43066 = vmatprep.subr.bf16.mxu1 %v49723_v17 }
0x1a86   :  { %38715 = vmatmul.mubr.f32.vlgmr.msra.gmra.mrb[44].mxu1 %v23260_v24 }
0x1a87   :  { %43068 = vmatpush3.bf16.msra.mxu1 %v44821_v18  ;;  %38725 = vmatprep.mubr.msk.f32.mxu1 %vm44710_vm1, %v49724_v49 }
0x1a88   :  { %43069 = vmatprep.subr.bf16.mxu1 %v49723_v17 }
0x1a8b   :  { %43071 = vmatpush3.bf16.msra.mxu1 %v44833_v28 }
0x1a8c   :  { %43144 = vmatprep.subr.bf16.mxu1 %v49723_v17 }
0x1a8e   :  { %38726 = vmatmul.mubr.f32.vlgmr.msra.gmra.mrb[44].mxu1 %v23260_v24 }
0x1a8f   :  { %43146 = vmatpush3.bf16.msra.mxu1 %v44964_v20  ;;  %38858 = vmatprep.mubr.msk.f32.mxu1 %vm44710_vm1, %v49724_v49 }
0x1a90   :  { %43147 = vmatprep.subr.bf16.mxu1 %v49723_v17 }
0x1a93   :  { %43149 = vmatpush3.bf16.msra.mxu1 %v44972_v26 }
0x1a94   :  { %43150 = vmatprep.subr.bf16.mxu1 %v49723_v17 }
0x1a97   :  { %43152 = vmatpush3.bf16.msra.mxu1 %v45089_v48 }
0x1a98   :  { %43153 = vmatprep.subr.bf16.mxu1 %v49723_v17 }
0x1a9b   :  { %43155 = vmatpush3.bf16.msra.mxu1 %v45093_v51 }
0x1a9c   :  { %43156 = vmatprep.subr.bf16.mxu1 %v49723_v17 }
0x1b61   :  { %v23672_v32 = vpop.f32.mrb[44].mxu1 }
0x1b62   :  { %v44053_v3 = vadd.f32 %v23672_v32, %v23186_v0  ;;  %v38727_v62 = vpop.f32.mrb[45].mxu1  ;;  %v50235_v0 = vld [vmem:[#allocation15_spill] sm:$0xff]  ;;  %v50236_v32 = vld [vmem:[#allocation29_spill] sm:$0xff] }
0x1b63   :  { %v50238_v62 = vld [vmem:[#allocation30_spill] sm:$0xff] }
0x1b64   :  { %v23676_v15 = vmax.f32 %v44053_v3, 0.0  ;;  %v50237_v3 = vld [vmem:[#allocation16_spill] sm:$0xff] }
0x1b66   :  { %v23678_v55 = vsel %vm1025_vm3, %v23676_v15, 0  ;;  %v50239_v15 = vld [vmem:[#allocation17_spill] sm:$0xff] }
0x1b67   :  { %v23753_v63 = vand.u32 4294901760, %v23678_v55 }
0x1b69   :  { %v23754_v31 = vsub.f32 %v23678_v55, %v23753_v63  ;;  %v50240_v55 = vld [vmem:[#allocation32_spill] sm:$0xff] }
0x1b6b   :  { %v23755_v16 = vand.u32 4294901760, %v23754_v31 }
0x1b6d   :  { %v23756_v34 = vsub.f32 %v23754_v31, %v23755_v16 }
0x1b6f   :  { %v23757_v57 = vand.u32 4294901760, %v23756_v34  ;;  %v50244_v34 = vld [vmem:[#allocation35_spill] sm:$0xff] }
0x1b71   :  { %38745 = vmatmul.mubr.f32.vlgmr.msra.gmra.mrb[46].mxu0 %v23757_v57  ;;  %v50245_v57 = vld [vmem:[#allocation24_spill] sm:$0xff] }
0x1b72   :  { %43086 = vmatpush3.bf16.msra.mxu0 %v49915_v35  ;;  %38763 = vmatprep.mubr.msk.f32.mxu0 %vm44710_vm1, %v49724_v49 }
0x1b73   :  { %43087 = vmatprep.subr.bf16.mxu0 %v49723_v17 }
0x1b76   :  { %43089 = vmatpush3.bf16.msra.mxu0 %v49916_v10 }
0x1b77   :  { %43090 = vmatprep.subr.bf16.mxu0 %v49723_v17 }
0x1b7a   :  { %43092 = vmatpush3.bf16.msra.mxu0 %v49917_v30 }
0x1b7b   :  { %43093 = vmatprep.subr.bf16.mxu0 %v49723_v17 }
0x1b7e   :  { %43095 = vmatpush3.bf16.msra.mxu0 %v49918_v33 }
0x1b7f   :  { %43096 = vmatprep.subr.bf16.mxu0 %v49723_v17 }
0x1b81   :  { %38764 = vmatmul.mubr.f32.vlgmr.msra.gmra.mrb[46].mxu0 %v23753_v63 }
0x1b82   :  { %43098 = vmatpush3.bf16.msra.mxu0 %v49919_v19  ;;  %38782 = vmatprep.mubr.msk.f32.mxu0 %vm44710_vm1, %v49724_v49 }
0x1b83   :  { %43099 = vmatprep.subr.bf16.mxu0 %v49723_v17 }
0x1b86   :  { %43101 = vmatpush3.bf16.msra.mxu0 %v49920_v14 }
0x1b87   :  { %43102 = vmatprep.subr.bf16.mxu0 %v49723_v17 }
0x1b8a   :  { %43104 = vmatpush3.bf16.msra.mxu0 %v49921_v8 }
0x1b8b   :  { %43105 = vmatprep.subr.bf16.mxu0 %v49723_v17 }
0x1b8e   :  { %43107 = vmatpush3.bf16.msra.mxu0 %v49922_v7 }
0x1b8f   :  { %43108 = vmatprep.subr.bf16.mxu0 %v49723_v17 }
0x1b91   :  { %38783 = vmatmul.mubr.f32.vlgmr.msra.gmra.mrb[46].mxu0 %v23754_v31  ;;  %v50242_v31 = vld [vmem:[#allocation34_spill] sm:$0xff] }
0x1b92   :  { %43110 = vmatpush3.bf16.msra.mxu0 %v44894_v1  ;;  %38801 = vmatprep.mubr.msk.f32.mxu0 %vm44710_vm1, %v49724_v49 }
0x1b93   :  { %43111 = vmatprep.subr.bf16.mxu0 %v49723_v17 }
0x1b96   :  { %43113 = vmatpush3.bf16.msra.mxu0 %v44904_v6 }
0x1b97   :  { %43114 = vmatprep.subr.bf16.mxu0 %v49723_v17 }
0x1b9a   :  { %43116 = vmatpush3.bf16.msra.mxu0 %v44914_v11 }
0x1b9b   :  { %43117 = vmatprep.subr.bf16.mxu0 %v49723_v17 }
0x1b9e   :  { %43119 = vmatpush3.bf16.msra.mxu0 %v44924_v22 }
0x1b9f   :  { %43120 = vmatprep.subr.bf16.mxu0 %v49723_v17 }
0x1ba1   :  { %38802 = vmatmul.mubr.f32.vlgmr.msra.gmra.mrb[46].mxu0 %v23755_v16  ;;  %v50243_v16 = vld [vmem:[#allocation23_spill] sm:$0xff] }
0x1ba2   :  { %43122 = vmatpush3.bf16.msra.mxu0 %v49923_v40  ;;  %38820 = vmatprep.mubr.msk.f32.mxu0 %vm44710_vm1, %v49724_v49 }
0x1ba3   :  { %43123 = vmatprep.subr.bf16.mxu0 %v49723_v17 }
0x1ba6   :  { %43125 = vmatpush3.bf16.msra.mxu0 %v49924_v39 }
0x1ba7   :  { %43126 = vmatprep.subr.bf16.mxu0 %v49723_v17 }
0x1baa   :  { %43128 = vmatpush3.bf16.msra.mxu0 %v49925_v41 }
0x1bab   :  { %43129 = vmatprep.subr.bf16.mxu0 %v49723_v17 }
0x1bae   :  { %43131 = vmatpush3.bf16.msra.mxu0 %v49926_v52 }
0x1baf   :  { %43132 = vmatprep.subr.bf16.mxu0 %v49723_v17 }
0x1bb1   :  { %38821 = vmatmul.mubr.f32.vlgmr.msra.gmra.mrb[46].mxu0 %v23753_v63 }
0x1bb2   :  { %43134 = vmatpush3.bf16.msra.mxu0 %v44894_v1  ;;  %38839 = vmatprep.mubr.msk.f32.mxu0 %vm44710_vm1, %v49724_v49 }
0x1bb3   :  { %43135 = vmatprep.subr.bf16.mxu0 %v49723_v17 }
0x1bb6   :  { %43137 = vmatpush3.bf16.msra.mxu0 %v44904_v6 }
0x1bb7   :  { %43138 = vmatprep.subr.bf16.mxu0 %v49723_v17 }
0x1bba   :  { %43140 = vmatpush3.bf16.msra.mxu0 %v44914_v11 }
0x1bbb   :  { %43141 = vmatprep.subr.bf16.mxu0 %v49723_v17 }
0x1bbe   :  { %43143 = vmatpush3.bf16.msra.mxu0 %v44924_v22 }
0x1bbf   :  { %43216 = vmatprep.subr.bf16.mxu0 %v49723_v17 }
0x1bc1   :  { %38840 = vmatmul.mubr.f32.vlgmr.msra.gmra.mrb[46].mxu0 %v23753_v63  ;;  %v50241_v63 = vld [vmem:[#allocation18_spill] sm:$0xff] }
0x1bc2   :  { %43218 = vmatpush3.bf16.msra.mxu0 %v49853_v23  ;;  %38972 = vmatprep.mubr.msk.f32.mxu0 %vm44710_vm1, %v49724_v49 }
0x1bc3   :  { %43219 = vmatprep.subr.bf16.mxu0 %v49723_v17 }
0x1bc6   :  { %43221 = vmatpush3.bf16.msra.mxu0 %v49854_v29 }
0x1bc7   :  { %43222 = vmatprep.subr.bf16.mxu0 %v49723_v17 }
0x1bca   :  { %43224 = vmatpush3.bf16.msra.mxu0 %v50232_v21 }
0x1bcb   :  { %43225 = vmatprep.subr.bf16.mxu0 %v49723_v17 }
0x1bce   :  { %43227 = vmatpush3.bf16.msra.mxu0 %v50233_v36 }
0x1bcf   :  { %43228 = vmatprep.subr.bf16.mxu0 %v49723_v17 }
0x1c94   :  { %v24213_v9 = vpop.f32.mrb[46].mxu0 }
0x1c95   :  { %v44054_v25 = vadd.f32 %v50234_v5, %v24213_v9  ;;  %v38841_v56 = vpop.f32.mrb[47].mxu0  ;;  %v50246_v9 = vld [vmem:[#allocation36_spill] sm:$0xff]  ;;  %v50247_v5 = vld [vmem:[#allocation19_spill] sm:$0xff] }
0x1c96   :  { %v50249_v56 = vld [vmem:[#allocation20_spill] sm:$0xff] }
0x1c97   :  { %v24217_v24 = vmax.f32 %v44054_v25, 0.0  ;;  %v50248_v25 = vld [vmem:[#allocation37_spill] sm:$0xff] }
0x1c99   :  { %v24219_v12 = vsel %vm1025_vm3, %v24217_v24, 0  ;;  %v50250_v24 = vld [vmem:[#allocation38_spill] sm:$0xff] }
0x1c9a   :  { %v48534_v2 = vand.u32 4294901760, %v24219_v12 }
0x1c9c   :  { %v48537_v47 = vsub.f32 %v24219_v12, %v48534_v2  ;;  %v31255_v12 = vld [vmem:[%s49414_s1 + $0x30] sm:$0xff] }
0x1c9d   :  { %24760 = vperm.xlu1 %44682, %v31255_v12   ;;  %25846 = vperm.xlu0 %44684, %v31255_v12  }
0x1c9e   :  { %v48540_v54 = vand.u32 4294901760, %v48537_v47 }
0x1ca0   :  { %v24297_v50 = vsub.f32 %v48537_v47, %v48540_v54 }
0x1ca2   :  { %v48544_v53 = vand.u32 4294901760, %v24297_v50  ;;  %v50251_v50 = vmov 1  }
0x1ca3   :  { %44683 = vset.pattern.permute.xlu1 %v50251_v50 }
0x1ca4   :  { %38859 = vmatmul.mubr.f32.vlgmr.msra.gmra.mrb[46].mxu1 %v48544_v53  ;;  %38973 = vmatmul.mubr.f32.vlgmr.msra.gmra.mrb[48].mxu0 %v48544_v53 }
0x1ca5   :  { %43158 = vmatpush3.bf16.msra.mxu1 %v50235_v0  ;;  %43230 = vmatpush3.bf16.msra.mxu0 %v50236_v32 }
0x1ca6   :  { %43159 = vmatprep.subr.bf16.mxu1 %v49723_v17  ;;  %43231 = vmatprep.subr.bf16.mxu0 %v49723_v17 }
0x1ca7   :  { %38877 = vmatprep.mubr.msk.f32.mxu1 %vm44710_vm1, %v49724_v49  ;;  %38991 = vmatprep.mubr.msk.f32.mxu0 %vm44710_vm1, %v49724_v49 }
0x1ca8   :  { %25303 = vperm.xlu1 %44683, %v31255_v12  }
0x1ca9   :  { %43161 = vmatpush3.bf16.msra.mxu1 %v50237_v3  ;;  %43233 = vmatpush3.bf16.msra.mxu0 %v50238_v62 }
0x1caa   :  { %43162 = vmatprep.subr.bf16.mxu1 %v49723_v17  ;;  %43234 = vmatprep.subr.bf16.mxu0 %v49723_v17 }
0x1cad   :  { %43164 = vmatpush3.bf16.msra.mxu1 %v50239_v15  ;;  %43236 = vmatpush3.bf16.msra.mxu0 %v50240_v55  ;;  %v50277_v55 = vld [vmem:[#allocation50_spill] sm:$0xff]  ;;  %v50278_v15 = vld [vmem:[#allocation64_spill] sm:$0xff] }
0x1cae   :  { %43165 = vmatprep.subr.bf16.mxu1 %v49723_v17  ;;  %43237 = vmatprep.subr.bf16.mxu0 %v49723_v17 }
0x1cb1   :  { %43167 = vmatpush3.bf16.msra.mxu1 %v50241_v63  ;;  %43239 = vmatpush3.bf16.msra.mxu0 %v50242_v31  ;;  %v50273_v31 = vld [vmem:[#allocation48_spill] sm:$0xff] }
0x1cb2   :  { %43168 = vmatprep.subr.bf16.mxu1 %v49723_v17  ;;  %43240 = vmatprep.subr.bf16.mxu0 %v49723_v17  ;;  %v50274_v63 = vld [vmem:[#allocation60_spill] sm:$0xff] }
0x1cb4   :  { %38878 = vmatmul.mubr.f32.vlgmr.msra.gmra.mrb[46].mxu1 %v48534_v2  ;;  %38992 = vmatmul.mubr.f32.vlgmr.msra.gmra.mrb[48].mxu0 %v48534_v2 }
0x1cb5   :  { %43170 = vmatpush3.bf16.msra.mxu1 %v50243_v16  ;;  %43242 = vmatpush3.bf16.msra.mxu0 %v50244_v34  ;;  %v50271_v34 = vld [vmem:[#allocation46_spill] sm:$0xff]  ;;  %v50272_v16 = vld [vmem:[#allocation59_spill] sm:$0xff] }
0x1cb6   :  { %43171 = vmatprep.subr.bf16.mxu1 %v49723_v17  ;;  %43243 = vmatprep.subr.bf16.mxu0 %v49723_v17 }
0x1cb7   :  { %38896 = vmatprep.mubr.msk.f32.mxu1 %vm44710_vm1, %v49724_v49  ;;  %39010 = vmatprep.mubr.msk.f32.mxu0 %vm44710_vm1, %v49724_v49 }
0x1cb9   :  { %43173 = vmatpush3.bf16.msra.mxu1 %v50245_v57  ;;  %43245 = vmatpush3.bf16.msra.mxu0 %v50246_v9  ;;  %v50260_v9 = vld [vmem:[#allocation45_spill] sm:$0xff]  ;;  %v50261_v57 = vld [vmem:[#allocation22_spill] sm:$0xff] }
0x1cba   :  { %43174 = vmatprep.subr.bf16.mxu1 %v49723_v17  ;;  %43246 = vmatprep.subr.bf16.mxu0 %v49723_v17 }
0x1cbd   :  { %43176 = vmatpush3.bf16.msra.mxu1 %v50247_v5  ;;  %43248 = vmatpush3.bf16.msra.mxu0 %v50248_v25  ;;  %v50255_v25 = vld [vmem:[#allocation41_spill] sm:$0xff]  ;;  %v50257_v5 = vld [vmem:[#allocation43_spill] sm:$0xff] }
0x1cbe   :  { %43177 = vmatprep.subr.bf16.mxu1 %v49723_v17  ;;  %43249 = vmatprep.subr.bf16.mxu0 %v49723_v17 }
0x1cc1   :  { %43179 = vmatpush3.bf16.msra.mxu1 %v50249_v56  ;;  %43251 = vmatpush3.bf16.msra.mxu0 %v50250_v24  ;;  %v50252_v24 = vmov 0   ;;  %v50253_v56 = vmov 3  }
0x1cc2   :  { %43180 = vmatprep.subr.bf16.mxu1 %v49723_v17  ;;  %43252 = vmatprep.subr.bf16.mxu0 %v49723_v17 }
0x1cc3   :  { %44687 = vset.pattern.permute.xlu0 %v50252_v24  ;;  %44685 = vset.pattern.permute.xlu1 %v50253_v56  ;;  %v50254_v24 = vld [vmem:[#allocation31_spill] sm:$0xff]  ;;  %v50256_v56 = vld [vmem:[#allocation33_spill] sm:$0xff] }
0x1cc4   :  { %38897 = vmatmul.mubr.f32.vlgmr.msra.gmra.mrb[46].mxu1 %v48537_v47  ;;  %39011 = vmatmul.mubr.f32.vlgmr.msra.gmra.mrb[48].mxu0 %v48537_v47 }
0x1cc5   :  { %43182 = vmatpush3.bf16.msra.mxu1 %v44964_v20  ;;  %43254 = vmatpush3.bf16.msra.mxu0 %v49853_v23 }
0x1cc6   :  { %43183 = vmatprep.subr.bf16.mxu1 %v49723_v17  ;;  %43255 = vmatprep.subr.bf16.mxu0 %v49723_v17 }
0x1cc7   :  { %38915 = vmatprep.mubr.msk.f32.mxu1 %vm44710_vm1, %v49724_v49  ;;  %39029 = vmatprep.mubr.msk.f32.mxu0 %vm44710_vm1, %v49724_v49 }
0x1cc8   :  { %26389 = vperm.xlu1 %44685, %v31255_v12  }
0x1cc9   :  { %43185 = vmatpush3.bf16.msra.mxu1 %v44972_v26  ;;  %43257 = vmatpush3.bf16.msra.mxu0 %v49854_v29 }
0x1cca   :  { %43186 = vmatprep.subr.bf16.mxu1 %v49723_v17  ;;  %43258 = vmatprep.subr.bf16.mxu0 %v49723_v17 }
0x1ccd   :  { %43188 = vmatpush3.bf16.msra.mxu1 %v45089_v48  ;;  %43260 = vmatpush3.bf16.msra.mxu0 %v50232_v21 }
0x1cce   :  { %43189 = vmatprep.subr.bf16.mxu1 %v49723_v17  ;;  %43261 = vmatprep.subr.bf16.mxu0 %v49723_v17 }
0x1cd1   :  { %43191 = vmatpush3.bf16.msra.mxu1 %v45093_v51  ;;  %43263 = vmatpush3.bf16.msra.mxu0 %v50233_v36 }
0x1cd2   :  { %43192 = vmatprep.subr.bf16.mxu1 %v49723_v17  ;;  %43264 = vmatprep.subr.bf16.mxu0 %v49723_v17 }
0x1cd4   :  { %38916 = vmatmul.mubr.f32.vlgmr.msra.gmra.mrb[46].mxu1 %v48540_v54  ;;  %39030 = vmatmul.mubr.f32.vlgmr.msra.gmra.mrb[48].mxu0 %v48540_v54 }
0x1cd5   :  { %43194 = vmatpush3.bf16.msra.mxu1 %v50254_v24  ;;  %43266 = vmatpush3.bf16.msra.mxu0 %v50255_v25  ;;  %v50258_v25 = vmov 4   ;;  %v50259_v24 = vld [vmem:[#allocation21_spill] sm:$0xff] }
0x1cd6   :  { %43195 = vmatprep.subr.bf16.mxu1 %v49723_v17  ;;  %43267 = vmatprep.subr.bf16.mxu0 %v49723_v17 }
0x1cd7   :  { %38934 = vmatprep.mubr.msk.f32.mxu1 %vm44710_vm1, %v49724_v49  ;;  %39048 = vmatprep.mubr.msk.f32.mxu0 %vm44710_vm1, %v49724_v49 }
0x1cd8   :  { %44686 = vset.pattern.permute.xlu1 %v50258_v25  ;;  %v50270_v25 = vld [vmem:[#allocation58_spill] sm:$0xff] }
0x1cd9   :  { %43197 = vmatpush3.bf16.msra.mxu1 %v50256_v56  ;;  %43269 = vmatpush3.bf16.msra.mxu0 %v50257_v5  ;;  %v50262_v56 = vld [vmem:[#allocation47_spill] sm:$0xff]  ;;  %v50269_v5 = vld [vmem:[#allocation44_spill] sm:$0xff] }
0x1cda   :  { %43198 = vmatprep.subr.bf16.mxu1 %v49723_v17  ;;  %43270 = vmatprep.subr.bf16.mxu0 %v49723_v17 }
0x1cdb   :  { %26932 = vperm.xlu1 %44686, %v31255_v12   ;;  %v50263_v12 = vld [vmem:[#allocation39_spill] sm:$0xff] }
0x1cdd   :  { %43200 = vmatpush3.bf16.msra.mxu1 %v50259_v24  ;;  %43272 = vmatpush3.bf16.msra.mxu0 %v50260_v9  ;;  %v50267_v9 = vld [vmem:[#allocation42_spill] sm:$0xff]  ;;  %v50268_v24 = vld [vmem:[#allocation57_spill] sm:$0xff] }
0x1cde   :  { %43201 = vmatprep.subr.bf16.mxu1 %v49723_v17  ;;  %43273 = vmatprep.subr.bf16.mxu0 %v49723_v17 }
0x1cdf   :  { %44688 = vset.pattern.permute.xlu1 %v50251_v50  ;;  %v50264_v50 = vld [vmem:[#allocation54_spill] sm:$0xff] }
0x1ce1   :  { %43203 = vmatpush3.bf16.msra.mxu1 %v50261_v57  ;;  %43275 = vmatpush3.bf16.msra.mxu0 %v50262_v56  ;;  %v50265_v56 = vld [vmem:[#allocation40_spill] sm:$0xff] }
0x1ce2   :  { %43204 = vmatprep.subr.bf16.mxu1 %v49723_v17  ;;  %43276 = vmatprep.subr.bf16.mxu0 %v49723_v17  ;;  %v50266_v57 = vld [vmem:[#allocation56_spill] sm:$0xff] }
0x1ce4   :  { %38935 = vmatmul.mubr.f32.vlgmr.msra.gmra.mrb[46].mxu1 %v48534_v2  ;;  %39049 = vmatmul.mubr.f32.vlgmr.msra.gmra.mrb[48].mxu0 %v48534_v2 }
0x1ce5   :  { %43206 = vmatpush3.bf16.msra.mxu1 %v44964_v20  ;;  %43278 = vmatpush3.bf16.msra.mxu0 %v49853_v23 }
0x1ce6   :  { %43207 = vmatprep.subr.bf16.mxu1 %v49723_v17  ;;  %43279 = vmatprep.subr.bf16.mxu0 %v49723_v17 }
0x1ce7   :  { %38953 = vmatprep.mubr.msk.f32.mxu1 %vm44710_vm1, %v49724_v49  ;;  %39067 = vmatprep.mubr.msk.f32.mxu0 %vm44710_vm1, %v49724_v49 }
0x1ce9   :  { %43209 = vmatpush3.bf16.msra.mxu1 %v44972_v26  ;;  %43281 = vmatpush3.bf16.msra.mxu0 %v49854_v29 }
0x1cea   :  { %43210 = vmatprep.subr.bf16.mxu1 %v49723_v17  ;;  %43282 = vmatprep.subr.bf16.mxu0 %v49723_v17 }
0x1ced   :  { %43212 = vmatpush3.bf16.msra.mxu1 %v45089_v48  ;;  %43284 = vmatpush3.bf16.msra.mxu0 %v50232_v21 }
0x1cee   :  { %43213 = vmatprep.subr.bf16.mxu1 %v49723_v17  ;;  %43285 = vmatprep.subr.bf16.mxu0 %v49723_v17 }
0x1cf1   :  { %43215 = vmatpush3.bf16.msra.mxu1 %v45093_v51  ;;  %43287 = vmatpush3.bf16.msra.mxu0 %v50233_v36 }
0x1cf2   :  { %43288 = vmatprep.subr.bf16.mxu1 %v49723_v17  ;;  %43360 = vmatprep.subr.bf16.mxu0 %v49723_v17 }
0x1cf4   :  { %38954 = vmatmul.mubr.f32.vlgmr.msra.gmra.mrb[46].mxu1 %v48534_v2  ;;  %39068 = vmatmul.mubr.f32.vlgmr.msra.gmra.mrb[48].mxu0 %v48534_v2 }
0x1cf5   :  { %43290 = vmatpush3.bf16.msra.mxu1 %v50263_v12  ;;  %43362 = vmatpush3.bf16.msra.mxu0 %v50264_v50 }
0x1cf6   :  { %43291 = vmatprep.subr.bf16.mxu1 %v49723_v17  ;;  %43363 = vmatprep.subr.bf16.mxu0 %v49723_v17 }
0x1cf7   :  { %39086 = vmatprep.mubr.msk.f32.mxu1 %vm44710_vm1, %v49724_v49  ;;  %39200 = vmatprep.mubr.msk.f32.mxu0 %vm44710_vm1, %v49724_v49 }
0x1cf9   :  { %43293 = vmatpush3.bf16.msra.mxu1 %v50265_v56  ;;  %43365 = vmatpush3.bf16.msra.mxu0 %v50266_v57 }
0x1cfa   :  { %43294 = vmatprep.subr.bf16.mxu1 %v49723_v17  ;;  %43366 = vmatprep.subr.bf16.mxu0 %v49723_v17 }
0x1cfd   :  { %43296 = vmatpush3.bf16.msra.mxu1 %v50267_v9  ;;  %43368 = vmatpush3.bf16.msra.mxu0 %v50268_v24 }
0x1cfe   :  { %43297 = vmatprep.subr.bf16.mxu1 %v49723_v17  ;;  %43369 = vmatprep.subr.bf16.mxu0 %v49723_v17 }
0x1d01   :  { %43299 = vmatpush3.bf16.msra.mxu1 %v50269_v5  ;;  %43371 = vmatpush3.bf16.msra.mxu0 %v50270_v25 }
0x1d02   :  { %43300 = vmatprep.subr.bf16.mxu1 %v49723_v17  ;;  %43372 = vmatprep.subr.bf16.mxu0 %v49723_v17 }
0x1d04   :  { %39087 = vmatmul.mubr.f32.vlgmr.msra.gmra.mrb[48].mxu1 %v48544_v53  ;;  %39201 = vmatmul.mubr.f32.vlgmr.msra.gmra.mrb[50].mxu0 %v48544_v53 }
0x1d05   :  { %43302 = vmatpush3.bf16.msra.mxu1 %v50271_v34  ;;  %43374 = vmatpush3.bf16.msra.mxu0 %v50272_v16  ;;  %v50275_v34 = vld [vmem:[#allocation49_spill] sm:$0xff]  ;;  %v50276_v16 = vld [vmem:[#allocation62_spill] sm:$0xff] }
0x1d06   :  { %43303 = vmatprep.subr.bf16.mxu1 %v49723_v17  ;;  %43375 = vmatprep.subr.bf16.mxu0 %v49723_v17 }
0x1d07   :  { %39105 = vmatprep.mubr.msk.f32.mxu1 %vm44710_vm1, %v49724_v49  ;;  %39219 = vmatprep.mubr.msk.f32.mxu0 %vm44710_vm1, %v49724_v49 }
0x1d09   :  { %43305 = vmatpush3.bf16.msra.mxu1 %v50273_v31  ;;  %43377 = vmatpush3.bf16.msra.mxu0 %v50274_v63  ;;  %v50279_v63 = vld [vmem:[#allocation51_spill] sm:$0xff]  ;;  %v50286_v31 = vld [vmem:[#allocation70_spill] sm:$0xff] }
0x1d0a   :  { %43306 = vmatprep.subr.bf16.mxu1 %v49723_v17  ;;  %43378 = vmatprep.subr.bf16.mxu0 %v49723_v17 }
0x1d0d   :  { %43308 = vmatpush3.bf16.msra.mxu1 %v50275_v34  ;;  %43380 = vmatpush3.bf16.msra.mxu0 %v50276_v16  ;;  %v50280_v34 = vld [vmem:[#allocation66_spill] sm:$0xff]  ;;  %v50285_v16 = vld [vmem:[#allocation55_spill] sm:$0xff] }
0x1d0e   :  { %43309 = vmatprep.subr.bf16.mxu1 %v49723_v17  ;;  %43381 = vmatprep.subr.bf16.mxu0 %v49723_v17 }
0x1d11   :  { %43311 = vmatpush3.bf16.msra.mxu1 %v50277_v55  ;;  %43383 = vmatpush3.bf16.msra.mxu0 %v50278_v15  ;;  %v50281_v15 = vld [vmem:[#allocation52_spill] sm:$0xff] }
0x1d12   :  { %43312 = vmatprep.subr.bf16.mxu1 %v49723_v17  ;;  %43384 = vmatprep.subr.bf16.mxu0 %v49723_v17  ;;  %v50282_v55 = vld [vmem:[#allocation68_spill] sm:$0xff] }
0x1d14   :  { %39106 = vmatmul.mubr.f32.vlgmr.msra.gmra.mrb[48].mxu1 %v48534_v2  ;;  %39220 = vmatmul.mubr.f32.vlgmr.msra.gmra.mrb[50].mxu0 %v48534_v2 }
0x1d15   :  { %43314 = vmatpush3.bf16.msra.mxu1 %v50279_v63  ;;  %43386 = vmatpush3.bf16.msra.mxu0 %v50280_v34  ;;  %v50283_v63 = vld [vmem:[#allocation53_spill] sm:$0xff] }
0x1d16   :  { %43315 = vmatprep.subr.bf16.mxu1 %v49723_v17  ;;  %43387 = vmatprep.subr.bf16.mxu0 %v49723_v17  ;;  %v50284_v34 = vld [vmem:[#allocation69_spill] sm:$0xff] }
0x1d17   :  { %39124 = vmatprep.mubr.msk.f32.mxu1 %vm44710_vm1, %v49724_v49  ;;  %39238 = vmatprep.mubr.msk.f32.mxu0 %vm44710_vm1, %v49724_v49 }
0x1d19   :  { %43317 = vmatpush3.bf16.msra.mxu1 %v50281_v15  ;;  %43389 = vmatpush3.bf16.msra.mxu0 %v50282_v55  ;;  %v50293_v55 = vld [vmem:[#allocation67_spill] sm:$0xff] }
0x1d1a   :  { %43318 = vmatprep.subr.bf16.mxu1 %v49723_v17  ;;  %43390 = vmatprep.subr.bf16.mxu0 %v49723_v17  ;;  %v50294_v15 = vld [vmem:[#allocation79_spill] sm:$0xff] }
0x1d1d   :  { %43320 = vmatpush3.bf16.msra.mxu1 %v50283_v63  ;;  %43392 = vmatpush3.bf16.msra.mxu0 %v50284_v34  ;;  %v50289_v34 = vld [vmem:[#allocation63_spill] sm:$0xff] }
0x1d1e   :  { %43321 = vmatprep.subr.bf16.mxu1 %v49723_v17  ;;  %43393 = vmatprep.subr.bf16.mxu0 %v49723_v17  ;;  %v50290_v63 = vld [vmem:[#allocation75_spill] sm:$0xff] }
0x1d21   :  { %43323 = vmatpush3.bf16.msra.mxu1 %v50285_v16  ;;  %43395 = vmatpush3.bf16.msra.mxu0 %v50286_v31  ;;  %v50287_v31 = vld [vmem:[#allocation61_spill] sm:$0xff] }
0x1d22   :  { %43324 = vmatprep.subr.bf16.mxu1 %v49723_v17  ;;  %43396 = vmatprep.subr.bf16.mxu0 %v49723_v17  ;;  %v50288_v16 = vld [vmem:[#allocation73_spill] sm:$0xff] }
0x1d24   :  { %39125 = vmatmul.mubr.f32.vlgmr.msra.gmra.mrb[48].mxu1 %v48537_v47  ;;  %39239 = vmatmul.mubr.f32.vlgmr.msra.gmra.mrb[50].mxu0 %v48537_v47 }
0x1d25   :  { %43326 = vmatpush3.bf16.msra.mxu1 %v50263_v12  ;;  %43398 = vmatpush3.bf16.msra.mxu0 %v50264_v50 }
0x1d26   :  { %43327 = vmatprep.subr.bf16.mxu1 %v49723_v17  ;;  %43399 = vmatprep.subr.bf16.mxu0 %v49723_v17 }
0x1d27   :  { %39143 = vmatprep.mubr.msk.f32.mxu1 %vm44710_vm1, %v49724_v49  ;;  %39257 = vmatprep.mubr.msk.f32.mxu0 %vm44710_vm1, %v49724_v49 }
0x1d29   :  { %43329 = vmatpush3.bf16.msra.mxu1 %v50265_v56  ;;  %43401 = vmatpush3.bf16.msra.mxu0 %v50266_v57 }
0x1d2a   :  { %43330 = vmatprep.subr.bf16.mxu1 %v49723_v17  ;;  %43402 = vmatprep.subr.bf16.mxu0 %v49723_v17 }
0x1d2d   :  { %43332 = vmatpush3.bf16.msra.mxu1 %v50267_v9  ;;  %43404 = vmatpush3.bf16.msra.mxu0 %v50268_v24 }
0x1d2e   :  { %43333 = vmatprep.subr.bf16.mxu1 %v49723_v17  ;;  %43405 = vmatprep.subr.bf16.mxu0 %v49723_v17 }
0x1d31   :  { %43335 = vmatpush3.bf16.msra.mxu1 %v50269_v5  ;;  %43407 = vmatpush3.bf16.msra.mxu0 %v50270_v25 }
0x1d32   :  { %43336 = vmatprep.subr.bf16.mxu1 %v49723_v17  ;;  %43408 = vmatprep.subr.bf16.mxu0 %v49723_v17 }
0x1d34   :  { %39144 = vmatmul.mubr.f32.vlgmr.msra.gmra.mrb[48].mxu1 %v48540_v54  ;;  %39258 = vmatmul.mubr.f32.vlgmr.msra.gmra.mrb[50].mxu0 %v48540_v54 }
0x1d35   :  { %43338 = vmatpush3.bf16.msra.mxu1 %v50287_v31  ;;  %43410 = vmatpush3.bf16.msra.mxu0 %v50288_v16  ;;  %v50291_v31 = vld [vmem:[#allocation65_spill] sm:$0xff] }
0x1d36   :  { %43339 = vmatprep.subr.bf16.mxu1 %v49723_v17  ;;  %43411 = vmatprep.subr.bf16.mxu0 %v49723_v17  ;;  %v50292_v16 = vld [vmem:[#allocation77_spill] sm:$0xff] }
0x1d37   :  { %39162 = vmatprep.mubr.msk.f32.mxu1 %vm44710_vm1, %v49724_v49  ;;  %39276 = vmatprep.mubr.msk.f32.mxu0 %vm44710_vm1, %v49724_v49 }
0x1d39   :  { %43341 = vmatpush3.bf16.msra.mxu1 %v50289_v34  ;;  %43413 = vmatpush3.bf16.msra.mxu0 %v50290_v63  ;;  %v50299_v63 = vld [vmem:[#allocation78_spill] sm:$0xff]  ;;  %v50300_v34 = vld [vmem:[#allocation80_spill] sm:$0xff] }
0x1d3a   :  { %43342 = vmatprep.subr.bf16.mxu1 %v49723_v17  ;;  %43414 = vmatprep.subr.bf16.mxu0 %v49723_v17 }
0x1d3d   :  { %43344 = vmatpush3.bf16.msra.mxu1 %v50291_v31  ;;  %43416 = vmatpush3.bf16.msra.mxu0 %v50292_v16  ;;  %v50297_v16 = vld [vmem:[#allocation74_spill] sm:$0xff]  ;;  %v50298_v31 = vld [vmem:[#allocation76_spill] sm:$0xff] }
0x1d3e   :  { %43345 = vmatprep.subr.bf16.mxu1 %v49723_v17  ;;  %43417 = vmatprep.subr.bf16.mxu0 %v49723_v17 }
0x1d41   :  { %43347 = vmatpush3.bf16.msra.mxu1 %v50293_v55  ;;  %43419 = vmatpush3.bf16.msra.mxu0 %v50294_v15  ;;  %v50295_v15 = vld [vmem:[#allocation71_spill] sm:$0xff]  ;;  %v50296_v55 = vld [vmem:[#allocation72_spill] sm:$0xff] }
0x1d42   :  { %43348 = vmatprep.subr.bf16.mxu1 %v49723_v17  ;;  %43420 = vmatprep.subr.bf16.mxu0 %v49723_v17 }
0x1d44   :  { %39163 = vmatmul.mubr.f32.vlgmr.msra.gmra.mrb[48].mxu1 %v48534_v2  ;;  %39277 = vmatmul.mubr.f32.vlgmr.msra.gmra.mrb[50].mxu0 %v48534_v2 }
0x1d45   :  { %43350 = vmatpush3.bf16.msra.mxu1 %v50263_v12  ;;  %43422 = vmatpush3.bf16.msra.mxu0 %v50264_v50 }
0x1d46   :  { %43351 = vmatprep.subr.bf16.mxu1 %v49723_v17  ;;  %43423 = vmatprep.subr.bf16.mxu0 %v49723_v17 }
0x1d47   :  { %39181 = vmatprep.mubr.msk.f32.mxu1 %vm44710_vm1, %v49724_v49  ;;  %39295 = vmatprep.mubr.msk.f32.mxu0 %vm44710_vm1, %v49724_v49 }
0x1d49   :  { %43353 = vmatpush3.bf16.msra.mxu1 %v50265_v56  ;;  %43425 = vmatpush3.bf16.msra.mxu0 %v50266_v57 }
0x1d4a   :  { %43354 = vmatprep.subr.bf16.mxu1 %v49723_v17  ;;  %43426 = vmatprep.subr.bf16.mxu0 %v49723_v17 }
0x1d4d   :  { %43356 = vmatpush3.bf16.msra.mxu1 %v50267_v9  ;;  %43428 = vmatpush3.bf16.msra.mxu0 %v50268_v24  ;;  %v25847_v24 = vpop.permute.xlu0 %25846 }
0x1d4e   :  { %43357 = vmatprep.subr.bf16.mxu1 %v49723_v17  ;;  %43429 = vmatprep.subr.bf16.mxu0 %v49723_v17 }
0x1d51   :  { %43359 = vmatpush3.bf16.msra.mxu1 %v50269_v5  ;;  %43431 = vmatpush3.bf16.msra.mxu0 %v50270_v25  ;;  %v50301_v25 = vld [vmem:[#allocation81_spill] sm:$0xff]  ;;  %v50302_v5 = vld [vmem:[#allocation82_spill] sm:$0xff] }
0x1d52   :  { %43432 = vmatprep.subr.bf16.mxu1 %v49723_v17  ;;  %43504 = vmatprep.subr.bf16.mxu0 %v49723_v17 }
0x1d54   :  { %39182 = vmatmul.mubr.f32.vlgmr.msra.gmra.mrb[48].mxu1 %v48534_v2  ;;  %39296 = vmatmul.mubr.f32.vlgmr.msra.gmra.mrb[50].mxu0 %v48534_v2 }
0x1d55   :  { %43434 = vmatpush3.bf16.msra.mxu1 %v50295_v15  ;;  %39314 = vmatprep.mubr.msk.f32.mxu1 %vm44710_vm1, %v49724_v49 }
0x1d56   :  { %43435 = vmatprep.subr.bf16.mxu1 %v49723_v17  ;;  %43506 = vmatpush3.bf16.msra.mxu0 %v44821_v18 }
0x1d57   :  { %43507 = vmatprep.subr.bf16.mxu0 %v49723_v17  ;;  %39420 = vmatprep.mubr.msk.f32.mxu0 %vm44710_vm1, %v49724_v49 }
0x1d59   :  { %43437 = vmatpush3.bf16.msra.mxu1 %v50296_v55 }
0x1d5a   :  { %43438 = vmatprep.subr.bf16.mxu1 %v49723_v17  ;;  %43509 = vmatpush3.bf16.msra.mxu0 %v44833_v28 }
0x1d5b   :  { %43510 = vmatprep.subr.bf16.mxu0 %v49723_v17 }
0x1d5d   :  { %43440 = vmatpush3.bf16.msra.mxu1 %v50297_v16 }
0x1d5e   :  { %43441 = vmatprep.subr.bf16.mxu1 %v49723_v17 }
0x1d61   :  { %43443 = vmatpush3.bf16.msra.mxu1 %v50298_v31 }
0x1d62   :  { %43444 = vmatprep.subr.bf16.mxu1 %v49723_v17 }
0x1d64   :  { %39315 = vmatmul.mubr.f32.vlgmr.msra.gmra.mrb[50].mxu1 %v48544_v53  ;;  %v50303_v53 = vld [vmem:[#allocation83_spill] sm:$0xff] }
0x1d65   :  { %43446 = vmatpush3.bf16.msra.mxu1 %v50299_v63  ;;  %39333 = vmatprep.mubr.msk.f32.mxu1 %vm44710_vm1, %v49724_v49 }
0x1d66   :  { %43447 = vmatprep.subr.bf16.mxu1 %v49723_v17 }
0x1d69   :  { %43449 = vmatpush3.bf16.msra.mxu1 %v50300_v34  ;;  %v50304_v34 = vld [vmem:[#allocation84_spill] sm:$0xff] }
0x1d6a   :  { %43450 = vmatprep.subr.bf16.mxu1 %v49723_v17 }
0x1d6d   :  { %43452 = vmatpush3.bf16.msra.mxu1 %v50301_v25  ;;  %v50305_v25 = vld [vmem:[#allocation85_spill] sm:$0xff] }
0x1d6e   :  { %43453 = vmatprep.subr.bf16.mxu1 %v49723_v17 }
0x1d71   :  { %43455 = vmatpush3.bf16.msra.mxu1 %v50302_v5  ;;  %v50306_v5 = vld [vmem:[#allocation86_spill] sm:$0xff] }
0x1d72   :  { %43456 = vmatprep.subr.bf16.mxu1 %v49723_v17 }
0x1d74   :  { %39334 = vmatmul.mubr.f32.vlgmr.msra.gmra.mrb[50].mxu1 %v48534_v2 }
0x1d75   :  { %43458 = vmatpush3.bf16.msra.mxu1 %v50303_v53  ;;  %39352 = vmatprep.mubr.msk.f32.mxu1 %vm44710_vm1, %v49724_v49 }
0x1d76   :  { %43459 = vmatprep.subr.bf16.mxu1 %v49723_v17 }
0x1d79   :  { %43461 = vmatpush3.bf16.msra.mxu1 %v50304_v34  ;;  %v50310_v34 = vld [vmem:[#allocation90_spill] sm:$0xff] }
0x1d7a   :  { %43462 = vmatprep.subr.bf16.mxu1 %v49723_v17 }
0x1d7d   :  { %43464 = vmatpush3.bf16.msra.mxu1 %v50305_v25  ;;  %v50309_v25 = vld [vmem:[#allocation89_spill] sm:$0xff] }
0x1d7e   :  { %43465 = vmatprep.subr.bf16.mxu1 %v49723_v17 }
0x1d81   :  { %43467 = vmatpush3.bf16.msra.mxu1 %v50306_v5  ;;  %v50308_v5 = vld [vmem:[#allocation88_spill] sm:$0xff] }
0x1d82   :  { %43468 = vmatprep.subr.bf16.mxu1 %v49723_v17 }
0x1d84   :  { %39353 = vmatmul.mubr.f32.vlgmr.msra.gmra.mrb[50].mxu1 %v48537_v47  ;;  %v50307_v47 = vld [vmem:[#allocation87_spill] sm:$0xff] }
0x1d85   :  { %43470 = vmatpush3.bf16.msra.mxu1 %v50295_v15  ;;  %39371 = vmatprep.mubr.msk.f32.mxu1 %vm44710_vm1, %v49724_v49 }
0x1d86   :  { %43471 = vmatprep.subr.bf16.mxu1 %v49723_v17 }
0x1d89   :  { %43473 = vmatpush3.bf16.msra.mxu1 %v50296_v55 }
0x1d8a   :  { %43474 = vmatprep.subr.bf16.mxu1 %v49723_v17 }
0x1d8d   :  { %43476 = vmatpush3.bf16.msra.mxu1 %v50297_v16 }
0x1d8e   :  { %43477 = vmatprep.subr.bf16.mxu1 %v49723_v17 }
0x1d91   :  { %43479 = vmatpush3.bf16.msra.mxu1 %v50298_v31 }
0x1d92   :  { %43480 = vmatprep.subr.bf16.mxu1 %v49723_v17 }
0x1d94   :  { %39372 = vmatmul.mubr.f32.vlgmr.msra.gmra.mrb[50].mxu1 %v48540_v54  ;;  %v24761_v54 = vpop.permute.xlu1 %24760 }
0x1d95   :  { %43482 = vmatpush3.bf16.msra.mxu1 %v50307_v47  ;;  %39390 = vmatprep.mubr.msk.f32.mxu1 %vm44710_vm1, %v49724_v49 }
0x1d96   :  { %43483 = vmatprep.subr.bf16.mxu1 %v49723_v17 }
0x1d99   :  { %43485 = vmatpush3.bf16.msra.mxu1 %v50308_v5  ;;  %v50311_v5 = vld [vmem:[#allocation91_spill] sm:$0xff] }
0x1d9a   :  { %43486 = vmatprep.subr.bf16.mxu1 %v49723_v17 }
0x1d9d   :  { %43488 = vmatpush3.bf16.msra.mxu1 %v50309_v25 }
0x1d9e   :  { %43489 = vmatprep.subr.bf16.mxu1 %v49723_v17 }
0x1da1   :  { %43491 = vmatpush3.bf16.msra.mxu1 %v50310_v34 }
0x1da2   :  { %43492 = vmatprep.subr.bf16.mxu1 %v49723_v17 }
0x1da4   :  { %39391 = vmatmul.mubr.f32.vlgmr.msra.gmra.mrb[50].mxu1 %v48534_v2 }
0x1da5   :  { %43494 = vmatpush3.bf16.msra.mxu1 %v50295_v15  ;;  %39409 = vmatprep.mubr.msk.f32.mxu1 %vm44710_vm1, %v49724_v49 }
0x1da6   :  { %43495 = vmatprep.subr.bf16.mxu1 %v49723_v17 }
0x1da9   :  { %43497 = vmatpush3.bf16.msra.mxu1 %v50296_v55 }
0x1daa   :  { %43498 = vmatprep.subr.bf16.mxu1 %v49723_v17 }
0x1dad   :  { %43500 = vmatpush3.bf16.msra.mxu1 %v50297_v16 }
0x1dae   :  { %43501 = vmatprep.subr.bf16.mxu1 %v49723_v17 }
0x1db1   :  { %43503 = vmatpush3.bf16.msra.mxu1 %v50298_v31 }
0x1db2   :  { %43540 = vmatprep.subr.bf16.mxu1 %v49723_v17 }
0x1db4   :  { %39410 = vmatmul.mubr.f32.vlgmr.msra.gmra.mrb[50].mxu1 %v48534_v2  ;;  %v25304_v2 = vpop.permute.xlu1 %25303 }
0x1db5   :  { %43542 = vmatpush3.bf16.msra.mxu1 %v44894_v1  ;;  %39494 = vmatprep.mubr.msk.f32.mxu1 %vm44710_vm1, %v49724_v49 }
0x1db6   :  { %43543 = vmatprep.subr.bf16.mxu1 %v49723_v17 }
0x1db8   :  { %v26390_v3 = vpop.permute.xlu1 %26389 }
0x1db9   :  { %43545 = vmatpush3.bf16.msra.mxu1 %v44904_v6 }
0x1dba   :  { %43546 = vmatprep.subr.bf16.mxu1 %v49723_v17 }
0x1dbd   :  { %43548 = vmatpush3.bf16.msra.mxu1 %v44914_v11 }
0x1dbe   :  { %43549 = vmatprep.subr.bf16.mxu1 %v49723_v17 }
0x1dc1   :  { %43551 = vmatpush3.bf16.msra.mxu1 %v44924_v22 }
0x1dc2   :  { %43552 = vmatprep.subr.bf16.mxu1 %v49723_v17 }
0x1dc7   :  { %v24754_v34 = vpop.f32.mrb[46].mxu1  ;;  %v25298_v25 = vpop.f32.mrb[48].mxu0 }
0x1dc8   :  { %v44055_v47 = vadd.f32 %v24754_v34, %v50311_v5  ;;  %v44056_v53 = vadd.f32 %v25298_v25, %v46004_v61  ;;  %v38955_v63 = vpop.f32.mrb[47].mxu1  ;;  %v39069_v31 = vpop.f32.mrb[49].mxu0 }
0x1dc9   :  { %v26933_v63 = vpop.permute.xlu1 %26932 }
0x1dca   :  { %v24763_v16 = vmul.f32 %v44055_v47, %v24761_v54  ;;  %v25306_v55 = vmul.f32 %v44056_v53, %v25304_v2 }
0x1dcc   :  { %v25307_v15 = vadd.f32 %v25306_v55, %v24763_v16 }
0x1e27   :  { %v25841_v9 = vpop.f32.mrb[48].mxu1  ;;  %v26384_v57 = vpop.f32.mrb[50].mxu0 }
0x1e28   :  { %v44057_v56 = vadd.f32 %v25841_v9, %v46008_v27  ;;  %v44058_v50 = vadd.f32 %v26384_v57, %v46012_v60  ;;  %v39183_v12 = vpop.f32.mrb[49].mxu1  ;;  %v39297_v62 = vpop.f32.mrb[51].mxu0 }
0x1e2a   :  { %v25849_v32 = vmul.f32 %v44057_v56, %v25847_v24  ;;  %v26392_v0 = vmul.f32 %v44058_v50, %v26390_v3 }
0x1e2c   :  { %v25850_v34 = vadd.f32 %v25849_v32, %v25307_v15 }
0x1e2e   :  { %v26393_v5 = vadd.f32 %v26392_v0, %v25850_v34 }
0x1e87   :  { %v26927_v25 = vpop.f32.mrb[50].mxu1 }
0x1e88   :  { %v44059_v31 = vadd.f32 %v26927_v25, %v46016_v13  ;;  %v39411_v53 = vpop.f32.mrb[51].mxu1  ;;  %v50318_v25 = vld [vmem:[#allocation18_spill] sm:$0xff] }
0x1e89   :  { %v50321_v53 = vld [vmem:[#allocation35_spill] sm:$0xff] }
0x1e8a   :  { %v26935_v55 = vmul.f32 %v44059_v31, %v26933_v63  ;;  %v50319_v63 = vld [vmem:[#allocation34_spill] sm:$0xff]  ;;  %v50320_v31 = vld [vmem:[#allocation23_spill] sm:$0xff] }
0x1e8c   :  { %v48885_v16 = vadd.f32 %v26935_v55, %v26393_v5  ;;  %v50322_v55 = vld [vmem:[#allocation24_spill] sm:$0xff] }
0x1e8e   :  { %v26937_v9 = vadd.f32 %v48885_v16, %v48414_v4 }
0x1e90   :  { %v26938_v47 = vmul.f32 0.5, %v26937_v9  ;;  %v50323_v9 = vld [vmem:[#allocation36_spill] sm:$0xff] }
0x1e92   :  { %v48890_v57 = vadd.f32 %v26938_v47, %v48419_v58  ;;  %v50324_v47 = vld [vmem:[#allocation19_spill] sm:$0xff] }
0x1e94   :  { %v26940_v62 = vmul.f32 2.0, %v48890_v57 }
0x1e96   :  { %v26941_v32 = vsub.f32 %v26940_v62, %v48424_v38  ;;  %v50325_v62 = vld [vmem:[#allocation37_spill] sm:$0xff] }
0x1e98   :  { %v26942_v0 = vadd.f32 %v26941_v32, %v48885_v16  ;;  %v50326_v32 = vld [vmem:[#allocation20_spill] sm:$0xff] }
0x1e9a   :  { %v26954_v3 = vsel %vm520_vm2, %v26942_v0, 0  ;;  %v50327_v0 = vld [vmem:[#allocation38_spill] sm:$0xff] }
0x1e9b   :  { %v27025_v15 = vand.u32 4294901760, %v26954_v3 }
0x1e9d   :  { %v27026_v56 = vsub.f32 %v26954_v3, %v27025_v15  ;;  %v31256_v3 = vld [vmem:[%s49414_s1 + $0x38] sm:$0xff] }
0x1e9e   :  { %29068 = vperm.xlu1 %44688, %v31256_v3   ;;  %28525 = vperm.xlu0 %44687, %v31256_v3  }
0x1e9f   :  { %v27027_v24 = vand.u32 4294901760, %v27026_v56 }
0x1ea1   :  { %v27028_v5 = vsub.f32 %v27026_v56, %v27027_v24 }
0x1ea3   :  { %v27029_v12 = vand.u32 4294901760, %v27028_v5  ;;  %v50331_v5 = vld [vmem:[#allocation41_spill] sm:$0xff] }
0x1ea5   :  { %39421 = vmatmul.mubr.f32.vlgmr.msra.gmra.mrb[52].mxu0 %v27029_v12  ;;  %v50332_v12 = vmov 4  }
0x1ea6   :  { %43512 = vmatpush3.bf16.msra.mxu0 %v44837_v37  ;;  %39431 = vmatprep.mubr.msk.f32.mxu0 %vm44710_vm1, %v49724_v49  ;;  %v44707_v37 = vld [vmem:[%s49412_s6] sm:$0x1] }
0x1ea7   :  { %43513 = vmatprep.subr.bf16.mxu0 %v49723_v17 }
0x1eaa   :  { %43515 = vmatpush3.bf16.msra.mxu0 %v44839_v42 }
0x1eab   :  { %43516 = vmatprep.subr.bf16.mxu0 %v49723_v17 }
0x1ead   :  { %39432 = vmatmul.mubr.f32.vlgmr.msra.gmra.mrb[52].mxu0 %v27025_v15 }
0x1eae   :  { %43518 = vmatpush3.bf16.msra.mxu0 %v44841_v43  ;;  %39442 = vmatprep.mubr.msk.f32.mxu0 %vm44710_vm1, %v49724_v49 }
0x1eaf   :  { %43519 = vmatprep.subr.bf16.mxu0 %v49723_v17 }
0x1eb2   :  { %43521 = vmatpush3.bf16.msra.mxu0 %v44843_v44 }
0x1eb3   :  { %43522 = vmatprep.subr.bf16.mxu0 %v49723_v17 }
0x1eb5   :  { %39443 = vmatmul.mubr.f32.vlgmr.msra.gmra.mrb[52].mxu0 %v27026_v56  ;;  %v50329_v56 = vmov 3  }
0x1eb6   :  { %43524 = vmatpush3.bf16.msra.mxu0 %v44821_v18  ;;  %39453 = vmatprep.mubr.msk.f32.mxu0 %vm44710_vm1, %v49724_v49 }
0x1eb7   :  { %43525 = vmatprep.subr.bf16.mxu0 %v49723_v17  ;;  %44690 = vset.pattern.permute.xlu0 %v50329_v56  ;;  %v50382_v56 = vld [vmem:[#allocation86_spill] sm:$0xff] }
0x1eb8   :  { %30154 = vperm.xlu0 %44690, %v31256_v3  }
0x1eba   :  { %43527 = vmatpush3.bf16.msra.mxu0 %v44833_v28 }
0x1ebb   :  { %43528 = vmatprep.subr.bf16.mxu0 %v49723_v17 }
0x1ebc   :  { %44692 = vset.pattern.permute.xlu0 %v50332_v12 }
0x1ebd   :  { %39454 = vmatmul.mubr.f32.vlgmr.msra.gmra.mrb[52].mxu0 %v27027_v24  ;;  %v50330_v24 = vld [vmem:[#allocation31_spill] sm:$0xff] }
0x1ebe   :  { %43530 = vmatpush3.bf16.msra.mxu0 %v44845_v45  ;;  %39464 = vmatprep.mubr.msk.f32.mxu0 %vm44710_vm1, %v49724_v49 }
0x1ebf   :  { %43531 = vmatprep.subr.bf16.mxu0 %v49723_v17 }
0x1ec2   :  { %43533 = vmatpush3.bf16.msra.mxu0 %v44847_v46 }
0x1ec3   :  { %43534 = vmatprep.subr.bf16.mxu0 %v49723_v17 }
0x1ec5   :  { %39465 = vmatmul.mubr.f32.vlgmr.msra.gmra.mrb[52].mxu0 %v27025_v15 }
0x1ec6   :  { %43536 = vmatpush3.bf16.msra.mxu0 %v44821_v18  ;;  %39475 = vmatprep.mubr.msk.f32.mxu0 %vm44710_vm1, %v49724_v49  ;;  %v44706_v18 = vld [vmem:[%s49411_s4] sm:$0x1] }
0x1ec7   :  { %43537 = vmatprep.subr.bf16.mxu0 %v49723_v17 }
0x1eca   :  { %43539 = vmatpush3.bf16.msra.mxu0 %v44833_v28  ;;  %v26945_v28 = vmul.f32 7.0, %v44706_v18  ;;  %v50333_v18 = vld [vmem:[#allocation33_spill] sm:$0xff] }
0x1ecb   :  { %43612 = vmatprep.subr.bf16.mxu0 %v49723_v17 }
0x1ecc   :  { %v26946_v42 = vadd.f32 %v44707_v37, %v26945_v28  ;;  %v50334_v28 = vld [vmem:[#allocation43_spill] sm:$0xff]  ;;  %v50335_v37 = vld [vmem:[#allocation21_spill] sm:$0xff] }
0x1ecd   :  { %39476 = vmatmul.mubr.f32.vlgmr.msra.gmra.mrb[52].mxu0 %v27025_v15  ;;  %v50328_v15 = vmov 2  }
0x1ece   :  { %43614 = vmatpush3.bf16.msra.mxu0 %v44964_v20  ;;  %39608 = vmatprep.mubr.msk.f32.mxu0 %vm44710_vm1, %v49724_v49  ;;  %v26951_v43 = vrot.slane %v26946_v42, %v45009_v59  ;;  %v50336_v42 = vld [vmem:[#allocation45_spill] sm:$0xff] }
0x1ecf   :  { %43615 = vmatprep.subr.bf16.mxu0 %v49723_v17  ;;  %44689 = vset.pattern.permute.xlu1 %v50328_v15  ;;  %v50381_v15 = vld [vmem:[#allocation85_spill] sm:$0xff] }
0x1ed0   :  { %29611 = vperm.xlu1 %44689, %v31256_v3  }
0x1ed2   :  { %43617 = vmatpush3.bf16.msra.mxu0 %v44972_v26 }
0x1ed3   :  { %43618 = vmatprep.subr.bf16.mxu0 %v49723_v17 }
0x1ed4   :  { %44691 = vset.pattern.permute.xlu1 %v50332_v12  ;;  %v50386_v12 = vld [vmem:[#allocation90_spill] sm:$0xff] }
0x1ed5   :  { %30697 = vperm.xlu1 %44691, %v31256_v3   ;;  %v50380_v3 = vld [vmem:[#allocation84_spill] sm:$0xff] }
0x1ed6   :  { %43620 = vmatpush3.bf16.msra.mxu0 %v45089_v48 }
0x1ed7   :  { %43621 = vmatprep.subr.bf16.mxu0 %v49723_v17 }
0x1eda   :  { %43623 = vmatpush3.bf16.msra.mxu0 %v45093_v51 }
0x1edb   :  { %43624 = vmatprep.subr.bf16.mxu0 %v49723_v17 }
0x1fa0   :  { %v27437_v44 = vpop.f32.mrb[52].mxu0 }
0x1fa1   :  { %v44060_v45 = vadd.f32 %v27437_v44, %v26951_v43  ;;  %v39477_v46 = vpop.f32.mrb[53].mxu0  ;;  %v50337_v43 = vld [vmem:[#allocation22_spill] sm:$0xff]  ;;  %v50338_v44 = vld [vmem:[#allocation47_spill] sm:$0xff] }
0x1fa2   :  { %v50348_v46 = vld [vmem:[#allocation59_spill] sm:$0xff] }
0x1fa3   :  { %v27441_v4 = vmax.f32 %v44060_v45, 0.0  ;;  %v50347_v45 = vld [vmem:[#allocation46_spill] sm:$0xff] }
0x1fa5   :  { %v27443_v58 = vsel %vm1025_vm3, %v27441_v4, 0  ;;  %v50349_v4 = vld [vmem:[#allocation48_spill] sm:$0xff] }
0x1fa6   :  { %v27518_v38 = vand.u32 4294901760, %v27443_v58 }
0x1fa8   :  { %v27519_v50 = vsub.f32 %v27443_v58, %v27518_v38  ;;  %v50350_v58 = vld [vmem:[#allocation60_spill] sm:$0xff] }
0x1faa   :  { %v27520_v54 = vand.u32 4294901760, %v27519_v50 }
0x1fac   :  { %v27521_v2 = vsub.f32 %v27519_v50, %v27520_v54 }
0x1fae   :  { %v27522_v34 = vand.u32 4294901760, %v27521_v2  ;;  %v50354_v2 = vld [vmem:[#allocation64_spill] sm:$0xff] }
0x1fb0   :  { %39495 = vmatmul.mubr.f32.vlgmr.msra.gmra.mrb[52].mxu1 %v27522_v34  ;;  %v50355_v34 = vld [vmem:[#allocation51_spill] sm:$0xff] }
0x1fb1   :  { %43554 = vmatpush3.bf16.msra.mxu1 %v49915_v35  ;;  %39513 = vmatprep.mubr.msk.f32.mxu1 %vm44710_vm1, %v49724_v49 }
0x1fb2   :  { %43555 = vmatprep.subr.bf16.mxu1 %v49723_v17 }
0x1fb5   :  { %43557 = vmatpush3.bf16.msra.mxu1 %v49916_v10 }
0x1fb6   :  { %43558 = vmatprep.subr.bf16.mxu1 %v49723_v17 }
0x1fb9   :  { %43560 = vmatpush3.bf16.msra.mxu1 %v49917_v30 }
0x1fba   :  { %43561 = vmatprep.subr.bf16.mxu1 %v49723_v17 }
0x1fbd   :  { %43563 = vmatpush3.bf16.msra.mxu1 %v49918_v33 }
0x1fbe   :  { %43564 = vmatprep.subr.bf16.mxu1 %v49723_v17 }
0x1fc0   :  { %39514 = vmatmul.mubr.f32.vlgmr.msra.gmra.mrb[52].mxu1 %v27518_v38 }
0x1fc1   :  { %43566 = vmatpush3.bf16.msra.mxu1 %v49919_v19  ;;  %39532 = vmatprep.mubr.msk.f32.mxu1 %vm44710_vm1, %v49724_v49 }
0x1fc2   :  { %43567 = vmatprep.subr.bf16.mxu1 %v49723_v17 }
0x1fc5   :  { %43569 = vmatpush3.bf16.msra.mxu1 %v49920_v14 }
0x1fc6   :  { %43570 = vmatprep.subr.bf16.mxu1 %v49723_v17 }
0x1fc9   :  { %43572 = vmatpush3.bf16.msra.mxu1 %v49921_v8  ;;  %v50312_v8 = vld [vmem:[#allocation15_spill] sm:$0xff] }
0x1fca   :  { %43573 = vmatprep.subr.bf16.mxu1 %v49723_v17 }
0x1fcd   :  { %43575 = vmatpush3.bf16.msra.mxu1 %v49922_v7  ;;  %v50313_v7 = vld [vmem:[#allocation29_spill] sm:$0xff] }
0x1fce   :  { %43576 = vmatprep.subr.bf16.mxu1 %v49723_v17 }
0x1fd0   :  { %39533 = vmatmul.mubr.f32.vlgmr.msra.gmra.mrb[52].mxu1 %v27519_v50  ;;  %v50352_v50 = vld [vmem:[#allocation62_spill] sm:$0xff] }
0x1fd1   :  { %43578 = vmatpush3.bf16.msra.mxu1 %v44894_v1  ;;  %39551 = vmatprep.mubr.msk.f32.mxu1 %vm44710_vm1, %v49724_v49 }
0x1fd2   :  { %43579 = vmatprep.subr.bf16.mxu1 %v49723_v17 }
0x1fd5   :  { %43581 = vmatpush3.bf16.msra.mxu1 %v44904_v6 }
0x1fd6   :  { %43582 = vmatprep.subr.bf16.mxu1 %v49723_v17 }
0x1fd9   :  { %43584 = vmatpush3.bf16.msra.mxu1 %v44914_v11 }
0x1fda   :  { %43585 = vmatprep.subr.bf16.mxu1 %v49723_v17 }
0x1fdd   :  { %43587 = vmatpush3.bf16.msra.mxu1 %v44924_v22 }
0x1fde   :  { %43588 = vmatprep.subr.bf16.mxu1 %v49723_v17 }
0x1fe0   :  { %39552 = vmatmul.mubr.f32.vlgmr.msra.gmra.mrb[52].mxu1 %v27520_v54  ;;  %v50353_v54 = vld [vmem:[#allocation50_spill] sm:$0xff] }
0x1fe1   :  { %43590 = vmatpush3.bf16.msra.mxu1 %v49923_v40  ;;  %39570 = vmatprep.mubr.msk.f32.mxu1 %vm44710_vm1, %v49724_v49  ;;  %v50314_v40 = vld [vmem:[#allocation16_spill] sm:$0xff] }
0x1fe2   :  { %43591 = vmatprep.subr.bf16.mxu1 %v49723_v17 }
0x1fe5   :  { %43593 = vmatpush3.bf16.msra.mxu1 %v49924_v39  ;;  %v50315_v39 = vld [vmem:[#allocation30_spill] sm:$0xff] }
0x1fe6   :  { %43594 = vmatprep.subr.bf16.mxu1 %v49723_v17 }
0x1fe9   :  { %43596 = vmatpush3.bf16.msra.mxu1 %v49925_v41  ;;  %v50316_v41 = vld [vmem:[#allocation17_spill] sm:$0xff] }
0x1fea   :  { %43597 = vmatprep.subr.bf16.mxu1 %v49723_v17 }
0x1fed   :  { %43599 = vmatpush3.bf16.msra.mxu1 %v49926_v52  ;;  %v50317_v52 = vld [vmem:[#allocation32_spill] sm:$0xff] }
0x1fee   :  { %43600 = vmatprep.subr.bf16.mxu1 %v49723_v17 }
0x1ff0   :  { %39571 = vmatmul.mubr.f32.vlgmr.msra.gmra.mrb[52].mxu1 %v27518_v38 }
0x1ff1   :  { %43602 = vmatpush3.bf16.msra.mxu1 %v44894_v1  ;;  %39589 = vmatprep.mubr.msk.f32.mxu1 %vm44710_vm1, %v49724_v49 }
0x1ff2   :  { %43603 = vmatprep.subr.bf16.mxu1 %v49723_v17 }
0x1ff5   :  { %43605 = vmatpush3.bf16.msra.mxu1 %v44904_v6  ;;  %v44708_v6 = vld [vmem:[%s49413_s8] ss:$0 sm:$0xff] }
0x1ff6   :  { %43606 = vmatprep.subr.bf16.mxu1 %v49723_v17 }
0x1ff9   :  { %43608 = vmatpush3.bf16.msra.mxu1 %v44914_v11 }
0x1ffa   :  { %43609 = vmatprep.subr.bf16.mxu1 %v49723_v17 }
0x1ffd   :  { %43611 = vmatpush3.bf16.msra.mxu1 %v44924_v22 }
0x1ffe   :  { %43684 = vmatprep.subr.bf16.mxu1 %v49723_v17 }
0x2000   :  { %39590 = vmatmul.mubr.f32.vlgmr.msra.gmra.mrb[52].mxu1 %v27518_v38  ;;  %v50351_v38 = vld [vmem:[#allocation49_spill] sm:$0xff] }
0x2001   :  { %43686 = vmatpush3.bf16.msra.mxu1 %v49853_v23  ;;  %39722 = vmatprep.mubr.msk.f32.mxu1 %vm44710_vm1, %v49724_v49 }
0x2002   :  { %43687 = vmatprep.subr.bf16.mxu1 %v49723_v17 }
0x2005   :  { %43689 = vmatpush3.bf16.msra.mxu1 %v49854_v29 }
0x2006   :  { %43690 = vmatprep.subr.bf16.mxu1 %v49723_v17 }
0x2009   :  { %43692 = vmatpush3.bf16.msra.mxu1 %v50232_v21 }
0x200a   :  { %43693 = vmatprep.subr.bf16.mxu1 %v49723_v17 }
0x200d   :  { %43695 = vmatpush3.bf16.msra.mxu1 %v50233_v36 }
0x200e   :  { %43696 = vmatprep.subr.bf16.mxu1 %v49723_v17 }
0x20d3   :  { %v27978_v1 = vpop.f32.mrb[52].mxu1 }
0x20d4   :  { %v44061_v11 = vadd.f32 %v44708_v6, %v27978_v1  ;;  %v39591_v22 = vpop.f32.mrb[53].mxu1  ;;  %v50356_v1 = vld [vmem:[#allocation66_spill] sm:$0xff]  ;;  %v50357_v6 = vld [vmem:[#allocation52_spill] sm:$0xff] }
0x20d5   :  { %v50359_v22 = vld [vmem:[#allocation53_spill] sm:$0xff] }
0x20d6   :  { %v27982_v59 = vmax.f32 %v44061_v11, 0.0  ;;  %v50358_v11 = vld [vmem:[#allocation68_spill] sm:$0xff] }
0x20d8   :  { %v27984_v35 = vsel %vm1025_vm3, %v27982_v59, 0  ;;  %v50360_v59 = vld [vmem:[#allocation69_spill] sm:$0xff] }
0x20d9   :  { %v49008_v10 = vand.u32 4294901760, %v27984_v35 }
0x20db   :  { %v49011_v30 = vsub.f32 %v27984_v35, %v49008_v10  ;;  %v50361_v35 = vld [vmem:[#allocation55_spill] sm:$0xff] }
0x20dd   :  { %v49014_v33 = vand.u32 4294901760, %v49011_v30 }
0x20df   :  { %v28062_v19 = vsub.f32 %v49011_v30, %v49014_v33 }
0x20e1   :  { %v49018_v14 = vand.u32 4294901760, %v28062_v19  ;;  %v50362_v19 = vld [vmem:[#allocation70_spill] sm:$0xff] }
0x20e3   :  { %39609 = vmatmul.mubr.f32.vlgmr.msra.gmra.mrb[54].mxu0 %v49018_v14  ;;  %39723 = vmatmul.mubr.f32.vlgmr.msra.gmra.mrb[54].mxu1 %v49018_v14 }
0x20e4   :  { %43626 = vmatpush3.bf16.msra.mxu0 %v50312_v8  ;;  %43698 = vmatpush3.bf16.msra.mxu1 %v50313_v7  ;;  %v50363_v8 = vld [vmem:[#allocation61_spill] sm:$0xff] }
0x20e5   :  { %43627 = vmatprep.subr.bf16.mxu0 %v49723_v17  ;;  %43699 = vmatprep.subr.bf16.mxu1 %v49723_v17  ;;  %v50364_v7 = vld [vmem:[#allocation73_spill] sm:$0xff] }
0x20e6   :  { %39627 = vmatprep.mubr.msk.f32.mxu0 %vm44710_vm1, %v49724_v49  ;;  %39741 = vmatprep.mubr.msk.f32.mxu1 %vm44710_vm1, %v49724_v49 }
0x20e8   :  { %43629 = vmatpush3.bf16.msra.mxu0 %v50314_v40  ;;  %43701 = vmatpush3.bf16.msra.mxu1 %v50315_v39  ;;  %v50365_v40 = vld [vmem:[#allocation63_spill] sm:$0xff] }
0x20e9   :  { %43630 = vmatprep.subr.bf16.mxu0 %v49723_v17  ;;  %43702 = vmatprep.subr.bf16.mxu1 %v49723_v17  ;;  %v50366_v39 = vld [vmem:[#allocation75_spill] sm:$0xff] }
0x20ec   :  { %43632 = vmatpush3.bf16.msra.mxu0 %v50316_v41  ;;  %43704 = vmatpush3.bf16.msra.mxu1 %v50317_v52  ;;  %v50367_v41 = vld [vmem:[#allocation65_spill] sm:$0xff] }
0x20ed   :  { %43633 = vmatprep.subr.bf16.mxu0 %v49723_v17  ;;  %43705 = vmatprep.subr.bf16.mxu1 %v49723_v17  ;;  %v50368_v52 = vld [vmem:[#allocation77_spill] sm:$0xff] }
0x20f0   :  { %43635 = vmatpush3.bf16.msra.mxu0 %v50318_v25  ;;  %43707 = vmatpush3.bf16.msra.mxu1 %v50319_v63  ;;  %v50369_v25 = vld [vmem:[#allocation67_spill] sm:$0xff] }
0x20f1   :  { %43636 = vmatprep.subr.bf16.mxu0 %v49723_v17  ;;  %43708 = vmatprep.subr.bf16.mxu1 %v49723_v17  ;;  %v50370_v63 = vld [vmem:[#allocation79_spill] sm:$0xff] }
0x20f3   :  { %39628 = vmatmul.mubr.f32.vlgmr.msra.gmra.mrb[54].mxu0 %v49008_v10  ;;  %39742 = vmatmul.mubr.f32.vlgmr.msra.gmra.mrb[54].mxu1 %v49008_v10 }
0x20f4   :  { %43638 = vmatpush3.bf16.msra.mxu0 %v50320_v31  ;;  %43710 = vmatpush3.bf16.msra.mxu1 %v50321_v53  ;;  %v50371_v31 = vld [vmem:[#allocation71_spill] sm:$0xff]  ;;  %v50372_v53 = vld [vmem:[#allocation72_spill] sm:$0xff] }
0x20f5   :  { %43639 = vmatprep.subr.bf16.mxu0 %v49723_v17  ;;  %43711 = vmatprep.subr.bf16.mxu1 %v49723_v17 }
0x20f6   :  { %39646 = vmatprep.mubr.msk.f32.mxu0 %vm44710_vm1, %v49724_v49  ;;  %39760 = vmatprep.mubr.msk.f32.mxu1 %vm44710_vm1, %v49724_v49 }
0x20f8   :  { %43641 = vmatpush3.bf16.msra.mxu0 %v50322_v55  ;;  %43713 = vmatpush3.bf16.msra.mxu1 %v50323_v9  ;;  %v50373_v55 = vld [vmem:[#allocation74_spill] sm:$0xff]  ;;  %v50374_v9 = vld [vmem:[#allocation76_spill] sm:$0xff] }
0x20f9   :  { %43642 = vmatprep.subr.bf16.mxu0 %v49723_v17  ;;  %43714 = vmatprep.subr.bf16.mxu1 %v49723_v17 }
0x20fc   :  { %43644 = vmatpush3.bf16.msra.mxu0 %v50324_v47  ;;  %43716 = vmatpush3.bf16.msra.mxu1 %v50325_v62  ;;  %v50375_v47 = vld [vmem:[#allocation78_spill] sm:$0xff]  ;;  %v50376_v62 = vld [vmem:[#allocation80_spill] sm:$0xff] }
0x20fd   :  { %43645 = vmatprep.subr.bf16.mxu0 %v49723_v17  ;;  %43717 = vmatprep.subr.bf16.mxu1 %v49723_v17 }
0x2100   :  { %43647 = vmatpush3.bf16.msra.mxu0 %v50326_v32  ;;  %43719 = vmatpush3.bf16.msra.mxu1 %v50327_v0  ;;  %v50377_v32 = vld [vmem:[#allocation81_spill] sm:$0xff]  ;;  %v50378_v0 = vld [vmem:[#allocation82_spill] sm:$0xff] }
0x2101   :  { %43648 = vmatprep.subr.bf16.mxu0 %v49723_v17  ;;  %43720 = vmatprep.subr.bf16.mxu1 %v49723_v17 }
0x2103   :  { %39647 = vmatmul.mubr.f32.vlgmr.msra.gmra.mrb[54].mxu0 %v49011_v30  ;;  %39761 = vmatmul.mubr.f32.vlgmr.msra.gmra.mrb[54].mxu1 %v49011_v30 }
0x2104   :  { %43650 = vmatpush3.bf16.msra.mxu0 %v44964_v20  ;;  %43722 = vmatpush3.bf16.msra.mxu1 %v49853_v23 }
0x2105   :  { %43651 = vmatprep.subr.bf16.mxu0 %v49723_v17  ;;  %43723 = vmatprep.subr.bf16.mxu1 %v49723_v17 }
0x2106   :  { %39665 = vmatprep.mubr.msk.f32.mxu0 %vm44710_vm1, %v49724_v49  ;;  %39779 = vmatprep.mubr.msk.f32.mxu1 %vm44710_vm1, %v49724_v49 }
0x2108   :  { %43653 = vmatpush3.bf16.msra.mxu0 %v44972_v26  ;;  %43725 = vmatpush3.bf16.msra.mxu1 %v49854_v29 }
0x2109   :  { %43654 = vmatprep.subr.bf16.mxu0 %v49723_v17  ;;  %43726 = vmatprep.subr.bf16.mxu1 %v49723_v17 }
0x210c   :  { %43656 = vmatpush3.bf16.msra.mxu0 %v45089_v48  ;;  %43728 = vmatpush3.bf16.msra.mxu1 %v50232_v21 }
0x210d   :  { %43657 = vmatprep.subr.bf16.mxu0 %v49723_v17  ;;  %43729 = vmatprep.subr.bf16.mxu1 %v49723_v17 }
0x2110   :  { %43659 = vmatpush3.bf16.msra.mxu0 %v45093_v51  ;;  %43731 = vmatpush3.bf16.msra.mxu1 %v50233_v36 }
0x2111   :  { %43660 = vmatprep.subr.bf16.mxu0 %v49723_v17  ;;  %43732 = vmatprep.subr.bf16.mxu1 %v49723_v17 }
0x2113   :  { %39666 = vmatmul.mubr.f32.vlgmr.msra.gmra.mrb[54].mxu0 %v49014_v33  ;;  %39780 = vmatmul.mubr.f32.vlgmr.msra.gmra.mrb[54].mxu1 %v49014_v33 }
0x2114   :  { %43662 = vmatpush3.bf16.msra.mxu0 %v50330_v24  ;;  %43734 = vmatpush3.bf16.msra.mxu1 %v50331_v5  ;;  %v50384_v24 = vld [vmem:[#allocation88_spill] sm:$0xff]  ;;  %v50385_v5 = vld [vmem:[#allocation89_spill] sm:$0xff] }
0x2115   :  { %43663 = vmatprep.subr.bf16.mxu0 %v49723_v17  ;;  %43735 = vmatprep.subr.bf16.mxu1 %v49723_v17 }
0x2116   :  { %39684 = vmatprep.mubr.msk.f32.mxu0 %vm44710_vm1, %v49724_v49  ;;  %39798 = vmatprep.mubr.msk.f32.mxu1 %vm44710_vm1, %v49724_v49 }
0x2118   :  { %43665 = vmatpush3.bf16.msra.mxu0 %v50333_v18  ;;  %43737 = vmatpush3.bf16.msra.mxu1 %v50334_v28  ;;  %v28526_v18 = vpop.permute.xlu0 %28525 }
0x2119   :  { %43666 = vmatprep.subr.bf16.mxu0 %v49723_v17  ;;  %43738 = vmatprep.subr.bf16.mxu1 %v49723_v17 }
0x211c   :  { %43668 = vmatpush3.bf16.msra.mxu0 %v50335_v37  ;;  %43740 = vmatpush3.bf16.msra.mxu1 %v50336_v42  ;;  %v50387_v42 = vld [vmem:[#allocation91_spill] sm:$0xff] }
0x211d   :  { %43669 = vmatprep.subr.bf16.mxu0 %v49723_v17  ;;  %43741 = vmatprep.subr.bf16.mxu1 %v49723_v17 }
0x2120   :  { %43671 = vmatpush3.bf16.msra.mxu0 %v50337_v43  ;;  %43743 = vmatpush3.bf16.msra.mxu1 %v50338_v44 }
0x2121   :  { %43672 = vmatprep.subr.bf16.mxu0 %v49723_v17  ;;  %43744 = vmatprep.subr.bf16.mxu1 %v49723_v17 }
0x2123   :  { %39685 = vmatmul.mubr.f32.vlgmr.msra.gmra.mrb[54].mxu0 %v49008_v10  ;;  %39799 = vmatmul.mubr.f32.vlgmr.msra.gmra.mrb[54].mxu1 %v49008_v10 }
0x2124   :  { %43674 = vmatpush3.bf16.msra.mxu0 %v44964_v20  ;;  %43746 = vmatpush3.bf16.msra.mxu1 %v49853_v23  ;;  %v50339_v20 = vld [vmem:[#allocation39_spill] sm:$0xff]  ;;  %v50343_v23 = vld [vmem:[#allocation42_spill] sm:$0xff] }
0x2125   :  { %43675 = vmatprep.subr.bf16.mxu0 %v49723_v17  ;;  %43747 = vmatprep.subr.bf16.mxu1 %v49723_v17 }
0x2126   :  { %39703 = vmatprep.mubr.msk.f32.mxu0 %vm44710_vm1, %v49724_v49  ;;  %39817 = vmatprep.mubr.msk.f32.mxu1 %vm44710_vm1, %v49724_v49 }
0x2128   :  { %43677 = vmatpush3.bf16.msra.mxu0 %v44972_v26  ;;  %43749 = vmatpush3.bf16.msra.mxu1 %v49854_v29  ;;  %v50340_v26 = vld [vmem:[#allocation54_spill] sm:$0xff]  ;;  %v50344_v29 = vld [vmem:[#allocation57_spill] sm:$0xff] }
0x2129   :  { %43678 = vmatprep.subr.bf16.mxu0 %v49723_v17  ;;  %43750 = vmatprep.subr.bf16.mxu1 %v49723_v17 }
0x212c   :  { %43680 = vmatpush3.bf16.msra.mxu0 %v45089_v48  ;;  %43752 = vmatpush3.bf16.msra.mxu1 %v50232_v21  ;;  %v50341_v48 = vld [vmem:[#allocation40_spill] sm:$0xff] }
0x212d   :  { %43681 = vmatprep.subr.bf16.mxu0 %v49723_v17  ;;  %43753 = vmatprep.subr.bf16.mxu1 %v49723_v17  ;;  %v50345_v21 = vld [vmem:[#allocation44_spill] sm:$0xff] }
0x2130   :  { %43683 = vmatpush3.bf16.msra.mxu0 %v45093_v51  ;;  %43755 = vmatpush3.bf16.msra.mxu1 %v50233_v36  ;;  %v50342_v51 = vld [vmem:[#allocation56_spill] sm:$0xff]  ;;  %v50346_v36 = vld [vmem:[#allocation58_spill] sm:$0xff] }
0x2131   :  { %43756 = vmatprep.subr.bf16.mxu0 %v49723_v17  ;;  %43828 = vmatprep.subr.bf16.mxu1 %v49723_v17 }
0x2133   :  { %39704 = vmatmul.mubr.f32.vlgmr.msra.gmra.mrb[54].mxu0 %v49008_v10  ;;  %39818 = vmatmul.mubr.f32.vlgmr.msra.gmra.mrb[54].mxu1 %v49008_v10 }
0x2134   :  { %43758 = vmatpush3.bf16.msra.mxu0 %v50339_v20  ;;  %43830 = vmatpush3.bf16.msra.mxu1 %v50340_v26 }
0x2135   :  { %43759 = vmatprep.subr.bf16.mxu0 %v49723_v17  ;;  %43831 = vmatprep.subr.bf16.mxu1 %v49723_v17 }
0x2136   :  { %39836 = vmatprep.mubr.msk.f32.mxu0 %vm44710_vm1, %v49724_v49  ;;  %39950 = vmatprep.mubr.msk.f32.mxu1 %vm44710_vm1, %v49724_v49 }
0x2138   :  { %43761 = vmatpush3.bf16.msra.mxu0 %v50341_v48  ;;  %43833 = vmatpush3.bf16.msra.mxu1 %v50342_v51 }
0x2139   :  { %43762 = vmatprep.subr.bf16.mxu0 %v49723_v17  ;;  %43834 = vmatprep.subr.bf16.mxu1 %v49723_v17 }
0x213c   :  { %43764 = vmatpush3.bf16.msra.mxu0 %v50343_v23  ;;  %43836 = vmatpush3.bf16.msra.mxu1 %v50344_v29 }
0x213d   :  { %43765 = vmatprep.subr.bf16.mxu0 %v49723_v17  ;;  %43837 = vmatprep.subr.bf16.mxu1 %v49723_v17 }
0x2140   :  { %43767 = vmatpush3.bf16.msra.mxu0 %v50345_v21  ;;  %43839 = vmatpush3.bf16.msra.mxu1 %v50346_v36 }
0x2141   :  { %43768 = vmatprep.subr.bf16.mxu0 %v49723_v17  ;;  %43840 = vmatprep.subr.bf16.mxu1 %v49723_v17 }
0x2143   :  { %39837 = vmatmul.mubr.f32.vlgmr.msra.gmra.mrb[56].mxu0 %v49018_v14  ;;  %39951 = vmatmul.mubr.f32.vlgmr.msra.gmra.mrb[56].mxu1 %v49018_v14 }
0x2144   :  { %43770 = vmatpush3.bf16.msra.mxu0 %v50347_v45  ;;  %43842 = vmatpush3.bf16.msra.mxu1 %v50348_v46 }
0x2145   :  { %43771 = vmatprep.subr.bf16.mxu0 %v49723_v17  ;;  %43843 = vmatprep.subr.bf16.mxu1 %v49723_v17 }
0x2146   :  { %39855 = vmatprep.mubr.msk.f32.mxu0 %vm44710_vm1, %v49724_v49  ;;  %39969 = vmatprep.mubr.msk.f32.mxu1 %vm44710_vm1, %v49724_v49 }
0x2148   :  { %43773 = vmatpush3.bf16.msra.mxu0 %v50349_v4  ;;  %43845 = vmatpush3.bf16.msra.mxu1 %v50350_v58  ;;  %v30707_v4 = vld [vmem:[%s49416_s11 + $0x10] sm:$0xff]  ;;  %v30708_v58 = vld [vmem:[%s49416_s11 + $0x18] sm:$0xff] }
0x2149   :  { %43774 = vmatprep.subr.bf16.mxu0 %v49723_v17  ;;  %43846 = vmatprep.subr.bf16.mxu1 %v49723_v17 }
0x214c   :  { %43776 = vmatpush3.bf16.msra.mxu0 %v50351_v38  ;;  %43848 = vmatpush3.bf16.msra.mxu1 %v50352_v50  ;;  %v30726_v38 = vand.u32 4294901760, %v30707_v4  ;;  %v30729_v50 = vand.u32 4294901760, %v30708_v58 }
0x214d   :  { %43777 = vmatprep.subr.bf16.mxu0 %v49723_v17  ;;  %43849 = vmatprep.subr.bf16.mxu1 %v49723_v17 }
0x2150   :  { %43779 = vmatpush3.bf16.msra.mxu0 %v50353_v54  ;;  %43851 = vmatpush3.bf16.msra.mxu1 %v50354_v2 }
0x2151   :  { %43780 = vmatprep.subr.bf16.mxu0 %v49723_v17  ;;  %43852 = vmatprep.subr.bf16.mxu1 %v49723_v17 }
0x2153   :  { %39856 = vmatmul.mubr.f32.vlgmr.msra.gmra.mrb[56].mxu0 %v49008_v10  ;;  %39970 = vmatmul.mubr.f32.vlgmr.msra.gmra.mrb[56].mxu1 %v49008_v10 }
0x2154   :  { %43782 = vmatpush3.bf16.msra.mxu0 %v50355_v34  ;;  %43854 = vmatpush3.bf16.msra.mxu1 %v50356_v1  ;;  %v49362_v34 = vpack.c.bf16 %v30729_v50, %v30726_v38  ;;  %v30814_v1 = vsub.f32 %v30707_v4, %v30726_v38 }
0x2155   :  { %43783 = vmatprep.subr.bf16.mxu0 %v49723_v17  ;;  %43855 = vmatprep.subr.bf16.mxu1 %v49723_v17 }
0x2156   :  { %39874 = vmatprep.mubr.msk.f32.mxu0 %vm44710_vm1, %v49724_v49  ;;  %39988 = vmatprep.mubr.msk.f32.mxu1 %vm44710_vm1, %v49724_v49 }
0x2158   :  { %43785 = vmatpush3.bf16.msra.mxu0 %v50357_v6  ;;  %43857 = vmatpush3.bf16.msra.mxu1 %v50358_v11  ;;  %v30821_v6 = vsub.f32 %v30708_v58, %v30729_v50 }
0x2159   :  { %43786 = vmatprep.subr.bf16.mxu0 %v49723_v17  ;;  %43858 = vmatprep.subr.bf16.mxu1 %v49723_v17 }
0x215c   :  { %43788 = vmatpush3.bf16.msra.mxu0 %v50359_v22  ;;  %43860 = vmatpush3.bf16.msra.mxu1 %v50360_v59 }
0x215d   :  { %43789 = vmatprep.subr.bf16.mxu0 %v49723_v17  ;;  %43861 = vmatprep.subr.bf16.mxu1 %v49723_v17 }
0x2160   :  { %43791 = vmatpush3.bf16.msra.mxu0 %v50361_v35  ;;  %43863 = vmatpush3.bf16.msra.mxu1 %v50362_v19  ;;  %v30815_v35 = vand.u32 4294901760, %v30814_v1  ;;  %v30822_v19 = vand.u32 4294901760, %v30821_v6 }
0x2161   :  { %43792 = vmatprep.subr.bf16.mxu0 %v49723_v17  ;;  %43864 = vmatprep.subr.bf16.mxu1 %v49723_v17 }
0x2163   :  { %39875 = vmatmul.mubr.f32.vlgmr.msra.gmra.mrb[56].mxu0 %v49011_v30  ;;  %39989 = vmatmul.mubr.f32.vlgmr.msra.gmra.mrb[56].mxu1 %v49011_v30 }
0x2164   :  { %43794 = vmatpush3.bf16.msra.mxu0 %v50339_v20  ;;  %43866 = vmatpush3.bf16.msra.mxu1 %v50340_v26 }
0x2165   :  { %43795 = vmatprep.subr.bf16.mxu0 %v49723_v17  ;;  %43867 = vmatprep.subr.bf16.mxu1 %v49723_v17 }
0x2166   :  { %39893 = vmatprep.mubr.msk.f32.mxu0 %vm44710_vm1, %v49724_v49  ;;  %40007 = vmatprep.mubr.msk.f32.mxu1 %vm44710_vm1, %v49724_v49 }
0x2168   :  { %43797 = vmatpush3.bf16.msra.mxu0 %v50341_v48  ;;  %43869 = vmatpush3.bf16.msra.mxu1 %v50342_v51 }
0x2169   :  { %43798 = vmatprep.subr.bf16.mxu0 %v49723_v17  ;;  %43870 = vmatprep.subr.bf16.mxu1 %v49723_v17 }
0x216c   :  { %43800 = vmatpush3.bf16.msra.mxu0 %v50343_v23  ;;  %43872 = vmatpush3.bf16.msra.mxu1 %v50344_v29 }
0x216d   :  { %43801 = vmatprep.subr.bf16.mxu0 %v49723_v17  ;;  %43873 = vmatprep.subr.bf16.mxu1 %v49723_v17 }
0x2170   :  { %43803 = vmatpush3.bf16.msra.mxu0 %v50345_v21  ;;  %43875 = vmatpush3.bf16.msra.mxu1 %v50346_v36 }
0x2171   :  { %43804 = vmatprep.subr.bf16.mxu0 %v49723_v17  ;;  %43876 = vmatprep.subr.bf16.mxu1 %v49723_v17 }
0x2173   :  { %39894 = vmatmul.mubr.f32.vlgmr.msra.gmra.mrb[56].mxu0 %v49014_v33  ;;  %40008 = vmatmul.mubr.f32.vlgmr.msra.gmra.mrb[56].mxu1 %v49014_v33 }
0x2174   :  { %43806 = vmatpush3.bf16.msra.mxu0 %v50363_v8  ;;  %43878 = vmatpush3.bf16.msra.mxu1 %v50364_v7  ;;  %v30816_v7 = vsub.f32 %v30814_v1, %v30815_v35 }
0x2175   :  { %43807 = vmatprep.subr.bf16.mxu0 %v49723_v17  ;;  %43879 = vmatprep.subr.bf16.mxu1 %v49723_v17 }
0x2176   :  { %39912 = vmatprep.mubr.msk.f32.mxu0 %vm44710_vm1, %v49724_v49  ;;  %40026 = vmatprep.mubr.msk.f32.mxu1 %vm44710_vm1, %v49724_v49 }
0x2178   :  { %43809 = vmatpush3.bf16.msra.mxu0 %v50365_v40  ;;  %43881 = vmatpush3.bf16.msra.mxu1 %v50366_v39  ;;  %v30823_v40 = vsub.f32 %v30821_v6, %v30822_v19 }
0x2179   :  { %43810 = vmatprep.subr.bf16.mxu0 %v49723_v17  ;;  %43882 = vmatprep.subr.bf16.mxu1 %v49723_v17 }
0x217c   :  { %43812 = vmatpush3.bf16.msra.mxu0 %v50367_v41  ;;  %43884 = vmatpush3.bf16.msra.mxu1 %v50368_v52  ;;  %v30817_v41 = vand.u32 4294901760, %v30816_v7  ;;  %v30824_v52 = vand.u32 4294901760, %v30823_v40 }
0x217d   :  { %43813 = vmatprep.subr.bf16.mxu0 %v49723_v17  ;;  %43885 = vmatprep.subr.bf16.mxu1 %v49723_v17 }
0x2180   :  { %43815 = vmatpush3.bf16.msra.mxu0 %v50369_v25  ;;  %43887 = vmatpush3.bf16.msra.mxu1 %v50370_v63  ;;  %v43982_v25 = vpack.c.bf16 %v30824_v52, %v30817_v41 }
0x2181   :  { %43816 = vmatprep.subr.bf16.mxu0 %v49723_v17  ;;  %43888 = vmatprep.subr.bf16.mxu1 %v49723_v17 }
0x2183   :  { %39913 = vmatmul.mubr.f32.vlgmr.msra.gmra.mrb[56].mxu0 %v49008_v10  ;;  %40027 = vmatmul.mubr.f32.vlgmr.msra.gmra.mrb[56].mxu1 %v49008_v10 }
0x2184   :  { %43818 = vmatpush3.bf16.msra.mxu0 %v50339_v20  ;;  %43890 = vmatpush3.bf16.msra.mxu1 %v50340_v26 }
0x2185   :  { %43819 = vmatprep.subr.bf16.mxu0 %v49723_v17  ;;  %43891 = vmatprep.subr.bf16.mxu1 %v49723_v17 }
0x2186   :  { %39931 = vmatprep.mubr.msk.f32.mxu0 %vm44710_vm1, %v49724_v49  ;;  %40045 = vmatprep.mubr.msk.f32.mxu1 %vm44710_vm1, %v49724_v49 }
0x2188   :  { %43821 = vmatpush3.bf16.msra.mxu0 %v50341_v48  ;;  %43893 = vmatpush3.bf16.msra.mxu1 %v50342_v51 }
0x2189   :  { %43822 = vmatprep.subr.bf16.mxu0 %v49723_v17  ;;  %43894 = vmatprep.subr.bf16.mxu1 %v49723_v17 }
0x218c   :  { %43824 = vmatpush3.bf16.msra.mxu0 %v50343_v23  ;;  %43896 = vmatpush3.bf16.msra.mxu1 %v50344_v29  ;;  %v30705_v29 = vld [vmem:[%s49416_s11] sm:$0xff] }
0x218d   :  { %43825 = vmatprep.subr.bf16.mxu0 %v49723_v17  ;;  %43897 = vmatprep.subr.bf16.mxu1 %v49723_v17 }
0x2190   :  { %43827 = vmatpush3.bf16.msra.mxu0 %v50345_v21  ;;  %43899 = vmatpush3.bf16.msra.mxu1 %v50346_v36  ;;  %v30720_v21 = vand.u32 4294901760, %v30705_v29 }
0x2191   :  { %43900 = vmatprep.subr.bf16.mxu0 %v49723_v17  ;;  %43972 = vmatprep.subr.bf16.mxu1 %v49723_v17 }
0x2192   :  { %v49348_v46 = vsub.f32 %v30705_v29, %v30720_v21 }
0x2193   :  { %39932 = vmatmul.mubr.f32.vlgmr.msra.gmra.mrb[56].mxu0 %v49008_v10  ;;  %40046 = vmatmul.mubr.f32.vlgmr.msra.gmra.mrb[56].mxu1 %v49008_v10 }
0x2194   :  { %43902 = vmatpush3.bf16.msra.mxu0 %v50371_v31  ;;  %40064 = vmatprep.mubr.msk.f32.mxu0 %vm44710_vm1, %v49724_v49  ;;  %v30801_v54 = vand.u32 4294901760, %v49348_v46 }
0x2195   :  { %43903 = vmatprep.subr.bf16.mxu0 %v49723_v17  ;;  %40170 = vmatprep.mubr.msk.f32.mxu1 %vm44710_vm1, %v49724_v49 }
0x2196   :  { %v30802_v11 = vsub.f32 %v49348_v46, %v30801_v54 }
0x2198   :  { %43905 = vmatpush3.bf16.msra.mxu0 %v50372_v53  ;;  %v30803_v59 = vand.u32 4294901760, %v30802_v11 }
0x2199   :  { %43906 = vmatprep.subr.bf16.mxu0 %v49723_v17 }
0x219c   :  { %43908 = vmatpush3.bf16.msra.mxu0 %v50373_v55 }
0x219d   :  { %43909 = vmatprep.subr.bf16.mxu0 %v49723_v17 }
0x21a0   :  { %43911 = vmatpush3.bf16.msra.mxu0 %v50374_v9 }
0x21a1   :  { %43912 = vmatprep.subr.bf16.mxu0 %v49723_v17 }
0x21a3   :  { %40065 = vmatmul.mubr.f32.vlgmr.msra.gmra.mrb[58].mxu0 %v49018_v14  ;;  %v50379_v14 = vld [vmem:[#allocation83_spill] sm:$0xff] }
0x21a4   :  { %43914 = vmatpush3.bf16.msra.mxu0 %v50375_v47  ;;  %40083 = vmatprep.mubr.msk.f32.mxu0 %vm44710_vm1, %v49724_v49 }
0x21a5   :  { %43915 = vmatprep.subr.bf16.mxu0 %v49723_v17 }
0x21a8   :  { %43917 = vmatpush3.bf16.msra.mxu0 %v50376_v62 }
0x21a9   :  { %43918 = vmatprep.subr.bf16.mxu0 %v49723_v17 }
0x21ac   :  { %43920 = vmatpush3.bf16.msra.mxu0 %v50377_v32 }
0x21ad   :  { %43921 = vmatprep.subr.bf16.mxu0 %v49723_v17 }
0x21b0   :  { %43923 = vmatpush3.bf16.msra.mxu0 %v50378_v0  ;;  %v30155_v0 = vpop.permute.xlu0 %30154 }
0x21b1   :  { %43924 = vmatprep.subr.bf16.mxu0 %v49723_v17 }
0x21b3   :  { %40084 = vmatmul.mubr.f32.vlgmr.msra.gmra.mrb[58].mxu0 %v49008_v10 }
0x21b4   :  { %43926 = vmatpush3.bf16.msra.mxu0 %v50379_v14  ;;  %40102 = vmatprep.mubr.msk.f32.mxu0 %vm44710_vm1, %v49724_v49  ;;  %v43988_v14 = vpack.c.bf16 %v30821_v6, %v30814_v1 }
0x21b5   :  { %43927 = vmatprep.subr.bf16.mxu0 %v49723_v17 }
0x21b8   :  { %43929 = vmatpush3.bf16.msra.mxu0 %v50380_v3 }
0x21b9   :  { %43930 = vmatprep.subr.bf16.mxu0 %v49723_v17 }
0x21bc   :  { %43932 = vmatpush3.bf16.msra.mxu0 %v50381_v15 }
0x21bd   :  { %43933 = vmatprep.subr.bf16.mxu0 %v49723_v17 }
0x21c0   :  { %43935 = vmatpush3.bf16.msra.mxu0 %v50382_v56 }
0x21c1   :  { %43936 = vmatprep.subr.bf16.mxu0 %v49723_v17 }
0x21c3   :  { %40103 = vmatmul.mubr.f32.vlgmr.msra.gmra.mrb[58].mxu0 %v49011_v30  ;;  %v50383_v30 = vld [vmem:[#allocation87_spill] sm:$0xff] }
0x21c4   :  { %43938 = vmatpush3.bf16.msra.mxu0 %v50371_v31  ;;  %40121 = vmatprep.mubr.msk.f32.mxu0 %vm44710_vm1, %v49724_v49 }
0x21c5   :  { %43939 = vmatprep.subr.bf16.mxu0 %v49723_v17 }
0x21c8   :  { %43941 = vmatpush3.bf16.msra.mxu0 %v50372_v53 }
0x21c9   :  { %43942 = vmatprep.subr.bf16.mxu0 %v49723_v17 }
0x21cc   :  { %43944 = vmatpush3.bf16.msra.mxu0 %v50373_v55 }
0x21cd   :  { %43945 = vmatprep.subr.bf16.mxu0 %v49723_v17 }
0x21d0   :  { %43947 = vmatpush3.bf16.msra.mxu0 %v50374_v9 }
0x21d1   :  { %43948 = vmatprep.subr.bf16.mxu0 %v49723_v17 }
0x21d3   :  { %40122 = vmatmul.mubr.f32.vlgmr.msra.gmra.mrb[58].mxu0 %v49014_v33  ;;  %v29069_v33 = vpop.permute.xlu1 %29068 }
0x21d4   :  { %43950 = vmatpush3.bf16.msra.mxu0 %v50383_v30  ;;  %40140 = vmatprep.mubr.msk.f32.mxu0 %vm44710_vm1, %v49724_v49 }
0x21d5   :  { %43951 = vmatprep.subr.bf16.mxu0 %v49723_v17 }
0x21d7   :  { %v29612_v63 = vpop.permute.xlu1 %29611 }
0x21d8   :  { %43953 = vmatpush3.bf16.msra.mxu0 %v50384_v24 }
0x21d9   :  { %43954 = vmatprep.subr.bf16.mxu0 %v49723_v17 }
0x21dc   :  { %43956 = vmatpush3.bf16.msra.mxu0 %v50385_v5  ;;  %v44000_v5 = vpack.c.bf16 %v30822_v19, %v30815_v35 }
0x21dd   :  { %43957 = vmatprep.subr.bf16.mxu0 %v49723_v17 }
0x21e0   :  { %43959 = vmatpush3.bf16.msra.mxu0 %v50386_v12  ;;  %v18_v12 = vstv %s49417_s12 }
0x21e1   :  { %43960 = vmatprep.subr.bf16.mxu0 %v49723_v17  ;;  %19 = vst [vmem:[#allocation2] sm:$0x1] %v18_v12 }
0x21e3   :  { %40141 = vmatmul.mubr.f32.vlgmr.msra.gmra.mrb[58].mxu0 %v49008_v10 }
0x21e4   :  { %43962 = vmatpush3.bf16.msra.mxu0 %v50371_v31  ;;  %40159 = vmatprep.mubr.msk.f32.mxu0 %vm44710_vm1, %v49724_v49 }
0x21e5   :  { %43963 = vmatprep.subr.bf16.mxu0 %v49723_v17 }
0x21e8   :  { %43965 = vmatpush3.bf16.msra.mxu0 %v50372_v53 }
0x21e9   :  { %43966 = vmatprep.subr.bf16.mxu0 %v49723_v17 }
0x21ec   :  { %43968 = vmatpush3.bf16.msra.mxu0 %v50373_v55 }
0x21ed   :  { %43969 = vmatprep.subr.bf16.mxu0 %v49723_v17 }
0x21f0   :  { %43971 = vmatpush3.bf16.msra.mxu0 %v50374_v9 }
0x21f3   :  { %40160 = vmatmul.mubr.f32.vlgmr.msra.gmra.mrb[58].mxu0 %v49008_v10  ;;  %v30706_v10 = vld [vmem:[%s49416_s11 + $0x8] sm:$0xff] }
0x21f4   :  { %v30723_v36 = vand.u32 4294901760, %v30706_v10 }
0x21f6   :  { %v49346_v45 = vpack.c.bf16 %v30723_v36, %v30720_v21 }
0x21f8   :  { %43974 = vmatpush3.bf16.msra.mxu1 %v49346_v45 }
0x21f9   :  { %43975 = vmatprep.subr.bf16.mxu1 %v49723_v17 }
0x21fc   :  { %43977 = vmatpush3.bf16.msra.mxu1 %v49362_v34 }
0x21fd   :  { %43978 = vmatprep.subr.bf16.mxu1 %v49723_v17 }
0x2206   :  { %v28519_v28 = vpop.f32.mrb[54].mxu0  ;;  %v29063_v37 = vpop.f32.mrb[54].mxu1 }
0x2207   :  { %v44062_v43 = vadd.f32 %v28519_v28, %v50387_v42  ;;  %v44063_v44 = vadd.f32 %v29063_v37, %v46004_v61  ;;  %v39705_v20 = vpop.f32.mrb[55].mxu0  ;;  %v39819_v26 = vpop.f32.mrb[55].mxu1  ;;  %v49350_v61 = vsub.f32 %v30706_v10, %v30723_v36 }
0x2209   :  { %v29071_v48 = vmul.f32 %v44063_v44, %v29069_v33  ;;  %v28528_v51 = vmul.f32 %v44062_v43, %v28526_v18  ;;  %v30808_v2 = vand.u32 4294901760, %v49350_v61  ;;  %v43985_v31 = vpack.c.bf16 %v49350_v61, %v49348_v46  ;;  %v30698_v18 = vpop.permute.xlu1 %30697 }
0x220b   :  { %v29072_v23 = vadd.f32 %v29071_v48, %v28528_v51  ;;  %v30809_v22 = vsub.f32 %v49350_v61, %v30808_v2  ;;  %v43997_v24 = vpack.c.bf16 %v30808_v2, %v30801_v54 }
0x220d   :  { %v30810_v8 = vand.u32 4294901760, %v30809_v22 }
0x220f   :  { %v43979_v39 = vpack.c.bf16 %v30810_v8, %v30803_v59 }
0x2266   :  { %v29606_v53 = vpop.f32.mrb[56].mxu0  ;;  %v30149_v55 = vpop.f32.mrb[56].mxu1 }
0x2267   :  { %v44064_v9 = vadd.f32 %v29606_v53, %v46008_v27  ;;  %v44065_v47 = vadd.f32 %v30149_v55, %v46012_v60  ;;  %v39933_v62 = vpop.f32.mrb[57].mxu0  ;;  %v40047_v32 = vpop.f32.mrb[57].mxu1 }
0x2269   :  { %v29614_v3 = vmul.f32 %v44064_v9, %v29612_v63  ;;  %v30157_v56 = vmul.f32 %v44065_v47, %v30155_v0 }
0x226b   :  { %v29615_v15 = vadd.f32 %v29614_v3, %v29072_v23 }
0x226d   :  { %v30158_v30 = vadd.f32 %v30157_v56, %v29615_v15 }
0x22c6   :  { %v30692_v33 = vpop.f32.mrb[58].mxu0 }
0x22c7   :  { %v44066_v27 = vadd.f32 %v30692_v33, %v46016_v13  ;;  %v40161_v60 = vpop.f32.mrb[59].mxu0  ;;  %v31257_v13 = vld [vmem:[#allocation2] ss:$0 sm:$0xff] }
0x22c9   :  { %v30700_v28 = vmul.f32 %v44066_v27, %v30698_v18 }
0x22cb   :  { %v30701_v37 = vadd.f32 %v30700_v28, %v30158_v30 }
0x22cd   :  { %v30702_v42 = vadd.f32 %v30701_v37, %v48885_v16 }
0x22cf   :  { %v30703_v43 = vmul.f32 0.5, %v30702_v42 }
0x22d1   :  { %v30704_v44 = vadd.f32 %v30703_v43, %v48890_v57 }
0x22d3   :  { %v30717_v20 = vsel %vm520_vm2, %v30704_v44, 0 }
0x22d4   :  { %v30788_v26 = vand.u32 4294901760, %v30717_v20 }
0x22d6   :  { %v30789_v48 = vsub.f32 %v30717_v20, %v30788_v26 }
0x22d8   :  { %v30790_v51 = vand.u32 4294901760, %v30789_v48 }
0x22da   :  { %v30791_v23 = vsub.f32 %v30789_v48, %v30790_v51 }
0x22dc   :  { %v30792_v29 = vand.u32 4294901760, %v30791_v23 }
0x22de   :  { %40171 = vmatmul.mubr.f32.vlgmr.msra.gmra.mrb[58].mxu1 %v30792_v29 }
0x22df   :  { %43980 = vmatpush3.bf16.msra.mxu1 %v43979_v39  ;;  %40181 = vmatprep.mubr.msk.f32.mxu1 %vm44710_vm1, %v49724_v49 }
0x22e0   :  { %43981 = vmatprep.subr.bf16.mxu1 %v49723_v17 }
0x22e3   :  { %43983 = vmatpush3.bf16.msra.mxu1 %v43982_v25 }
0x22e4   :  { %43984 = vmatprep.subr.bf16.mxu1 %v49723_v17 }
0x22e6   :  { %40182 = vmatmul.mubr.f32.vlgmr.msra.gmra.mrb[58].mxu1 %v30788_v26 }
0x22e7   :  { %43986 = vmatpush3.bf16.msra.mxu1 %v43985_v31  ;;  %40192 = vmatprep.mubr.msk.f32.mxu1 %vm44710_vm1, %v49724_v49 }
0x22e8   :  { %43987 = vmatprep.subr.bf16.mxu1 %v49723_v17 }
0x22eb   :  { %43989 = vmatpush3.bf16.msra.mxu1 %v43988_v14 }
0x22ec   :  { %43990 = vmatprep.subr.bf16.mxu1 %v49723_v17 }
0x22ee   :  { %40193 = vmatmul.mubr.f32.vlgmr.msra.gmra.mrb[58].mxu1 %v30789_v48 }
0x22ef   :  { %43992 = vmatpush3.bf16.msra.mxu1 %v49346_v45  ;;  %40203 = vmatprep.mubr.msk.f32.mxu1 %vm44710_vm1, %v49724_v49 }
0x22f0   :  { %43993 = vmatprep.subr.bf16.mxu1 %v49723_v17 }
0x22f3   :  { %43995 = vmatpush3.bf16.msra.mxu1 %v49362_v34 }
0x22f4   :  { %43996 = vmatprep.subr.bf16.mxu1 %v49723_v17 }
0x22f6   :  { %40204 = vmatmul.mubr.f32.vlgmr.msra.gmra.mrb[58].mxu1 %v30790_v51 }
0x22f7   :  { %43998 = vmatpush3.bf16.msra.mxu1 %v43997_v24  ;;  %40214 = vmatprep.mubr.msk.f32.mxu1 %vm44710_vm1, %v49724_v49 }
0x22f8   :  { %43999 = vmatprep.subr.bf16.mxu1 %v49723_v17 }
0x22fb   :  { %44001 = vmatpush3.bf16.msra.mxu1 %v44000_v5 }
0x22fc   :  { %44002 = vmatprep.subr.bf16.mxu1 %v49723_v17 }
0x22fe   :  { %40215 = vmatmul.mubr.f32.vlgmr.msra.gmra.mrb[58].mxu1 %v30788_v26 }
0x22ff   :  { %44004 = vmatpush3.bf16.msra.mxu1 %v49346_v45  ;;  %40225 = vmatprep.mubr.msk.f32.mxu1 %vm44710_vm1, %v49724_v49 }
0x2300   :  { %44005 = vmatprep.subr.bf16.mxu1 %v49723_v17 }
0x2303   :  { %44007 = vmatpush3.bf16.msra.mxu1 %v49362_v34 }
0x2306   :  { %40226 = vmatmul.mubr.f32.vlgmr.msra.gmra.mrb[58].mxu1 %v30788_v26 }
0x23d9   :  { %v31200_v16 = vpop.f32.mrb[58].mxu1 }
0x23da   :  { %v44067_v57 = vadd.f32 %v31257_v13, %v31200_v16  ;;  %v40227_v10 = vpop.f32.mrb[59].mxu1 }
0x23dc   :  { %v31204_v21 = vsub.f32 0.0, %v44067_v57 }
0x23de   :  { %v31205_v36 = vmul.f32 1.442695, %v31204_v21 }
0x23e0   :  { %44693 = vpow2.f32 %v31205_v36 }
0x23ea   :  { %v44694_v46 = vpop.eup %44693 }
0x23eb   :  { %v31207_v61 = vadd.f32 1.0, %v44694_v46 }
0x23ed   :  { %44695 = vrcp.f32 %v31207_v61 }
0x23f7   :  { %v44696_v45 = vpop.eup %44695 }
0x23f8   :  { %31211 = vst.msk [vmem:[%s49418_s13] sm:$0xff] %vm31210_vm4, %v44696_v45 }

</bundles_post_ra>
